<compile_context>
chip_gen: v7x
topology: tpu7x:2x2x1
jax: 0.10.0
libtpu: 0.0.40
codegen_flags: <defaults>
</compile_context>

<pallas_src>
import functools

import jax
import jax.numpy as jnp
from jax.experimental import pallas as pl
from jax.experimental.pallas import tpu as pltpu


# ----------------------------------------------------------------------------
# small helpers
# ----------------------------------------------------------------------------
def _round_up(x, m):
    return (x + m - 1) // m * m


def _largest_row_block(m, cap=512):
    """Largest multiple-of-8 divisor of m that is <= cap (falls back to full m)."""
    for r in range(min(m, cap), 7, -1):
        if m % r == 0 and r % 8 == 0:
            return r
    return m


# ----------------------------------------------------------------------------
# Pallas kernels
# ----------------------------------------------------------------------------
def _conv_matmul_kernel(*refs, mode):
    """Tiled bf16 matmul with f32 accumulation and a fused epilogue.

    grid = (group, m_tiles, n_tiles, k_tiles); k (reduction) is last / "arbitrary".
    refs = (a, w, [gamma, beta, [residual]], out, acc_scratch)

    modes:
      "none"    : out = A @ W
      "tanh"    : out = tanh(A @ W)
      "in_relu" : out = relu(IN(A @ W) * gamma + beta)    (M-tile == one image's HW rows)
      "in_res"  : out = residual + IN(A @ W) * gamma + beta
    """
    a_ref, w_ref = refs[0], refs[1]
    o_ref, acc_ref = refs[-2], refs[-1]
    k = pl.program_id(3)

    @pl.when(k == 0)
    def _init():
        acc_ref[...] = jnp.zeros_like(acc_ref)

    acc_ref[...] += jnp.dot(a_ref[0], w_ref[0], preferred_element_type=jnp.float32)

    @pl.when(k == pl.num_programs(3) - 1)
    def _finish():
        y = acc_ref[...]                                    # (TM, TN) f32
        if mode == "tanh":
            y = jnp.tanh(y)
        elif mode in ("in_relu", "in_res"):
            g_ref, b_ref = refs[2], refs[3]
            mean = jnp.mean(y, axis=0, keepdims=True)       # per-channel stats over HW
            yc = y - mean
            var = jnp.mean(yc * yc, axis=0, keepdims=True)  # biased var (matches PyTorch IN)
            y = yc * jax.lax.rsqrt(var + 1e-5) * g_ref[...] + b_ref[...]
            if mode == "in_relu":
                y = jnp.maximum(y, 0.0)
            else:
                y = refs[4][0] + y                          # fused skip connection
        o_ref[0] = y.astype(o_ref.dtype)


def _in_relu_kernel(x_ref, g_ref, b_ref, o_ref):
    """Standalone InstanceNorm(affine) + ReLU for the norms that precede a conv."""
    x = x_ref[0]                                            # (HW, C)
    mean = jnp.mean(x, axis=0, keepdims=True)
    xc = x - mean
    var = jnp.mean(xc * xc, axis=0, keepdims=True)
    y = xc * jax.lax.rsqrt(var + 1e-5) * g_ref[...] + b_ref[...]
    o_ref[0] = jnp.maximum(y, 0.0)


# ----------------------------------------------------------------------------
# Pallas call wrappers
# ----------------------------------------------------------------------------
def _fused_matmul(a, w, *, mode, gamma=None, beta=None, residual=None, rows_per_block):
    """a: (G, M, Kp) bf16 ; w: (G, Kp, Cp) bf16 -> (G, M, Cp) f32 with fused epilogue."""
    G, M, Kp = a.shape
    Gw, Kp2, Cp = w.shape
    assert Gw == G and Kp2 == Kp
    TM = rows_per_block
    TN = 256 if Cp % 256 == 0 else 128                      # v6e/v7x MXU is 2x 256x256
    TK = 256 if Kp % 256 == 0 else 128
    assert M % TM == 0 and Cp % TN == 0 and Kp % TK == 0
    grid = (G, M // TM, Cp // TN, Kp // TK)

    in_specs = [pl.BlockSpec((1, TM, TK), lambda g, i, j, k: (g, i, k)),
                pl.BlockSpec((1, TK, TN), lambda g, i, j, k: (g, k, j))]
    args = [a, w]
    if mode in ("in_relu", "in_res"):
        in_specs += [pl.BlockSpec((1, TN), lambda g, i, j, k: (0, j)),
                     pl.BlockSpec((1, TN), lambda g, i, j, k: (0, j))]
        args += [gamma, beta]
    if mode == "in_res":
        in_specs.append(pl.BlockSpec((1, TM, TN), lambda g, i, j, k: (0, i, j)))
        args.append(residual)

    return pl.pallas_call(
        functools.partial(_conv_matmul_kernel, mode=mode),
        grid=grid,
        in_specs=in_specs,
        out_specs=pl.BlockSpec((1, TM, TN), lambda g, i, j, k: (g, i, j)),
        out_shape=jax.ShapeDtypeStruct((G, M, Cp), jnp.float32),
        scratch_shapes=[pltpu.VMEM((TM, TN), jnp.float32)],
        compiler_params=pltpu.CompilerParams(
            dimension_semantics=("parallel", "parallel", "parallel", "arbitrary")),
    )(*args)


def instance_norm_relu(x, gamma, beta):
    """x: (N, H, W, C) f32; per-(n, c) InstanceNorm over HW, fused ReLU."""
    N, H, W, C = x.shape
    HW = H * W
    xf = x.reshape(N, HW, C)
    out = pl.pallas_call(
        _in_relu_kernel,
        grid=(N,),
        in_specs=[pl.BlockSpec((1, HW, C), lambda n: (n, 0, 0)),
                  pl.BlockSpec((1, C), lambda n: (0, 0)),
                  pl.BlockSpec((1, C), lambda n: (0, 0))],
        out_specs=pl.BlockSpec((1, HW, C), lambda n: (n, 0, 0)),
        out_shape=jax.ShapeDtypeStruct((N, HW, C), jnp.float32),
        compiler_params=pltpu.CompilerParams(dimension_semantics=("parallel",)),
    )(xf, gamma, beta)
    return out.reshape(N, H, W, C)


# ----------------------------------------------------------------------------
# Conv wrappers (im2col glue + fused Pallas matmul)
# ----------------------------------------------------------------------------
def _im2col(x, kh, kw, stride, pad_h, pad_w):
    """x: (N, H, W, C) -> patches (N, Ho, Wo, kh*kw*C); K order = (tap_i*kw + tap_j)*C + c."""
    N, H, W, C = x.shape
    xp = jnp.pad(x, ((0, 0), pad_h, pad_w, (0, 0)))
    Hp = H + pad_h[0] + pad_h[1]
    Wp = W + pad_w[0] + pad_w[1]
    Ho = (Hp - kh) // stride + 1
    Wo = (Wp - kw) // stride + 1
    cols = []
    for i in range(kh):
        for j in range(kw):
            cols.append(xp[:, i:i + (Ho - 1) * stride + 1:stride,
                              j:j + (Wo - 1) * stride + 1:stride, :])
    patches = jnp.stack(cols, axis=3).reshape(N, Ho, Wo, kh * kw * C)
    return patches, Ho, Wo


def conv2d(x, pw, *, stride, pad, mode="none", residual=None):
    """nn.Conv2d(bias=False) with the fused epilogue selected by `mode`."""
    N, H, W, C = x.shape
    kh, kw = pw["kh"], pw["kw"]
    Kp, Cp = pw["kpad"], pw["cpad"]
    patches, Ho, Wo = _im2col(x, kh, kw, stride, (pad, pad), (pad, pad))
    M = N * Ho * Wo
    K = kh * kw * C
    a = patches.reshape(M, K)
    if Kp > K:
        a = jnp.pad(a, ((0, 0), (0, Kp - K)))
    a = a.astype(jnp.bfloat16)[None]                        # (1, M, Kp)

    if mode in ("in_relu", "in_res"):
        rows = Ho * Wo                                      # one image per M-block (IN stats)
        assert rows % 8 == 0, "fused-IN path needs HW % 8 == 0"
    else:
        rows = _largest_row_block(M)

    res = None
    if mode == "in_res":
        r = residual.reshape(1, M, residual.shape[-1]).astype(jnp.float32)
        if r.shape[-1] < Cp:
            r = jnp.pad(r, ((0, 0), (0, 0), (0, Cp - r.shape[-1])))
        res = r

    out = _fused_matmul(a, pw["w"], mode=mode, gamma=pw.get("gamma"), beta=pw.get("beta"),
                        residual=res, rows_per_block=rows)
    return out.reshape(N, Ho, Wo, Cp)[..., :pw["cout"]]


def conv_transpose2d(x, pw):
    """nn.ConvTranspose2d(k=4, s=2, p=1, bias=False) via the stride^2 sub-kernel decomposition.

    out[:, 2q+rh, 2p+rw, :] is a stride-1 conv of x with a 2x2 sub-kernel; the 4 sub-convs are
    batched through one Pallas matmul call (leading group axis) and interleaved afterwards.
    """
    N, H, W, C = x.shape
    Kp, Cp, Cout = pw["kpad"], pw["cpad"], pw["cout"]
    K = 4 * C
    pats = []
    for rh in range(2):
        pad_h = (1, 0) if rh == 0 else (0, 1)
        for rw in range(2):
            pad_w_lr = (1, 0) if rw == 0 else (0, 1)
            p, Ho, Wo = _im2col(x, 2, 2, 1, pad_h, pad_w_lr)   # Ho == H, Wo == W
            pats.append(p.reshape(N * H * W, K))
    a = jnp.stack(pats, axis=0)                             # (4, M, 4*C)
    if Kp > K:
        a = jnp.pad(a, ((0, 0), (0, 0), (0, Kp - K)))
    a = a.astype(jnp.bfloat16)

    rows = _largest_row_block(N * H * W)
    out = _fused_matmul(a, pw["w"], mode="none", rows_per_block=rows)   # (4, M, Cp)

    out = out.reshape(2, 2, N, H, W, Cp)                    # (rh, rw, n, h, w, c)
    out = jnp.transpose(out, (2, 3, 0, 4, 1, 5))            # (n, h, rh, w, rw, c)
    return out.reshape(N, 2 * H, 2 * W, Cp)[..., :Cout]


# ----------------------------------------------------------------------------
# Parameter construction & one-time prep (hoisted out of the forward pass)
# ----------------------------------------------------------------------------
def init_raw_params(key, conv_dim=8, repeat_num=2, input_nc=3):
    keys = iter(jax.random.split(key, 32))

    def conv_w(shape):
        return jax.random.normal(next(keys), shape, jnp.float32) * 0.05

    def in_aff(c):  # PyTorch InstanceNorm2d(affine=True) init: weight=1, bias=0
        return jnp.ones((c,), jnp.float32), jnp.zeros((c,), jnp.float32)

    C = conv_dim
    p = {}
    p["ib_conv1"] = conv_w((C, input_nc, 7, 7));  p["ib_in1"] = in_aff(C)
    p["ib_conv2"] = conv_w((2 * C, C, 4, 4));     p["ib_in2"] = in_aff(2 * C)
    p["m_conv"] = conv_w((4 * C, 2 * C, 4, 4))
    p["res"] = []
    for _ in range(repeat_num):
        p["res"].append(dict(conv1=conv_w((4 * C, 4 * C, 3, 3)), in1=in_aff(4 * C),
                             conv2=conv_w((4 * C, 4 * C, 3, 3)), in2=in_aff(4 * C)))
    p["d_in1"] = in_aff(4 * C); p["d_convt1"] = conv_w((4 * C, 2 * C, 4, 4))
    p["d_in2"] = in_aff(2 * C); p["d_convt2"] = conv_w((2 * C, C, 4, 4))
    p["ob_in1"] = in_aff(C); p["ob_conv1"] = conv_w((C, C, 3, 3))
    p["ob_in2"] = in_aff(C); p["ob_conv2"] = conv_w((C, C, 3, 3))
    p["ob_in3"] = in_aff(C); p["ob_conv3"] = conv_w((3, C, 7, 7))
    return p


def _prep_conv(w_oihw, affine=None):
    """-> ready-to-matmul bf16 [Kp, Cp] weight (+ padded gamma/beta), computed once."""
    Cout, Cin, kh, kw = w_oihw.shape
    K = kh * kw * Cin
    Kp, Cp = _round_up(K, 128), _round_up(Cout, 128)
    wmat = jnp.transpose(w_oihw, (2, 3, 1, 0)).reshape(K, Cout)
    wmat = jnp.pad(wmat, ((0, Kp - K), (0, Cp - Cout))).astype(jnp.bfloat16)
    d = {"w": wmat[None], "kh": kh, "kw": kw, "cout": Cout, "cpad": Cp, "kpad": Kp}
    if affine is not None:
        g, b = affine
        d["gamma"] = jnp.pad(g.astype(jnp.float32), (0, Cp - Cout)).reshape(1, Cp)
        d["beta"] = jnp.pad(b.astype(jnp.float32), (0, Cp - Cout)).reshape(1, Cp)
    return d


def _prep_convT(w_iohw):
    """ConvTranspose2d(k=4,s=2,p=1) -> 4 stacked 2x2 sub-kernel matrices (4, Kp, Cp) bf16."""
    Cin, Cout, kh, kw = w_iohw.shape
    assert (kh, kw) == (4, 4), "sub-pixel decomposition hard-coded for k=4, s=2, p=1"
    K = 4 * Cin
    Kp, Cp = _round_up(K, 128), _round_up(Cout, 128)
    subs = []
    for rh in range(2):
        kh_idx = jnp.array([3, 1] if rh == 0 else [2, 0])
        for rw in range(2):
            kw_idx = jnp.array([3, 1] if rw == 0 else [2, 0])
            wsub = jnp.take(jnp.take(w_iohw, kh_idx, axis=2), kw_idx, axis=3)  # (Cin,Cout,2,2)
            wmat = jnp.transpose(wsub, (2, 3, 0, 1)).reshape(K, Cout)
            subs.append(jnp.pad(wmat, ((0, Kp - K), (0, Cp - Cout))))
    w = jnp.stack(subs, axis=0).astype(jnp.bfloat16)
    return {"w": w, "cout": Cout, "cpad": Cp, "kpad": Kp}


def _prep_in(affine):
    g, b = affine
    C = g.shape[0]
    return g.astype(jnp.float32).reshape(1, C), b.astype(jnp.float32).reshape(1, C)


def prepare_params(raw):
    pp = {}
    pp["c1"] = _prep_conv(raw["ib_conv1"], affine=raw["ib_in1"])
    pp["c2"] = _prep_conv(raw["ib_conv2"], affine=raw["ib_in2"])
    pp["c3"] = _prep_conv(raw["m_conv"])
    pp["res"] = [{"a": _prep_conv(r["conv1"], affine=r["in1"]),
                  "b": _prep_conv(r["conv2"], affine=r["in2"])} for r in raw["res"]]
    pp["in_d1"] = _prep_in(raw["d_in1"]); pp["t1"] = _prep_convT(raw["d_convt1"])
    pp["in_d2"] = _prep_in(raw["d_in2"]); pp["t2"] = _prep_convT(raw["d_convt2"])
    pp["in_o1"] = _prep_in(raw["ob_in1"])
    pp["c4"] = _prep_conv(raw["ob_conv1"], affine=raw["ob_in2"])
    pp["c5"] = _prep_conv(raw["ob_conv2"], affine=raw["ob_in3"])
    pp["c6"] = _prep_conv(raw["ob_conv3"])
    return pp


# ----------------------------------------------------------------------------
# Forward pass (mirrors GeneratorDeMakeup.forward)
# ----------------------------------------------------------------------------
def generator_demakeup_forward(pp, x_nchw):
    x = jnp.transpose(x_nchw, (0, 2, 3, 1)).astype(jnp.float32)    # NCHW -> NHWC

    # ---- input_branch_1: conv -> [IN+ReLU fused] x2 ----
    h = conv2d(x, pp["c1"], stride=1, pad=3, mode="in_relu")
    h = conv2d(h, pp["c2"], stride=2, pad=1, mode="in_relu")

    # ---- main ----
    h = conv2d(h, pp["c3"], stride=2, pad=1, mode="none")
    for rp in pp["res"]:                                           # SimpleResidualBlock
        t = conv2d(h, rp["a"], stride=1, pad=1, mode="in_relu")
        h = conv2d(t, rp["b"], stride=1, pad=1, mode="in_res", residual=h)
    h = instance_norm_relu(h, *pp["in_d1"])
    h = conv_transpose2d(h, pp["t1"])
    h = instance_norm_relu(h, *pp["in_d2"])
    h = conv_transpose2d(h, pp["t2"])

    # ---- output_branch_1 ----
    h = instance_norm_relu(h, *pp["in_o1"])
    h = conv2d(h, pp["c4"], stride=1, pad=1, mode="in_relu")       # IN(ob_in2)+ReLU fused
    h = conv2d(h, pp["c5"], stride=1, pad=1, mode="in_relu")       # IN(ob_in3)+ReLU fused
    h = conv2d(h, pp["c6"], stride=1, pad=3, mode="tanh")          # Tanh fused in epilogue

    return jnp.transpose(h, (0, 3, 1, 2))                          # back to NCHW


# ----------------------------------------------------------------------------
if __name__ == "__main__":
    key = jax.random.PRNGKey(0)
    k_param, k_x = jax.random.split(key)

    conv_dim, repeat_num, input_nc = 8, 2, 3
    raw = init_raw_params(k_param, conv_dim=conv_dim, repeat_num=repeat_num, input_nc=input_nc)
    prepared = prepare_params(raw)     # weight reshapes / flips / padding hoisted out of fwd

    x = jax.random.normal(k_x, (2, input_nc, 16, 16), jnp.float32)  # NCHW, as in PyTorch

    fwd = jax.jit(lambda inp: generator_demakeup_forward(prepared, inp))
    out = jax.block_until_ready(fwd(x))

    assert out.shape == (2, 3, 16, 16), out.shape
    assert out.dtype == jnp.float32
    assert bool(jnp.all(jnp.isfinite(out)))
    assert bool(jnp.all(jnp.abs(out) <= 1.0 + 1e-6))   # tanh output range
    print("KERNEL_OK")
</pallas_src>

<mosaic_0001>
module attributes {stable_mosaic.version = 11 : i64} {
  func.func @_conv_matmul_kernel(%arg0: i32, %arg1: i32, %arg2: i32, %arg3: i32, %arg4: memref<1x256x256xbf16, #tpu.memory_space<vmem>>, %arg5: memref<1x256x128xbf16, #tpu.memory_space<vmem>>, %arg6: memref<1x128xf32, #tpu.memory_space<vmem>>, %arg7: memref<1x128xf32, #tpu.memory_space<vmem>>, %arg8: memref<1x256x128xf32, #tpu.memory_space<vmem>>, %arg9: memref<256x128xf32, #tpu.memory_space<vmem>>) attributes {dimension_semantics = [#tpu.dimension_semantics<parallel>, #tpu.dimension_semantics<parallel>, #tpu.dimension_semantics<parallel>, #tpu.dimension_semantics<arbitrary>], iteration_bounds = array<i64: 1, 2, 1, 1>, scalar_prefetch = 0 : i64, scratch_operands = 1 : i64, tpu.core_type = #tpu.core_type<tc>, window_params = [{transform_indices = @transform_0, window_bounds = array<i64: 1, 256, 256>}, {transform_indices = @transform_1, window_bounds = array<i64: 1, 256, 128>}, {transform_indices = @transform_2, window_bounds = array<i64: 1, 128>}, {transform_indices = @transform_3, window_bounds = array<i64: 1, 128>}, {transform_indices = @transform_4, window_bounds = array<i64: 1, 256, 128>}]} {
    %c0_i32 = arith.constant 0 : i32
    %0 = arith.cmpi eq, %arg3, %c0_i32 : i32
    %1 = arith.extui %0 : i1 to i32
    %c0_i32_0 = arith.constant 0 : i32
    %2 = arith.cmpi ne, %1, %c0_i32_0 : i32
    scf.if %2 {
      %cst_12 = arith.constant 0.000000e+00 : f32
      %14 = vector.broadcast %cst_12 : f32 to vector<256x128xf32>
      %c0_13 = arith.constant 0 : index
      %c0_14 = arith.constant 0 : index
      %15 = vector.load %arg9[%c0_13, %c0_14] : memref<256x128xf32, #tpu.memory_space<vmem>>, vector<256x128xf32>
      tpu.vector_store %arg9[%c0_13, %c0_14], %14 {strides = array<i32>} : memref<256x128xf32, #tpu.memory_space<vmem>>, vector<256x128xf32>,
    } else {
    }
    %c0 = arith.constant 0 : index
    %c0_1 = arith.constant 0 : index
    %3 = vector.load %arg9[%c0, %c0_1] : memref<256x128xf32, #tpu.memory_space<vmem>>, vector<256x128xf32>
    %c0_2 = arith.constant 0 : index
    %c0_3 = arith.constant 0 : index
    %c0_4 = arith.constant 0 : index
    %4 = vector.load %arg4[%c0_2, %c0_3, %c0_4] : memref<1x256x256xbf16, #tpu.memory_space<vmem>>, vector<1x256x256xbf16>
    %5 = vector.shape_cast %4 : vector<1x256x256xbf16> to vector<256x256xbf16>
    %c0_5 = arith.constant 0 : index
    %c0_6 = arith.constant 0 : index
    %c0_7 = arith.constant 0 : index
    %6 = vector.load %arg5[%c0_5, %c0_6, %c0_7] : memref<1x256x128xbf16, #tpu.memory_space<vmem>>, vector<1x256x128xbf16>
    %7 = vector.shape_cast %6 : vector<1x256x128xbf16> to vector<256x128xbf16>
    %cst = arith.constant dense<0.000000e+00> : vector<256x128xf32>
    %8 = tpu.matmul %5, %7, %cst {dimension_numbers = #tpu.dot_dimension_numbers<[1], [0], [0], [1], [0, 0, 1, 1], [], []>} : vector<256x256xbf16>, vector<256x128xbf16>, vector<256x128xf32> -> vector<256x128xf32>
    %9 = arith.addf %3, %8 : vector<256x128xf32>
    %c0_8 = arith.constant 0 : index
    %c0_9 = arith.constant 0 : index
    %10 = vector.load %arg9[%c0_8, %c0_9] : memref<256x128xf32, #tpu.memory_space<vmem>>, vector<256x128xf32>
    tpu.vector_store %arg9[%c0_8, %c0_9], %9 {strides = array<i32>} : memref<256x128xf32, #tpu.memory_space<vmem>>, vector<256x128xf32>,
    %c0_i32_10 = arith.constant 0 : i32
    %11 = arith.cmpi eq, %arg3, %c0_i32_10 : i32
    %12 = arith.extui %11 : i1 to i32
    %c0_i32_11 = arith.constant 0 : i32
    %13 = arith.cmpi ne, %12, %c0_i32_11 : i32
    scf.if %13 {
      %c0_12 = arith.constant 0 : index
      %c0_13 = arith.constant 0 : index
      %14 = vector.load %arg9[%c0_12, %c0_13] : memref<256x128xf32, #tpu.memory_space<vmem>>, vector<256x128xf32>
      %cst_14 = arith.constant dense<0.000000e+00> : vector<128xf32>
      %15 = vector.multi_reduction <add>, %14, %cst_14 [0] : vector<256x128xf32> to vector<128xf32>
      %16 = vector.shape_cast %15 : vector<128xf32> to vector<1x128xf32>
      %cst_15 = arith.constant 2.560000e+02 : f32
      %17 = vector.broadcast %cst_15 : f32 to vector<1x128xf32>
      %18 = arith.divf %16, %17 : vector<1x128xf32>
      %19 = vector.broadcast %18 : vector<1x128xf32> to vector<256x128xf32>
      %20 = arith.subf %14, %19 : vector<256x128xf32>
      %21 = arith.mulf %20, %20 : vector<256x128xf32>
      %cst_16 = arith.constant dense<0.000000e+00> : vector<128xf32>
      %22 = vector.multi_reduction <add>, %21, %cst_16 [0] : vector<256x128xf32> to vector<128xf32>
      %23 = vector.shape_cast %22 : vector<128xf32> to vector<1x128xf32>
      %cst_17 = arith.constant 2.560000e+02 : f32
      %24 = vector.broadcast %cst_17 : f32 to vector<1x128xf32>
      %25 = arith.divf %23, %24 : vector<1x128xf32>
      %cst_18 = arith.constant 9.99999974E-6 : f32
      %26 = vector.broadcast %cst_18 : f32 to vector<1x128xf32>
      %27 = arith.addf %25, %26 : vector<1x128xf32>
      %28 = math.rsqrt %27 : vector<1x128xf32>
      %29 = vector.broadcast %28 : vector<1x128xf32> to vector<256x128xf32>
      %30 = arith.mulf %20, %29 : vector<256x128xf32>
      %c0_19 = arith.constant 0 : index
      %c0_20 = arith.constant 0 : index
      %31 = vector.load %arg6[%c0_19, %c0_20] : memref<1x128xf32, #tpu.memory_space<vmem>>, vector<1x128xf32>
      %32 = vector.broadcast %31 : vector<1x128xf32> to vector<256x128xf32>
      %33 = arith.mulf %30, %32 : vector<256x128xf32>
      %c0_21 = arith.constant 0 : index
      %c0_22 = arith.constant 0 : index
      %34 = vector.load %arg7[%c0_21, %c0_22] : memref<1x128xf32, #tpu.memory_space<vmem>>, vector<1x128xf32>
      %35 = vector.broadcast %34 : vector<1x128xf32> to vector<256x128xf32>
      %36 = arith.addf %33, %35 : vector<256x128xf32>
      %cst_23 = arith.constant 0.000000e+00 : f32
      %37 = vector.broadcast %cst_23 : f32 to vector<256x128xf32>
      %38 = arith.maximumf %36, %37 : vector<256x128xf32>
      %c0_24 = arith.constant 0 : index
      %c0_25 = arith.constant 0 : index
      %c0_26 = arith.constant 0 : index
      %39 = vector.load %arg8[%c0_24, %c0_25, %c0_26] : memref<1x256x128xf32, #tpu.memory_space<vmem>>, vector<1x256x128xf32>
      %40 = vector.shape_cast %39 : vector<1x256x128xf32> to vector<256x128xf32>
      %41 = vector.shape_cast %38 : vector<256x128xf32> to vector<1x256x128xf32>
      tpu.vector_store %arg8[%c0_24, %c0_25, %c0_26], %41 {strides = array<i32>} : memref<1x256x128xf32, #tpu.memory_space<vmem>>, vector<1x256x128xf32>,
    } else {
    }
    return
  }
  func.func @transform_0(%arg0: i32, %arg1: i32, %arg2: i32, %arg3: i32) -> (i32, i32, i32) {
    %c0_i32 = arith.constant 0 : i32
    return %arg0, %arg1, %arg3 : i32, i32, i32
  }
  func.func @transform_1(%arg0: i32, %arg1: i32, %arg2: i32, %arg3: i32) -> (i32, i32, i32) {
    %c0_i32 = arith.constant 0 : i32
    return %arg0, %arg3, %arg2 : i32, i32, i32
  }
  func.func @transform_2(%arg0: i32, %arg1: i32, %arg2: i32, %arg3: i32) -> (i32, i32) {
    %c0_i32 = arith.constant 0 : i32
    %c0_i32_0 = arith.constant 0 : i32
    return %c0_i32, %arg2 : i32, i32
  }
  func.func @transform_3(%arg0: i32, %arg1: i32, %arg2: i32, %arg3: i32) -> (i32, i32) {
    %c0_i32 = arith.constant 0 : i32
    %c0_i32_0 = arith.constant 0 : i32
    return %c0_i32, %arg2 : i32, i32
  }
  func.func @transform_4(%arg0: i32, %arg1: i32, %arg2: i32, %arg3: i32) -> (i32, i32, i32) {
    %c0_i32 = arith.constant 0 : i32
    return %arg0, %arg1, %arg2 : i32, i32, i32
  }
}

module attributes {stable_mosaic.version = 11 : i64} {
  func.func @_conv_matmul_kernel(%arg0: i32, %arg1: i32, %arg2: i32, %arg3: i32, %arg4: memref<1x64x128xbf16, #tpu.memory_space<vmem>>, %arg5: memref<1x128x128xbf16, #tpu.memory_space<vmem>>, %arg6: memref<1x128xf32, #tpu.memory_space<vmem>>, %arg7: memref<1x128xf32, #tpu.memory_space<vmem>>, %arg8: memref<1x64x128xf32, #tpu.memory_space<vmem>>, %arg9: memref<64x128xf32, #tpu.memory_space<vmem>>) attributes {dimension_semantics = [#tpu.dimension_semantics<parallel>, #tpu.dimension_semantics<parallel>, #tpu.dimension_semantics<parallel>, #tpu.dimension_semantics<arbitrary>], iteration_bounds = array<i64: 1, 2, 1, 1>, scalar_prefetch = 0 : i64, scratch_operands = 1 : i64, tpu.core_type = #tpu.core_type<tc>, window_params = [{transform_indices = @transform_0, window_bounds = array<i64: 1, 64, 128>}, {transform_indices = @transform_1, window_bounds = array<i64: 1, 128, 128>}, {transform_indices = @transform_2, window_bounds = array<i64: 1, 128>}, {transform_indices = @transform_3, window_bounds = array<i64: 1, 128>}, {transform_indices = @transform_4, window_bounds = array<i64: 1, 64, 128>}]} {
    %c0_i32 = arith.constant 0 : i32
    %0 = arith.cmpi eq, %arg3, %c0_i32 : i32
    %1 = arith.extui %0 : i1 to i32
    %c0_i32_0 = arith.constant 0 : i32
    %2 = arith.cmpi ne, %1, %c0_i32_0 : i32
    scf.if %2 {
      %cst_12 = arith.constant 0.000000e+00 : f32
      %14 = vector.broadcast %cst_12 : f32 to vector<64x128xf32>
      %c0_13 = arith.constant 0 : index
      %c0_14 = arith.constant 0 : index
      %15 = vector.load %arg9[%c0_13, %c0_14] : memref<64x128xf32, #tpu.memory_space<vmem>>, vector<64x128xf32>
      tpu.vector_store %arg9[%c0_13, %c0_14], %14 {strides = array<i32>} : memref<64x128xf32, #tpu.memory_space<vmem>>, vector<64x128xf32>,
    } else {
    }
    %c0 = arith.constant 0 : index
    %c0_1 = arith.constant 0 : index
    %3 = vector.load %arg9[%c0, %c0_1] : memref<64x128xf32, #tpu.memory_space<vmem>>, vector<64x128xf32>
    %c0_2 = arith.constant 0 : index
    %c0_3 = arith.constant 0 : index
    %c0_4 = arith.constant 0 : index
    %4 = vector.load %arg4[%c0_2, %c0_3, %c0_4] : memref<1x64x128xbf16, #tpu.memory_space<vmem>>, vector<1x64x128xbf16>
    %5 = vector.shape_cast %4 : vector<1x64x128xbf16> to vector<64x128xbf16>
    %c0_5 = arith.constant 0 : index
    %c0_6 = arith.constant 0 : index
    %c0_7 = arith.constant 0 : index
    %6 = vector.load %arg5[%c0_5, %c0_6, %c0_7] : memref<1x128x128xbf16, #tpu.memory_space<vmem>>, vector<1x128x128xbf16>
    %7 = vector.shape_cast %6 : vector<1x128x128xbf16> to vector<128x128xbf16>
    %cst = arith.constant dense<0.000000e+00> : vector<64x128xf32>
    %8 = tpu.matmul %5, %7, %cst {dimension_numbers = #tpu.dot_dimension_numbers<[1], [0], [0], [1], [0, 0, 1, 1], [], []>} : vector<64x128xbf16>, vector<128x128xbf16>, vector<64x128xf32> -> vector<64x128xf32>
    %9 = arith.addf %3, %8 : vector<64x128xf32>
    %c0_8 = arith.constant 0 : index
    %c0_9 = arith.constant 0 : index
    %10 = vector.load %arg9[%c0_8, %c0_9] : memref<64x128xf32, #tpu.memory_space<vmem>>, vector<64x128xf32>
    tpu.vector_store %arg9[%c0_8, %c0_9], %9 {strides = array<i32>} : memref<64x128xf32, #tpu.memory_space<vmem>>, vector<64x128xf32>,
    %c0_i32_10 = arith.constant 0 : i32
    %11 = arith.cmpi eq, %arg3, %c0_i32_10 : i32
    %12 = arith.extui %11 : i1 to i32
    %c0_i32_11 = arith.constant 0 : i32
    %13 = arith.cmpi ne, %12, %c0_i32_11 : i32
    scf.if %13 {
      %c0_12 = arith.constant 0 : index
      %c0_13 = arith.constant 0 : index
      %14 = vector.load %arg9[%c0_12, %c0_13] : memref<64x128xf32, #tpu.memory_space<vmem>>, vector<64x128xf32>
      %cst_14 = arith.constant dense<0.000000e+00> : vector<128xf32>
      %15 = vector.multi_reduction <add>, %14, %cst_14 [0] : vector<64x128xf32> to vector<128xf32>
      %16 = vector.shape_cast %15 : vector<128xf32> to vector<1x128xf32>
      %cst_15 = arith.constant 6.400000e+01 : f32
      %17 = vector.broadcast %cst_15 : f32 to vector<1x128xf32>
      %18 = arith.divf %16, %17 : vector<1x128xf32>
      %19 = vector.broadcast %18 : vector<1x128xf32> to vector<64x128xf32>
      %20 = arith.subf %14, %19 : vector<64x128xf32>
      %21 = arith.mulf %20, %20 : vector<64x128xf32>
      %cst_16 = arith.constant dense<0.000000e+00> : vector<128xf32>
      %22 = vector.multi_reduction <add>, %21, %cst_16 [0] : vector<64x128xf32> to vector<128xf32>
      %23 = vector.shape_cast %22 : vector<128xf32> to vector<1x128xf32>
      %cst_17 = arith.constant 6.400000e+01 : f32
      %24 = vector.broadcast %cst_17 : f32 to vector<1x128xf32>
      %25 = arith.divf %23, %24 : vector<1x128xf32>
      %cst_18 = arith.constant 9.99999974E-6 : f32
      %26 = vector.broadcast %cst_18 : f32 to vector<1x128xf32>
      %27 = arith.addf %25, %26 : vector<1x128xf32>
      %28 = math.rsqrt %27 : vector<1x128xf32>
      %29 = vector.broadcast %28 : vector<1x128xf32> to vector<64x128xf32>
      %30 = arith.mulf %20, %29 : vector<64x128xf32>
      %c0_19 = arith.constant 0 : index
      %c0_20 = arith.constant 0 : index
      %31 = vector.load %arg6[%c0_19, %c0_20] : memref<1x128xf32, #tpu.memory_space<vmem>>, vector<1x128xf32>
      %32 = vector.broadcast %31 : vector<1x128xf32> to vector<64x128xf32>
      %33 = arith.mulf %30, %32 : vector<64x128xf32>
      %c0_21 = arith.constant 0 : index
      %c0_22 = arith.constant 0 : index
      %34 = vector.load %arg7[%c0_21, %c0_22] : memref<1x128xf32, #tpu.memory_space<vmem>>, vector<1x128xf32>
      %35 = vector.broadcast %34 : vector<1x128xf32> to vector<64x128xf32>
      %36 = arith.addf %33, %35 : vector<64x128xf32>
      %cst_23 = arith.constant 0.000000e+00 : f32
      %37 = vector.broadcast %cst_23 : f32 to vector<64x128xf32>
      %38 = arith.maximumf %36, %37 : vector<64x128xf32>
      %c0_24 = arith.constant 0 : index
      %c0_25 = arith.constant 0 : index
      %c0_26 = arith.constant 0 : index
      %39 = vector.load %arg8[%c0_24, %c0_25, %c0_26] : memref<1x64x128xf32, #tpu.memory_space<vmem>>, vector<1x64x128xf32>
      %40 = vector.shape_cast %39 : vector<1x64x128xf32> to vector<64x128xf32>
      %41 = vector.shape_cast %38 : vector<64x128xf32> to vector<1x64x128xf32>
      tpu.vector_store %arg8[%c0_24, %c0_25, %c0_26], %41 {strides = array<i32>} : memref<1x64x128xf32, #tpu.memory_space<vmem>>, vector<1x64x128xf32>,
    } else {
    }
    return
  }
  func.func @transform_0(%arg0: i32, %arg1: i32, %arg2: i32, %arg3: i32) -> (i32, i32, i32) {
    %c0_i32 = arith.constant 0 : i32
    return %arg0, %arg1, %arg3 : i32, i32, i32
  }
  func.func @transform_1(%arg0: i32, %arg1: i32, %arg2: i32, %arg3: i32) -> (i32, i32, i32) {
    %c0_i32 = arith.constant 0 : i32
    return %arg0, %arg3, %arg2 : i32, i32, i32
  }
  func.func @transform_2(%arg0: i32, %arg1: i32, %arg2: i32, %arg3: i32) -> (i32, i32) {
    %c0_i32 = arith.constant 0 : i32
    %c0_i32_0 = arith.constant 0 : i32
    return %c0_i32, %arg2 : i32, i32
  }
  func.func @transform_3(%arg0: i32, %arg1: i32, %arg2: i32, %arg3: i32) -> (i32, i32) {
    %c0_i32 = arith.constant 0 : i32
    %c0_i32_0 = arith.constant 0 : i32
    return %c0_i32, %arg2 : i32, i32
  }
  func.func @transform_4(%arg0: i32, %arg1: i32, %arg2: i32, %arg3: i32) -> (i32, i32, i32) {
    %c0_i32 = arith.constant 0 : i32
    return %arg0, %arg1, %arg2 : i32, i32, i32
  }
}

module attributes {stable_mosaic.version = 11 : i64} {
  func.func @_conv_matmul_kernel(%arg0: i32, %arg1: i32, %arg2: i32, %arg3: i32, %arg4: memref<1x32x256xbf16, #tpu.memory_space<vmem>>, %arg5: memref<1x256x128xbf16, #tpu.memory_space<vmem>>, %arg6: memref<1x32x128xf32, #tpu.memory_space<vmem>>, %arg7: memref<32x128xf32, #tpu.memory_space<vmem>>) attributes {dimension_semantics = [#tpu.dimension_semantics<parallel>, #tpu.dimension_semantics<parallel>, #tpu.dimension_semantics<parallel>, #tpu.dimension_semantics<arbitrary>], iteration_bounds = array<i64: 1, 1, 1, 1>, scalar_prefetch = 0 : i64, scratch_operands = 1 : i64, tpu.core_type = #tpu.core_type<tc>, window_params = [{transform_indices = @transform_0, window_bounds = array<i64: 1, 32, 256>}, {transform_indices = @transform_1, window_bounds = array<i64: 1, 256, 128>}, {transform_indices = @transform_2, window_bounds = array<i64: 1, 32, 128>}]} {
    %c0_i32 = arith.constant 0 : i32
    %0 = arith.cmpi eq, %arg3, %c0_i32 : i32
    %1 = arith.extui %0 : i1 to i32
    %c0_i32_0 = arith.constant 0 : i32
    %2 = arith.cmpi ne, %1, %c0_i32_0 : i32
    scf.if %2 {
      %cst_12 = arith.constant 0.000000e+00 : f32
      %14 = vector.broadcast %cst_12 : f32 to vector<32x128xf32>
      %c0_13 = arith.constant 0 : index
      %c0_14 = arith.constant 0 : index
      %15 = vector.load %arg7[%c0_13, %c0_14] : memref<32x128xf32, #tpu.memory_space<vmem>>, vector<32x128xf32>
      tpu.vector_store %arg7[%c0_13, %c0_14], %14 {strides = array<i32>} : memref<32x128xf32, #tpu.memory_space<vmem>>, vector<32x128xf32>,
    } else {
    }
    %c0 = arith.constant 0 : index
    %c0_1 = arith.constant 0 : index
    %3 = vector.load %arg7[%c0, %c0_1] : memref<32x128xf32, #tpu.memory_space<vmem>>, vector<32x128xf32>
    %c0_2 = arith.constant 0 : index
    %c0_3 = arith.constant 0 : index
    %c0_4 = arith.constant 0 : index
    %4 = vector.load %arg4[%c0_2, %c0_3, %c0_4] : memref<1x32x256xbf16, #tpu.memory_space<vmem>>, vector<1x32x256xbf16>
    %5 = vector.shape_cast %4 : vector<1x32x256xbf16> to vector<32x256xbf16>
    %c0_5 = arith.constant 0 : index
    %c0_6 = arith.constant 0 : index
    %c0_7 = arith.constant 0 : index
    %6 = vector.load %arg5[%c0_5, %c0_6, %c0_7] : memref<1x256x128xbf16, #tpu.memory_space<vmem>>, vector<1x256x128xbf16>
    %7 = vector.shape_cast %6 : vector<1x256x128xbf16> to vector<256x128xbf16>
    %cst = arith.constant dense<0.000000e+00> : vector<32x128xf32>
    %8 = tpu.matmul %5, %7, %cst {dimension_numbers = #tpu.dot_dimension_numbers<[1], [0], [0], [1], [0, 0, 1, 1], [], []>} : vector<32x256xbf16>, vector<256x128xbf16>, vector<32x128xf32> -> vector<32x128xf32>
    %9 = arith.addf %3, %8 : vector<32x128xf32>
    %c0_8 = arith.constant 0 : index
    %c0_9 = arith.constant 0 : index
    %10 = vector.load %arg7[%c0_8, %c0_9] : memref<32x128xf32, #tpu.memory_space<vmem>>, vector<32x128xf32>
    tpu.vector_store %arg7[%c0_8, %c0_9], %9 {strides = array<i32>} : memref<32x128xf32, #tpu.memory_space<vmem>>, vector<32x128xf32>,
    %c0_i32_10 = arith.constant 0 : i32
    %11 = arith.cmpi eq, %arg3, %c0_i32_10 : i32
    %12 = arith.extui %11 : i1 to i32
    %c0_i32_11 = arith.constant 0 : i32
    %13 = arith.cmpi ne, %12, %c0_i32_11 : i32
    scf.if %13 {
      %c0_12 = arith.constant 0 : index
      %c0_13 = arith.constant 0 : index
      %14 = vector.load %arg7[%c0_12, %c0_13] : memref<32x128xf32, #tpu.memory_space<vmem>>, vector<32x128xf32>
      %c0_14 = arith.constant 0 : index
      %c0_15 = arith.constant 0 : index
      %c0_16 = arith.constant 0 : index
      %15 = vector.load %arg6[%c0_14, %c0_15, %c0_16] : memref<1x32x128xf32, #tpu.memory_space<vmem>>, vector<1x32x128xf32>
      %16 = vector.shape_cast %15 : vector<1x32x128xf32> to vector<32x128xf32>
      %17 = vector.shape_cast %14 : vector<32x128xf32> to vector<1x32x128xf32>
      tpu.vector_store %arg6[%c0_14, %c0_15, %c0_16], %17 {strides = array<i32>} : memref<1x32x128xf32, #tpu.memory_space<vmem>>, vector<1x32x128xf32>,
    } else {
    }
    return
  }
  func.func @transform_0(%arg0: i32, %arg1: i32, %arg2: i32, %arg3: i32) -> (i32, i32, i32) {
    %c0_i32 = arith.constant 0 : i32
    return %arg0, %arg1, %arg3 : i32, i32, i32
  }
  func.func @transform_1(%arg0: i32, %arg1: i32, %arg2: i32, %arg3: i32) -> (i32, i32, i32) {
    %c0_i32 = arith.constant 0 : i32
    return %arg0, %arg3, %arg2 : i32, i32, i32
  }
  func.func @transform_2(%arg0: i32, %arg1: i32, %arg2: i32, %arg3: i32) -> (i32, i32, i32) {
    %c0_i32 = arith.constant 0 : i32
    return %arg0, %arg1, %arg2 : i32, i32, i32
  }
}

module attributes {stable_mosaic.version = 11 : i64} {
  func.func @_conv_matmul_kernel(%arg0: i32, %arg1: i32, %arg2: i32, %arg3: i32, %arg4: memref<1x16x128xbf16, #tpu.memory_space<vmem>>, %arg5: memref<1x128x128xbf16, #tpu.memory_space<vmem>>, %arg6: memref<1x128xf32, #tpu.memory_space<vmem>>, %arg7: memref<1x128xf32, #tpu.memory_space<vmem>>, %arg8: memref<1x16x128xf32, #tpu.memory_space<vmem>>, %arg9: memref<1x16x128xf32, #tpu.memory_space<vmem>>, %arg10: memref<16x128xf32, #tpu.memory_space<vmem>>) attributes {dimension_semantics = [#tpu.dimension_semantics<parallel>, #tpu.dimension_semantics<parallel>, #tpu.dimension_semantics<parallel>, #tpu.dimension_semantics<arbitrary>], iteration_bounds = array<i64: 1, 2, 1, 3>, scalar_prefetch = 0 : i64, scratch_operands = 1 : i64, tpu.core_type = #tpu.core_type<tc>, window_params = [{transform_indices = @transform_0, window_bounds = array<i64: 1, 16, 128>}, {transform_indices = @transform_1, window_bounds = array<i64: 1, 128, 128>}, {transform_indices = @transform_2, window_bounds = array<i64: 1, 128>}, {transform_indices = @transform_3, window_bounds = array<i64: 1, 128>}, {transform_indices = @transform_4, window_bounds = array<i64: 1, 16, 128>}, {transform_indices = @transform_5, window_bounds = array<i64: 1, 16, 128>}]} {
    %c0_i32 = arith.constant 0 : i32
    %0 = arith.cmpi eq, %arg3, %c0_i32 : i32
    %1 = arith.extui %0 : i1 to i32
    %c0_i32_0 = arith.constant 0 : i32
    %2 = arith.cmpi ne, %1, %c0_i32_0 : i32
    scf.if %2 {
      %cst_11 = arith.constant 0.000000e+00 : f32
      %14 = vector.broadcast %cst_11 : f32 to vector<16x128xf32>
      %c0_12 = arith.constant 0 : index
      %c0_13 = arith.constant 0 : index
      %15 = vector.load %arg10[%c0_12, %c0_13] : memref<16x128xf32, #tpu.memory_space<vmem>>, vector<16x128xf32>
      tpu.vector_store %arg10[%c0_12, %c0_13], %14 {strides = array<i32>} : memref<16x128xf32, #tpu.memory_space<vmem>>, vector<16x128xf32>,
    } else {
    }
    %c0 = arith.constant 0 : index
    %c0_1 = arith.constant 0 : index
    %3 = vector.load %arg10[%c0, %c0_1] : memref<16x128xf32, #tpu.memory_space<vmem>>, vector<16x128xf32>
    %c0_2 = arith.constant 0 : index
    %c0_3 = arith.constant 0 : index
    %c0_4 = arith.constant 0 : index
    %4 = vector.load %arg4[%c0_2, %c0_3, %c0_4] : memref<1x16x128xbf16, #tpu.memory_space<vmem>>, vector<1x16x128xbf16>
    %5 = vector.shape_cast %4 : vector<1x16x128xbf16> to vector<16x128xbf16>
    %c0_5 = arith.constant 0 : index
    %c0_6 = arith.constant 0 : index
    %c0_7 = arith.constant 0 : index
    %6 = vector.load %arg5[%c0_5, %c0_6, %c0_7] : memref<1x128x128xbf16, #tpu.memory_space<vmem>>, vector<1x128x128xbf16>
    %7 = vector.shape_cast %6 : vector<1x128x128xbf16> to vector<128x128xbf16>
    %cst = arith.constant dense<0.000000e+00> : vector<16x128xf32>
    %8 = tpu.matmul %5, %7, %cst {dimension_numbers = #tpu.dot_dimension_numbers<[1], [0], [0], [1], [0, 0, 1, 1], [], []>} : vector<16x128xbf16>, vector<128x128xbf16>, vector<16x128xf32> -> vector<16x128xf32>
    %9 = arith.addf %3, %8 : vector<16x128xf32>
    %c0_8 = arith.constant 0 : index
    %c0_9 = arith.constant 0 : index
    %10 = vector.load %arg10[%c0_8, %c0_9] : memref<16x128xf32, #tpu.memory_space<vmem>>, vector<16x128xf32>
    tpu.vector_store %arg10[%c0_8, %c0_9], %9 {strides = array<i32>} : memref<16x128xf32, #tpu.memory_space<vmem>>, vector<16x128xf32>,
    %c2_i32 = arith.constant 2 : i32
    %11 = arith.cmpi eq, %arg3, %c2_i32 : i32
    %12 = arith.extui %11 : i1 to i32
    %c0_i32_10 = arith.constant 0 : i32
    %13 = arith.cmpi ne, %12, %c0_i32_10 : i32
    scf.if %13 {
      %c0_11 = arith.constant 0 : index
      %c0_12 = arith.constant 0 : index
      %14 = vector.load %arg10[%c0_11, %c0_12] : memref<16x128xf32, #tpu.memory_space<vmem>>, vector<16x128xf32>
      %cst_13 = arith.constant dense<0.000000e+00> : vector<128xf32>
      %15 = vector.multi_reduction <add>, %14, %cst_13 [0] : vector<16x128xf32> to vector<128xf32>
      %16 = vector.shape_cast %15 : vector<128xf32> to vector<1x128xf32>
      %cst_14 = arith.constant 1.600000e+01 : f32
      %17 = vector.broadcast %cst_14 : f32 to vector<1x128xf32>
      %18 = arith.divf %16, %17 : vector<1x128xf32>
      %19 = vector.broadcast %18 : vector<1x128xf32> to vector<16x128xf32>
      %20 = arith.subf %14, %19 : vector<16x128xf32>
      %21 = arith.mulf %20, %20 : vector<16x128xf32>
      %cst_15 = arith.constant dense<0.000000e+00> : vector<128xf32>
      %22 = vector.multi_reduction <add>, %21, %cst_15 [0] : vector<16x128xf32> to vector<128xf32>
      %23 = vector.shape_cast %22 : vector<128xf32> to vector<1x128xf32>
      %cst_16 = arith.constant 1.600000e+01 : f32
      %24 = vector.broadcast %cst_16 : f32 to vector<1x128xf32>
      %25 = arith.divf %23, %24 : vector<1x128xf32>
      %cst_17 = arith.constant 9.99999974E-6 : f32
      %26 = vector.broadcast %cst_17 : f32 to vector<1x128xf32>
      %27 = arith.addf %25, %26 : vector<1x128xf32>
      %28 = math.rsqrt %27 : vector<1x128xf32>
      %29 = vector.broadcast %28 : vector<1x128xf32> to vector<16x128xf32>
      %30 = arith.mulf %20, %29 : vector<16x128xf32>
      %c0_18 = arith.constant 0 : index
      %c0_19 = arith.constant 0 : index
      %31 = vector.load %arg6[%c0_18, %c0_19] : memref<1x128xf32, #tpu.memory_space<vmem>>, vector<1x128xf32>
      %32 = vector.broadcast %31 : vector<1x128xf32> to vector<16x128xf32>
      %33 = arith.mulf %30, %32 : vector<16x128xf32>
      %c0_20 = arith.constant 0 : index
      %c0_21 = arith.constant 0 : index
      %34 = vector.load %arg7[%c0_20, %c0_21] : memref<1x128xf32, #tpu.memory_space<vmem>>, vector<1x128xf32>
      %35 = vector.broadcast %34 : vector<1x128xf32> to vector<16x128xf32>
      %36 = arith.addf %33, %35 : vector<16x128xf32>
      %c0_22 = arith.constant 0 : index
      %c0_23 = arith.constant 0 : index
      %c0_24 = arith.constant 0 : index
      %37 = vector.load %arg8[%c0_22, %c0_23, %c0_24] : memref<1x16x128xf32, #tpu.memory_space<vmem>>, vector<1x16x128xf32>
      %38 = vector.shape_cast %37 : vector<1x16x128xf32> to vector<16x128xf32>
      %39 = arith.addf %38, %36 : vector<16x128xf32>
      %c0_25 = arith.constant 0 : index
      %c0_26 = arith.constant 0 : index
      %c0_27 = arith.constant 0 : index
      %40 = vector.load %arg9[%c0_25, %c0_26, %c0_27] : memref<1x16x128xf32, #tpu.memory_space<vmem>>, vector<1x16x128xf32>
      %41 = vector.shape_cast %40 : vector<1x16x128xf32> to vector<16x128xf32>
      %42 = vector.shape_cast %39 : vector<16x128xf32> to vector<1x16x128xf32>
      tpu.vector_store %arg9[%c0_25, %c0_26, %c0_27], %42 {strides = array<i32>} : memref<1x16x128xf32, #tpu.memory_space<vmem>>, vector<1x16x128xf32>,
    } else {
    }
    return
  }
  func.func @transform_0(%arg0: i32, %arg1: i32, %arg2: i32, %arg3: i32) -> (i32, i32, i32) {
    %c0_i32 = arith.constant 0 : i32
    return %arg0, %arg1, %arg3 : i32, i32, i32
  }
  func.func @transform_1(%arg0: i32, %arg1: i32, %arg2: i32, %arg3: i32) -> (i32, i32, i32) {
    %c0_i32 = arith.constant 0 : i32
    return %arg0, %arg3, %arg2 : i32, i32, i32
  }
  func.func @transform_2(%arg0: i32, %arg1: i32, %arg2: i32, %arg3: i32) -> (i32, i32) {
    %c0_i32 = arith.constant 0 : i32
    %c0_i32_0 = arith.constant 0 : i32
    return %c0_i32, %arg2 : i32, i32
  }
  func.func @transform_3(%arg0: i32, %arg1: i32, %arg2: i32, %arg3: i32) -> (i32, i32) {
    %c0_i32 = arith.constant 0 : i32
    %c0_i32_0 = arith.constant 0 : i32
    return %c0_i32, %arg2 : i32, i32
  }
  func.func @transform_4(%arg0: i32, %arg1: i32, %arg2: i32, %arg3: i32) -> (i32, i32, i32) {
    %c0_i32 = arith.constant 0 : i32
    %c0_i32_0 = arith.constant 0 : i32
    return %c0_i32, %arg1, %arg2 : i32, i32, i32
  }
  func.func @transform_5(%arg0: i32, %arg1: i32, %arg2: i32, %arg3: i32) -> (i32, i32, i32) {
    %c0_i32 = arith.constant 0 : i32
    return %arg0, %arg1, %arg2 : i32, i32, i32
  }
}

module attributes {stable_mosaic.version = 11 : i64} {
  func.func @_conv_matmul_kernel(%arg0: i32, %arg1: i32, %arg2: i32, %arg3: i32, %arg4: memref<1x16x128xbf16, #tpu.memory_space<vmem>>, %arg5: memref<1x128x128xbf16, #tpu.memory_space<vmem>>, %arg6: memref<1x128xf32, #tpu.memory_space<vmem>>, %arg7: memref<1x128xf32, #tpu.memory_space<vmem>>, %arg8: memref<1x16x128xf32, #tpu.memory_space<vmem>>, %arg9: memref<16x128xf32, #tpu.memory_space<vmem>>) attributes {dimension_semantics = [#tpu.dimension_semantics<parallel>, #tpu.dimension_semantics<parallel>, #tpu.dimension_semantics<parallel>, #tpu.dimension_semantics<arbitrary>], iteration_bounds = array<i64: 1, 2, 1, 3>, scalar_prefetch = 0 : i64, scratch_operands = 1 : i64, tpu.core_type = #tpu.core_type<tc>, window_params = [{transform_indices = @transform_0, window_bounds = array<i64: 1, 16, 128>}, {transform_indices = @transform_1, window_bounds = array<i64: 1, 128, 128>}, {transform_indices = @transform_2, window_bounds = array<i64: 1, 128>}, {transform_indices = @transform_3, window_bounds = array<i64: 1, 128>}, {transform_indices = @transform_4, window_bounds = array<i64: 1, 16, 128>}]} {
    %c0_i32 = arith.constant 0 : i32
    %0 = arith.cmpi eq, %arg3, %c0_i32 : i32
    %1 = arith.extui %0 : i1 to i32
    %c0_i32_0 = arith.constant 0 : i32
    %2 = arith.cmpi ne, %1, %c0_i32_0 : i32
    scf.if %2 {
      %cst_11 = arith.constant 0.000000e+00 : f32
      %14 = vector.broadcast %cst_11 : f32 to vector<16x128xf32>
      %c0_12 = arith.constant 0 : index
      %c0_13 = arith.constant 0 : index
      %15 = vector.load %arg9[%c0_12, %c0_13] : memref<16x128xf32, #tpu.memory_space<vmem>>, vector<16x128xf32>
      tpu.vector_store %arg9[%c0_12, %c0_13], %14 {strides = array<i32>} : memref<16x128xf32, #tpu.memory_space<vmem>>, vector<16x128xf32>,
    } else {
    }
    %c0 = arith.constant 0 : index
    %c0_1 = arith.constant 0 : index
    %3 = vector.load %arg9[%c0, %c0_1] : memref<16x128xf32, #tpu.memory_space<vmem>>, vector<16x128xf32>
    %c0_2 = arith.constant 0 : index
    %c0_3 = arith.constant 0 : index
    %c0_4 = arith.constant 0 : index
    %4 = vector.load %arg4[%c0_2, %c0_3, %c0_4] : memref<1x16x128xbf16, #tpu.memory_space<vmem>>, vector<1x16x128xbf16>
    %5 = vector.shape_cast %4 : vector<1x16x128xbf16> to vector<16x128xbf16>
    %c0_5 = arith.constant 0 : index
    %c0_6 = arith.constant 0 : index
    %c0_7 = arith.constant 0 : index
    %6 = vector.load %arg5[%c0_5, %c0_6, %c0_7] : memref<1x128x128xbf16, #tpu.memory_space<vmem>>, vector<1x128x128xbf16>
    %7 = vector.shape_cast %6 : vector<1x128x128xbf16> to vector<128x128xbf16>
    %cst = arith.constant dense<0.000000e+00> : vector<16x128xf32>
    %8 = tpu.matmul %5, %7, %cst {dimension_numbers = #tpu.dot_dimension_numbers<[1], [0], [0], [1], [0, 0, 1, 1], [], []>} : vector<16x128xbf16>, vector<128x128xbf16>, vector<16x128xf32> -> vector<16x128xf32>
    %9 = arith.addf %3, %8 : vector<16x128xf32>
    %c0_8 = arith.constant 0 : index
    %c0_9 = arith.constant 0 : index
    %10 = vector.load %arg9[%c0_8, %c0_9] : memref<16x128xf32, #tpu.memory_space<vmem>>, vector<16x128xf32>
    tpu.vector_store %arg9[%c0_8, %c0_9], %9 {strides = array<i32>} : memref<16x128xf32, #tpu.memory_space<vmem>>, vector<16x128xf32>,
    %c2_i32 = arith.constant 2 : i32
    %11 = arith.cmpi eq, %arg3, %c2_i32 : i32
    %12 = arith.extui %11 : i1 to i32
    %c0_i32_10 = arith.constant 0 : i32
    %13 = arith.cmpi ne, %12, %c0_i32_10 : i32
    scf.if %13 {
      %c0_11 = arith.constant 0 : index
      %c0_12 = arith.constant 0 : index
      %14 = vector.load %arg9[%c0_11, %c0_12] : memref<16x128xf32, #tpu.memory_space<vmem>>, vector<16x128xf32>
      %cst_13 = arith.constant dense<0.000000e+00> : vector<128xf32>
      %15 = vector.multi_reduction <add>, %14, %cst_13 [0] : vector<16x128xf32> to vector<128xf32>
      %16 = vector.shape_cast %15 : vector<128xf32> to vector<1x128xf32>
      %cst_14 = arith.constant 1.600000e+01 : f32
      %17 = vector.broadcast %cst_14 : f32 to vector<1x128xf32>
      %18 = arith.divf %16, %17 : vector<1x128xf32>
      %19 = vector.broadcast %18 : vector<1x128xf32> to vector<16x128xf32>
      %20 = arith.subf %14, %19 : vector<16x128xf32>
      %21 = arith.mulf %20, %20 : vector<16x128xf32>
      %cst_15 = arith.constant dense<0.000000e+00> : vector<128xf32>
      %22 = vector.multi_reduction <add>, %21, %cst_15 [0] : vector<16x128xf32> to vector<128xf32>
      %23 = vector.shape_cast %22 : vector<128xf32> to vector<1x128xf32>
      %cst_16 = arith.constant 1.600000e+01 : f32
      %24 = vector.broadcast %cst_16 : f32 to vector<1x128xf32>
      %25 = arith.divf %23, %24 : vector<1x128xf32>
      %cst_17 = arith.constant 9.99999974E-6 : f32
      %26 = vector.broadcast %cst_17 : f32 to vector<1x128xf32>
      %27 = arith.addf %25, %26 : vector<1x128xf32>
      %28 = math.rsqrt %27 : vector<1x128xf32>
      %29 = vector.broadcast %28 : vector<1x128xf32> to vector<16x128xf32>
      %30 = arith.mulf %20, %29 : vector<16x128xf32>
      %c0_18 = arith.constant 0 : index
      %c0_19 = arith.constant 0 : index
      %31 = vector.load %arg6[%c0_18, %c0_19] : memref<1x128xf32, #tpu.memory_space<vmem>>, vector<1x128xf32>
      %32 = vector.broadcast %31 : vector<1x128xf32> to vector<16x128xf32>
      %33 = arith.mulf %30, %32 : vector<16x128xf32>
      %c0_20 = arith.constant 0 : index
      %c0_21 = arith.constant 0 : index
      %34 = vector.load %arg7[%c0_20, %c0_21] : memref<1x128xf32, #tpu.memory_space<vmem>>, vector<1x128xf32>
      %35 = vector.broadcast %34 : vector<1x128xf32> to vector<16x128xf32>
      %36 = arith.addf %33, %35 : vector<16x128xf32>
      %cst_22 = arith.constant 0.000000e+00 : f32
      %37 = vector.broadcast %cst_22 : f32 to vector<16x128xf32>
      %38 = arith.maximumf %36, %37 : vector<16x128xf32>
      %c0_23 = arith.constant 0 : index
      %c0_24 = arith.constant 0 : index
      %c0_25 = arith.constant 0 : index
      %39 = vector.load %arg8[%c0_23, %c0_24, %c0_25] : memref<1x16x128xf32, #tpu.memory_space<vmem>>, vector<1x16x128xf32>
      %40 = vector.shape_cast %39 : vector<1x16x128xf32> to vector<16x128xf32>
      %41 = vector.shape_cast %38 : vector<16x128xf32> to vector<1x16x128xf32>
      tpu.vector_store %arg8[%c0_23, %c0_24, %c0_25], %41 {strides = array<i32>} : memref<1x16x128xf32, #tpu.memory_space<vmem>>, vector<1x16x128xf32>,
    } else {
    }
    return
  }
  func.func @transform_0(%arg0: i32, %arg1: i32, %arg2: i32, %arg3: i32) -> (i32, i32, i32) {
    %c0_i32 = arith.constant 0 : i32
    return %arg0, %arg1, %arg3 : i32, i32, i32
  }
  func.func @transform_1(%arg0: i32, %arg1: i32, %arg2: i32, %arg3: i32) -> (i32, i32, i32) {
    %c0_i32 = arith.constant 0 : i32
    return %arg0, %arg3, %arg2 : i32, i32, i32
  }
  func.func @transform_2(%arg0: i32, %arg1: i32, %arg2: i32, %arg3: i32) -> (i32, i32) {
    %c0_i32 = arith.constant 0 : i32
    %c0_i32_0 = arith.constant 0 : i32
    return %c0_i32, %arg2 : i32, i32
  }
  func.func @transform_3(%arg0: i32, %arg1: i32, %arg2: i32, %arg3: i32) -> (i32, i32) {
    %c0_i32 = arith.constant 0 : i32
    %c0_i32_0 = arith.constant 0 : i32
    return %c0_i32, %arg2 : i32, i32
  }
  func.func @transform_4(%arg0: i32, %arg1: i32, %arg2: i32, %arg3: i32) -> (i32, i32, i32) {
    %c0_i32 = arith.constant 0 : i32
    return %arg0, %arg1, %arg2 : i32, i32, i32
  }
}

module attributes {stable_mosaic.version = 11 : i64} {
  func.func @_in_relu_kernel(%arg0: i32, %arg1: memref<1x16x32xf32, #tpu.memory_space<vmem>>, %arg2: memref<1x32xf32, #tpu.memory_space<vmem>>, %arg3: memref<1x32xf32, #tpu.memory_space<vmem>>, %arg4: memref<1x16x32xf32, #tpu.memory_space<vmem>>) attributes {dimension_semantics = [#tpu.dimension_semantics<parallel>], iteration_bounds = array<i64: 2>, scalar_prefetch = 0 : i64, scratch_operands = 0 : i64, tpu.core_type = #tpu.core_type<tc>, window_params = [{transform_indices = @transform_0, window_bounds = array<i64: 1, 16, 32>}, {pipeline_mode = #tpu.pipeline_mode<synchronous>, transform_indices = @transform_1, window_bounds = array<i64: 1, 32>}, {pipeline_mode = #tpu.pipeline_mode<synchronous>, transform_indices = @transform_2, window_bounds = array<i64: 1, 32>}, {transform_indices = @transform_3, window_bounds = array<i64: 1, 16, 32>}]} {
    %c0 = arith.constant 0 : index
    %c0_0 = arith.constant 0 : index
    %c0_1 = arith.constant 0 : index
    %0 = vector.load %arg1[%c0, %c0_0, %c0_1] : memref<1x16x32xf32, #tpu.memory_space<vmem>>, vector<1x16x32xf32>
    %1 = vector.shape_cast %0 : vector<1x16x32xf32> to vector<16x32xf32>
    %cst = arith.constant dense<0.000000e+00> : vector<32xf32>
    %2 = vector.multi_reduction <add>, %1, %cst [0] : vector<16x32xf32> to vector<32xf32>
    %3 = vector.shape_cast %2 : vector<32xf32> to vector<1x32xf32>
    %cst_2 = arith.constant 1.600000e+01 : f32
    %4 = vector.broadcast %cst_2 : f32 to vector<1x32xf32>
    %5 = arith.divf %3, %4 : vector<1x32xf32>
    %6 = vector.broadcast %5 : vector<1x32xf32> to vector<16x32xf32>
    %7 = arith.subf %1, %6 : vector<16x32xf32>
    %8 = arith.mulf %7, %7 : vector<16x32xf32>
    %cst_3 = arith.constant dense<0.000000e+00> : vector<32xf32>
    %9 = vector.multi_reduction <add>, %8, %cst_3 [0] : vector<16x32xf32> to vector<32xf32>
    %10 = vector.shape_cast %9 : vector<32xf32> to vector<1x32xf32>
    %cst_4 = arith.constant 1.600000e+01 : f32
    %11 = vector.broadcast %cst_4 : f32 to vector<1x32xf32>
    %12 = arith.divf %10, %11 : vector<1x32xf32>
    %cst_5 = arith.constant 9.99999974E-6 : f32
    %13 = vector.broadcast %cst_5 : f32 to vector<1x32xf32>
    %14 = arith.addf %12, %13 : vector<1x32xf32>
    %15 = math.rsqrt %14 : vector<1x32xf32>
    %16 = vector.broadcast %15 : vector<1x32xf32> to vector<16x32xf32>
    %17 = arith.mulf %7, %16 : vector<16x32xf32>
    %c0_6 = arith.constant 0 : index
    %c0_7 = arith.constant 0 : index
    %18 = vector.load %arg2[%c0_6, %c0_7] : memref<1x32xf32, #tpu.memory_space<vmem>>, vector<1x32xf32>
    %19 = vector.broadcast %18 : vector<1x32xf32> to vector<16x32xf32>
    %20 = arith.mulf %17, %19 : vector<16x32xf32>
    %c0_8 = arith.constant 0 : index
    %c0_9 = arith.constant 0 : index
    %21 = vector.load %arg3[%c0_8, %c0_9] : memref<1x32xf32, #tpu.memory_space<vmem>>, vector<1x32xf32>
    %22 = vector.broadcast %21 : vector<1x32xf32> to vector<16x32xf32>
    %23 = arith.addf %20, %22 : vector<16x32xf32>
    %cst_10 = arith.constant 0.000000e+00 : f32
    %24 = vector.broadcast %cst_10 : f32 to vector<16x32xf32>
    %25 = arith.maximumf %23, %24 : vector<16x32xf32>
    %c0_11 = arith.constant 0 : index
    %c0_12 = arith.constant 0 : index
    %c0_13 = arith.constant 0 : index
    %26 = vector.load %arg4[%c0_11, %c0_12, %c0_13] : memref<1x16x32xf32, #tpu.memory_space<vmem>>, vector<1x16x32xf32>
    %27 = vector.shape_cast %26 : vector<1x16x32xf32> to vector<16x32xf32>
    %28 = vector.shape_cast %25 : vector<16x32xf32> to vector<1x16x32xf32>
    tpu.vector_store %arg4[%c0_11, %c0_12, %c0_13], %28 {strides = array<i32>} : memref<1x16x32xf32, #tpu.memory_space<vmem>>, vector<1x16x32xf32>,
    return
  }
  func.func @transform_0(%arg0: i32) -> (i32, i32, i32) {
    %c0_i32 = arith.constant 0 : i32
    %c0_i32_0 = arith.constant 0 : i32
    %c0_i32_1 = arith.constant 0 : i32
    return %arg0, %c0_i32, %c0_i32_0 : i32, i32, i32
  }
  func.func @transform_1(%arg0: i32) -> (i32, i32) {
    %c0_i32 = arith.constant 0 : i32
    %c0_i32_0 = arith.constant 0 : i32
    %c0_i32_1 = arith.constant 0 : i32
    return %c0_i32, %c0_i32_0 : i32, i32
  }
  func.func @transform_2(%arg0: i32) -> (i32, i32) {
    %c0_i32 = arith.constant 0 : i32
    %c0_i32_0 = arith.constant 0 : i32
    %c0_i32_1 = arith.constant 0 : i32
    return %c0_i32, %c0_i32_0 : i32, i32
  }
  func.func @transform_3(%arg0: i32) -> (i32, i32, i32) {
    %c0_i32 = arith.constant 0 : i32
    %c0_i32_0 = arith.constant 0 : i32
    %c0_i32_1 = arith.constant 0 : i32
    return %arg0, %c0_i32, %c0_i32_0 : i32, i32, i32
  }
}

module attributes {stable_mosaic.version = 11 : i64} {
  func.func @_conv_matmul_kernel(%arg0: i32, %arg1: i32, %arg2: i32, %arg3: i32, %arg4: memref<1x32x128xbf16, #tpu.memory_space<vmem>>, %arg5: memref<1x128x128xbf16, #tpu.memory_space<vmem>>, %arg6: memref<1x32x128xf32, #tpu.memory_space<vmem>>, %arg7: memref<32x128xf32, #tpu.memory_space<vmem>>) attributes {dimension_semantics = [#tpu.dimension_semantics<parallel>, #tpu.dimension_semantics<parallel>, #tpu.dimension_semantics<parallel>, #tpu.dimension_semantics<arbitrary>], iteration_bounds = array<i64: 4, 1, 1, 1>, scalar_prefetch = 0 : i64, scratch_operands = 1 : i64, tpu.core_type = #tpu.core_type<tc>, window_params = [{transform_indices = @transform_0, window_bounds = array<i64: 1, 32, 128>}, {transform_indices = @transform_1, window_bounds = array<i64: 1, 128, 128>}, {transform_indices = @transform_2, window_bounds = array<i64: 1, 32, 128>}]} {
    %c0_i32 = arith.constant 0 : i32
    %0 = arith.cmpi eq, %arg3, %c0_i32 : i32
    %1 = arith.extui %0 : i1 to i32
    %c0_i32_0 = arith.constant 0 : i32
    %2 = arith.cmpi ne, %1, %c0_i32_0 : i32
    scf.if %2 {
      %cst_12 = arith.constant 0.000000e+00 : f32
      %14 = vector.broadcast %cst_12 : f32 to vector<32x128xf32>
      %c0_13 = arith.constant 0 : index
      %c0_14 = arith.constant 0 : index
      %15 = vector.load %arg7[%c0_13, %c0_14] : memref<32x128xf32, #tpu.memory_space<vmem>>, vector<32x128xf32>
      tpu.vector_store %arg7[%c0_13, %c0_14], %14 {strides = array<i32>} : memref<32x128xf32, #tpu.memory_space<vmem>>, vector<32x128xf32>,
    } else {
    }
    %c0 = arith.constant 0 : index
    %c0_1 = arith.constant 0 : index
    %3 = vector.load %arg7[%c0, %c0_1] : memref<32x128xf32, #tpu.memory_space<vmem>>, vector<32x128xf32>
    %c0_2 = arith.constant 0 : index
    %c0_3 = arith.constant 0 : index
    %c0_4 = arith.constant 0 : index
    %4 = vector.load %arg4[%c0_2, %c0_3, %c0_4] : memref<1x32x128xbf16, #tpu.memory_space<vmem>>, vector<1x32x128xbf16>
    %5 = vector.shape_cast %4 : vector<1x32x128xbf16> to vector<32x128xbf16>
    %c0_5 = arith.constant 0 : index
    %c0_6 = arith.constant 0 : index
    %c0_7 = arith.constant 0 : index
    %6 = vector.load %arg5[%c0_5, %c0_6, %c0_7] : memref<1x128x128xbf16, #tpu.memory_space<vmem>>, vector<1x128x128xbf16>
    %7 = vector.shape_cast %6 : vector<1x128x128xbf16> to vector<128x128xbf16>
    %cst = arith.constant dense<0.000000e+00> : vector<32x128xf32>
    %8 = tpu.matmul %5, %7, %cst {dimension_numbers = #tpu.dot_dimension_numbers<[1], [0], [0], [1], [0, 0, 1, 1], [], []>} : vector<32x128xbf16>, vector<128x128xbf16>, vector<32x128xf32> -> vector<32x128xf32>
    %9 = arith.addf %3, %8 : vector<32x128xf32>
    %c0_8 = arith.constant 0 : index
    %c0_9 = arith.constant 0 : index
    %10 = vector.load %arg7[%c0_8, %c0_9] : memref<32x128xf32, #tpu.memory_space<vmem>>, vector<32x128xf32>
    tpu.vector_store %arg7[%c0_8, %c0_9], %9 {strides = array<i32>} : memref<32x128xf32, #tpu.memory_space<vmem>>, vector<32x128xf32>,
    %c0_i32_10 = arith.constant 0 : i32
    %11 = arith.cmpi eq, %arg3, %c0_i32_10 : i32
    %12 = arith.extui %11 : i1 to i32
    %c0_i32_11 = arith.constant 0 : i32
    %13 = arith.cmpi ne, %12, %c0_i32_11 : i32
    scf.if %13 {
      %c0_12 = arith.constant 0 : index
      %c0_13 = arith.constant 0 : index
      %14 = vector.load %arg7[%c0_12, %c0_13] : memref<32x128xf32, #tpu.memory_space<vmem>>, vector<32x128xf32>
      %c0_14 = arith.constant 0 : index
      %c0_15 = arith.constant 0 : index
      %c0_16 = arith.constant 0 : index
      %15 = vector.load %arg6[%c0_14, %c0_15, %c0_16] : memref<1x32x128xf32, #tpu.memory_space<vmem>>, vector<1x32x128xf32>
      %16 = vector.shape_cast %15 : vector<1x32x128xf32> to vector<32x128xf32>
      %17 = vector.shape_cast %14 : vector<32x128xf32> to vector<1x32x128xf32>
      tpu.vector_store %arg6[%c0_14, %c0_15, %c0_16], %17 {strides = array<i32>} : memref<1x32x128xf32, #tpu.memory_space<vmem>>, vector<1x32x128xf32>,
    } else {
    }
    return
  }
  func.func @transform_0(%arg0: i32, %arg1: i32, %arg2: i32, %arg3: i32) -> (i32, i32, i32) {
    %c0_i32 = arith.constant 0 : i32
    return %arg0, %arg1, %arg3 : i32, i32, i32
  }
  func.func @transform_1(%arg0: i32, %arg1: i32, %arg2: i32, %arg3: i32) -> (i32, i32, i32) {
    %c0_i32 = arith.constant 0 : i32
    return %arg0, %arg3, %arg2 : i32, i32, i32
  }
  func.func @transform_2(%arg0: i32, %arg1: i32, %arg2: i32, %arg3: i32) -> (i32, i32, i32) {
    %c0_i32 = arith.constant 0 : i32
    return %arg0, %arg1, %arg2 : i32, i32, i32
  }
}

module attributes {stable_mosaic.version = 11 : i64} {
  func.func @_in_relu_kernel(%arg0: i32, %arg1: memref<1x64x16xf32, #tpu.memory_space<vmem>>, %arg2: memref<1x16xf32, #tpu.memory_space<vmem>>, %arg3: memref<1x16xf32, #tpu.memory_space<vmem>>, %arg4: memref<1x64x16xf32, #tpu.memory_space<vmem>>) attributes {dimension_semantics = [#tpu.dimension_semantics<parallel>], iteration_bounds = array<i64: 2>, scalar_prefetch = 0 : i64, scratch_operands = 0 : i64, tpu.core_type = #tpu.core_type<tc>, window_params = [{transform_indices = @transform_0, window_bounds = array<i64: 1, 64, 16>}, {pipeline_mode = #tpu.pipeline_mode<synchronous>, transform_indices = @transform_1, window_bounds = array<i64: 1, 16>}, {pipeline_mode = #tpu.pipeline_mode<synchronous>, transform_indices = @transform_2, window_bounds = array<i64: 1, 16>}, {transform_indices = @transform_3, window_bounds = array<i64: 1, 64, 16>}]} {
    %c0 = arith.constant 0 : index
    %c0_0 = arith.constant 0 : index
    %c0_1 = arith.constant 0 : index
    %0 = vector.load %arg1[%c0, %c0_0, %c0_1] : memref<1x64x16xf32, #tpu.memory_space<vmem>>, vector<1x64x16xf32>
    %1 = vector.shape_cast %0 : vector<1x64x16xf32> to vector<64x16xf32>
    %cst = arith.constant dense<0.000000e+00> : vector<16xf32>
    %2 = vector.multi_reduction <add>, %1, %cst [0] : vector<64x16xf32> to vector<16xf32>
    %3 = vector.shape_cast %2 : vector<16xf32> to vector<1x16xf32>
    %cst_2 = arith.constant 6.400000e+01 : f32
    %4 = vector.broadcast %cst_2 : f32 to vector<1x16xf32>
    %5 = arith.divf %3, %4 : vector<1x16xf32>
    %6 = vector.broadcast %5 : vector<1x16xf32> to vector<64x16xf32>
    %7 = arith.subf %1, %6 : vector<64x16xf32>
    %8 = arith.mulf %7, %7 : vector<64x16xf32>
    %cst_3 = arith.constant dense<0.000000e+00> : vector<16xf32>
    %9 = vector.multi_reduction <add>, %8, %cst_3 [0] : vector<64x16xf32> to vector<16xf32>
    %10 = vector.shape_cast %9 : vector<16xf32> to vector<1x16xf32>
    %cst_4 = arith.constant 6.400000e+01 : f32
    %11 = vector.broadcast %cst_4 : f32 to vector<1x16xf32>
    %12 = arith.divf %10, %11 : vector<1x16xf32>
    %cst_5 = arith.constant 9.99999974E-6 : f32
    %13 = vector.broadcast %cst_5 : f32 to vector<1x16xf32>
    %14 = arith.addf %12, %13 : vector<1x16xf32>
    %15 = math.rsqrt %14 : vector<1x16xf32>
    %16 = vector.broadcast %15 : vector<1x16xf32> to vector<64x16xf32>
    %17 = arith.mulf %7, %16 : vector<64x16xf32>
    %c0_6 = arith.constant 0 : index
    %c0_7 = arith.constant 0 : index
    %18 = vector.load %arg2[%c0_6, %c0_7] : memref<1x16xf32, #tpu.memory_space<vmem>>, vector<1x16xf32>
    %19 = vector.broadcast %18 : vector<1x16xf32> to vector<64x16xf32>
    %20 = arith.mulf %17, %19 : vector<64x16xf32>
    %c0_8 = arith.constant 0 : index
    %c0_9 = arith.constant 0 : index
    %21 = vector.load %arg3[%c0_8, %c0_9] : memref<1x16xf32, #tpu.memory_space<vmem>>, vector<1x16xf32>
    %22 = vector.broadcast %21 : vector<1x16xf32> to vector<64x16xf32>
    %23 = arith.addf %20, %22 : vector<64x16xf32>
    %cst_10 = arith.constant 0.000000e+00 : f32
    %24 = vector.broadcast %cst_10 : f32 to vector<64x16xf32>
    %25 = arith.maximumf %23, %24 : vector<64x16xf32>
    %c0_11 = arith.constant 0 : index
    %c0_12 = arith.constant 0 : index
    %c0_13 = arith.constant 0 : index
    %26 = vector.load %arg4[%c0_11, %c0_12, %c0_13] : memref<1x64x16xf32, #tpu.memory_space<vmem>>, vector<1x64x16xf32>
    %27 = vector.shape_cast %26 : vector<1x64x16xf32> to vector<64x16xf32>
    %28 = vector.shape_cast %25 : vector<64x16xf32> to vector<1x64x16xf32>
    tpu.vector_store %arg4[%c0_11, %c0_12, %c0_13], %28 {strides = array<i32>} : memref<1x64x16xf32, #tpu.memory_space<vmem>>, vector<1x64x16xf32>,
    return
  }
  func.func @transform_0(%arg0: i32) -> (i32, i32, i32) {
    %c0_i32 = arith.constant 0 : i32
    %c0_i32_0 = arith.constant 0 : i32
    %c0_i32_1 = arith.constant 0 : i32
    return %arg0, %c0_i32, %c0_i32_0 : i32, i32, i32
  }
  func.func @transform_1(%arg0: i32) -> (i32, i32) {
    %c0_i32 = arith.constant 0 : i32
    %c0_i32_0 = arith.constant 0 : i32
    %c0_i32_1 = arith.constant 0 : i32
    return %c0_i32, %c0_i32_0 : i32, i32
  }
  func.func @transform_2(%arg0: i32) -> (i32, i32) {
    %c0_i32 = arith.constant 0 : i32
    %c0_i32_0 = arith.constant 0 : i32
    %c0_i32_1 = arith.constant 0 : i32
    return %c0_i32, %c0_i32_0 : i32, i32
  }
  func.func @transform_3(%arg0: i32) -> (i32, i32, i32) {
    %c0_i32 = arith.constant 0 : i32
    %c0_i32_0 = arith.constant 0 : i32
    %c0_i32_1 = arith.constant 0 : i32
    return %arg0, %c0_i32, %c0_i32_0 : i32, i32, i32
  }
}

module attributes {stable_mosaic.version = 11 : i64} {
  func.func @_conv_matmul_kernel(%arg0: i32, %arg1: i32, %arg2: i32, %arg3: i32, %arg4: memref<1x128x128xbf16, #tpu.memory_space<vmem>>, %arg5: memref<1x128x128xbf16, #tpu.memory_space<vmem>>, %arg6: memref<1x128x128xf32, #tpu.memory_space<vmem>>, %arg7: memref<128x128xf32, #tpu.memory_space<vmem>>) attributes {dimension_semantics = [#tpu.dimension_semantics<parallel>, #tpu.dimension_semantics<parallel>, #tpu.dimension_semantics<parallel>, #tpu.dimension_semantics<arbitrary>], iteration_bounds = array<i64: 4, 1, 1, 1>, scalar_prefetch = 0 : i64, scratch_operands = 1 : i64, tpu.core_type = #tpu.core_type<tc>, window_params = [{transform_indices = @transform_0, window_bounds = array<i64: 1, 128, 128>}, {transform_indices = @transform_1, window_bounds = array<i64: 1, 128, 128>}, {transform_indices = @transform_2, window_bounds = array<i64: 1, 128, 128>}]} {
    %c0_i32 = arith.constant 0 : i32
    %0 = arith.cmpi eq, %arg3, %c0_i32 : i32
    %1 = arith.extui %0 : i1 to i32
    %c0_i32_0 = arith.constant 0 : i32
    %2 = arith.cmpi ne, %1, %c0_i32_0 : i32
    scf.if %2 {
      %cst_12 = arith.constant 0.000000e+00 : f32
      %14 = vector.broadcast %cst_12 : f32 to vector<128x128xf32>
      %c0_13 = arith.constant 0 : index
      %c0_14 = arith.constant 0 : index
      %15 = vector.load %arg7[%c0_13, %c0_14] : memref<128x128xf32, #tpu.memory_space<vmem>>, vector<128x128xf32>
      tpu.vector_store %arg7[%c0_13, %c0_14], %14 {strides = array<i32>} : memref<128x128xf32, #tpu.memory_space<vmem>>, vector<128x128xf32>,
    } else {
    }
    %c0 = arith.constant 0 : index
    %c0_1 = arith.constant 0 : index
    %3 = vector.load %arg7[%c0, %c0_1] : memref<128x128xf32, #tpu.memory_space<vmem>>, vector<128x128xf32>
    %c0_2 = arith.constant 0 : index
    %c0_3 = arith.constant 0 : index
    %c0_4 = arith.constant 0 : index
    %4 = vector.load %arg4[%c0_2, %c0_3, %c0_4] : memref<1x128x128xbf16, #tpu.memory_space<vmem>>, vector<1x128x128xbf16>
    %5 = vector.shape_cast %4 : vector<1x128x128xbf16> to vector<128x128xbf16>
    %c0_5 = arith.constant 0 : index
    %c0_6 = arith.constant 0 : index
    %c0_7 = arith.constant 0 : index
    %6 = vector.load %arg5[%c0_5, %c0_6, %c0_7] : memref<1x128x128xbf16, #tpu.memory_space<vmem>>, vector<1x128x128xbf16>
    %7 = vector.shape_cast %6 : vector<1x128x128xbf16> to vector<128x128xbf16>
    %cst = arith.constant dense<0.000000e+00> : vector<128x128xf32>
    %8 = tpu.matmul %5, %7, %cst {dimension_numbers = #tpu.dot_dimension_numbers<[1], [0], [0], [1], [0, 0, 1, 1], [], []>} : vector<128x128xbf16>, vector<128x128xbf16>, vector<128x128xf32> -> vector<128x128xf32>
    %9 = arith.addf %3, %8 : vector<128x128xf32>
    %c0_8 = arith.constant 0 : index
    %c0_9 = arith.constant 0 : index
    %10 = vector.load %arg7[%c0_8, %c0_9] : memref<128x128xf32, #tpu.memory_space<vmem>>, vector<128x128xf32>
    tpu.vector_store %arg7[%c0_8, %c0_9], %9 {strides = array<i32>} : memref<128x128xf32, #tpu.memory_space<vmem>>, vector<128x128xf32>,
    %c0_i32_10 = arith.constant 0 : i32
    %11 = arith.cmpi eq, %arg3, %c0_i32_10 : i32
    %12 = arith.extui %11 : i1 to i32
    %c0_i32_11 = arith.constant 0 : i32
    %13 = arith.cmpi ne, %12, %c0_i32_11 : i32
    scf.if %13 {
      %c0_12 = arith.constant 0 : index
      %c0_13 = arith.constant 0 : index
      %14 = vector.load %arg7[%c0_12, %c0_13] : memref<128x128xf32, #tpu.memory_space<vmem>>, vector<128x128xf32>
      %c0_14 = arith.constant 0 : index
      %c0_15 = arith.constant 0 : index
      %c0_16 = arith.constant 0 : index
      %15 = vector.load %arg6[%c0_14, %c0_15, %c0_16] : memref<1x128x128xf32, #tpu.memory_space<vmem>>, vector<1x128x128xf32>
      %16 = vector.shape_cast %15 : vector<1x128x128xf32> to vector<128x128xf32>
      %17 = vector.shape_cast %14 : vector<128x128xf32> to vector<1x128x128xf32>
      tpu.vector_store %arg6[%c0_14, %c0_15, %c0_16], %17 {strides = array<i32>} : memref<1x128x128xf32, #tpu.memory_space<vmem>>, vector<1x128x128xf32>,
    } else {
    }
    return
  }
  func.func @transform_0(%arg0: i32, %arg1: i32, %arg2: i32, %arg3: i32) -> (i32, i32, i32) {
    %c0_i32 = arith.constant 0 : i32
    return %arg0, %arg1, %arg3 : i32, i32, i32
  }
  func.func @transform_1(%arg0: i32, %arg1: i32, %arg2: i32, %arg3: i32) -> (i32, i32, i32) {
    %c0_i32 = arith.constant 0 : i32
    return %arg0, %arg3, %arg2 : i32, i32, i32
  }
  func.func @transform_2(%arg0: i32, %arg1: i32, %arg2: i32, %arg3: i32) -> (i32, i32, i32) {
    %c0_i32 = arith.constant 0 : i32
    return %arg0, %arg1, %arg2 : i32, i32, i32
  }
}

module attributes {stable_mosaic.version = 11 : i64} {
  func.func @_in_relu_kernel(%arg0: i32, %arg1: memref<1x256x8xf32, #tpu.memory_space<vmem>>, %arg2: memref<1x8xf32, #tpu.memory_space<vmem>>, %arg3: memref<1x8xf32, #tpu.memory_space<vmem>>, %arg4: memref<1x256x8xf32, #tpu.memory_space<vmem>>) attributes {dimension_semantics = [#tpu.dimension_semantics<parallel>], iteration_bounds = array<i64: 2>, scalar_prefetch = 0 : i64, scratch_operands = 0 : i64, tpu.core_type = #tpu.core_type<tc>, window_params = [{transform_indices = @transform_0, window_bounds = array<i64: 1, 256, 8>}, {pipeline_mode = #tpu.pipeline_mode<synchronous>, transform_indices = @transform_1, window_bounds = array<i64: 1, 8>}, {pipeline_mode = #tpu.pipeline_mode<synchronous>, transform_indices = @transform_2, window_bounds = array<i64: 1, 8>}, {transform_indices = @transform_3, window_bounds = array<i64: 1, 256, 8>}]} {
    %c0 = arith.constant 0 : index
    %c0_0 = arith.constant 0 : index
    %c0_1 = arith.constant 0 : index
    %0 = vector.load %arg1[%c0, %c0_0, %c0_1] : memref<1x256x8xf32, #tpu.memory_space<vmem>>, vector<1x256x8xf32>
    %1 = vector.shape_cast %0 : vector<1x256x8xf32> to vector<256x8xf32>
    %cst = arith.constant dense<0.000000e+00> : vector<8xf32>
    %2 = vector.multi_reduction <add>, %1, %cst [0] : vector<256x8xf32> to vector<8xf32>
    %3 = vector.shape_cast %2 : vector<8xf32> to vector<1x8xf32>
    %cst_2 = arith.constant 2.560000e+02 : f32
    %4 = vector.broadcast %cst_2 : f32 to vector<1x8xf32>
    %5 = arith.divf %3, %4 : vector<1x8xf32>
    %6 = vector.broadcast %5 : vector<1x8xf32> to vector<256x8xf32>
    %7 = arith.subf %1, %6 : vector<256x8xf32>
    %8 = arith.mulf %7, %7 : vector<256x8xf32>
    %cst_3 = arith.constant dense<0.000000e+00> : vector<8xf32>
    %9 = vector.multi_reduction <add>, %8, %cst_3 [0] : vector<256x8xf32> to vector<8xf32>
    %10 = vector.shape_cast %9 : vector<8xf32> to vector<1x8xf32>
    %cst_4 = arith.constant 2.560000e+02 : f32
    %11 = vector.broadcast %cst_4 : f32 to vector<1x8xf32>
    %12 = arith.divf %10, %11 : vector<1x8xf32>
    %cst_5 = arith.constant 9.99999974E-6 : f32
    %13 = vector.broadcast %cst_5 : f32 to vector<1x8xf32>
    %14 = arith.addf %12, %13 : vector<1x8xf32>
    %15 = math.rsqrt %14 : vector<1x8xf32>
    %16 = vector.broadcast %15 : vector<1x8xf32> to vector<256x8xf32>
    %17 = arith.mulf %7, %16 : vector<256x8xf32>
    %c0_6 = arith.constant 0 : index
    %c0_7 = arith.constant 0 : index
    %18 = vector.load %arg2[%c0_6, %c0_7] : memref<1x8xf32, #tpu.memory_space<vmem>>, vector<1x8xf32>
    %19 = vector.broadcast %18 : vector<1x8xf32> to vector<256x8xf32>
    %20 = arith.mulf %17, %19 : vector<256x8xf32>
    %c0_8 = arith.constant 0 : index
    %c0_9 = arith.constant 0 : index
    %21 = vector.load %arg3[%c0_8, %c0_9] : memref<1x8xf32, #tpu.memory_space<vmem>>, vector<1x8xf32>
    %22 = vector.broadcast %21 : vector<1x8xf32> to vector<256x8xf32>
    %23 = arith.addf %20, %22 : vector<256x8xf32>
    %cst_10 = arith.constant 0.000000e+00 : f32
    %24 = vector.broadcast %cst_10 : f32 to vector<256x8xf32>
    %25 = arith.maximumf %23, %24 : vector<256x8xf32>
    %c0_11 = arith.constant 0 : index
    %c0_12 = arith.constant 0 : index
    %c0_13 = arith.constant 0 : index
    %26 = vector.load %arg4[%c0_11, %c0_12, %c0_13] : memref<1x256x8xf32, #tpu.memory_space<vmem>>, vector<1x256x8xf32>
    %27 = vector.shape_cast %26 : vector<1x256x8xf32> to vector<256x8xf32>
    %28 = vector.shape_cast %25 : vector<256x8xf32> to vector<1x256x8xf32>
    tpu.vector_store %arg4[%c0_11, %c0_12, %c0_13], %28 {strides = array<i32>} : memref<1x256x8xf32, #tpu.memory_space<vmem>>, vector<1x256x8xf32>,
    return
  }
  func.func @transform_0(%arg0: i32) -> (i32, i32, i32) {
    %c0_i32 = arith.constant 0 : i32
    %c0_i32_0 = arith.constant 0 : i32
    %c0_i32_1 = arith.constant 0 : i32
    return %arg0, %c0_i32, %c0_i32_0 : i32, i32, i32
  }
  func.func @transform_1(%arg0: i32) -> (i32, i32) {
    %c0_i32 = arith.constant 0 : i32
    %c0_i32_0 = arith.constant 0 : i32
    %c0_i32_1 = arith.constant 0 : i32
    return %c0_i32, %c0_i32_0 : i32, i32
  }
  func.func @transform_2(%arg0: i32) -> (i32, i32) {
    %c0_i32 = arith.constant 0 : i32
    %c0_i32_0 = arith.constant 0 : i32
    %c0_i32_1 = arith.constant 0 : i32
    return %c0_i32, %c0_i32_0 : i32, i32
  }
  func.func @transform_3(%arg0: i32) -> (i32, i32, i32) {
    %c0_i32 = arith.constant 0 : i32
    %c0_i32_0 = arith.constant 0 : i32
    %c0_i32_1 = arith.constant 0 : i32
    return %arg0, %c0_i32, %c0_i32_0 : i32, i32, i32
  }
}

module attributes {stable_mosaic.version = 11 : i64} {
  func.func @_conv_matmul_kernel(%arg0: i32, %arg1: i32, %arg2: i32, %arg3: i32, %arg4: memref<1x256x128xbf16, #tpu.memory_space<vmem>>, %arg5: memref<1x128x128xbf16, #tpu.memory_space<vmem>>, %arg6: memref<1x128xf32, #tpu.memory_space<vmem>>, %arg7: memref<1x128xf32, #tpu.memory_space<vmem>>, %arg8: memref<1x256x128xf32, #tpu.memory_space<vmem>>, %arg9: memref<256x128xf32, #tpu.memory_space<vmem>>) attributes {dimension_semantics = [#tpu.dimension_semantics<parallel>, #tpu.dimension_semantics<parallel>, #tpu.dimension_semantics<parallel>, #tpu.dimension_semantics<arbitrary>], iteration_bounds = array<i64: 1, 2, 1, 1>, scalar_prefetch = 0 : i64, scratch_operands = 1 : i64, tpu.core_type = #tpu.core_type<tc>, window_params = [{transform_indices = @transform_0, window_bounds = array<i64: 1, 256, 128>}, {transform_indices = @transform_1, window_bounds = array<i64: 1, 128, 128>}, {transform_indices = @transform_2, window_bounds = array<i64: 1, 128>}, {transform_indices = @transform_3, window_bounds = array<i64: 1, 128>}, {transform_indices = @transform_4, window_bounds = array<i64: 1, 256, 128>}]} {
    %c0_i32 = arith.constant 0 : i32
    %0 = arith.cmpi eq, %arg3, %c0_i32 : i32
    %1 = arith.extui %0 : i1 to i32
    %c0_i32_0 = arith.constant 0 : i32
    %2 = arith.cmpi ne, %1, %c0_i32_0 : i32
    scf.if %2 {
      %cst_12 = arith.constant 0.000000e+00 : f32
      %14 = vector.broadcast %cst_12 : f32 to vector<256x128xf32>
      %c0_13 = arith.constant 0 : index
      %c0_14 = arith.constant 0 : index
      %15 = vector.load %arg9[%c0_13, %c0_14] : memref<256x128xf32, #tpu.memory_space<vmem>>, vector<256x128xf32>
      tpu.vector_store %arg9[%c0_13, %c0_14], %14 {strides = array<i32>} : memref<256x128xf32, #tpu.memory_space<vmem>>, vector<256x128xf32>,
    } else {
    }
    %c0 = arith.constant 0 : index
    %c0_1 = arith.constant 0 : index
    %3 = vector.load %arg9[%c0, %c0_1] : memref<256x128xf32, #tpu.memory_space<vmem>>, vector<256x128xf32>
    %c0_2 = arith.constant 0 : index
    %c0_3 = arith.constant 0 : index
    %c0_4 = arith.constant 0 : index
    %4 = vector.load %arg4[%c0_2, %c0_3, %c0_4] : memref<1x256x128xbf16, #tpu.memory_space<vmem>>, vector<1x256x128xbf16>
    %5 = vector.shape_cast %4 : vector<1x256x128xbf16> to vector<256x128xbf16>
    %c0_5 = arith.constant 0 : index
    %c0_6 = arith.constant 0 : index
    %c0_7 = arith.constant 0 : index
    %6 = vector.load %arg5[%c0_5, %c0_6, %c0_7] : memref<1x128x128xbf16, #tpu.memory_space<vmem>>, vector<1x128x128xbf16>
    %7 = vector.shape_cast %6 : vector<1x128x128xbf16> to vector<128x128xbf16>
    %cst = arith.constant dense<0.000000e+00> : vector<256x128xf32>
    %8 = tpu.matmul %5, %7, %cst {dimension_numbers = #tpu.dot_dimension_numbers<[1], [0], [0], [1], [0, 0, 1, 1], [], []>} : vector<256x128xbf16>, vector<128x128xbf16>, vector<256x128xf32> -> vector<256x128xf32>
    %9 = arith.addf %3, %8 : vector<256x128xf32>
    %c0_8 = arith.constant 0 : index
    %c0_9 = arith.constant 0 : index
    %10 = vector.load %arg9[%c0_8, %c0_9] : memref<256x128xf32, #tpu.memory_space<vmem>>, vector<256x128xf32>
    tpu.vector_store %arg9[%c0_8, %c0_9], %9 {strides = array<i32>} : memref<256x128xf32, #tpu.memory_space<vmem>>, vector<256x128xf32>,
    %c0_i32_10 = arith.constant 0 : i32
    %11 = arith.cmpi eq, %arg3, %c0_i32_10 : i32
    %12 = arith.extui %11 : i1 to i32
    %c0_i32_11 = arith.constant 0 : i32
    %13 = arith.cmpi ne, %12, %c0_i32_11 : i32
    scf.if %13 {
      %c0_12 = arith.constant 0 : index
      %c0_13 = arith.constant 0 : index
      %14 = vector.load %arg9[%c0_12, %c0_13] : memref<256x128xf32, #tpu.memory_space<vmem>>, vector<256x128xf32>
      %cst_14 = arith.constant dense<0.000000e+00> : vector<128xf32>
      %15 = vector.multi_reduction <add>, %14, %cst_14 [0] : vector<256x128xf32> to vector<128xf32>
      %16 = vector.shape_cast %15 : vector<128xf32> to vector<1x128xf32>
      %cst_15 = arith.constant 2.560000e+02 : f32
      %17 = vector.broadcast %cst_15 : f32 to vector<1x128xf32>
      %18 = arith.divf %16, %17 : vector<1x128xf32>
      %19 = vector.broadcast %18 : vector<1x128xf32> to vector<256x128xf32>
      %20 = arith.subf %14, %19 : vector<256x128xf32>
      %21 = arith.mulf %20, %20 : vector<256x128xf32>
      %cst_16 = arith.constant dense<0.000000e+00> : vector<128xf32>
      %22 = vector.multi_reduction <add>, %21, %cst_16 [0] : vector<256x128xf32> to vector<128xf32>
      %23 = vector.shape_cast %22 : vector<128xf32> to vector<1x128xf32>
      %cst_17 = arith.constant 2.560000e+02 : f32
      %24 = vector.broadcast %cst_17 : f32 to vector<1x128xf32>
      %25 = arith.divf %23, %24 : vector<1x128xf32>
      %cst_18 = arith.constant 9.99999974E-6 : f32
      %26 = vector.broadcast %cst_18 : f32 to vector<1x128xf32>
      %27 = arith.addf %25, %26 : vector<1x128xf32>
      %28 = math.rsqrt %27 : vector<1x128xf32>
      %29 = vector.broadcast %28 : vector<1x128xf32> to vector<256x128xf32>
      %30 = arith.mulf %20, %29 : vector<256x128xf32>
      %c0_19 = arith.constant 0 : index
      %c0_20 = arith.constant 0 : index
      %31 = vector.load %arg6[%c0_19, %c0_20] : memref<1x128xf32, #tpu.memory_space<vmem>>, vector<1x128xf32>
      %32 = vector.broadcast %31 : vector<1x128xf32> to vector<256x128xf32>
      %33 = arith.mulf %30, %32 : vector<256x128xf32>
      %c0_21 = arith.constant 0 : index
      %c0_22 = arith.constant 0 : index
      %34 = vector.load %arg7[%c0_21, %c0_22] : memref<1x128xf32, #tpu.memory_space<vmem>>, vector<1x128xf32>
      %35 = vector.broadcast %34 : vector<1x128xf32> to vector<256x128xf32>
      %36 = arith.addf %33, %35 : vector<256x128xf32>
      %cst_23 = arith.constant 0.000000e+00 : f32
      %37 = vector.broadcast %cst_23 : f32 to vector<256x128xf32>
      %38 = arith.maximumf %36, %37 : vector<256x128xf32>
      %c0_24 = arith.constant 0 : index
      %c0_25 = arith.constant 0 : index
      %c0_26 = arith.constant 0 : index
      %39 = vector.load %arg8[%c0_24, %c0_25, %c0_26] : memref<1x256x128xf32, #tpu.memory_space<vmem>>, vector<1x256x128xf32>
      %40 = vector.shape_cast %39 : vector<1x256x128xf32> to vector<256x128xf32>
      %41 = vector.shape_cast %38 : vector<256x128xf32> to vector<1x256x128xf32>
      tpu.vector_store %arg8[%c0_24, %c0_25, %c0_26], %41 {strides = array<i32>} : memref<1x256x128xf32, #tpu.memory_space<vmem>>, vector<1x256x128xf32>,
    } else {
    }
    return
  }
  func.func @transform_0(%arg0: i32, %arg1: i32, %arg2: i32, %arg3: i32) -> (i32, i32, i32) {
    %c0_i32 = arith.constant 0 : i32
    return %arg0, %arg1, %arg3 : i32, i32, i32
  }
  func.func @transform_1(%arg0: i32, %arg1: i32, %arg2: i32, %arg3: i32) -> (i32, i32, i32) {
    %c0_i32 = arith.constant 0 : i32
    return %arg0, %arg3, %arg2 : i32, i32, i32
  }
  func.func @transform_2(%arg0: i32, %arg1: i32, %arg2: i32, %arg3: i32) -> (i32, i32) {
    %c0_i32 = arith.constant 0 : i32
    %c0_i32_0 = arith.constant 0 : i32
    return %c0_i32, %arg2 : i32, i32
  }
  func.func @transform_3(%arg0: i32, %arg1: i32, %arg2: i32, %arg3: i32) -> (i32, i32) {
    %c0_i32 = arith.constant 0 : i32
    %c0_i32_0 = arith.constant 0 : i32
    return %c0_i32, %arg2 : i32, i32
  }
  func.func @transform_4(%arg0: i32, %arg1: i32, %arg2: i32, %arg3: i32) -> (i32, i32, i32) {
    %c0_i32 = arith.constant 0 : i32
    return %arg0, %arg1, %arg2 : i32, i32, i32
  }
}

module attributes {stable_mosaic.version = 11 : i64} {
  func.func @_conv_matmul_kernel(%arg0: i32, %arg1: i32, %arg2: i32, %arg3: i32, %arg4: memref<1x512x256xbf16, #tpu.memory_space<vmem>>, %arg5: memref<1x256x128xbf16, #tpu.memory_space<vmem>>, %arg6: memref<1x512x128xf32, #tpu.memory_space<vmem>>, %arg7: memref<512x128xf32, #tpu.memory_space<vmem>>) attributes {dimension_semantics = [#tpu.dimension_semantics<parallel>, #tpu.dimension_semantics<parallel>, #tpu.dimension_semantics<parallel>, #tpu.dimension_semantics<arbitrary>], iteration_bounds = array<i64: 1, 1, 1, 2>, scalar_prefetch = 0 : i64, scratch_operands = 1 : i64, tpu.core_type = #tpu.core_type<tc>, window_params = [{transform_indices = @transform_0, window_bounds = array<i64: 1, 512, 256>}, {transform_indices = @transform_1, window_bounds = array<i64: 1, 256, 128>}, {transform_indices = @transform_2, window_bounds = array<i64: 1, 512, 128>}]} {
    %c0_i32 = arith.constant 0 : i32
    %0 = arith.cmpi eq, %arg3, %c0_i32 : i32
    %1 = arith.extui %0 : i1 to i32
    %c0_i32_0 = arith.constant 0 : i32
    %2 = arith.cmpi ne, %1, %c0_i32_0 : i32
    scf.if %2 {
      %cst_11 = arith.constant 0.000000e+00 : f32
      %14 = vector.broadcast %cst_11 : f32 to vector<512x128xf32>
      %c0_12 = arith.constant 0 : index
      %c0_13 = arith.constant 0 : index
      %15 = vector.load %arg7[%c0_12, %c0_13] : memref<512x128xf32, #tpu.memory_space<vmem>>, vector<512x128xf32>
      tpu.vector_store %arg7[%c0_12, %c0_13], %14 {strides = array<i32>} : memref<512x128xf32, #tpu.memory_space<vmem>>, vector<512x128xf32>,
    } else {
    }
    %c0 = arith.constant 0 : index
    %c0_1 = arith.constant 0 : index
    %3 = vector.load %arg7[%c0, %c0_1] : memref<512x128xf32, #tpu.memory_space<vmem>>, vector<512x128xf32>
    %c0_2 = arith.constant 0 : index
    %c0_3 = arith.constant 0 : index
    %c0_4 = arith.constant 0 : index
    %4 = vector.load %arg4[%c0_2, %c0_3, %c0_4] : memref<1x512x256xbf16, #tpu.memory_space<vmem>>, vector<1x512x256xbf16>
    %5 = vector.shape_cast %4 : vector<1x512x256xbf16> to vector<512x256xbf16>
    %c0_5 = arith.constant 0 : index
    %c0_6 = arith.constant 0 : index
    %c0_7 = arith.constant 0 : index
    %6 = vector.load %arg5[%c0_5, %c0_6, %c0_7] : memref<1x256x128xbf16, #tpu.memory_space<vmem>>, vector<1x256x128xbf16>
    %7 = vector.shape_cast %6 : vector<1x256x128xbf16> to vector<256x128xbf16>
    %cst = arith.constant dense<0.000000e+00> : vector<512x128xf32>
    %8 = tpu.matmul %5, %7, %cst {dimension_numbers = #tpu.dot_dimension_numbers<[1], [0], [0], [1], [0, 0, 1, 1], [], []>} : vector<512x256xbf16>, vector<256x128xbf16>, vector<512x128xf32> -> vector<512x128xf32>
    %9 = arith.addf %3, %8 : vector<512x128xf32>
    %c0_8 = arith.constant 0 : index
    %c0_9 = arith.constant 0 : index
    %10 = vector.load %arg7[%c0_8, %c0_9] : memref<512x128xf32, #tpu.memory_space<vmem>>, vector<512x128xf32>
    tpu.vector_store %arg7[%c0_8, %c0_9], %9 {strides = array<i32>} : memref<512x128xf32, #tpu.memory_space<vmem>>, vector<512x128xf32>,
    %c1_i32 = arith.constant 1 : i32
    %11 = arith.cmpi eq, %arg3, %c1_i32 : i32
    %12 = arith.extui %11 : i1 to i32
    %c0_i32_10 = arith.constant 0 : i32
    %13 = arith.cmpi ne, %12, %c0_i32_10 : i32
    scf.if %13 {
      %c0_11 = arith.constant 0 : index
      %c0_12 = arith.constant 0 : index
      %14 = vector.load %arg7[%c0_11, %c0_12] : memref<512x128xf32, #tpu.memory_space<vmem>>, vector<512x128xf32>
      %15 = math.tanh %14 : vector<512x128xf32>
      %c0_13 = arith.constant 0 : index
      %c0_14 = arith.constant 0 : index
      %c0_15 = arith.constant 0 : index
      %16 = vector.load %arg6[%c0_13, %c0_14, %c0_15] : memref<1x512x128xf32, #tpu.memory_space<vmem>>, vector<1x512x128xf32>
      %17 = vector.shape_cast %16 : vector<1x512x128xf32> to vector<512x128xf32>
      %18 = vector.shape_cast %15 : vector<512x128xf32> to vector<1x512x128xf32>
      tpu.vector_store %arg6[%c0_13, %c0_14, %c0_15], %18 {strides = array<i32>} : memref<1x512x128xf32, #tpu.memory_space<vmem>>, vector<1x512x128xf32>,
    } else {
    }
    return
  }
  func.func @transform_0(%arg0: i32, %arg1: i32, %arg2: i32, %arg3: i32) -> (i32, i32, i32) {
    %c0_i32 = arith.constant 0 : i32
    return %arg0, %arg1, %arg3 : i32, i32, i32
  }
  func.func @transform_1(%arg0: i32, %arg1: i32, %arg2: i32, %arg3: i32) -> (i32, i32, i32) {
    %c0_i32 = arith.constant 0 : i32
    return %arg0, %arg3, %arg2 : i32, i32, i32
  }
  func.func @transform_2(%arg0: i32, %arg1: i32, %arg2: i32, %arg3: i32) -> (i32, i32, i32) {
    %c0_i32 = arith.constant 0 : i32
    return %arg0, %arg1, %arg2 : i32, i32, i32
  }
}

</mosaic_0001>

<bundles_post_ra>
// kernel: _lambda_.15
= control target key start
LH: loop header
LB: loop body
LE: loop exit
PB: predicated region body
PF: predicated region fallthrough
CT: control target
= control target key end

     0   :  { %s1809_s15 = smov 0   ;;  %s1811_s16 = smov 0   ;;  %s2263_s0 = inlined_call_operand.vmem [shape: bf16[1,512,256], index: 0, kind: input, shape index: {}]   ;;  %s2264_s1 = inlined_call_operand.vmem [shape: bf16[1,256,128], index: 1, kind: input, shape index: {}]   ;;  %s2265_s2 = inlined_call_operand.vmem [shape: f32[1,128], index: 2, kind: input, shape index: {}]   ;;  %s2266_s3 = inlined_call_operand.vmem [shape: f32[1,128], index: 3, kind: input, shape index: {}]   ;;  %s2267_s4 = inlined_call_operand.vmem [shape: f32[1,512,128], index: 4, kind: output, shape index: {}]  }
   0x1   :  { %s1813_s17 = smov 0  }
   0x2 LB: > { %s36_s18 = sadd.s32 1, %s1778_s16  ;;  %p1483_p0 = scmp.ge.s32.totalorder %s1782_s17, 1  ;;  %s1782_s17 = sphi %s1813_s17, %s14_s17   ;;  %s1778_s16 = sphi %s1811_s16, %s2269_s16   ;;  %s1774_s15 = sphi %s1809_s15, %s2268_s15  }
   0x3   : > { %p38_p1 = scmp.ge.s32.totalorder %s36_s18, 2  ;;  %p245_p2 = scmp.lt.s32.totalorder %s1782_s17, 3 }
   0x5   : > { %s2271_s18 = smov (%p38_p1, %s36_s18), 0  ;;  %p246_p3 = pnand %p1483_p0, %p245_p2 }
   0x6   : > { %v1694_v0 = vld [vmem:[%s2264_s1 + $0x40] sm:$0xff] (!%p246_p3)   ;;  %s1484_s21 = sshll.u32 (!%p246_p3), %s1774_s15, 5  ;;  %v1696_v2 = vld [vmem:[%s2264_s1 + $0x48] sm:$0xff] (!%p246_p3)   ;;  %v1698_v4 = vld [vmem:[%s2264_s1 + $0x50] sm:$0xff] (!%p246_p3)  }
   0x7   : > { %249 = sbr.rel (%p246_p3) target bundleno = 500 (0x1f4), region = 36  ;;  %v1695_v1 = vld [vmem:[%s2264_s1] sm:$0xff] (!%p246_p3)   ;;  %1542 = vmatprep.subr.bf16.mxu0 (!%p246_p3), %v1694_v0  ;;  %1654 = vmatprep.subr.bf16.mxu1 (!%p246_p3), %v1694_v0  ;;  %v1697_v3 = vld [vmem:[%s2264_s1 + $0x8] sm:$0xff] (!%p246_p3)   ;;  %p309_p4 = scmp.lt.s32.totalorder (!%p246_p3), %s1484_s21, 63  ;;  %v1699_v5 = vld [vmem:[%s2264_s1 + $0x10] sm:$0xff] (!%p246_p3)  }
   0x8   : > { %1543 = vmatpush3.bf16.msra.mxu0 (!%p246_p3), %v1695_v1  ;;  %1662 = vmatpush3.bf16.msra.mxu1 (!%p246_p3), %v1695_v1  ;;  %v1700_v6 = vld [vmem:[%s2264_s1 + $0x58] sm:$0xff] (!%p246_p3)   ;;  %v1702_v8 = vld [vmem:[%s2264_s1 + $0x60] sm:$0xff] (!%p246_p3)   ;;  %v1704_v10 = vld [vmem:[%s2264_s1 + $0x68] sm:$0xff] (!%p246_p3)  }
   0x9   : > { %1544 = vmatprep.subr.bf16.mxu0 (!%p246_p3), %v1696_v2  ;;  %1655 = vmatprep.subr.bf16.mxu1 (!%p246_p3), %v1696_v2  ;;  %v1701_v7 = vld [vmem:[%s2264_s1 + $0x18] sm:$0xff] (!%p246_p3)   ;;  %v1703_v9 = vld [vmem:[%s2264_s1 + $0x20] sm:$0xff] (!%p246_p3)   ;;  %v1705_v12 = vld [vmem:[%s2264_s1 + $0x28] sm:$0xff] (!%p246_p3)  }
   0xa   : > { %v1706_v13 = vld [vmem:[%s2264_s1 + $0x70] sm:$0xff] (!%p246_p3)   ;;  %v1708_v16 = vld [vmem:[%s2264_s1 + $0x78] sm:$0xff] (!%p246_p3)  }
   0xb   : > { %v1707_v15 = vld [vmem:[%s2264_s1 + $0x30] sm:$0xff] (!%p246_p3)   ;;  %v1709_v17 = vld [vmem:[%s2264_s1 + $0x38] sm:$0xff] (!%p246_p3)  }
   0xc   : > { %1545 = vmatpush3.bf16.msra.mxu0 (!%p246_p3), %v1697_v3  ;;  %1663 = vmatpush3.bf16.msra.mxu1 (!%p246_p3), %v1697_v3 }
   0xd   : > { %1546 = vmatprep.subr.bf16.mxu0 (!%p246_p3), %v1698_v4  ;;  %1656 = vmatprep.subr.bf16.mxu1 (!%p246_p3), %v1698_v4 }
   0xe   : > { %s2273_s21 = smov (!%p309_p4, %s1484_s21), 63 }
   0xf   : > { %s1541_s10 = sshll.u32 %s2273_s21, 3 }
  0x10   : > { %1547 = vmatpush3.bf16.msra.mxu0 %v1699_v5  ;;  %1664 = vmatpush3.bf16.msra.mxu1 %v1699_v5  ;;  %s1862_s15 = scalar_lea.vmem %s2263_s0, %s1541_s10 }
  0x11   : > { %1548 = vmatprep.subr.bf16.mxu0 %v1700_v6  ;;  %1657 = vmatprep.subr.bf16.mxu1 %v1700_v6  ;;  %v1712_v11 = vld [vmem:[%s1862_s15 + $0x4] ss:$8 sps:$4 sm:$0xff]   ;;  %v1710_v18 = vld [vmem:[%s1862_s15] ss:$8 sps:$4 sm:$0xff]   ;;  %v1713_v19 = vld [vmem:[%s1862_s15 + $0x14] ss:$8 sps:$4 sm:$0xff]  }
  0x12   : > { %774 = vmatprep.mubr.bf16.mxu0 %v1712_v11  ;;  %v1724_v14 = vld [vmem:[%s1862_s15 + $0x84] ss:$8 sps:$4 sm:$0xff]   ;;  %v1722_v20 = vld [vmem:[%s1862_s15 + $0x80] ss:$8 sps:$4 sm:$0xff]   ;;  %v1728_v21 = vld [vmem:[%s1862_s15 + $0x94] ss:$8 sps:$4 sm:$0xff]  }
  0x13   : > { %838 = vmatprep.mubr.bf16.mxu1 %v1724_v14  ;;  %v1715_v22 = vld [vmem:[%s1862_s15 + $0x10] ss:$8 sps:$4 sm:$0xff]   ;;  %v1716_v23 = vld [vmem:[%s1862_s15 + $0x24] ss:$8 sps:$4 sm:$0xff]   ;;  %v1718_v26 = vld [vmem:[%s1862_s15 + $0x20] ss:$8 sps:$4 sm:$0xff]  }
  0x14   : > { %1549 = vmatpush3.bf16.msra.mxu0 %v1701_v7  ;;  %1665 = vmatpush3.bf16.msra.mxu1 %v1701_v7  ;;  %v1730_v24 = vld [vmem:[%s1862_s15 + $0x90] ss:$8 sps:$4 sm:$0xff]   ;;  %v1734_v25 = vld [vmem:[%s1862_s15 + $0xa4] ss:$8 sps:$4 sm:$0xff]   ;;  %v1719_v27 = vld [vmem:[%s1862_s15 + $0x34] ss:$8 sps:$4 sm:$0xff]  }
  0x15   : > { %1550 = vmatprep.subr.bf16.mxu0 %v1702_v8  ;;  %1658 = vmatprep.subr.bf16.mxu1 %v1702_v8  ;;  %v1736_v28 = vld [vmem:[%s1862_s15 + $0xa0] ss:$8 sps:$4 sm:$0xff]   ;;  %v1740_v29 = vld [vmem:[%s1862_s15 + $0xb4] ss:$8 sps:$4 sm:$0xff]   ;;  %v1721_v30 = vld [vmem:[%s1862_s15 + $0x30] ss:$8 sps:$4 sm:$0xff]  }
  0x16   : > { %v1725_v31 = vld [vmem:[%s1862_s15 + $0x44] ss:$8 sps:$4 sm:$0xff]   ;;  %v1742_v32 = vld [vmem:[%s1862_s15 + $0xb0] ss:$8 sps:$4 sm:$0xff]   ;;  %v1727_v34 = vld [vmem:[%s1862_s15 + $0x40] ss:$8 sps:$4 sm:$0xff]  }
  0x17   : > { %v1746_v33 = vld [vmem:[%s1862_s15 + $0xc4] ss:$8 sps:$4 sm:$0xff]   ;;  %v1731_v35 = vld [vmem:[%s1862_s15 + $0x54] ss:$8 sps:$4 sm:$0xff]   ;;  %v1748_v36 = vld [vmem:[%s1862_s15 + $0xc0] ss:$8 sps:$4 sm:$0xff]  }
  0x18   : > { %1551 = vmatpush3.bf16.msra.mxu0 %v1703_v9  ;;  %1666 = vmatpush3.bf16.msra.mxu1 %v1703_v9  ;;  %v1749_v37 = vld [vmem:[%s1862_s15 + $0xd4] ss:$8 sps:$4 sm:$0xff]   ;;  %v1733_v38 = vld [vmem:[%s1862_s15 + $0x50] ss:$8 sps:$4 sm:$0xff]   ;;  %v1737_v39 = vld [vmem:[%s1862_s15 + $0x64] ss:$8 sps:$4 sm:$0xff]  }
  0x19   : > { %1552 = vmatprep.subr.bf16.mxu0 %v1704_v10  ;;  %1659 = vmatprep.subr.bf16.mxu1 %v1704_v10  ;;  %v1751_v40 = vld [vmem:[%s1862_s15 + $0xd0] ss:$8 sps:$4 sm:$0xff]   ;;  %v1752_v41 = vld [vmem:[%s1862_s15 + $0xe4] ss:$8 sps:$4 sm:$0xff]   ;;  %v1739_v42 = vld [vmem:[%s1862_s15 + $0x60] ss:$8 sps:$4 sm:$0xff]  }
  0x1a   : > { %v1743_v43 = vld [vmem:[%s1862_s15 + $0x74] ss:$8 sps:$4 sm:$0xff]   ;;  %v1754_v44 = vld [vmem:[%s1862_s15 + $0xe0] ss:$8 sps:$4 sm:$0xff]   ;;  %v1745_v46 = vld [vmem:[%s1862_s15 + $0x70] ss:$8 sps:$4 sm:$0xff]  }
  0x1b   : > { %v1755_v45 = vld [vmem:[%s1862_s15 + $0xf4] ss:$8 sps:$4 sm:$0xff]   ;;  %v1757_v47 = vld [vmem:[%s1862_s15 + $0xf0] ss:$8 sps:$4 sm:$0xff]   ;;  %s2200_s15 = scalar_lea.vmem %s2267_s4, %s1541_s10 }
  0x1c   : > { %1553 = vmatpush3.bf16.msra.mxu0 %v1705_v12  ;;  %1667 = vmatpush3.bf16.msra.mxu1 %v1705_v12 }
  0x1d   : > { %1554 = vmatprep.subr.bf16.mxu0 %v1706_v13  ;;  %1660 = vmatprep.subr.bf16.mxu1 %v1706_v13 }
  0x20   : > { %1555 = vmatpush3.bf16.msra.mxu0 %v1707_v15  ;;  %1668 = vmatpush3.bf16.msra.mxu1 %v1707_v15 }
  0x21   : > { %1556 = vmatprep.subr.bf16.mxu0 %v1708_v16  ;;  %1661 = vmatprep.subr.bf16.mxu1 %v1708_v16 }
  0x24   : > { %1557 = vmatpush3.bf16.msra.mxu0 %v1709_v17  ;;  %1669 = vmatpush3.bf16.msra.mxu1 %v1709_v17 }
  0x27   : > { %775 = vmatmul.mubr.bf16.vlgmr.msra.gmra.mrb[0].mxu0 %v1710_v18  ;;  %839 = vmatmul.mubr.bf16.vlgmr.msra.gmra.mrb[0].mxu1 %v1722_v20 }
  0x28   : > { %782 = vmatprep.mubr.bf16.mxu0 %v1713_v19  ;;  %846 = vmatprep.mubr.bf16.mxu1 %v1728_v21 }
  0x2f   : > { %783 = vmatmul.mubr.bf16.gmra.mrb[4].mxu0 %v1715_v22  ;;  %847 = vmatmul.mubr.bf16.gmra.mrb[4].mxu1 %v1730_v24 }
  0x30   : > { %790 = vmatprep.mubr.bf16.mxu0 %v1716_v23  ;;  %854 = vmatprep.mubr.bf16.mxu1 %v1734_v25 }
  0x37   : > { %791 = vmatmul.mubr.bf16.gmra.mrb[8].mxu0 %v1718_v26  ;;  %855 = vmatmul.mubr.bf16.gmra.mrb[8].mxu1 %v1736_v28 }
  0x38   : > { %798 = vmatprep.mubr.bf16.mxu0 %v1719_v27  ;;  %862 = vmatprep.mubr.bf16.mxu1 %v1740_v29 }
  0x3f   : > { %799 = vmatmul.mubr.bf16.gmra.mrb[12].mxu0 %v1721_v30  ;;  %863 = vmatmul.mubr.bf16.gmra.mrb[12].mxu1 %v1742_v32 }
  0x40   : > { %806 = vmatprep.mubr.bf16.mxu0 %v1725_v31  ;;  %870 = vmatprep.mubr.bf16.mxu1 %v1746_v33 }
  0x47   : > { %807 = vmatmul.mubr.bf16.gmra.mrb[16].mxu0 %v1727_v34  ;;  %871 = vmatmul.mubr.bf16.gmra.mrb[16].mxu1 %v1748_v36 }
  0x48   : > { %814 = vmatprep.mubr.bf16.mxu0 %v1731_v35  ;;  %878 = vmatprep.mubr.bf16.mxu1 %v1749_v37 }
  0x4f   : > { %815 = vmatmul.mubr.bf16.gmra.mrb[20].mxu0 %v1733_v38  ;;  %879 = vmatmul.mubr.bf16.gmra.mrb[20].mxu1 %v1751_v40 }
  0x50   : > { %822 = vmatprep.mubr.bf16.mxu0 %v1737_v39  ;;  %886 = vmatprep.mubr.bf16.mxu1 %v1752_v41 }
  0x57   : > { %823 = vmatmul.mubr.bf16.gmra.mrb[24].mxu0 %v1739_v42  ;;  %887 = vmatmul.mubr.bf16.gmra.mrb[24].mxu1 %v1754_v44 }
  0x58   : > { %830 = vmatprep.mubr.bf16.mxu0 %v1743_v43  ;;  %894 = vmatprep.mubr.bf16.mxu1 %v1755_v45 }
  0x5f   : > { %831 = vmatmul.mubr.bf16.gmra.mrb[28].mxu0 %v1745_v46  ;;  %895 = vmatmul.mubr.bf16.gmra.mrb[28].mxu1 %v1757_v47 }
  0xfa   : > { %v1558_v48 = vpop.f32.mrb[0].mxu0  ;;  %v1606_v50 = vpop.f32.mrb[0].mxu1 }
  0xfb   : > { %v1559_v49 = vpop.f32.mrb[1].mxu0  ;;  %v1607_v53 = vpop.f32.mrb[1].mxu1 }
  0xfc   : > { %v1917_v51 = vadd.f32 %v1559_v49, %v1558_v48  ;;  %v1561_v52 = vpop.f32.mrb[2].mxu0  ;;  %v1919_v55 = vadd.f32 %v1607_v53, %v1606_v50  ;;  %v1609_v56 = vpop.f32.mrb[2].mxu1 }
  0xfd   : > { %v1562_v54 = vpop.f32.mrb[3].mxu0  ;;  %v1610_v58 = vpop.f32.mrb[3].mxu1 }
  0xfe   : > { %v1921_v57 = vadd.f32 %v1562_v54, %v1561_v52  ;;  %v1923_v59 = vadd.f32 %v1610_v58, %v1609_v56 }
 0x100   : > { %v1002_v17 = vadd.f32 %v1921_v57, %v1917_v51 }
 0x102   : > { %v1564_v60 = vpop.f32.mrb[4].mxu0  ;;  %v1612_v62 = vpop.f32.mrb[4].mxu1 }
 0x103   : > { %v1565_v61 = vpop.f32.mrb[5].mxu0  ;;  %v1613_v1 = vpop.f32.mrb[5].mxu1 }
 0x104   : > { %v1925_v63 = vadd.f32 %v1565_v61, %v1564_v60  ;;  %v1567_v0 = vpop.f32.mrb[6].mxu0  ;;  %v1927_v3 = vadd.f32 %v1613_v1, %v1612_v62  ;;  %v1615_v4 = vpop.f32.mrb[6].mxu1 }
 0x105   : > { %v1568_v2 = vpop.f32.mrb[7].mxu0  ;;  %v1616_v6 = vpop.f32.mrb[7].mxu1 }
 0x106   : > { %v1929_v5 = vadd.f32 %v1568_v2, %v1567_v0  ;;  %v1931_v7 = vadd.f32 %v1616_v6, %v1615_v4  ;;  %v1003_v21 = vadd.f32 %v1925_v63, %v1002_v17 }
 0x108   : > { %v1004_v25 = vadd.f32 %v1929_v5, %v1003_v21 }
 0x10a   : > { %v1570_v8 = vpop.f32.mrb[8].mxu0  ;;  %v1618_v10 = vpop.f32.mrb[8].mxu1 }
 0x10b   : > { %v1571_v9 = vpop.f32.mrb[9].mxu0  ;;  %v1619_v13 = vpop.f32.mrb[9].mxu1 }
 0x10c   : > { %v1933_v11 = vadd.f32 %v1571_v9, %v1570_v8  ;;  %v1573_v12 = vpop.f32.mrb[10].mxu0  ;;  %v1935_v15 = vadd.f32 %v1619_v13, %v1618_v10  ;;  %v1621_v16 = vpop.f32.mrb[10].mxu1 }
 0x10d   : > { %v1574_v14 = vpop.f32.mrb[11].mxu0  ;;  %v1622_v19 = vpop.f32.mrb[11].mxu1 }
 0x10e   : > { %v1939_v18 = vadd.f32 %v1574_v14, %v1573_v12  ;;  %v1941_v20 = vadd.f32 %v1622_v19, %v1621_v16  ;;  %v1005_v32 = vadd.f32 %v1933_v11, %v1004_v25 }
 0x110   : > { %v1006_v36 = vadd.f32 %v1939_v18, %v1005_v32 }
 0x112   : > { %v1576_v22 = vpop.f32.mrb[12].mxu0  ;;  %v1624_v24 = vpop.f32.mrb[12].mxu1 }
 0x113   : > { %v1577_v23 = vpop.f32.mrb[13].mxu0  ;;  %v1625_v28 = vpop.f32.mrb[13].mxu1 }
 0x114   : > { %v1945_v26 = vadd.f32 %v1577_v23, %v1576_v22  ;;  %v1579_v27 = vpop.f32.mrb[14].mxu0  ;;  %v1947_v30 = vadd.f32 %v1625_v28, %v1624_v24  ;;  %v1627_v31 = vpop.f32.mrb[14].mxu1 }
 0x115   : > { %v1580_v29 = vpop.f32.mrb[15].mxu0  ;;  %v1628_v34 = vpop.f32.mrb[15].mxu1 }
 0x116   : > { %v1950_v33 = vadd.f32 %v1580_v29, %v1579_v27  ;;  %v1952_v35 = vadd.f32 %v1628_v34, %v1627_v31  ;;  %v1007_v40 = vadd.f32 %v1945_v26, %v1006_v36 }
 0x118   : > { %v1008_v50 = vadd.f32 %v1950_v33, %v1007_v40 }
 0x11a   : > { %v1582_v37 = vpop.f32.mrb[16].mxu0  ;;  %v1630_v39 = vpop.f32.mrb[16].mxu1 }
 0x11b   : > { %v1583_v38 = vpop.f32.mrb[17].mxu0  ;;  %v1631_v43 = vpop.f32.mrb[17].mxu1 }
 0x11c   : > { %v1956_v41 = vadd.f32 %v1583_v38, %v1582_v37  ;;  %v1585_v42 = vpop.f32.mrb[18].mxu0  ;;  %v1958_v45 = vadd.f32 %v1631_v43, %v1630_v39  ;;  %v1633_v46 = vpop.f32.mrb[18].mxu1 }
 0x11d   : > { %v1586_v44 = vpop.f32.mrb[19].mxu0  ;;  %v1634_v48 = vpop.f32.mrb[19].mxu1 }
 0x11e   : > { %v1960_v47 = vadd.f32 %v1586_v44, %v1585_v42  ;;  %v1962_v49 = vadd.f32 %v1634_v48, %v1633_v46  ;;  %v1009_v52 = vadd.f32 %v1956_v41, %v1008_v50 }
 0x120   : > { %v1010_v2 = vadd.f32 %v1960_v47, %v1009_v52 }
 0x122   : > { %v1588_v53 = vpop.f32.mrb[20].mxu0  ;;  %v1636_v56 = vpop.f32.mrb[20].mxu1 }
 0x123   : > { %v1589_v54 = vpop.f32.mrb[21].mxu0  ;;  %v1637_v61 = vpop.f32.mrb[21].mxu1 }
 0x124   : > { %v1966_v58 = vadd.f32 %v1589_v54, %v1588_v53  ;;  %v1591_v60 = vpop.f32.mrb[22].mxu0  ;;  %v1968_v0 = vadd.f32 %v1637_v61, %v1636_v56  ;;  %v1639_v1 = vpop.f32.mrb[22].mxu1 }
 0x125   : > { %v1592_v62 = vpop.f32.mrb[23].mxu0  ;;  %v1640_v6 = vpop.f32.mrb[23].mxu1 }
 0x126   : > { %v1971_v4 = vadd.f32 %v1592_v62, %v1591_v60  ;;  %v1973_v8 = vadd.f32 %v1640_v6, %v1639_v1  ;;  %v1011_v9 = vadd.f32 %v1966_v58, %v1010_v2 }
 0x128   : > { %v1012_v14 = vadd.f32 %v1971_v4, %v1011_v9 }
 0x12a   : > { %v1594_v10 = vpop.f32.mrb[24].mxu0  ;;  %v1642_v13 = vpop.f32.mrb[24].mxu1 }
 0x12b   : > { %v1595_v12 = vpop.f32.mrb[25].mxu0  ;;  %v1643_v19 = vpop.f32.mrb[25].mxu1 }
 0x12c   : > { %v1596_v16 = vadd.f32 %v1595_v12, %v1594_v10  ;;  %v1597_v17 = vpop.f32.mrb[26].mxu0  ;;  %v1644_v22 = vadd.f32 %v1643_v19, %v1642_v13  ;;  %v1645_v23 = vpop.f32.mrb[26].mxu1 }
 0x12d   : > { %v1598_v21 = vpop.f32.mrb[27].mxu0  ;;  %v1646_v27 = vpop.f32.mrb[27].mxu1 }
 0x12e   : > { %v1013_v24 = vadd.f32 %v1596_v16, %v1012_v14  ;;  %v1599_v25 = vadd.f32 %v1598_v21, %v1597_v17  ;;  %v1647_v28 = vadd.f32 %v1646_v27, %v1645_v23 }
 0x130   : > { %v1014_v29 = vadd.f32 %v1599_v25, %v1013_v24 }
 0x132   : > { %v1600_v31 = vpop.f32.mrb[28].mxu0  ;;  %v1648_v34 = vpop.f32.mrb[28].mxu1 }
 0x133   : > { %v1601_v32 = vpop.f32.mrb[29].mxu0  ;;  %v1649_v38 = vpop.f32.mrb[29].mxu1 }
 0x134   : > { %v1602_v36 = vadd.f32 %v1601_v32, %v1600_v31  ;;  %v1603_v37 = vpop.f32.mrb[30].mxu0  ;;  %v1650_v40 = vadd.f32 %v1649_v38, %v1648_v34  ;;  %v1651_v42 = vpop.f32.mrb[30].mxu1 }
 0x135   : > { %v1604_v39 = vpop.f32.mrb[31].mxu0  ;;  %v1652_v46 = vpop.f32.mrb[31].mxu1 }
 0x136   : > { %v1015_v43 = vadd.f32 %v1602_v36, %v1014_v29  ;;  %v1605_v44 = vadd.f32 %v1604_v39, %v1603_v37  ;;  %v1653_v48 = vadd.f32 %v1652_v46, %v1651_v42 }
 0x138   : > { %v1016_v50 = vadd.f32 %v1605_v44, %v1015_v43 }
 0x13a   : > { %v1017_v52 = vadd.f32 %v1919_v55, %v1016_v50 }
 0x13c   : > { %v1018_v53 = vadd.f32 %v1923_v59, %v1017_v52 }
 0x13e   : > { %v1019_v54 = vadd.f32 %v1927_v3, %v1018_v53 }
 0x140   : > { %v1020_v56 = vadd.f32 %v1931_v7, %v1019_v54 }
 0x142   : > { %v1021_v60 = vadd.f32 %v1935_v15, %v1020_v56 }
 0x144   : > { %v1022_v61 = vadd.f32 %v1941_v20, %v1021_v60 }
 0x146   : > { %v1023_v62 = vadd.f32 %v1947_v30, %v1022_v61 }
 0x148   : > { %v1024_v1 = vadd.f32 %v1952_v35, %v1023_v62 }
 0x14a   : > { %v1025_v2 = vadd.f32 %v1958_v45, %v1024_v1 }
 0x14c   : > { %v1026_v6 = vadd.f32 %v1962_v49, %v1025_v2 }
 0x14e   : > { %v1027_v9 = vadd.f32 %v1968_v0, %v1026_v6 }
 0x150   : > { %v1028_v10 = vadd.f32 %v1973_v8, %v1027_v9 }
 0x152   : > { %v1029_v12 = vadd.f32 %v1644_v22, %v1028_v10 }
 0x154   : > { %v1030_v13 = vadd.f32 %v1647_v28, %v1029_v12 }
 0x156   : > { %v1031_v14 = vadd.f32 %v1650_v40, %v1030_v13 }
 0x158   : > { %v1032_v17 = vadd.f32 %v1653_v48, %v1031_v14 }
 0x15a   : > { %v1033_v19 = vrot.slane %v1032_v17, 4 }
 0x15c   : > { %v1034_v21 = vadd.f32 %v1033_v19, %v1032_v17 }
 0x15e   : > { %v1035_v23 = vrot.slane %v1034_v21, 2 }
 0x160   : > { %v1036_v24 = vadd.f32 %v1035_v23, %v1034_v21 }
 0x162   : > { %v1037_v27 = vrot.slane %v1036_v24, 1 }
 0x164   : > { %v1038_v29 = vadd.f32 %v1037_v27, %v1036_v24 }
 0x166   : > { %v1040_v31 = vmul.f32 0.00390625, %v1038_v29 }
 0x168   : > { %v1989_v32 = vsub.f32 %v1596_v16, %v1040_v31  ;;  %v1991_v34 = vsub.f32 %v1599_v25, %v1040_v31  ;;  %v1993_v37 = vsub.f32 %v1602_v36, %v1040_v31  ;;  %v1995_v38 = vsub.f32 %v1605_v44, %v1040_v31 }
 0x169   : > { %v1998_v39 = vsub.f32 %v1919_v55, %v1040_v31  ;;  %v2001_v42 = vsub.f32 %v1923_v59, %v1040_v31  ;;  %v2004_v43 = vsub.f32 %v1927_v3, %v1040_v31  ;;  %v2007_v46 = vsub.f32 %v1931_v7, %v1040_v31 }
 0x16a   : > { %v2010_v16 = vsub.f32 %v1935_v15, %v1040_v31  ;;  %v2013_v25 = vsub.f32 %v1941_v20, %v1040_v31  ;;  %v2016_v36 = vsub.f32 %v1947_v30, %v1040_v31  ;;  %v2019_v55 = vsub.f32 %v1952_v35, %v1040_v31 }
 0x16b   : > { %v2022_v59 = vsub.f32 %v1958_v45, %v1040_v31  ;;  %v2025_v3 = vsub.f32 %v1962_v49, %v1040_v31  ;;  %v2028_v7 = vsub.f32 %v1968_v0, %v1040_v31  ;;  %v2031_v15 = vsub.f32 %v1973_v8, %v1040_v31 }
 0x16c   : > { %v2033_v20 = vsub.f32 %v1644_v22, %v1040_v31  ;;  %v2035_v44 = vsub.f32 %v1647_v28, %v1040_v31  ;;  %v2037_v30 = vsub.f32 %v1650_v40, %v1040_v31  ;;  %v2039_v35 = vsub.f32 %v1653_v48, %v1040_v31 }
 0x16d   : > { %v2042_v45 = vsub.f32 %v1917_v51, %v1040_v31  ;;  %v2045_v49 = vsub.f32 %v1921_v57, %v1040_v31  ;;  %v2048_v0 = vsub.f32 %v1925_v63, %v1040_v31  ;;  %v2055_v28 = vsub.f32 %v1929_v5, %v1040_v31 }
 0x16e   : > { %v2058_v40 = vsub.f32 %v1933_v11, %v1040_v31  ;;  %v2063_v48 = vsub.f32 %v1939_v18, %v1040_v31  ;;  %v2068_v52 = vsub.f32 %v1945_v26, %v1040_v31  ;;  %v2073_v11 = vsub.f32 %v1950_v33, %v1040_v31 }
 0x16f   : > { %v1073_v8 = vmul.f32 %v2042_v45, %v2042_v45  ;;  %v1074_v22 = vmul.f32 %v2045_v49, %v2045_v49  ;;  %v1075_v51 = vmul.f32 %v2048_v0, %v2048_v0  ;;  %v1076_v63 = vmul.f32 %v2055_v28, %v2055_v28 }
 0x170   : > { %v1077_v5 = vmul.f32 %v2058_v40, %v2058_v40  ;;  %v1078_v54 = vmul.f32 %v2063_v48, %v2063_v48  ;;  %v2078_v18 = vsub.f32 %v1956_v41, %v1040_v31  ;;  %v1079_v60 = vmul.f32 %v2068_v52, %v2068_v52 }
 0x171   : > { %v1105_v57 = vadd.f32 %v1074_v22, %v1073_v8  ;;  %v2083_v26 = vsub.f32 %v1960_v47, %v1040_v31  ;;  %v1080_v62 = vmul.f32 %v2073_v11, %v2073_v11  ;;  %v2088_v33 = vsub.f32 %v1966_v58, %v1040_v31 }
 0x172   : > { %v1081_v2 = vmul.f32 %v2078_v18, %v2078_v18  ;;  %v2093_v41 = vsub.f32 %v1971_v4, %v1040_v31  ;;  %v1085_v14 = vmul.f32 %v1989_v32, %v1989_v32  ;;  %v1086_v4 = vmul.f32 %v1991_v34, %v1991_v34 }
 0x173   : > { %v1106_v50 = vadd.f32 %v1105_v57, %v1075_v51  ;;  %v1082_v9 = vmul.f32 %v2083_v26, %v2083_v26  ;;  %v1083_v47 = vmul.f32 %v2088_v33, %v2088_v33  ;;  %v1087_v21 = vmul.f32 %v1993_v37, %v1993_v37 }
 0x174   : > { %v1084_v13 = vmul.f32 %v2093_v41, %v2093_v41  ;;  %v1088_v24 = vmul.f32 %v1995_v38, %v1995_v38  ;;  %v1089_v29 = vmul.f32 %v1998_v39, %v1998_v39  ;;  %v1090_v8 = vmul.f32 %v2001_v42, %v2001_v42 }
 0x175   : > { %v1107_v53 = vadd.f32 %v1106_v50, %v1076_v63  ;;  %v1091_v51 = vmul.f32 %v2004_v43, %v2004_v43  ;;  %v1092_v63 = vmul.f32 %v2007_v46, %v2007_v46 }
 0x177   : > { %v1108_v56 = vadd.f32 %v1107_v53, %v1077_v5  ;;  %v1093_v5 = vmul.f32 %v2010_v16, %v2010_v16 }
 0x179   : > { %v1109_v61 = vadd.f32 %v1108_v56, %v1078_v54  ;;  %v1094_v54 = vmul.f32 %v2013_v25, %v2013_v25 }
 0x17b   : > { %v1110_v1 = vadd.f32 %v1109_v61, %v1079_v60  ;;  %v1095_v60 = vmul.f32 %v2016_v36, %v2016_v36 }
 0x17d   : > { %v1111_v6 = vadd.f32 %v1110_v1, %v1080_v62  ;;  %v1096_v62 = vmul.f32 %v2019_v55, %v2019_v55 }
 0x17f   : > { %v1112_v10 = vadd.f32 %v1111_v6, %v1081_v2  ;;  %v1097_v2 = vmul.f32 %v2022_v59, %v2022_v59 }
 0x181   : > { %v1113_v12 = vadd.f32 %v1112_v10, %v1082_v9  ;;  %v1098_v9 = vmul.f32 %v2025_v3, %v2025_v3 }
 0x183   : > { %v1114_v58 = vadd.f32 %v1113_v12, %v1083_v47  ;;  %v1099_v47 = vmul.f32 %v2028_v7, %v2028_v7 }
 0x185   : > { %v1115_v17 = vadd.f32 %v1114_v58, %v1084_v13  ;;  %v1100_v13 = vmul.f32 %v2031_v15, %v2031_v15 }
 0x187   : > { %v1116_v19 = vadd.f32 %v1115_v17, %v1085_v14  ;;  %v1101_v14 = vmul.f32 %v2033_v20, %v2033_v20 }
 0x189   : > { %v1117_v23 = vadd.f32 %v1116_v19, %v1086_v4  ;;  %v1102_v4 = vmul.f32 %v2035_v44, %v2035_v44 }
 0x18b   : > { %v1118_v27 = vadd.f32 %v1117_v23, %v1087_v21  ;;  %v1103_v21 = vmul.f32 %v2037_v30, %v2037_v30 }
 0x18d   : > { %v1119_v31 = vadd.f32 %v1118_v27, %v1088_v24  ;;  %v1104_v24 = vmul.f32 %v2039_v35, %v2039_v35 }
 0x18f   : > { %v1120_v22 = vadd.f32 %v1119_v31, %v1089_v29 }
 0x191   : > { %v1121_v57 = vadd.f32 %v1120_v22, %v1090_v8 }
 0x193   : > { %v1122_v50 = vadd.f32 %v1121_v57, %v1091_v51 }
 0x195   : > { %v1123_v53 = vadd.f32 %v1122_v50, %v1092_v63 }
 0x197   : > { %v1124_v56 = vadd.f32 %v1123_v53, %v1093_v5 }
 0x199   : > { %v1125_v61 = vadd.f32 %v1124_v56, %v1094_v54 }
 0x19b   : > { %v1126_v1 = vadd.f32 %v1125_v61, %v1095_v60 }
 0x19d   : > { %v1127_v6 = vadd.f32 %v1126_v1, %v1096_v62 }
 0x19f   : > { %v1128_v10 = vadd.f32 %v1127_v6, %v1097_v2 }
 0x1a1   : > { %v1129_v12 = vadd.f32 %v1128_v10, %v1098_v9 }
 0x1a3   : > { %v1130_v58 = vadd.f32 %v1129_v12, %v1099_v47 }
 0x1a5   : > { %v1131_v17 = vadd.f32 %v1130_v58, %v1100_v13 }
 0x1a7   : > { %v1132_v19 = vadd.f32 %v1131_v17, %v1101_v14 }
 0x1a9   : > { %v1133_v23 = vadd.f32 %v1132_v19, %v1102_v4 }
 0x1ab   : > { %v1134_v27 = vadd.f32 %v1133_v23, %v1103_v21 }
 0x1ad   : > { %v1135_v29 = vadd.f32 %v1134_v27, %v1104_v24 }
 0x1af   : > { %v1136_v31 = vrot.slane %v1135_v29, 4 }
 0x1b1   : > { %v1137_v8 = vadd.f32 %v1136_v31, %v1135_v29 }
 0x1b3   : > { %v1138_v22 = vrot.slane %v1137_v8, 2 }
 0x1b5   : > { %v1139_v51 = vadd.f32 %v1138_v22, %v1137_v8  ;;  %v1538_v22 = vld [vmem:[%s2266_s3] ss:$0 sm:$0xff] }
 0x1b7   : > { %v1140_v57 = vrot.slane %v1139_v51, 1 }
 0x1b9   : > { %v1141_v63 = vadd.f32 %v1140_v57, %v1139_v51 }
 0x1bb   : > { %v1142_v50 = vmul.f32 0.00390625, %v1141_v63 }
 0x1bd   : > { %v1143_v5 = vadd.f32 1e-05, %v1142_v50 }
 0x1bf   : > { %1758 = vrsqrt.f32 %v1143_v5 }
 0x1c9   : > { %v1759_v53 = vpop.eup %1758 }
 0x1ca   : > { %v1145_v54 = vmul.f32 %v1759_v53, %v2042_v45  ;;  %v1146_v56 = vmul.f32 %v1759_v53, %v2045_v49  ;;  %v1147_v60 = vmul.f32 %v1759_v53, %v2048_v0  ;;  %v1148_v61 = vmul.f32 %v1759_v53, %v2055_v28 }
 0x1cb   : > { %v1149_v62 = vmul.f32 %v1759_v53, %v2058_v40  ;;  %v1150_v1 = vmul.f32 %v1759_v53, %v2063_v48  ;;  %v1151_v2 = vmul.f32 %v1759_v53, %v2068_v52  ;;  %v1152_v6 = vmul.f32 %v1759_v53, %v2073_v11 }
 0x1cc   : > { %v1153_v9 = vmul.f32 %v1759_v53, %v2078_v18  ;;  %v1154_v10 = vmul.f32 %v1759_v53, %v2083_v26  ;;  %v1155_v45 = vmul.f32 %v1759_v53, %v2088_v33  ;;  %v1156_v49 = vmul.f32 %v1759_v53, %v2093_v41 }
 0x1cd   : > { %v1157_v0 = vmul.f32 %v1759_v53, %v1989_v32  ;;  %v1158_v28 = vmul.f32 %v1759_v53, %v1991_v34  ;;  %v1159_v40 = vmul.f32 %v1759_v53, %v1993_v37  ;;  %v1160_v48 = vmul.f32 %v1759_v53, %v1995_v38  ;;  %v1537_v37 = vld [vmem:[%s2265_s2] ss:$0 sm:$0xff] }
 0x1ce   : > { %v1161_v52 = vmul.f32 %v1759_v53, %v1998_v39  ;;  %v1162_v11 = vmul.f32 %v1759_v53, %v2001_v42  ;;  %v1163_v18 = vmul.f32 %v1759_v53, %v2004_v43  ;;  %v1164_v26 = vmul.f32 %v1759_v53, %v2007_v46 }
 0x1cf   : > { %v1165_v33 = vmul.f32 %v1759_v53, %v2010_v16  ;;  %v1166_v41 = vmul.f32 %v1759_v53, %v2013_v25  ;;  %v1167_v32 = vmul.f32 %v1759_v53, %v2016_v36  ;;  %v1168_v34 = vmul.f32 %v1759_v53, %v2019_v55 }
 0x1d0   : > { %v1169_v38 = vmul.f32 %v1759_v53, %v2022_v59  ;;  %v1170_v39 = vmul.f32 %v1759_v53, %v2025_v3  ;;  %v1171_v42 = vmul.f32 %v1759_v53, %v2028_v7  ;;  %v1172_v43 = vmul.f32 %v1759_v53, %v2031_v15 }
 0x1d1   : > { %v1173_v46 = vmul.f32 %v1759_v53, %v2033_v20  ;;  %v1174_v16 = vmul.f32 %v1759_v53, %v2035_v44  ;;  %v1175_v25 = vmul.f32 %v1759_v53, %v2037_v30  ;;  %v1176_v36 = vmul.f32 %v1759_v53, %v2039_v35 }
 0x1d2   : > { %v1184_v55 = vmul.f32 %v1537_v37, %v1145_v54  ;;  %v1185_v47 = vmul.f32 %v1537_v37, %v1146_v56  ;;  %v1186_v12 = vmul.f32 %v1537_v37, %v1147_v60  ;;  %v1187_v13 = vmul.f32 %v1537_v37, %v1148_v61 }
 0x1d3   : > { %v1188_v58 = vmul.f32 %v1537_v37, %v1149_v62  ;;  %v1189_v59 = vmul.f32 %v1537_v37, %v1150_v1  ;;  %v1190_v14 = vmul.f32 %v1537_v37, %v1151_v2  ;;  %v1191_v3 = vmul.f32 %v1537_v37, %v1152_v6 }
 0x1d4   : > { %v1192_v17 = vmul.f32 %v1537_v37, %v1153_v9  ;;  %v1193_v7 = vmul.f32 %v1537_v37, %v1154_v10  ;;  %v1194_v4 = vmul.f32 %v1537_v37, %v1155_v45  ;;  %v1195_v15 = vmul.f32 %v1537_v37, %v1156_v49 }
 0x1d5   : > { %v1196_v19 = vmul.f32 %v1537_v37, %v1157_v0  ;;  %v1197_v20 = vmul.f32 %v1537_v37, %v1158_v28  ;;  %v1198_v21 = vmul.f32 %v1537_v37, %v1159_v40  ;;  %v1199_v44 = vmul.f32 %v1537_v37, %v1160_v48 }
 0x1d6   : > { %v1200_v23 = vmul.f32 %v1537_v37, %v1161_v52  ;;  %v1201_v30 = vmul.f32 %v1537_v37, %v1162_v11  ;;  %v1202_v24 = vmul.f32 %v1537_v37, %v1163_v18  ;;  %v1203_v35 = vmul.f32 %v1537_v37, %v1164_v26 }
 0x1d7   : > { %v1204_v27 = vmul.f32 %v1537_v37, %v1165_v33  ;;  %v1205_v29 = vmul.f32 %v1537_v37, %v1166_v41  ;;  %v1206_v31 = vmul.f32 %v1537_v37, %v1167_v32  ;;  %v1207_v8 = vmul.f32 %v1537_v37, %v1168_v34 }
 0x1d8   : > { %v1208_v51 = vmul.f32 %v1537_v37, %v1169_v38  ;;  %v1209_v57 = vmul.f32 %v1537_v37, %v1170_v39  ;;  %v1210_v63 = vmul.f32 %v1537_v37, %v1171_v42  ;;  %v1211_v50 = vmul.f32 %v1537_v37, %v1172_v43 }
 0x1d9   : > { %v1212_v5 = vmul.f32 %v1537_v37, %v1173_v46  ;;  %v1213_v53 = vmul.f32 %v1537_v37, %v1174_v16  ;;  %v1214_v54 = vmul.f32 %v1537_v37, %v1175_v25  ;;  %v1215_v56 = vmul.f32 %v1537_v37, %v1176_v36 }
 0x1da   : > { %v1223_v60 = vadd.f32 %v1538_v22, %v1184_v55  ;;  %v1224_v61 = vadd.f32 %v1538_v22, %v1185_v47  ;;  %v1225_v62 = vadd.f32 %v1538_v22, %v1186_v12  ;;  %v1226_v1 = vadd.f32 %v1538_v22, %v1187_v13 }
 0x1db   : > { %v1227_v2 = vadd.f32 %v1538_v22, %v1188_v58  ;;  %v1228_v6 = vadd.f32 %v1538_v22, %v1189_v59  ;;  %v1229_v9 = vadd.f32 %v1538_v22, %v1190_v14  ;;  %v1230_v10 = vadd.f32 %v1538_v22, %v1191_v3 }
 0x1dc   : > { %v1231_v45 = vadd.f32 %v1538_v22, %v1192_v17  ;;  %v1232_v49 = vadd.f32 %v1538_v22, %v1193_v7  ;;  %v1233_v0 = vadd.f32 %v1538_v22, %v1194_v4  ;;  %v1234_v28 = vadd.f32 %v1538_v22, %v1195_v15 }
 0x1dd   : > { %v1235_v40 = vadd.f32 %v1538_v22, %v1196_v19  ;;  %v1236_v48 = vadd.f32 %v1538_v22, %v1197_v20  ;;  %v1237_v52 = vadd.f32 %v1538_v22, %v1198_v21  ;;  %v1238_v11 = vadd.f32 %v1538_v22, %v1199_v44 }
 0x1de   : > { %v1239_v18 = vadd.f32 %v1538_v22, %v1200_v23  ;;  %v1240_v26 = vadd.f32 %v1538_v22, %v1201_v30  ;;  %v1241_v33 = vadd.f32 %v1538_v22, %v1202_v24  ;;  %v1242_v41 = vadd.f32 %v1538_v22, %v1203_v35 }
 0x1df   : > { %v2179_v32 = vadd.f32 %v1538_v22, %v1204_v27  ;;  %v2181_v34 = vadd.f32 %v1538_v22, %v1205_v29  ;;  %v2183_v37 = vadd.f32 %v1538_v22, %v1206_v31  ;;  %v2185_v38 = vadd.f32 %v1538_v22, %v1207_v8 }
 0x1e0   : > { %v2187_v39 = vadd.f32 %v1538_v22, %v1208_v51  ;;  %v2189_v42 = vadd.f32 %v1538_v22, %v1209_v57  ;;  %v2191_v43 = vadd.f32 %v1538_v22, %v1210_v63  ;;  %v2193_v46 = vadd.f32 %v1538_v22, %v1211_v50 }
 0x1e1   : > { %v2202_v16 = vadd.f32 %v1538_v22, %v1212_v5  ;;  %v2204_v25 = vadd.f32 %v1538_v22, %v1213_v53  ;;  %v2206_v36 = vadd.f32 %v1538_v22, %v1214_v54  ;;  %v2208_v55 = vadd.f32 %v1538_v22, %v1215_v56 }
 0x1e2   : > { %v1255_v47 = vmax.f32 %v1223_v60, 0.0  ;;  %v1256_v12 = vmax.f32 %v1224_v61, 0.0  ;;  %v1257_v13 = vmax.f32 %v1225_v62, 0.0  ;;  %v1258_v58 = vmax.f32 %v1226_v1, 0.0 }
 0x1e3   : > { %v1259_v59 = vmax.f32 %v1227_v2, 0.0  ;;  %v1260_v14 = vmax.f32 %v1228_v6, 0.0  ;;  %v1261_v3 = vmax.f32 %v1229_v9, 0.0  ;;  %v1262_v17 = vmax.f32 %v1230_v10, 0.0 }
 0x1e4   : > { %v1263_v7 = vmax.f32 %v1231_v45, 0.0  ;;  %v1264_v4 = vmax.f32 %v1232_v49, 0.0  ;;  %v1265_v15 = vmax.f32 %v1233_v0, 0.0  ;;  %v1266_v19 = vmax.f32 %v1234_v28, 0.0  ;;  %1287 = vst [vmem:[%s2200_s15] sm:$0xff] %v1255_v47  ;;  %1288 = vst [vmem:[%s2200_s15 + $0x8] sm:$0xff] %v1256_v12 }
 0x1e5   : > { %1289 = vst [vmem:[%s2200_s15 + $0x10] sm:$0xff] %v1257_v13  ;;  %1290 = vst [vmem:[%s2200_s15 + $0x18] sm:$0xff] %v1258_v58  ;;  %v1267_v20 = vmax.f32 %v1235_v40, 0.0  ;;  %v1268_v21 = vmax.f32 %v1236_v48, 0.0  ;;  %v1269_v44 = vmax.f32 %v1237_v52, 0.0  ;;  %v1270_v23 = vmax.f32 %v1238_v11, 0.0 }
 0x1e6   : > { %1291 = vst [vmem:[%s2200_s15 + $0x20] sm:$0xff] %v1259_v59  ;;  %1292 = vst [vmem:[%s2200_s15 + $0x28] sm:$0xff] %v1260_v14  ;;  %v1271_v30 = vmax.f32 %v1239_v18, 0.0  ;;  %v1272_v24 = vmax.f32 %v1240_v26, 0.0  ;;  %v1273_v35 = vmax.f32 %v1241_v33, 0.0  ;;  %v1274_v27 = vmax.f32 %v1242_v41, 0.0 }
 0x1e7   : > { %1293 = vst [vmem:[%s2200_s15 + $0x30] sm:$0xff] %v1261_v3  ;;  %1294 = vst [vmem:[%s2200_s15 + $0x38] sm:$0xff] %v1262_v17  ;;  %v1275_v29 = vmax.f32 %v2179_v32, 0.0  ;;  %v1276_v31 = vmax.f32 %v2181_v34, 0.0  ;;  %v1277_v8 = vmax.f32 %v2183_v37, 0.0  ;;  %v1278_v22 = vmax.f32 %v2185_v38, 0.0 }
 0x1e8   : > { %1295 = vst [vmem:[%s2200_s15 + $0x40] sm:$0xff] %v1263_v7  ;;  %1296 = vst [vmem:[%s2200_s15 + $0x48] sm:$0xff] %v1264_v4  ;;  %v1279_v51 = vmax.f32 %v2187_v39, 0.0  ;;  %v1280_v57 = vmax.f32 %v2189_v42, 0.0  ;;  %v1281_v63 = vmax.f32 %v2191_v43, 0.0  ;;  %v1282_v50 = vmax.f32 %v2193_v46, 0.0 }
 0x1e9   : > { %1297 = vst [vmem:[%s2200_s15 + $0x50] sm:$0xff] %v1265_v15  ;;  %1298 = vst [vmem:[%s2200_s15 + $0x58] sm:$0xff] %v1266_v19  ;;  %v1283_v5 = vmax.f32 %v2202_v16, 0.0  ;;  %v1284_v53 = vmax.f32 %v2204_v25, 0.0  ;;  %v1285_v54 = vmax.f32 %v2206_v36, 0.0  ;;  %v1286_v56 = vmax.f32 %v2208_v55, 0.0 }
 0x1ea   : > { %1299 = vst [vmem:[%s2200_s15 + $0x60] sm:$0xff] %v1267_v20  ;;  %1300 = vst [vmem:[%s2200_s15 + $0x68] sm:$0xff] %v1268_v21 }
 0x1eb   : > { %1301 = vst [vmem:[%s2200_s15 + $0x70] sm:$0xff] %v1269_v44  ;;  %1302 = vst [vmem:[%s2200_s15 + $0x78] sm:$0xff] %v1270_v23 }
 0x1ec   : > { %1303 = vst [vmem:[%s2200_s15 + $0x80] sm:$0xff] %v1271_v30  ;;  %1304 = vst [vmem:[%s2200_s15 + $0x88] sm:$0xff] %v1272_v24 }
 0x1ed   : > { %1305 = vst [vmem:[%s2200_s15 + $0x90] sm:$0xff] %v1273_v35  ;;  %1306 = vst [vmem:[%s2200_s15 + $0x98] sm:$0xff] %v1274_v27 }
 0x1ee   : > { %1307 = vst [vmem:[%s2200_s15 + $0xa0] sm:$0xff] %v1275_v29  ;;  %1308 = vst [vmem:[%s2200_s15 + $0xa8] sm:$0xff] %v1276_v31 }
 0x1ef   : > { %1309 = vst [vmem:[%s2200_s15 + $0xb0] sm:$0xff] %v1277_v8  ;;  %1310 = vst [vmem:[%s2200_s15 + $0xb8] sm:$0xff] %v1278_v22 }
 0x1f0   : > { %1311 = vst [vmem:[%s2200_s15 + $0xc0] sm:$0xff] %v1279_v51  ;;  %1312 = vst [vmem:[%s2200_s15 + $0xc8] sm:$0xff] %v1280_v57 }
 0x1f1   : > { %1313 = vst [vmem:[%s2200_s15 + $0xd0] sm:$0xff] %v1281_v63  ;;  %1314 = vst [vmem:[%s2200_s15 + $0xd8] sm:$0xff] %v1282_v50 }
 0x1f2   : > { %1315 = vst [vmem:[%s2200_s15 + $0xe0] sm:$0xff] %v1283_v5  ;;  %1316 = vst [vmem:[%s2200_s15 + $0xe8] sm:$0xff] %v1284_v53 }
 0x1f3   : > { %1317 = vst [vmem:[%s2200_s15 + $0xf0] sm:$0xff] %v1285_v54  ;;  %1318 = vst [vmem:[%s2200_s15 + $0xf8] sm:$0xff] %v1286_v56 }
 0x1f4 PF: > { %s14_s17 = sadd.s32 1, %s1782_s17   ;;  %s2268_s15 = smov %s1778_s16 }
 0x1f5   : > { %p11_p5 = scmp.ge.s32.totalorder %s14_s17, 4   ;;  %s2269_s16 = smov %s2271_s18 }
 0x1f7   :  { %13 = sbr.rel (!%p11_p5) target bundleno = 2 (0x2), region = 83 }

// kernel: _lambda_.16
= control target key start
LH: loop header
LB: loop body
LE: loop exit
PB: predicated region body
PF: predicated region fallthrough
CT: control target
= control target key end

     0   :  { %s976_s15 = smov 0   ;;  %s978_s16 = smov 0   ;;  %s1049_s0 = inlined_call_operand.vmem [shape: bf16[1,128,128], index: 0, kind: input, shape index: {}]   ;;  %s1050_s1 = inlined_call_operand.vmem [shape: bf16[1,128,128], index: 1, kind: input, shape index: {}]   ;;  %s1051_s2 = inlined_call_operand.vmem [shape: f32[1,128], index: 2, kind: input, shape index: {}]   ;;  %s1052_s3 = inlined_call_operand.vmem [shape: f32[1,128], index: 3, kind: input, shape index: {}]   ;;  %s1053_s4 = inlined_call_operand.vmem [shape: f32[1,128,128], index: 4, kind: output, shape index: {}]  }
   0x1   :  { %s980_s17 = smov 0  }
   0x2 LB: > { %s36_s18 = sadd.s32 1, %s945_s16  ;;  %p816_p0 = scmp.ge.s32.totalorder %s949_s17, 1  ;;  %s949_s17 = sphi %s980_s17, %s14_s17   ;;  %s945_s16 = sphi %s978_s16, %s1055_s16   ;;  %s941_s15 = sphi %s976_s15, %s1054_s15  }
   0x3   : > { %p38_p1 = scmp.ge.s32.totalorder %s36_s18, 2  ;;  %p242_p2 = scmp.lt.s32.totalorder %s949_s17, 3 }
   0x5   : > { %s1057_s18 = smov (%p38_p1, %s36_s18), 0  ;;  %p243_p3 = pnand %p816_p0, %p242_p2 }
   0x6   : > { %v913_v0 = vld [vmem:[%s1050_s1] sm:$0xff] (!%p243_p3)   ;;  %s817_s21 = sshll.u32 (!%p243_p3), %s941_s15, 3  ;;  %v914_v1 = vld [vmem:[%s1050_s1 + $0x8] sm:$0xff] (!%p243_p3)   ;;  %v915_v2 = vld [vmem:[%s1050_s1 + $0x10] sm:$0xff] (!%p243_p3)  }
   0x7   : > { %246 = sbr.rel (%p243_p3) target bundleno = 339 (0x153), region = 36  ;;  %p303_p4 = scmp.lt.s32.totalorder (!%p243_p3), %s817_s21, 15  ;;  %849 = vmatprep.subr.bf16.mxu0 (!%p243_p3), %v913_v0  ;;  %873 = vmatprep.subr.bf16.mxu1 (!%p243_p3), %v913_v0  ;;  %v916_v3 = vld [vmem:[%s1050_s1 + $0x18] sm:$0xff] (!%p243_p3)   ;;  %v917_v6 = vld [vmem:[%s1050_s1 + $0x20] sm:$0xff] (!%p243_p3)   ;;  %v918_v7 = vld [vmem:[%s1050_s1 + $0x28] sm:$0xff] (!%p243_p3)  }
   0x8   : > { %850 = vmatpush3.bf16.msra.mxu0 (!%p243_p3), %v913_v0  ;;  %881 = vmatpush3.bf16.msra.mxu1 (!%p243_p3), %v913_v0  ;;  %v919_v8 = vld [vmem:[%s1050_s1 + $0x30] sm:$0xff] (!%p243_p3)   ;;  %v920_v9 = vld [vmem:[%s1050_s1 + $0x38] sm:$0xff] (!%p243_p3)  }
   0x9   : > { %851 = vmatprep.subr.bf16.mxu0 (!%p243_p3), %v914_v1  ;;  %874 = vmatprep.subr.bf16.mxu1 (!%p243_p3), %v914_v1 }
   0xc   : > { %852 = vmatpush3.bf16.msra.mxu0 (!%p243_p3), %v914_v1  ;;  %882 = vmatpush3.bf16.msra.mxu1 (!%p243_p3), %v914_v1 }
   0xd   : > { %853 = vmatprep.subr.bf16.mxu0 (!%p243_p3), %v915_v2  ;;  %875 = vmatprep.subr.bf16.mxu1 (!%p243_p3), %v915_v2 }
   0xe   : > { %s1059_s21 = smov (!%p303_p4, %s817_s21), 15 }
   0xf   : > { %s818_s26 = sshll.u32 %s1059_s21, 2  ;;  %s820_s22 = sshll.u32 %s1059_s21, 3 }
  0x10   : > { %s1009_s29 = scalar_lea.vmem %s1049_s0, %s818_s26  ;;  %854 = vmatpush3.bf16.msra.mxu0 %v915_v2  ;;  %883 = vmatpush3.bf16.msra.mxu1 %v915_v2  ;;  %v833_v2 = vld [vmem:[%s1051_s2] ss:$0 sm:$0xff]  ;;  %s343_s25 = scalar_lea.vmem %s1053_s4, %s820_s22 }
  0x11   : > { %v921_v4 = vld [vmem:[%s1009_s29] sm:$0xff]   ;;  %v923_v5 = vld [vmem:[%s1009_s29 + $0x10] sm:$0xff]   ;;  %855 = vmatprep.subr.bf16.mxu0 %v916_v3  ;;  %876 = vmatprep.subr.bf16.mxu1 %v916_v3  ;;  %v922_v10 = vld [vmem:[%s1009_s29 + $0x8] sm:$0xff]  }
  0x12   : > { %865 = vmatprep.mubr.bf16.mxu0 %v921_v4  ;;  %869 = vmatprep.mubr.bf16.mxu1 %v923_v5  ;;  %v924_v11 = vld [vmem:[%s1009_s29 + $0x18] sm:$0xff]  }
  0x14   : > { %856 = vmatpush3.bf16.msra.mxu0 %v916_v3  ;;  %884 = vmatpush3.bf16.msra.mxu1 %v916_v3 }
  0x15   : > { %857 = vmatprep.subr.bf16.mxu0 %v917_v6  ;;  %877 = vmatprep.subr.bf16.mxu1 %v917_v6 }
  0x18   : > { %858 = vmatpush3.bf16.msra.mxu0 %v917_v6  ;;  %885 = vmatpush3.bf16.msra.mxu1 %v917_v6 }
  0x19   : > { %859 = vmatprep.subr.bf16.mxu0 %v918_v7  ;;  %878 = vmatprep.subr.bf16.mxu1 %v918_v7 }
  0x1c   : > { %860 = vmatpush3.bf16.msra.mxu0 %v918_v7  ;;  %886 = vmatpush3.bf16.msra.mxu1 %v918_v7 }
  0x1d   : > { %861 = vmatprep.subr.bf16.mxu0 %v919_v8  ;;  %879 = vmatprep.subr.bf16.mxu1 %v919_v8 }
  0x20   : > { %862 = vmatpush3.bf16.msra.mxu0 %v919_v8  ;;  %887 = vmatpush3.bf16.msra.mxu1 %v919_v8 }
  0x21   : > { %863 = vmatprep.subr.bf16.mxu0 %v920_v9  ;;  %880 = vmatprep.subr.bf16.mxu1 %v920_v9 }
  0x24   : > { %864 = vmatpush3.bf16.msra.mxu0 %v920_v9  ;;  %888 = vmatpush3.bf16.msra.mxu1 %v920_v9 }
  0x27   : > { %866 = vmatmul.mubr.bf16.vlgmr.msra.gmra.mrb[0].mxu0 %v922_v10  ;;  %870 = vmatmul.mubr.bf16.vlgmr.msra.gmra.mrb[0].mxu1 %v924_v11  ;;  %v834_v11 = vld [vmem:[%s1052_s3] ss:$0 sm:$0xff] }
  0xfa   : > { %v867_v12 = vpop.f32.mrb[0].mxu0  ;;  %v871_v13 = vpop.f32.mrb[0].mxu1 }
  0xfb   : > { %v496_v14 = vpop.f32.mrb[1].mxu0  ;;  %v512_v15 = vpop.f32.mrb[1].mxu1 }
  0xfc   : > { %v868_v16 = vpop.f32.mrb[2].mxu0  ;;  %v872_v17 = vpop.f32.mrb[2].mxu1 }
  0xfd   : > { %v499_v18 = vpop.f32.mrb[3].mxu0  ;;  %v515_v19 = vpop.f32.mrb[3].mxu1 }
  0xfe   : > { %v554_v20 = vadd.f32 %v499_v18, %v496_v14 }
 0x100   : > { %v555_v21 = vadd.f32 %v867_v12, %v554_v20 }
 0x102   : > { %v556_v22 = vadd.f32 %v868_v16, %v555_v21 }
 0x104   : > { %v557_v23 = vadd.f32 %v556_v22, %v512_v15 }
 0x106   : > { %v558_v24 = vadd.f32 %v557_v23, %v515_v19 }
 0x108   : > { %v559_v25 = vadd.f32 %v871_v13, %v558_v24 }
 0x10a   : > { %v560_v26 = vadd.f32 %v872_v17, %v559_v25 }
 0x10c   : > { %v561_v27 = vrot.slane %v560_v26, 4 }
 0x10e   : > { %v562_v28 = vadd.f32 %v561_v27, %v560_v26 }
 0x110   : > { %v563_v29 = vrot.slane %v562_v28, 2 }
 0x112   : > { %v564_v30 = vadd.f32 %v563_v29, %v562_v28 }
 0x114   : > { %v565_v31 = vrot.slane %v564_v30, 1 }
 0x116   : > { %v566_v32 = vadd.f32 %v565_v31, %v564_v30 }
 0x118   : > { %v568_v33 = vmul.f32 0.015625, %v566_v32 }
 0x11a   : > { %v569_v34 = vsub.f32 %v496_v14, %v568_v33  ;;  %v570_v35 = vsub.f32 %v499_v18, %v568_v33  ;;  %v571_v36 = vsub.f32 %v867_v12, %v568_v33  ;;  %v572_v37 = vsub.f32 %v868_v16, %v568_v33 }
 0x11b   : > { %v573_v38 = vsub.f32 %v512_v15, %v568_v33  ;;  %v574_v39 = vsub.f32 %v515_v19, %v568_v33  ;;  %v575_v40 = vsub.f32 %v871_v13, %v568_v33  ;;  %v576_v41 = vsub.f32 %v872_v17, %v568_v33 }
 0x11c   : > { %v577_v42 = vmul.f32 %v569_v34, %v569_v34  ;;  %v578_v43 = vmul.f32 %v570_v35, %v570_v35  ;;  %v579_v44 = vmul.f32 %v571_v36, %v571_v36  ;;  %v580_v46 = vmul.f32 %v572_v37, %v572_v37 }
 0x11d   : > { %v581_v48 = vmul.f32 %v573_v38, %v573_v38  ;;  %v582_v50 = vmul.f32 %v574_v39, %v574_v39  ;;  %v583_v52 = vmul.f32 %v575_v40, %v575_v40  ;;  %v584_v54 = vmul.f32 %v576_v41, %v576_v41 }
 0x11e   : > { %v585_v45 = vadd.f32 %v578_v43, %v577_v42 }
 0x120   : > { %v586_v47 = vadd.f32 %v585_v45, %v579_v44 }
 0x122   : > { %v587_v49 = vadd.f32 %v586_v47, %v580_v46 }
 0x124   : > { %v588_v51 = vadd.f32 %v587_v49, %v581_v48 }
 0x126   : > { %v589_v53 = vadd.f32 %v588_v51, %v582_v50 }
 0x128   : > { %v590_v55 = vadd.f32 %v589_v53, %v583_v52 }
 0x12a   : > { %v591_v56 = vadd.f32 %v590_v55, %v584_v54 }
 0x12c   : > { %v592_v57 = vrot.slane %v591_v56, 4 }
 0x12e   : > { %v593_v58 = vadd.f32 %v592_v57, %v591_v56 }
 0x130   : > { %v594_v59 = vrot.slane %v593_v58, 2 }
 0x132   : > { %v595_v60 = vadd.f32 %v594_v59, %v593_v58 }
 0x134   : > { %v596_v61 = vrot.slane %v595_v60, 1 }
 0x136   : > { %v597_v62 = vadd.f32 %v596_v61, %v595_v60 }
 0x138   : > { %v598_v63 = vmul.f32 0.015625, %v597_v62 }
 0x13a   : > { %v599_v0 = vadd.f32 1e-05, %v598_v63 }
 0x13c   : > { %925 = vrsqrt.f32 %v599_v0 }
 0x146   : > { %v926_v1 = vpop.eup %925 }
 0x147   : > { %v601_v3 = vmul.f32 %v926_v1, %v569_v34  ;;  %v602_v4 = vmul.f32 %v926_v1, %v570_v35  ;;  %v603_v5 = vmul.f32 %v926_v1, %v571_v36  ;;  %v604_v6 = vmul.f32 %v926_v1, %v572_v37 }
 0x148   : > { %v605_v7 = vmul.f32 %v926_v1, %v573_v38  ;;  %v606_v8 = vmul.f32 %v926_v1, %v574_v39  ;;  %v607_v9 = vmul.f32 %v926_v1, %v575_v40  ;;  %v608_v10 = vmul.f32 %v926_v1, %v576_v41 }
 0x149   : > { %v616_v12 = vmul.f32 %v833_v2, %v601_v3  ;;  %v617_v13 = vmul.f32 %v833_v2, %v602_v4  ;;  %v618_v14 = vmul.f32 %v833_v2, %v603_v5  ;;  %v619_v15 = vmul.f32 %v833_v2, %v604_v6 }
 0x14a   : > { %v620_v16 = vmul.f32 %v833_v2, %v605_v7  ;;  %v621_v17 = vmul.f32 %v833_v2, %v606_v8  ;;  %v622_v18 = vmul.f32 %v833_v2, %v607_v9  ;;  %v623_v19 = vmul.f32 %v833_v2, %v608_v10 }
 0x14b   : > { %v631_v20 = vadd.f32 %v834_v11, %v616_v12  ;;  %v632_v21 = vadd.f32 %v834_v11, %v617_v13  ;;  %v633_v22 = vadd.f32 %v834_v11, %v618_v14  ;;  %v634_v23 = vadd.f32 %v834_v11, %v619_v15 }
 0x14c   : > { %v635_v24 = vadd.f32 %v834_v11, %v620_v16  ;;  %v636_v25 = vadd.f32 %v834_v11, %v621_v17  ;;  %v637_v26 = vadd.f32 %v834_v11, %v622_v18  ;;  %v638_v27 = vadd.f32 %v834_v11, %v623_v19 }
 0x14d   : > { %v639_v28 = vmax.f32 %v631_v20, 0.0  ;;  %v640_v29 = vmax.f32 %v632_v21, 0.0  ;;  %v641_v30 = vmax.f32 %v633_v22, 0.0  ;;  %v642_v31 = vmax.f32 %v634_v23, 0.0 }
 0x14e   : > { %v643_v32 = vmax.f32 %v635_v24, 0.0  ;;  %v644_v33 = vmax.f32 %v636_v25, 0.0  ;;  %v645_v34 = vmax.f32 %v637_v26, 0.0  ;;  %v646_v35 = vmax.f32 %v638_v27, 0.0 }
 0x14f   : > { %647 = vst [vmem:[%s343_s25] sm:$0xff] %v639_v28  ;;  %648 = vst [vmem:[%s343_s25 + $0x8] sm:$0xff] %v640_v29 }
 0x150   : > { %649 = vst [vmem:[%s343_s25 + $0x10] sm:$0xff] %v641_v30  ;;  %650 = vst [vmem:[%s343_s25 + $0x18] sm:$0xff] %v642_v31 }
 0x151   : > { %651 = vst [vmem:[%s343_s25 + $0x20] sm:$0xff] %v643_v32  ;;  %652 = vst [vmem:[%s343_s25 + $0x28] sm:$0xff] %v644_v33 }
 0x152   : > { %653 = vst [vmem:[%s343_s25 + $0x30] sm:$0xff] %v645_v34  ;;  %654 = vst [vmem:[%s343_s25 + $0x38] sm:$0xff] %v646_v35 }
 0x153 PF: > { %s14_s17 = sadd.s32 1, %s949_s17   ;;  %s1054_s15 = smov %s945_s16 }
 0x154   : > { %p11_p5 = scmp.ge.s32.totalorder %s14_s17, 4   ;;  %s1055_s16 = smov %s1057_s18 }
 0x156   :  { %13 = sbr.rel (!%p11_p5) target bundleno = 2 (0x2), region = 83 }

// kernel: _lambda_.17
= control target key start
LH: loop header
LB: loop body
LE: loop exit
PB: predicated region body
PF: predicated region fallthrough
CT: control target
= control target key end

     0   :  { %s421_s1 = inlined_call_operand.vmem [shape: bf16[1,256,128], index: 1, kind: input, shape index: {}]   ;;  %s422_s0 = inlined_call_operand.vmem [shape: bf16[1,32,256], index: 0, kind: input, shape index: {}]   ;;  %s423_s2 = inlined_call_operand.vmem [shape: f32[1,32,128], index: 2, kind: output, shape index: {}]  }
   0x1   :  { %v312_v0 = vld [vmem:[%s421_s1 + $0x40] sm:$0xff]   ;;  %v314_v2 = vld [vmem:[%s421_s1 + $0x48] sm:$0xff]   ;;  %v316_v4 = vld [vmem:[%s421_s1 + $0x50] sm:$0xff]  }
   0x2   :  { %v313_v1 = vld [vmem:[%s421_s1] sm:$0xff]   ;;  %268 = vmatprep.subr.bf16.mxu0 %v312_v0  ;;  %296 = vmatprep.subr.bf16.mxu1 %v312_v0  ;;  %v315_v3 = vld [vmem:[%s421_s1 + $0x8] sm:$0xff]   ;;  %v317_v5 = vld [vmem:[%s421_s1 + $0x10] sm:$0xff]  }
   0x3   :  { %269 = vmatpush3.bf16.msra.mxu0 %v313_v1  ;;  %304 = vmatpush3.bf16.msra.mxu1 %v313_v1  ;;  %v318_v6 = vld [vmem:[%s421_s1 + $0x58] sm:$0xff]   ;;  %v320_v8 = vld [vmem:[%s421_s1 + $0x60] sm:$0xff]   ;;  %v322_v10 = vld [vmem:[%s421_s1 + $0x68] sm:$0xff]  }
   0x4   :  { %270 = vmatprep.subr.bf16.mxu0 %v314_v2  ;;  %297 = vmatprep.subr.bf16.mxu1 %v314_v2  ;;  %v319_v7 = vld [vmem:[%s421_s1 + $0x18] sm:$0xff]   ;;  %v321_v9 = vld [vmem:[%s421_s1 + $0x20] sm:$0xff]   ;;  %v323_v13 = vld [vmem:[%s421_s1 + $0x28] sm:$0xff]  }
   0x5   :  { %v330_v11 = vld [vmem:[%s422_s0 + $0x4] ss:$8 sps:$4 sm:$0xff]   ;;  %v333_v12 = vld [vmem:[%s422_s0 + $0x14] ss:$8 sps:$4 sm:$0xff]   ;;  %v328_v18 = vld [vmem:[%s422_s0] ss:$8 sps:$4 sm:$0xff]  }
   0x6   :  { %v324_v14 = vld [vmem:[%s421_s1 + $0x70] sm:$0xff]   ;;  %208 = vmatprep.mubr.bf16.mxu0 %v330_v11  ;;  %216 = vmatprep.mubr.bf16.mxu1 %v333_v12  ;;  %v326_v16 = vld [vmem:[%s421_s1 + $0x78] sm:$0xff]  }
   0x7   :  { %271 = vmatpush3.bf16.msra.mxu0 %v315_v3  ;;  %305 = vmatpush3.bf16.msra.mxu1 %v315_v3  ;;  %v325_v15 = vld [vmem:[%s421_s1 + $0x30] sm:$0xff]   ;;  %v327_v17 = vld [vmem:[%s421_s1 + $0x38] sm:$0xff]  }
   0x8   :  { %272 = vmatprep.subr.bf16.mxu0 %v316_v4  ;;  %298 = vmatprep.subr.bf16.mxu1 %v316_v4  ;;  %v331_v19 = vld [vmem:[%s422_s0 + $0x10] ss:$8 sps:$4 sm:$0xff]  }
   0xb   :  { %273 = vmatpush3.bf16.msra.mxu0 %v317_v5  ;;  %306 = vmatpush3.bf16.msra.mxu1 %v317_v5 }
   0xc   :  { %274 = vmatprep.subr.bf16.mxu0 %v318_v6  ;;  %299 = vmatprep.subr.bf16.mxu1 %v318_v6 }
   0xf   :  { %275 = vmatpush3.bf16.msra.mxu0 %v319_v7  ;;  %307 = vmatpush3.bf16.msra.mxu1 %v319_v7 }
  0x10   :  { %276 = vmatprep.subr.bf16.mxu0 %v320_v8  ;;  %300 = vmatprep.subr.bf16.mxu1 %v320_v8 }
  0x13   :  { %277 = vmatpush3.bf16.msra.mxu0 %v321_v9  ;;  %308 = vmatpush3.bf16.msra.mxu1 %v321_v9 }
  0x14   :  { %278 = vmatprep.subr.bf16.mxu0 %v322_v10  ;;  %301 = vmatprep.subr.bf16.mxu1 %v322_v10 }
  0x17   :  { %279 = vmatpush3.bf16.msra.mxu0 %v323_v13  ;;  %309 = vmatpush3.bf16.msra.mxu1 %v323_v13 }
  0x18   :  { %280 = vmatprep.subr.bf16.mxu0 %v324_v14  ;;  %302 = vmatprep.subr.bf16.mxu1 %v324_v14 }
  0x1b   :  { %281 = vmatpush3.bf16.msra.mxu0 %v325_v15  ;;  %310 = vmatpush3.bf16.msra.mxu1 %v325_v15 }
  0x1c   :  { %282 = vmatprep.subr.bf16.mxu0 %v326_v16  ;;  %303 = vmatprep.subr.bf16.mxu1 %v326_v16 }
  0x1f   :  { %283 = vmatpush3.bf16.msra.mxu0 %v327_v17  ;;  %311 = vmatpush3.bf16.msra.mxu1 %v327_v17 }
  0x22   :  { %209 = vmatmul.mubr.bf16.vlgmr.msra.gmra.mrb[0].mxu0 %v328_v18  ;;  %217 = vmatmul.mubr.bf16.vlgmr.msra.gmra.mrb[0].mxu1 %v331_v19 }
  0xf5   :  { %v284_v20 = vpop.f32.mrb[0].mxu0  ;;  %v290_v21 = vpop.f32.mrb[0].mxu1 }
  0xf6   :  { %v285_v22 = vpop.f32.mrb[1].mxu0  ;;  %v291_v23 = vpop.f32.mrb[1].mxu1 }
  0xf7   :  { %v286_v24 = vadd.f32 %v285_v22, %v284_v20  ;;  %v292_v25 = vadd.f32 %v291_v23, %v290_v21  ;;  %v287_v26 = vpop.f32.mrb[2].mxu0  ;;  %v293_v27 = vpop.f32.mrb[2].mxu1 }
  0xf8   :  { %v288_v28 = vpop.f32.mrb[3].mxu0  ;;  %v294_v29 = vpop.f32.mrb[3].mxu1 }
  0xf9   :  { %240 = vst [vmem:[%s423_s2] sm:$0xff] %v286_v24  ;;  %242 = vst [vmem:[%s423_s2 + $0x10] sm:$0xff] %v292_v25  ;;  %v289_v30 = vadd.f32 %v288_v28, %v287_v26  ;;  %v295_v31 = vadd.f32 %v294_v29, %v293_v27 }
  0xfb   :  { %241 = vst [vmem:[%s423_s2 + $0x8] sm:$0xff] %v289_v30  ;;  %243 = vst [vmem:[%s423_s2 + $0x18] sm:$0xff] %v295_v31 }

// kernel: _lambda_.19
= control target key start
LH: loop header
LB: loop body
LE: loop exit
PB: predicated region body
PF: predicated region fallthrough
CT: control target
= control target key end

     0   :  { %s1006_s18 = smov 0   ;;  %s1008_s19 = smov 0   ;;  %s1132_s0 = inlined_call_operand.vmem [shape: bf16[1,32,384], index: 0, kind: input, shape index: {}]   ;;  %s1133_s1 = inlined_call_operand.vmem [shape: bf16[1,384,128], index: 1, kind: input, shape index: {}]   ;;  %s1134_s2 = inlined_call_operand.vmem [shape: f32[1,128], index: 2, kind: input, shape index: {}]   ;;  %s1135_s3 = inlined_call_operand.vmem [shape: f32[1,128], index: 3, kind: input, shape index: {}]   ;;  %s1136_s4 = inlined_call_operand.vmem [shape: f32[1,32,128], index: 4, kind: input, shape index: {}]   ;;  %s1137_s5 = inlined_call_operand.vmem [shape: f32[1,32,128], index: 5, kind: output, shape index: {}]  }
   0x1   :  { %s1010_s20 = smov 0   ;;  %s1012_s21 = smov 0  }
   0x2   :  { %s1014_s22 = smov 0   ;;  %s1016_s23 = smov 0  }
   0x3   :  { %s1018_s24 = smov 0  }
   0x4 LB: > { %s30_s25 = sadd.s32 1, %s963_s22  ;;  %s37_s26 = sadd.s32 1, %s967_s23  ;;  %s971_s24 = sphi %s1018_s24, %s15_s24   ;;  %s967_s23 = sphi %s1016_s23, %s1143_s23   ;;  %s963_s22 = sphi %s1014_s22, %s1142_s22   ;;  %s959_s21 = sphi %s1012_s21, %s1141_s21   ;;  %s955_s20 = sphi %s1010_s20, %s1140_s20   ;;  %s951_s19 = sphi %s1008_s19, %s1139_s19   ;;  %s947_s18 = sphi %s1006_s18, %s1138_s18  }
   0x5   : > { %p31_p0 = scmp.ge.s32.totalorder %s30_s25, 3  ;;  %p59_p1 = scmp.ne.s32.totalorder %s951_s19, %s947_s18 }
   0x6   : > { %p60_p2 = scmp.eq.s32.totalorder %s971_s24, 0  ;;  %s52_s30 = sadd.s32 1, %s951_s19 }
   0x7   : > { %s1145_s25 = smov (%p31_p0, %s30_s25), 0  ;;  %s1147_s26 = smov (!%p31_p0, %s37_s26), %s967_s23 }
   0x8   : > { %p61_p3 = por %p60_p2, %p59_p1  ;;  %p39_p4 = scmp.ge.s32.totalorder %s1147_s26, 2 }
   0x9   : > { %s48_s27 = ssub.s32 %s963_s22, %s1145_s25  ;;  %p789_p6 = scmp.ge.s32.totalorder %s971_s24, 6 }
   0xa   : > { %s1149_s26 = smov (%p39_p4, %s1147_s26), 0 }
   0xb   : > { %s46_s28 = ssub.s32 %s967_s23, %s1149_s26  ;;  %237 = sbr.rel (%p789_p6) target bundleno = 26 (0x1a), region = 24 }
   0xc   : > { %s49_s29 = sor.u32 %s48_s27, %s46_s28 }
   0xd   : > { %p50_p5 = scmp.eq.s32.totalorder %s49_s29, 0 }
   0xf   : > { %s1057_s6 = scalar_select %p50_p5, %s951_s19, %s52_s30  }
  0x12   : > { %240 = sbr.rel (!%p61_p3) target bundleno = 26 (0x1a), region = 28  ;;  %s242_s7 = sand.u32 (%p61_p3), 1, %s951_s19  }
  0x13   : > { %s846_s8 = smul.u32 (%p61_p3), 6, %s967_s23  ;;  %s790_s9 = sshll.u32 (%p61_p3), %s242_s7, 3 }
  0x14   : > { %s244_s15 = scalar_lea.vmem (%p61_p3), [#allocation3], %s790_s9 }
  0x15   : > { %s247_s10 = sadd.s32 (%p61_p3), %s963_s22, %s846_s8 }
  0x16   : > { %s793_s11 = sshll.u32 (%p61_p3), %s247_s10, 2 }
  0x17   : > { %s251_s14 = scalar_lea.vmem (%p61_p3), %s1132_s0, %s793_s11 }
  0x18   : > { %v267_v0 = vld [vmem:[%s251_s14] sm:$0xf] (%p61_p3)  ;;  %v269_v1 = vld [vmem:[%s251_s14 + $0xc] sm:$0xf] (%p61_p3) }
  0x19   : > { %268 = vst [vmem:[%s244_s15] sm:$0xf] %v267_v0  ;;  %270 = vst [vmem:[%s244_s15 + $0x4] sm:$0xf] %v269_v1 }
  0x1a PF: > { %p794_p7 = scmp.ge.s32.totalorder %s971_s24, 1  ;;  %p324_p8 = scmp.lt.s32.totalorder %s971_s24, 7 }
  0x1c   : > { %p325_p9 = pnand %p794_p7, %p324_p8 }
  0x1d   : > { %s331_s16 = sand.u32 (!%p325_p9), 1, %s947_s18   ;;  %s796_s17 = sshll.u32 (!%p325_p9), %s955_s20, 4 }
  0x1e   : > { %328 = sbr.rel (%p325_p9) target bundleno = 362 (0x16a), region = 77  ;;  %s1070_s27 = sshll.u32 (!%p325_p9), %s331_s16, 3 }
  0x1f   : > { %p395_p10 = scmp.lt.s32.totalorder (!%p325_p9), %s796_s17, 47  ;;  %s798_s28 = sshll.u32 (!%p325_p9), %s959_s21, 1 }
  0x20   : > { %p412_p11 = scmp.lt.s32.totalorder (!%p325_p9), %s798_s28, 3  ;;  %s333_s21 = scalar_lea.vmem (!%p325_p9), [#allocation3], %s1070_s27 }
  0x21   : > { %p802_p12 = scmp.ne.s32.totalorder (!%p325_p9), %s955_s20, 0 }
  0x25   : > { %s1151_s17 = smov (!%p395_p10, %s796_s17), 47  ;;  %s1153_s28 = smov (!%p412_p11, %s798_s28), 3 }
  0x26   : > { %s797_s29 = sshll.u32 %s1151_s17, 2  ;;  %s799_s9 = sshll.u32 %s1153_s28, 3  ;;  %v973_v2 = vmov (!%p802_p12), 0.0  }
  0x27   : > { %s1076_s8 = scalar_lea.vmem %s1133_s1, %s797_s29  ;;  %s1081_s18 = scalar_lea.vmem %s1136_s4, %s799_s9  ;;  %438 = vst [vmem:[#allocation2] sm:$0xff] (!%p802_p12), %v973_v2  ;;  %439 = vst [vmem:[#allocation2 + $0x8] sm:$0xff] (!%p802_p12), %v973_v2 }
  0x28   : > { %s1086_s14 = scalar_lea.vmem %s1137_s5, %s799_s9  ;;  %437 = sbr.rel (%p802_p12) target bundleno = 47 (0x2f), region = 85 }
  0x2f PF: > { %v906_v3 = vld [vmem:[%s1076_s8] sm:$0xff]   ;;  %v974_v4 = vmov 0.0   ;;  %v907_v5 = vld [vmem:[%s1076_s8 + $0x8] sm:$0xff]   ;;  %vm975_vm0 = vmmov 0   ;;  %v908_v6 = vld [vmem:[%s1076_s8 + $0x10] sm:$0xff]   ;;  %p812_p13 = scmp.ne.s32.totalorder %s955_s20, 2 }
  0x30   : > { %826 = vmatprep.subr.bf16.mxu0 %v974_v4  ;;  %842 = vmatprep.mubr.msk.bf16.mxu0 %vm975_vm0, %v974_v4  ;;  %v909_v7 = vld [vmem:[%s1076_s8 + $0x18] sm:$0xff]   ;;  %v910_v8 = vld [vmem:[%s1076_s8 + $0x20] sm:$0xff]   ;;  %v911_v9 = vld [vmem:[%s1076_s8 + $0x28] sm:$0xff]  }
  0x31   : > { %827 = vmatpush3.bf16.msra.mxu0 %v906_v3  ;;  %v912_v10 = vld [vmem:[%s1076_s8 + $0x30] sm:$0xff]   ;;  %v913_v11 = vld [vmem:[%s1076_s8 + $0x38] sm:$0xff]   ;;  %v440_v13 = vld [vmem:[#allocation2] sm:$0xff] }
  0x32   : > { %828 = vmatprep.subr.bf16.mxu0 %v974_v4  ;;  %v914_v12 = vld [vmem:[%s333_s21] sm:$0xff]   ;;  %v441_v15 = vld [vmem:[#allocation2 + $0x8] sm:$0xff]  ;;  %v813_v45 = vld [vmem:[%s1134_s2] ss:$0 sm:$0xff] (!%p812_p13) }
  0x33   : > { %v814_v48 = vld [vmem:[%s1135_s3] ss:$0 sm:$0xff] (!%p812_p13)  ;;  %v609_v52 = vld [vmem:[%s1081_s18 + $0x8] sm:$0xff] (!%p812_p13) }
  0x34   : > { %v608_v51 = vld [vmem:[%s1081_s18] sm:$0xff] (!%p812_p13) }
  0x35   : > { %829 = vmatpush3.bf16.msra.mxu0 %v907_v5 }
  0x36   : > { %830 = vmatprep.subr.bf16.mxu0 %v974_v4 }
  0x39   : > { %831 = vmatpush3.bf16.msra.mxu0 %v908_v6 }
  0x3a   : > { %832 = vmatprep.subr.bf16.mxu0 %v974_v4 }
  0x3d   : > { %833 = vmatpush3.bf16.msra.mxu0 %v909_v7 }
  0x3e   : > { %834 = vmatprep.subr.bf16.mxu0 %v974_v4 }
  0x41   : > { %835 = vmatpush3.bf16.msra.mxu0 %v910_v8 }
  0x42   : > { %836 = vmatprep.subr.bf16.mxu0 %v974_v4 }
  0x45   : > { %837 = vmatpush3.bf16.msra.mxu0 %v911_v9 }
  0x46   : > { %838 = vmatprep.subr.bf16.mxu0 %v974_v4 }
  0x49   : > { %839 = vmatpush3.bf16.msra.mxu0 %v912_v10 }
  0x4a   : > { %840 = vmatprep.subr.bf16.mxu0 %v974_v4 }
  0x4d   : > { %841 = vmatpush3.bf16.msra.mxu0 %v913_v11 }
  0x50   : > { %843 = vmatmul.mubr.bf16.vlgmr.msra.gmra.mrb[0].mxu0 %v914_v12 }
 0x122   : > { %562 = sbr.rel (%p812_p13) target bundleno = 362 (0x16a), region = 89 }
 0x123   : > { %v548_v14 = vpop.f32.mrb[0].mxu0 }
 0x124   : > { %v555_v16 = vadd.f32 %v548_v14, %v440_v13  ;;  %v844_v17 = vpop.f32.mrb[1].mxu0 }
 0x125   : > { %v551_v18 = vpop.f32.mrb[2].mxu0 }
 0x126   : > { %557 = vst [vmem:[#allocation2] sm:$0xff] %v555_v16  ;;  %v556_v19 = vadd.f32 %v551_v18, %v441_v15  ;;  %v845_v20 = vpop.f32.mrb[3].mxu0 }
 0x128   : > { %558 = vst [vmem:[#allocation2 + $0x8] sm:$0xff] %v556_v19 }
 0x12d   : > { %v563_v21 = vld [vmem:[#allocation2] sm:$0xff] }
 0x12f   : > { %v564_v22 = vld [vmem:[#allocation2 + $0x8] sm:$0xff] }
 0x130   : > { %v565_v23 = vadd.f32 %v564_v22, %v563_v21 }
 0x132   : > { %v566_v24 = vrot.slane %v565_v23, 4 }
 0x134   : > { %v567_v25 = vadd.f32 %v566_v24, %v565_v23 }
 0x136   : > { %v568_v26 = vrot.slane %v567_v25, 2 }
 0x138   : > { %v569_v27 = vadd.f32 %v568_v26, %v567_v25 }
 0x13a   : > { %v570_v28 = vrot.slane %v569_v27, 1 }
 0x13c   : > { %v571_v29 = vadd.f32 %v570_v28, %v569_v27 }
 0x13e   : > { %v573_v30 = vmul.f32 0.0625, %v571_v29 }
 0x140   : > { %v574_v31 = vsub.f32 %v563_v21, %v573_v30  ;;  %v575_v32 = vsub.f32 %v564_v22, %v573_v30 }
 0x142   : > { %v576_v33 = vmul.f32 %v574_v31, %v574_v31  ;;  %v577_v34 = vmul.f32 %v575_v32, %v575_v32 }
 0x144   : > { %v578_v35 = vadd.f32 %v577_v34, %v576_v33 }
 0x146   : > { %v579_v36 = vrot.slane %v578_v35, 4 }
 0x148   : > { %v580_v37 = vadd.f32 %v579_v36, %v578_v35 }
 0x14a   : > { %v581_v38 = vrot.slane %v580_v37, 2 }
 0x14c   : > { %v582_v39 = vadd.f32 %v581_v38, %v580_v37 }
 0x14e   : > { %v583_v40 = vrot.slane %v582_v39, 1 }
 0x150   : > { %v584_v41 = vadd.f32 %v583_v40, %v582_v39 }
 0x152   : > { %v585_v42 = vmul.f32 0.0625, %v584_v41 }
 0x154   : > { %v586_v43 = vadd.f32 1e-05, %v585_v42 }
 0x156   : > { %915 = vrsqrt.f32 %v586_v43 }
 0x160   : > { %v916_v44 = vpop.eup %915 }
 0x161   : > { %v588_v46 = vmul.f32 %v916_v44, %v574_v31  ;;  %v589_v47 = vmul.f32 %v916_v44, %v575_v32 }
 0x163   : > { %v597_v49 = vmul.f32 %v813_v45, %v588_v46  ;;  %v598_v50 = vmul.f32 %v813_v45, %v589_v47 }
 0x165   : > { %v606_v53 = vadd.f32 %v814_v48, %v597_v49  ;;  %v607_v54 = vadd.f32 %v814_v48, %v598_v50 }
 0x167   : > { %v610_v55 = vadd.f32 %v608_v51, %v606_v53  ;;  %v611_v56 = vadd.f32 %v609_v52, %v607_v54 }
 0x169   : > { %612 = vst [vmem:[%s1086_s14] sm:$0xff] %v610_v55  ;;  %613 = vst [vmem:[%s1086_s14 + $0x8] sm:$0xff] %v611_v56 }
 0x16a PF: > { %s15_s24 = sadd.s32 1, %s971_s24   ;;  %s1138_s18 = smov %s951_s19 }
 0x16b   : > { %p12_p0 = scmp.ge.s32.totalorder %s15_s24, 8   ;;  %s1139_s19 = smov %s1057_s6 }
 0x16c   : > { %s1140_s20 = smov %s963_s22  ;;  %s1141_s21 = smov %s967_s23 }
 0x16d   : > { %s1142_s22 = smov %s1145_s25  ;;  %s1143_s23 = smov %s1149_s26 }
 0x16e   :  { %14 = sbr.rel (!%p12_p0) target bundleno = 4 (0x4), region = 136 }

// kernel: _lambda_.22
= control target key start
LH: loop header
LB: loop body
LE: loop exit
PB: predicated region body
PF: predicated region fallthrough
CT: control target
= control target key end

     0   :  { %s333_s12 = smov 0   ;;  %s369_s0 = inlined_call_operand.vmem [shape: f32[2,16,32], index: 0, kind: input, shape index: {}]   ;;  %s370_s1 = inlined_call_operand.vmem [shape: f32[1,32], index: 1, kind: input, shape index: {}]   ;;  %s371_s2 = inlined_call_operand.vmem [shape: f32[1,32], index: 2, kind: input, shape index: {}]   ;;  %s372_s3 = inlined_call_operand.vmem [shape: f32[2,16,32], index: 3, kind: output, shape index: {}]  }
   0x1 LB: > { %s280_s13 = sadd.s32 4294967295, %s311_s12   ;;  %p284_p0 = scmp.ge.s32.totalorder %s311_s12, 1  ;;  %s311_s12 = sphi %s333_s12, %s13_s12  }
   0x2   : > { %p137_p1 = scmp.lt.s32.totalorder %s311_s12, 3 }
   0x4   : > { %p138_p2 = pnand %p284_p0, %p137_p1 }
   0x5   : > { %p161_p3 = scmp.lt.s32.totalorder (!%p138_p2), %s280_s13, 1  ;;  %vm173_vm0 = vcmask (!%p138_p2), 261120   ;;  %v289_v28 = vld [vmem:[%s370_s1] ss:$0 sm:$0xff] (!%p138_p2) }
   0x6   : > { %141 = sbr.rel (%p138_p2) target bundleno = 77 (0x4d), region = 32  ;;  %v290_v31 = vld [vmem:[%s371_s2] ss:$0 sm:$0xff] (!%p138_p2) }
   0xd   : > { %s374_s13 = smov (!%p161_p3, %s280_s13), 1 }
   0xe   : > { %s293_s14 = sshll.u32 %s374_s13, 4 }
   0xf   : > { %s165_s17 = scalar_lea.vmem %s369_s0, %s293_s14  ;;  %s170_s24 = scalar_lea.vmem %s372_s3, %s293_s14 }
  0x10   : > { %v171_v0 = vld [vmem:[%s165_s17] sm:$0xff]  ;;  %v172_v1 = vld [vmem:[%s165_s17 + $0x8] sm:$0xff] }
  0x11   : > { %v174_v2 = vsel %vm173_vm0, %v171_v0, 0.0  ;;  %v175_v3 = vsel %vm173_vm0, %v172_v1, 0.0 }
  0x12   : > { %v176_v4 = vadd.f32 %v175_v3, %v174_v2 }
  0x14   : > { %v177_v5 = vrot.slane %v176_v4, 4 }
  0x16   : > { %v178_v6 = vadd.f32 %v177_v5, %v176_v4 }
  0x18   : > { %v179_v7 = vrot.slane %v178_v6, 2 }
  0x1a   : > { %v180_v8 = vadd.f32 %v179_v7, %v178_v6 }
  0x1c   : > { %v181_v9 = vrot.slane %v180_v8, 1 }
  0x1e   : > { %v182_v10 = vadd.f32 %v181_v9, %v180_v8 }
  0x20   : > { %v184_v11 = vmul.f32 0.0625, %v182_v10 }
  0x22   : > { %v185_v12 = vsub.f32 %v171_v0, %v184_v11  ;;  %v186_v13 = vsub.f32 %v172_v1, %v184_v11 }
  0x24   : > { %v187_v14 = vmul.f32 %v185_v12, %v185_v12  ;;  %v188_v15 = vmul.f32 %v186_v13, %v186_v13 }
  0x26   : > { %v189_v16 = vsel %vm173_vm0, %v187_v14, 0.0  ;;  %v190_v17 = vsel %vm173_vm0, %v188_v15, 0.0 }
  0x27   : > { %v191_v18 = vadd.f32 %v190_v17, %v189_v16 }
  0x29   : > { %v192_v19 = vrot.slane %v191_v18, 4 }
  0x2b   : > { %v193_v20 = vadd.f32 %v192_v19, %v191_v18 }
  0x2d   : > { %v194_v21 = vrot.slane %v193_v20, 2 }
  0x2f   : > { %v195_v22 = vadd.f32 %v194_v21, %v193_v20 }
  0x31   : > { %v196_v23 = vrot.slane %v195_v22, 1 }
  0x33   : > { %v197_v24 = vadd.f32 %v196_v23, %v195_v22 }
  0x35   : > { %v198_v25 = vmul.f32 0.0625, %v197_v24 }
  0x37   : > { %v199_v26 = vadd.f32 1e-05, %v198_v25 }
  0x39   : > { %303 = vrsqrt.f32 %v199_v26 }
  0x43   : > { %v304_v27 = vpop.eup %303 }
  0x44   : > { %v201_v29 = vmul.f32 %v304_v27, %v185_v12  ;;  %v202_v30 = vmul.f32 %v304_v27, %v186_v13 }
  0x46   : > { %v210_v32 = vmul.f32 %v289_v28, %v201_v29  ;;  %v211_v33 = vmul.f32 %v289_v28, %v202_v30 }
  0x48   : > { %v219_v34 = vadd.f32 %v290_v31, %v210_v32  ;;  %v220_v35 = vadd.f32 %v290_v31, %v211_v33 }
  0x4a   : > { %v221_v36 = vmax.f32 %v219_v34, 0.0  ;;  %v222_v37 = vmax.f32 %v220_v35, 0.0 }
  0x4c   : > { %223 = vst.msk [vmem:[%s170_s24] sm:$0xff] %vm173_vm0, %v221_v36  ;;  %224 = vst.msk [vmem:[%s170_s24 + $0x8] sm:$0xff] %vm173_vm0, %v222_v37 }
  0x4d PF: > { %s13_s12 = sadd.s32 1, %s311_s12  }
  0x4e   : > { %p10_p4 = scmp.ge.s32.totalorder %s13_s12, 4  }
  0x50   :  { %12 = sbr.rel (!%p10_p4) target bundleno = 1 (0x1), region = 62 }

// kernel: _lambda_.18
= control target key start
LH: loop header
LB: loop body
LE: loop exit
PB: predicated region body
PF: predicated region fallthrough
CT: control target
= control target key end

     0   :  { %s922_s15 = smov 0   ;;  %s924_s16 = smov 0   ;;  %s1041_s0 = inlined_call_operand.vmem [shape: bf16[1,32,384], index: 0, kind: input, shape index: {}]   ;;  %s1042_s1 = inlined_call_operand.vmem [shape: bf16[1,384,128], index: 1, kind: input, shape index: {}]   ;;  %s1043_s2 = inlined_call_operand.vmem [shape: f32[1,128], index: 2, kind: input, shape index: {}]   ;;  %s1044_s3 = inlined_call_operand.vmem [shape: f32[1,128], index: 3, kind: input, shape index: {}]   ;;  %s1045_s4 = inlined_call_operand.vmem [shape: f32[1,32,128], index: 4, kind: output, shape index: {}]  }
   0x1   :  { %s926_s17 = smov 0   ;;  %s928_s18 = smov 0  }
   0x2   :  { %s930_s19 = smov 0   ;;  %s932_s20 = smov 0  }
   0x3   :  { %s934_s21 = smov 0  }
   0x4 LB: > { %s29_s22 = sadd.s32 1, %s884_s19  ;;  %s36_s23 = sadd.s32 1, %s888_s20  ;;  %s892_s21 = sphi %s934_s21, %s14_s21   ;;  %s888_s20 = sphi %s932_s20, %s1051_s20   ;;  %s884_s19 = sphi %s930_s19, %s1050_s19   ;;  %s880_s18 = sphi %s928_s18, %s1049_s18   ;;  %s876_s17 = sphi %s926_s17, %s1048_s17   ;;  %s872_s16 = sphi %s924_s16, %s1047_s16   ;;  %s868_s15 = sphi %s922_s15, %s1046_s15  }
   0x5   : > { %p30_p0 = scmp.ge.s32.totalorder %s29_s22, 3  ;;  %p58_p1 = scmp.ne.s32.totalorder %s872_s16, %s868_s15 }
   0x6   : > { %p59_p2 = scmp.eq.s32.totalorder %s892_s21, 0  ;;  %s51_s27 = sadd.s32 1, %s872_s16 }
   0x7   : > { %s1053_s22 = smov (%p30_p0, %s29_s22), 0  ;;  %s1055_s23 = smov (!%p30_p0, %s36_s23), %s888_s20 }
   0x8   : > { %p60_p3 = por %p59_p2, %p58_p1  ;;  %p38_p4 = scmp.ge.s32.totalorder %s1055_s23, 2 }
   0x9   : > { %s47_s24 = ssub.s32 %s884_s19, %s1053_s22  ;;  %p712_p6 = scmp.ge.s32.totalorder %s892_s21, 6 }
   0xa   : > { %s1057_s23 = smov (%p38_p4, %s1055_s23), 0 }
   0xb   : > { %s45_s25 = ssub.s32 %s888_s20, %s1057_s23  ;;  %208 = sbr.rel (%p712_p6) target bundleno = 26 (0x1a), region = 24 }
   0xc   : > { %s48_s26 = sor.u32 %s47_s24, %s45_s25 }
   0xd   : > { %p49_p5 = scmp.eq.s32.totalorder %s48_s26, 0 }
   0xf   : > { %s973_s28 = scalar_select %p49_p5, %s872_s16, %s51_s27  }
  0x12   : > { %211 = sbr.rel (!%p60_p3) target bundleno = 26 (0x1a), region = 28  ;;  %s213_s29 = sand.u32 (%p60_p3), 1, %s872_s16  }
  0x13   : > { %s767_s30 = smul.u32 (%p60_p3), 6, %s888_s20  ;;  %s713_s5 = sshll.u32 (%p60_p3), %s213_s29, 3 }
  0x14   : > { %s215_s11 = scalar_lea.vmem (%p60_p3), [#allocation3], %s713_s5 }
  0x15   : > { %s218_s6 = sadd.s32 (%p60_p3), %s884_s19, %s767_s30 }
  0x16   : > { %s716_s7 = sshll.u32 (%p60_p3), %s218_s6, 2 }
  0x17   : > { %s222_s10 = scalar_lea.vmem (%p60_p3), %s1041_s0, %s716_s7 }
  0x18   : > { %v238_v0 = vld [vmem:[%s222_s10] sm:$0xf] (%p60_p3)  ;;  %v240_v1 = vld [vmem:[%s222_s10 + $0xc] sm:$0xf] (%p60_p3) }
  0x19   : > { %239 = vst [vmem:[%s215_s11] sm:$0xf] %v238_v0  ;;  %241 = vst [vmem:[%s215_s11 + $0x4] sm:$0xf] %v240_v1 }
  0x1a PF: > { %p717_p7 = scmp.ge.s32.totalorder %s892_s21, 1  ;;  %p283_p8 = scmp.lt.s32.totalorder %s892_s21, 7 }
  0x1c   : > { %p284_p9 = pnand %p717_p7, %p283_p8 }
  0x1d   : > { %s290_s12 = sand.u32 (!%p284_p9), 1, %s868_s15   ;;  %s719_s13 = sshll.u32 (!%p284_p9), %s876_s17, 4 }
  0x1e   : > { %287 = sbr.rel (%p284_p9) target bundleno = 362 (0x16a), region = 73  ;;  %s986_s14 = sshll.u32 (!%p284_p9), %s290_s12, 3 }
  0x1f   : > { %p344_p10 = scmp.lt.s32.totalorder (!%p284_p9), %s719_s13, 47  ;;  %s721_s24 = sshll.u32 (!%p284_p9), %s880_s18, 1 }
  0x20   : > { %p363_p11 = scmp.lt.s32.totalorder (!%p284_p9), %s721_s24, 3  ;;  %s292_s7 = scalar_lea.vmem (!%p284_p9), [#allocation3], %s986_s14 }
  0x21   : > { %p723_p12 = scmp.ne.s32.totalorder (!%p284_p9), %s876_s17, 0 }
  0x25   : > { %s1059_s13 = smov (!%p344_p10, %s719_s13), 47  ;;  %s1061_s24 = smov (!%p363_p11, %s721_s24), 3 }
  0x26   : > { %s720_s25 = sshll.u32 %s1059_s13, 2  ;;  %s722_s30 = sshll.u32 %s1061_s24, 3  ;;  %v894_v2 = vmov (!%p723_p12), 0.0  }
  0x27   : > { %s992_s29 = scalar_lea.vmem %s1042_s1, %s720_s25  ;;  %s997_s15 = scalar_lea.vmem %s1045_s4, %s722_s30  ;;  %378 = vst [vmem:[#allocation2] sm:$0xff] (!%p723_p12), %v894_v2  ;;  %379 = vst [vmem:[#allocation2 + $0x8] sm:$0xff] (!%p723_p12), %v894_v2 }
  0x28   : > { %377 = sbr.rel (%p723_p12) target bundleno = 47 (0x2f), region = 81 }
  0x2f PF: > { %v827_v3 = vld [vmem:[%s992_s29] sm:$0xff]   ;;  %v895_v4 = vmov 0.0   ;;  %v828_v5 = vld [vmem:[%s992_s29 + $0x8] sm:$0xff]   ;;  %vm896_vm0 = vmmov 0   ;;  %v829_v6 = vld [vmem:[%s992_s29 + $0x10] sm:$0xff]   ;;  %p733_p13 = scmp.ne.s32.totalorder %s876_s17, 2 }
  0x30   : > { %747 = vmatprep.subr.bf16.mxu0 %v895_v4  ;;  %763 = vmatprep.mubr.msk.bf16.mxu0 %vm896_vm0, %v895_v4  ;;  %v830_v7 = vld [vmem:[%s992_s29 + $0x18] sm:$0xff]   ;;  %v831_v8 = vld [vmem:[%s992_s29 + $0x20] sm:$0xff]   ;;  %v832_v9 = vld [vmem:[%s992_s29 + $0x28] sm:$0xff]  }
  0x31   : > { %748 = vmatpush3.bf16.msra.mxu0 %v827_v3  ;;  %v833_v10 = vld [vmem:[%s992_s29 + $0x30] sm:$0xff]   ;;  %v834_v11 = vld [vmem:[%s992_s29 + $0x38] sm:$0xff]   ;;  %v380_v13 = vld [vmem:[#allocation2] sm:$0xff] }
  0x32   : > { %749 = vmatprep.subr.bf16.mxu0 %v895_v4  ;;  %v835_v12 = vld [vmem:[%s292_s7] sm:$0xff]   ;;  %v381_v15 = vld [vmem:[#allocation2 + $0x8] sm:$0xff]  ;;  %v734_v45 = vld [vmem:[%s1043_s2] ss:$0 sm:$0xff] (!%p733_p13) }
  0x33   : > { %v735_v48 = vld [vmem:[%s1044_s3] ss:$0 sm:$0xff] (!%p733_p13) }
  0x35   : > { %750 = vmatpush3.bf16.msra.mxu0 %v828_v5 }
  0x36   : > { %751 = vmatprep.subr.bf16.mxu0 %v895_v4 }
  0x39   : > { %752 = vmatpush3.bf16.msra.mxu0 %v829_v6 }
  0x3a   : > { %753 = vmatprep.subr.bf16.mxu0 %v895_v4 }
  0x3d   : > { %754 = vmatpush3.bf16.msra.mxu0 %v830_v7 }
  0x3e   : > { %755 = vmatprep.subr.bf16.mxu0 %v895_v4 }
  0x41   : > { %756 = vmatpush3.bf16.msra.mxu0 %v831_v8 }
  0x42   : > { %757 = vmatprep.subr.bf16.mxu0 %v895_v4 }
  0x45   : > { %758 = vmatpush3.bf16.msra.mxu0 %v832_v9 }
  0x46   : > { %759 = vmatprep.subr.bf16.mxu0 %v895_v4 }
  0x49   : > { %760 = vmatpush3.bf16.msra.mxu0 %v833_v10 }
  0x4a   : > { %761 = vmatprep.subr.bf16.mxu0 %v895_v4 }
  0x4d   : > { %762 = vmatpush3.bf16.msra.mxu0 %v834_v11 }
  0x50   : > { %764 = vmatmul.mubr.bf16.vlgmr.msra.gmra.mrb[0].mxu0 %v835_v12 }
 0x122   : > { %502 = sbr.rel (%p733_p13) target bundleno = 362 (0x16a), region = 85 }
 0x123   : > { %v488_v14 = vpop.f32.mrb[0].mxu0 }
 0x124   : > { %v495_v16 = vadd.f32 %v488_v14, %v380_v13  ;;  %v765_v17 = vpop.f32.mrb[1].mxu0 }
 0x125   : > { %v491_v18 = vpop.f32.mrb[2].mxu0 }
 0x126   : > { %497 = vst [vmem:[#allocation2] sm:$0xff] %v495_v16  ;;  %v496_v19 = vadd.f32 %v491_v18, %v381_v15  ;;  %v766_v20 = vpop.f32.mrb[3].mxu0 }
 0x128   : > { %498 = vst [vmem:[#allocation2 + $0x8] sm:$0xff] %v496_v19 }
 0x12d   : > { %v503_v21 = vld [vmem:[#allocation2] sm:$0xff] }
 0x12f   : > { %v504_v22 = vld [vmem:[#allocation2 + $0x8] sm:$0xff] }
 0x130   : > { %v505_v23 = vadd.f32 %v504_v22, %v503_v21 }
 0x132   : > { %v506_v24 = vrot.slane %v505_v23, 4 }
 0x134   : > { %v507_v25 = vadd.f32 %v506_v24, %v505_v23 }
 0x136   : > { %v508_v26 = vrot.slane %v507_v25, 2 }
 0x138   : > { %v509_v27 = vadd.f32 %v508_v26, %v507_v25 }
 0x13a   : > { %v510_v28 = vrot.slane %v509_v27, 1 }
 0x13c   : > { %v511_v29 = vadd.f32 %v510_v28, %v509_v27 }
 0x13e   : > { %v513_v30 = vmul.f32 0.0625, %v511_v29 }
 0x140   : > { %v514_v31 = vsub.f32 %v503_v21, %v513_v30  ;;  %v515_v32 = vsub.f32 %v504_v22, %v513_v30 }
 0x142   : > { %v516_v33 = vmul.f32 %v514_v31, %v514_v31  ;;  %v517_v34 = vmul.f32 %v515_v32, %v515_v32 }
 0x144   : > { %v518_v35 = vadd.f32 %v517_v34, %v516_v33 }
 0x146   : > { %v519_v36 = vrot.slane %v518_v35, 4 }
 0x148   : > { %v520_v37 = vadd.f32 %v519_v36, %v518_v35 }
 0x14a   : > { %v521_v38 = vrot.slane %v520_v37, 2 }
 0x14c   : > { %v522_v39 = vadd.f32 %v521_v38, %v520_v37 }
 0x14e   : > { %v523_v40 = vrot.slane %v522_v39, 1 }
 0x150   : > { %v524_v41 = vadd.f32 %v523_v40, %v522_v39 }
 0x152   : > { %v525_v42 = vmul.f32 0.0625, %v524_v41 }
 0x154   : > { %v526_v43 = vadd.f32 1e-05, %v525_v42 }
 0x156   : > { %836 = vrsqrt.f32 %v526_v43 }
 0x160   : > { %v837_v44 = vpop.eup %836 }
 0x161   : > { %v528_v46 = vmul.f32 %v837_v44, %v514_v31  ;;  %v529_v47 = vmul.f32 %v837_v44, %v515_v32 }
 0x163   : > { %v537_v49 = vmul.f32 %v734_v45, %v528_v46  ;;  %v538_v50 = vmul.f32 %v734_v45, %v529_v47 }
 0x165   : > { %v546_v51 = vadd.f32 %v735_v48, %v537_v49  ;;  %v547_v52 = vadd.f32 %v735_v48, %v538_v50 }
 0x167   : > { %v548_v53 = vmax.f32 %v546_v51, 0.0  ;;  %v549_v54 = vmax.f32 %v547_v52, 0.0 }
 0x169   : > { %550 = vst [vmem:[%s997_s15] sm:$0xff] %v548_v53  ;;  %551 = vst [vmem:[%s997_s15 + $0x8] sm:$0xff] %v549_v54 }
 0x16a PF: > { %s14_s21 = sadd.s32 1, %s892_s21   ;;  %s1046_s15 = smov %s872_s16 }
 0x16b   : > { %p11_p0 = scmp.ge.s32.totalorder %s14_s21, 8   ;;  %s1047_s16 = smov %s973_s28 }
 0x16c   : > { %s1048_s17 = smov %s884_s19  ;;  %s1049_s18 = smov %s888_s20 }
 0x16d   : > { %s1050_s19 = smov %s1053_s22  ;;  %s1051_s20 = smov %s1057_s23 }
 0x16e   :  { %13 = sbr.rel (!%p11_p0) target bundleno = 4 (0x4), region = 129 }

// kernel: _lambda_.23
= control target key start
LH: loop header
LB: loop body
LE: loop exit
PB: predicated region body
PF: predicated region fallthrough
CT: control target
= control target key end

     0   :  { %s680_s9 = smov 0   ;;  %s682_s10 = smov 0   ;;  %s721_s0 = inlined_call_operand.vmem [shape: bf16[4,32,128], index: 0, kind: input, shape index: {}]   ;;  %s722_s1 = inlined_call_operand.vmem [shape: bf16[4,128,128], index: 1, kind: input, shape index: {}]   ;;  %s723_s2 = inlined_call_operand.vmem [shape: f32[4,32,128], index: 2, kind: output, shape index: {}]  }
   0x1   :  { %s684_s11 = smov 0  }
   0x2 LB: > { %s38_s12 = sadd.s32 1, %s659_s10  ;;  %p555_p0 = scmp.ge.s32.totalorder %s663_s11, 1  ;;  %s663_s11 = sphi %s684_s11, %s12_s11   ;;  %s659_s10 = sphi %s682_s10, %s725_s10   ;;  %s655_s9 = sphi %s680_s9, %s724_s9  }
   0x3   : > { %p40_p1 = scmp.ge.s32.totalorder %s38_s12, 4  ;;  %p176_p2 = scmp.lt.s32.totalorder %s663_s11, 5 }
   0x5   : > { %s727_s12 = smov (%p40_p1, %s38_s12), 0  ;;  %p177_p3 = pnand %p555_p0, %p176_p2 }
   0x6   : > { %p225_p4 = scmp.lt.s32.totalorder (!%p177_p3), %s655_s9, 3 }
   0x7   : > { %180 = sbr.rel (%p177_p3) target bundleno = 266 (0x10a), region = 28 }
   0xe   : > { %s729_s9 = smov (!%p225_p4, %s655_s9), 3 }
   0xf   : > { %s575_s13 = sshll.u32 %s729_s9, 6  ;;  %s574_s17 = sshll.u32 %s729_s9, 4 }
  0x10   : > { %s248_s16 = scalar_lea.vmem %s722_s1, %s575_s13  ;;  %s235_s20 = scalar_lea.vmem %s721_s0, %s574_s17 }
  0x11   : > { %v631_v0 = vld [vmem:[%s248_s16] sm:$0xff]   ;;  %v632_v1 = vld [vmem:[%s248_s16 + $0x8] sm:$0xff]   ;;  %v633_v2 = vld [vmem:[%s248_s16 + $0x10] sm:$0xff]   ;;  %s576_s21 = sshll.u32 %s729_s9, 5 }
  0x12   : > { %587 = vmatprep.subr.bf16.mxu0 %v631_v0  ;;  %v634_v3 = vld [vmem:[%s248_s16 + $0x18] sm:$0xff]   ;;  %v639_v4 = vld [vmem:[%s235_s20] sm:$0xff]   ;;  %v636_v6 = vld [vmem:[%s248_s16 + $0x28] sm:$0xff]   ;;  %s261_s24 = scalar_lea.vmem %s723_s2, %s576_s21 }
  0x13   : > { %588 = vmatpush3.bf16.msra.mxu0 %v631_v0  ;;  %603 = vmatprep.mubr.bf16.mxu0 %v639_v4  ;;  %v635_v5 = vld [vmem:[%s248_s16 + $0x20] sm:$0xff]   ;;  %v637_v7 = vld [vmem:[%s248_s16 + $0x30] sm:$0xff]   ;;  %v638_v8 = vld [vmem:[%s248_s16 + $0x38] sm:$0xff]  }
  0x14   : > { %589 = vmatprep.subr.bf16.mxu0 %v632_v1  ;;  %v640_v9 = vld [vmem:[%s235_s20 + $0x8] sm:$0xff]  }
  0x17   : > { %590 = vmatpush3.bf16.msra.mxu0 %v632_v1 }
  0x18   : > { %591 = vmatprep.subr.bf16.mxu0 %v633_v2 }
  0x1b   : > { %592 = vmatpush3.bf16.msra.mxu0 %v633_v2 }
  0x1c   : > { %593 = vmatprep.subr.bf16.mxu0 %v634_v3 }
  0x1f   : > { %594 = vmatpush3.bf16.msra.mxu0 %v634_v3 }
  0x20   : > { %595 = vmatprep.subr.bf16.mxu0 %v635_v5 }
  0x23   : > { %596 = vmatpush3.bf16.msra.mxu0 %v635_v5 }
  0x24   : > { %597 = vmatprep.subr.bf16.mxu0 %v636_v6 }
  0x27   : > { %598 = vmatpush3.bf16.msra.mxu0 %v636_v6 }
  0x28   : > { %599 = vmatprep.subr.bf16.mxu0 %v637_v7 }
  0x2b   : > { %600 = vmatpush3.bf16.msra.mxu0 %v637_v7 }
  0x2c   : > { %601 = vmatprep.subr.bf16.mxu0 %v638_v8 }
  0x2f   : > { %602 = vmatpush3.bf16.msra.mxu0 %v638_v8 }
  0x32   : > { %604 = vmatmul.mubr.bf16.vlgmr.msra.gmra.mrb[0].mxu0 %v640_v9 }
 0x105   : > { %v605_v10 = vpop.f32.mrb[0].mxu0 }
 0x106   : > { %422 = vst [vmem:[%s261_s24 + $0x10] sm:$0xff] %v605_v10  ;;  %v390_v11 = vpop.f32.mrb[1].mxu0 }
 0x107   : > { %420 = vst [vmem:[%s261_s24] sm:$0xff] %v390_v11  ;;  %v606_v12 = vpop.f32.mrb[2].mxu0 }
 0x108   : > { %423 = vst [vmem:[%s261_s24 + $0x18] sm:$0xff] %v606_v12  ;;  %v393_v13 = vpop.f32.mrb[3].mxu0 }
 0x109   : > { %421 = vst [vmem:[%s261_s24 + $0x8] sm:$0xff] %v393_v13 }
 0x10a PF: > { %s12_s11 = sadd.s32 1, %s663_s11   ;;  %s724_s9 = smov %s659_s10 }
 0x10b   : > { %p9_p5 = scmp.ge.s32.totalorder %s12_s11, 6   ;;  %s725_s10 = smov %s727_s12 }
 0x10d   :  { %11 = sbr.rel (!%p9_p5) target bundleno = 2 (0x2), region = 69 }

// kernel: _lambda_.24
= control target key start
LH: loop header
LB: loop body
LE: loop exit
PB: predicated region body
PF: predicated region fallthrough
CT: control target
= control target key end

     0   :  { %s405_s12 = smov 0   ;;  %s459_s0 = inlined_call_operand.vmem [shape: f32[2,64,16], index: 0, kind: input, shape index: {}]   ;;  %s460_s1 = inlined_call_operand.vmem [shape: f32[1,16], index: 1, kind: input, shape index: {}]   ;;  %s461_s2 = inlined_call_operand.vmem [shape: f32[1,16], index: 2, kind: input, shape index: {}]   ;;  %s462_s3 = inlined_call_operand.vmem [shape: f32[2,64,16], index: 3, kind: output, shape index: {}]  }
   0x1 LB: > { %s352_s13 = sadd.s32 4294967295, %s383_s12   ;;  %p356_p0 = scmp.ge.s32.totalorder %s383_s12, 1  ;;  %s383_s12 = sphi %s405_s12, %s13_s12  }
   0x2   : > { %p137_p1 = scmp.lt.s32.totalorder %s383_s12, 3 }
   0x4   : > { %p138_p2 = pnand %p356_p0, %p137_p1 }
   0x5   : > { %p161_p3 = scmp.lt.s32.totalorder (!%p138_p2), %s352_s13, 1  ;;  %vm179_vm0 = vcmask (!%p138_p2), 130048  }
   0x6   : > { %141 = sbr.rel (%p138_p2) target bundleno = 104 (0x68), region = 32 }
   0xd   : > { %s464_s13 = smov (!%p161_p3, %s352_s13), 1 }
   0xe   : > { %s365_s14 = sshll.u32 %s464_s13, 6 }
   0xf   : > { %s165_s17 = scalar_lea.vmem %s459_s0, %s365_s14  ;;  %s170_s24 = scalar_lea.vmem %s462_s3, %s365_s14 }
  0x10   : > { %v171_v0 = vld [vmem:[%s165_s17] sm:$0xff]  ;;  %v172_v1 = vld [vmem:[%s165_s17 + $0x8] sm:$0xff]  ;;  %v173_v2 = vld [vmem:[%s165_s17 + $0x10] sm:$0xff] }
  0x11   : > { %v174_v3 = vld [vmem:[%s165_s17 + $0x18] sm:$0xff]  ;;  %v180_v4 = vsel %vm179_vm0, %v171_v0, 0.0  ;;  %v181_v5 = vsel %vm179_vm0, %v172_v1, 0.0  ;;  %v183_v6 = vsel %vm179_vm0, %v173_v2, 0.0  ;;  %v175_v7 = vld [vmem:[%s165_s17 + $0x20] sm:$0xff]  ;;  %v176_v10 = vld [vmem:[%s165_s17 + $0x28] sm:$0xff] }
  0x12   : > { %v182_v8 = vadd.f32 %v181_v5, %v180_v4  ;;  %v185_v9 = vsel %vm179_vm0, %v174_v3, 0.0  ;;  %v187_v12 = vsel %vm179_vm0, %v175_v7, 0.0  ;;  %v177_v13 = vld [vmem:[%s165_s17 + $0x30] sm:$0xff]  ;;  %v189_v15 = vsel %vm179_vm0, %v176_v10, 0.0  ;;  %v178_v16 = vld [vmem:[%s165_s17 + $0x38] sm:$0xff] }
  0x13   : > { %v191_v18 = vsel %vm179_vm0, %v177_v13, 0.0  ;;  %v193_v20 = vsel %vm179_vm0, %v178_v16, 0.0 }
  0x14   : > { %v184_v11 = vadd.f32 %v183_v6, %v182_v8  ;;  %v361_v6 = vld [vmem:[%s460_s1] ss:$0 sm:$0xff] }
  0x16   : > { %v186_v14 = vadd.f32 %v185_v9, %v184_v11  ;;  %v362_v11 = vld [vmem:[%s461_s2] ss:$0 sm:$0xff] }
  0x18   : > { %v188_v17 = vadd.f32 %v187_v12, %v186_v14 }
  0x1a   : > { %v190_v19 = vadd.f32 %v189_v15, %v188_v17 }
  0x1c   : > { %v192_v21 = vadd.f32 %v191_v18, %v190_v19 }
  0x1e   : > { %v194_v22 = vadd.f32 %v193_v20, %v192_v21 }
  0x20   : > { %v195_v23 = vrot.slane %v194_v22, 4 }
  0x22   : > { %v196_v24 = vadd.f32 %v195_v23, %v194_v22 }
  0x24   : > { %v197_v25 = vrot.slane %v196_v24, 2 }
  0x26   : > { %v198_v26 = vadd.f32 %v197_v25, %v196_v24 }
  0x28   : > { %v199_v27 = vrot.slane %v198_v26, 1 }
  0x2a   : > { %v200_v28 = vadd.f32 %v199_v27, %v198_v26 }
  0x2c   : > { %v202_v29 = vmul.f32 0.015625, %v200_v28 }
  0x2e   : > { %v203_v30 = vsub.f32 %v171_v0, %v202_v29  ;;  %v204_v31 = vsub.f32 %v172_v1, %v202_v29  ;;  %v205_v32 = vsub.f32 %v173_v2, %v202_v29  ;;  %v206_v33 = vsub.f32 %v174_v3, %v202_v29 }
  0x2f   : > { %v207_v34 = vsub.f32 %v175_v7, %v202_v29  ;;  %v208_v35 = vsub.f32 %v176_v10, %v202_v29  ;;  %v209_v40 = vsub.f32 %v177_v13, %v202_v29  ;;  %v210_v46 = vsub.f32 %v178_v16, %v202_v29 }
  0x30   : > { %v211_v36 = vmul.f32 %v203_v30, %v203_v30  ;;  %v212_v37 = vmul.f32 %v204_v31, %v204_v31  ;;  %v213_v38 = vmul.f32 %v205_v32, %v205_v32  ;;  %v214_v39 = vmul.f32 %v206_v33, %v206_v33 }
  0x31   : > { %v215_v41 = vmul.f32 %v207_v34, %v207_v34  ;;  %v216_v47 = vmul.f32 %v208_v35, %v208_v35  ;;  %v217_v50 = vmul.f32 %v209_v40, %v209_v40  ;;  %v218_v53 = vmul.f32 %v210_v46, %v210_v46 }
  0x32   : > { %v219_v42 = vsel %vm179_vm0, %v211_v36, 0.0  ;;  %v220_v43 = vsel %vm179_vm0, %v212_v37, 0.0  ;;  %v222_v44 = vsel %vm179_vm0, %v213_v38, 0.0  ;;  %v224_v48 = vsel %vm179_vm0, %v214_v39, 0.0 }
  0x33   : > { %v221_v45 = vadd.f32 %v220_v43, %v219_v42  ;;  %v226_v51 = vsel %vm179_vm0, %v215_v41, 0.0  ;;  %v228_v54 = vsel %vm179_vm0, %v216_v47, 0.0  ;;  %v230_v56 = vsel %vm179_vm0, %v217_v50, 0.0 }
  0x34   : > { %v232_v58 = vsel %vm179_vm0, %v218_v53, 0.0 }
  0x35   : > { %v223_v49 = vadd.f32 %v222_v44, %v221_v45 }
  0x37   : > { %v225_v52 = vadd.f32 %v224_v48, %v223_v49 }
  0x39   : > { %v227_v55 = vadd.f32 %v226_v51, %v225_v52 }
  0x3b   : > { %v229_v57 = vadd.f32 %v228_v54, %v227_v55 }
  0x3d   : > { %v231_v59 = vadd.f32 %v230_v56, %v229_v57 }
  0x3f   : > { %v233_v60 = vadd.f32 %v232_v58, %v231_v59 }
  0x41   : > { %v234_v61 = vrot.slane %v233_v60, 4 }
  0x43   : > { %v235_v62 = vadd.f32 %v234_v61, %v233_v60 }
  0x45   : > { %v236_v63 = vrot.slane %v235_v62, 2 }
  0x47   : > { %v237_v0 = vadd.f32 %v236_v63, %v235_v62 }
  0x49   : > { %v238_v1 = vrot.slane %v237_v0, 1 }
  0x4b   : > { %v239_v2 = vadd.f32 %v238_v1, %v237_v0 }
  0x4d   : > { %v240_v3 = vmul.f32 0.015625, %v239_v2 }
  0x4f   : > { %v241_v4 = vadd.f32 1e-05, %v240_v3 }
  0x51   : > { %375 = vrsqrt.f32 %v241_v4 }
  0x5b   : > { %v376_v5 = vpop.eup %375 }
  0x5c   : > { %v243_v7 = vmul.f32 %v376_v5, %v203_v30  ;;  %v244_v8 = vmul.f32 %v376_v5, %v204_v31  ;;  %v245_v9 = vmul.f32 %v376_v5, %v205_v32  ;;  %v246_v10 = vmul.f32 %v376_v5, %v206_v33 }
  0x5d   : > { %v247_v12 = vmul.f32 %v376_v5, %v207_v34  ;;  %v248_v13 = vmul.f32 %v376_v5, %v208_v35  ;;  %v249_v14 = vmul.f32 %v376_v5, %v209_v40  ;;  %v250_v15 = vmul.f32 %v376_v5, %v210_v46 }
  0x5e   : > { %v258_v16 = vmul.f32 %v361_v6, %v243_v7  ;;  %v259_v17 = vmul.f32 %v361_v6, %v244_v8  ;;  %v260_v18 = vmul.f32 %v361_v6, %v245_v9  ;;  %v261_v19 = vmul.f32 %v361_v6, %v246_v10 }
  0x5f   : > { %v262_v20 = vmul.f32 %v361_v6, %v247_v12  ;;  %v263_v21 = vmul.f32 %v361_v6, %v248_v13  ;;  %v264_v22 = vmul.f32 %v361_v6, %v249_v14  ;;  %v265_v23 = vmul.f32 %v361_v6, %v250_v15 }
  0x60   : > { %v273_v24 = vadd.f32 %v362_v11, %v258_v16  ;;  %v274_v25 = vadd.f32 %v362_v11, %v259_v17  ;;  %v275_v26 = vadd.f32 %v362_v11, %v260_v18  ;;  %v276_v27 = vadd.f32 %v362_v11, %v261_v19 }
  0x61   : > { %v277_v28 = vadd.f32 %v362_v11, %v262_v20  ;;  %v278_v29 = vadd.f32 %v362_v11, %v263_v21  ;;  %v279_v30 = vadd.f32 %v362_v11, %v264_v22  ;;  %v280_v31 = vadd.f32 %v362_v11, %v265_v23 }
  0x62   : > { %v281_v32 = vmax.f32 %v273_v24, 0.0  ;;  %v282_v33 = vmax.f32 %v274_v25, 0.0  ;;  %v283_v34 = vmax.f32 %v275_v26, 0.0  ;;  %v284_v35 = vmax.f32 %v276_v27, 0.0 }
  0x63   : > { %v285_v36 = vmax.f32 %v277_v28, 0.0  ;;  %v286_v37 = vmax.f32 %v278_v29, 0.0  ;;  %v287_v38 = vmax.f32 %v279_v30, 0.0  ;;  %v288_v39 = vmax.f32 %v280_v31, 0.0 }
  0x64   : > { %289 = vst.msk [vmem:[%s170_s24] sm:$0xff] %vm179_vm0, %v281_v32  ;;  %290 = vst.msk [vmem:[%s170_s24 + $0x8] sm:$0xff] %vm179_vm0, %v282_v33 }
  0x65   : > { %291 = vst.msk [vmem:[%s170_s24 + $0x10] sm:$0xff] %vm179_vm0, %v283_v34  ;;  %292 = vst.msk [vmem:[%s170_s24 + $0x18] sm:$0xff] %vm179_vm0, %v284_v35 }
  0x66   : > { %293 = vst.msk [vmem:[%s170_s24 + $0x20] sm:$0xff] %vm179_vm0, %v285_v36  ;;  %294 = vst.msk [vmem:[%s170_s24 + $0x28] sm:$0xff] %vm179_vm0, %v286_v37 }
  0x67   : > { %295 = vst.msk [vmem:[%s170_s24 + $0x30] sm:$0xff] %vm179_vm0, %v287_v38  ;;  %296 = vst.msk [vmem:[%s170_s24 + $0x38] sm:$0xff] %vm179_vm0, %v288_v39 }
  0x68 PF: > { %s13_s12 = sadd.s32 1, %s383_s12  }
  0x69   : > { %p10_p4 = scmp.ge.s32.totalorder %s13_s12, 4  }
  0x6b   :  { %12 = sbr.rel (!%p10_p4) target bundleno = 1 (0x1), region = 62 }

// kernel: _lambda_.25
= control target key start
LH: loop header
LB: loop body
LE: loop exit
PB: predicated region body
PF: predicated region fallthrough
CT: control target
= control target key end

     0   :  { %s894_s9 = smov 0   ;;  %s896_s10 = smov 0   ;;  %s972_s0 = inlined_call_operand.vmem [shape: bf16[4,128,128], index: 0, kind: input, shape index: {}]   ;;  %s973_s1 = inlined_call_operand.vmem [shape: bf16[4,128,128], index: 1, kind: input, shape index: {}]   ;;  %s974_s2 = inlined_call_operand.vmem [shape: f32[4,128,128], index: 2, kind: output, shape index: {}]  }
   0x1   :  { %s898_s11 = smov 0  }
   0x2 LB: > { %s38_s12 = sadd.s32 1, %s873_s10  ;;  %p723_p0 = scmp.ge.s32.totalorder %s877_s11, 1  ;;  %s877_s11 = sphi %s898_s11, %s12_s11   ;;  %s873_s10 = sphi %s896_s10, %s976_s10   ;;  %s869_s9 = sphi %s894_s9, %s975_s9  }
   0x3   : > { %p40_p1 = scmp.ge.s32.totalorder %s38_s12, 4  ;;  %p176_p2 = scmp.lt.s32.totalorder %s877_s11, 5 }
   0x5   : > { %s978_s12 = smov (%p40_p1, %s38_s12), 0  ;;  %p177_p3 = pnand %p723_p0, %p176_p2 }
   0x6   : > { %p225_p4 = scmp.lt.s32.totalorder (!%p177_p3), %s869_s9, 3 }
   0x7   : > { %180 = sbr.rel (%p177_p3) target bundleno = 274 (0x112), region = 28 }
   0xe   : > { %s980_s9 = smov (!%p225_p4, %s869_s9), 3 }
   0xf   : > { %s748_s13 = sshll.u32 %s980_s9, 6  ;;  %s750_s20 = sshll.u32 %s980_s9, 7 }
  0x10   : > { %s918_s16 = scalar_lea.vmem %s973_s1, %s748_s13  ;;  %s926_s19 = scalar_lea.vmem %s972_s0, %s748_s13 }
  0x11   : > { %v839_v0 = vld [vmem:[%s918_s16] sm:$0xff]   ;;  %v840_v1 = vld [vmem:[%s918_s16 + $0x8] sm:$0xff]   ;;  %v841_v2 = vld [vmem:[%s918_s16 + $0x10] sm:$0xff]   ;;  %s945_s23 = scalar_lea.vmem %s974_s2, %s750_s20 }
  0x12   : > { %767 = vmatprep.subr.bf16.mxu0 %v839_v0  ;;  %799 = vmatprep.subr.bf16.mxu1 %v839_v0  ;;  %v842_v3 = vld [vmem:[%s918_s16 + $0x18] sm:$0xff]   ;;  %v847_v4 = vld [vmem:[%s926_s19] sm:$0xff]   ;;  %v844_v7 = vld [vmem:[%s918_s16 + $0x28] sm:$0xff]  }
  0x13   : > { %768 = vmatpush3.bf16.msra.mxu0 %v839_v0  ;;  %807 = vmatpush3.bf16.msra.mxu1 %v839_v0  ;;  %v848_v5 = vld [vmem:[%s926_s19 + $0x20] sm:$0xff]   ;;  %v845_v8 = vld [vmem:[%s918_s16 + $0x30] sm:$0xff]   ;;  %v846_v9 = vld [vmem:[%s918_s16 + $0x38] sm:$0xff]  }
  0x14   : > { %769 = vmatprep.subr.bf16.mxu0 %v840_v1  ;;  %800 = vmatprep.subr.bf16.mxu1 %v840_v1  ;;  %v843_v6 = vld [vmem:[%s918_s16 + $0x20] sm:$0xff]   ;;  %v849_v10 = vld [vmem:[%s926_s19 + $0x8] sm:$0xff]   ;;  %v851_v12 = vld [vmem:[%s926_s19 + $0x10] sm:$0xff]  }
  0x15   : > { %783 = vmatprep.mubr.bf16.mxu0 %v847_v4  ;;  %791 = vmatprep.mubr.bf16.mxu1 %v848_v5  ;;  %v850_v11 = vld [vmem:[%s926_s19 + $0x28] sm:$0xff]   ;;  %v852_v13 = vld [vmem:[%s926_s19 + $0x30] sm:$0xff]   ;;  %v853_v14 = vld [vmem:[%s926_s19 + $0x18] sm:$0xff]  }
  0x16   : > { %v854_v15 = vld [vmem:[%s926_s19 + $0x38] sm:$0xff]  }
  0x17   : > { %770 = vmatpush3.bf16.msra.mxu0 %v840_v1  ;;  %808 = vmatpush3.bf16.msra.mxu1 %v840_v1 }
  0x18   : > { %771 = vmatprep.subr.bf16.mxu0 %v841_v2  ;;  %801 = vmatprep.subr.bf16.mxu1 %v841_v2 }
  0x1b   : > { %772 = vmatpush3.bf16.msra.mxu0 %v841_v2  ;;  %809 = vmatpush3.bf16.msra.mxu1 %v841_v2 }
  0x1c   : > { %773 = vmatprep.subr.bf16.mxu0 %v842_v3  ;;  %802 = vmatprep.subr.bf16.mxu1 %v842_v3 }
  0x1f   : > { %774 = vmatpush3.bf16.msra.mxu0 %v842_v3  ;;  %810 = vmatpush3.bf16.msra.mxu1 %v842_v3 }
  0x20   : > { %775 = vmatprep.subr.bf16.mxu0 %v843_v6  ;;  %803 = vmatprep.subr.bf16.mxu1 %v843_v6 }
  0x23   : > { %776 = vmatpush3.bf16.msra.mxu0 %v843_v6  ;;  %811 = vmatpush3.bf16.msra.mxu1 %v843_v6 }
  0x24   : > { %777 = vmatprep.subr.bf16.mxu0 %v844_v7  ;;  %804 = vmatprep.subr.bf16.mxu1 %v844_v7 }
  0x27   : > { %778 = vmatpush3.bf16.msra.mxu0 %v844_v7  ;;  %812 = vmatpush3.bf16.msra.mxu1 %v844_v7 }
  0x28   : > { %779 = vmatprep.subr.bf16.mxu0 %v845_v8  ;;  %805 = vmatprep.subr.bf16.mxu1 %v845_v8 }
  0x2b   : > { %780 = vmatpush3.bf16.msra.mxu0 %v845_v8  ;;  %813 = vmatpush3.bf16.msra.mxu1 %v845_v8 }
  0x2c   : > { %781 = vmatprep.subr.bf16.mxu0 %v846_v9  ;;  %806 = vmatprep.subr.bf16.mxu1 %v846_v9 }
  0x2f   : > { %782 = vmatpush3.bf16.msra.mxu0 %v846_v9  ;;  %814 = vmatpush3.bf16.msra.mxu1 %v846_v9 }
  0x32   : > { %784 = vmatmul.mubr.bf16.vlgmr.msra.gmra.mrb[0].mxu0 %v849_v10  ;;  %792 = vmatmul.mubr.bf16.vlgmr.msra.gmra.mrb[0].mxu1 %v850_v11 }
  0x33   : > { %787 = vmatprep.mubr.bf16.mxu0 %v851_v12  ;;  %795 = vmatprep.mubr.bf16.mxu1 %v852_v13 }
  0x3a   : > { %788 = vmatmul.mubr.bf16.gmra.mrb[4].mxu0 %v853_v14  ;;  %796 = vmatmul.mubr.bf16.gmra.mrb[4].mxu1 %v854_v15 }
 0x105   : > { %v785_v16 = vpop.f32.mrb[0].mxu0  ;;  %v793_v17 = vpop.f32.mrb[0].mxu1 }
 0x106   : > { %578 = vst [vmem:[%s945_s23 + $0x10] sm:$0xff] %v785_v16  ;;  %586 = vst [vmem:[%s945_s23 + $0x50] sm:$0xff] %v793_v17  ;;  %v462_v18 = vpop.f32.mrb[1].mxu0  ;;  %v494_v19 = vpop.f32.mrb[1].mxu1 }
 0x107   : > { %576 = vst [vmem:[%s945_s23] sm:$0xff] %v462_v18  ;;  %584 = vst [vmem:[%s945_s23 + $0x40] sm:$0xff] %v494_v19  ;;  %v786_v20 = vpop.f32.mrb[2].mxu0  ;;  %v794_v21 = vpop.f32.mrb[2].mxu1 }
 0x108   : > { %579 = vst [vmem:[%s945_s23 + $0x18] sm:$0xff] %v786_v20  ;;  %587 = vst [vmem:[%s945_s23 + $0x58] sm:$0xff] %v794_v21  ;;  %v465_v22 = vpop.f32.mrb[3].mxu0  ;;  %v497_v23 = vpop.f32.mrb[3].mxu1 }
 0x109   : > { %577 = vst [vmem:[%s945_s23 + $0x8] sm:$0xff] %v465_v22  ;;  %585 = vst [vmem:[%s945_s23 + $0x48] sm:$0xff] %v497_v23 }
 0x10d   : > { %v789_v24 = vpop.f32.mrb[4].mxu0  ;;  %v797_v25 = vpop.f32.mrb[4].mxu1 }
 0x10e   : > { %582 = vst [vmem:[%s945_s23 + $0x30] sm:$0xff] %v789_v24  ;;  %590 = vst [vmem:[%s945_s23 + $0x70] sm:$0xff] %v797_v25  ;;  %v478_v26 = vpop.f32.mrb[5].mxu0  ;;  %v510_v27 = vpop.f32.mrb[5].mxu1 }
 0x10f   : > { %580 = vst [vmem:[%s945_s23 + $0x20] sm:$0xff] %v478_v26  ;;  %588 = vst [vmem:[%s945_s23 + $0x60] sm:$0xff] %v510_v27  ;;  %v790_v28 = vpop.f32.mrb[6].mxu0  ;;  %v798_v29 = vpop.f32.mrb[6].mxu1 }
 0x110   : > { %583 = vst [vmem:[%s945_s23 + $0x38] sm:$0xff] %v790_v28  ;;  %591 = vst [vmem:[%s945_s23 + $0x78] sm:$0xff] %v798_v29  ;;  %v481_v30 = vpop.f32.mrb[7].mxu0  ;;  %v513_v31 = vpop.f32.mrb[7].mxu1 }
 0x111   : > { %581 = vst [vmem:[%s945_s23 + $0x28] sm:$0xff] %v481_v30  ;;  %589 = vst [vmem:[%s945_s23 + $0x68] sm:$0xff] %v513_v31 }
 0x112 PF: > { %s12_s11 = sadd.s32 1, %s877_s11   ;;  %s975_s9 = smov %s873_s10 }
 0x113   : > { %p9_p5 = scmp.ge.s32.totalorder %s12_s11, 6   ;;  %s976_s10 = smov %s978_s12 }
 0x115   :  { %11 = sbr.rel (!%p9_p5) target bundleno = 2 (0x2), region = 69 }

// kernel: _lambda_.26
= control target key start
LH: loop header
LB: loop body
LE: loop exit
PB: predicated region body
PF: predicated region fallthrough
CT: control target
= control target key end

     0   :  { %s693_s12 = smov 0   ;;  %s1311_s0 = inlined_call_operand.vmem [shape: f32[2,256,8], index: 0, kind: input, shape index: {}]   ;;  %s1312_s1 = inlined_call_operand.vmem [shape: f32[1,8], index: 1, kind: input, shape index: {}]   ;;  %s1313_s2 = inlined_call_operand.vmem [shape: f32[1,8], index: 2, kind: input, shape index: {}]   ;;  %s1314_s3 = inlined_call_operand.vmem [shape: f32[2,256,8], index: 3, kind: output, shape index: {}]  }
   0x1 LB: > { %s640_s13 = sadd.s32 4294967295, %s671_s12   ;;  %p644_p0 = scmp.ge.s32.totalorder %s671_s12, 1  ;;  %s671_s12 = sphi %s693_s12, %s13_s12  }
   0x2   : > { %p137_p1 = scmp.lt.s32.totalorder %s671_s12, 3 }
   0x4   : > { %p138_p2 = pnand %p644_p0, %p137_p1 }
   0x5   : > { %p161_p3 = scmp.lt.s32.totalorder (!%p138_p2), %s640_s13, 1  ;;  %vm203_vm0 = vcmask (!%p138_p2), 64512  }
   0x6   : > { %141 = sbr.rel (%p138_p2) target bundleno = 227 (0xe3), region = 32 }
   0xd   : > { %s1316_s13 = smov (!%p161_p3, %s640_s13), 1 }
   0xe   : > { %s653_s14 = sshll.u32 %s1316_s13, 8 }
   0xf   : > { %s709_s17 = scalar_lea.vmem %s1311_s0, %s653_s14  ;;  %s1142_s24 = scalar_lea.vmem %s1314_s3, %s653_s14 }
  0x10   : > { %v712_v0 = vld [vmem:[%s709_s17] sm:$0xff]  ;;  %v715_v1 = vld [vmem:[%s709_s17 + $0x8] sm:$0xff]  ;;  %v718_v2 = vld [vmem:[%s709_s17 + $0x10] sm:$0xff] }
  0x11   : > { %v721_v3 = vld [vmem:[%s709_s17 + $0x18] sm:$0xff]  ;;  %v204_v4 = vsel %vm203_vm0, %v712_v0, 0.0  ;;  %v205_v5 = vsel %vm203_vm0, %v715_v1, 0.0  ;;  %v207_v6 = vsel %vm203_vm0, %v718_v2, 0.0  ;;  %v730_v7 = vld [vmem:[%s709_s17 + $0x20] sm:$0xff]  ;;  %v735_v10 = vld [vmem:[%s709_s17 + $0x28] sm:$0xff] }
  0x12   : > { %v206_v8 = vadd.f32 %v205_v5, %v204_v4  ;;  %v209_v9 = vsel %vm203_vm0, %v721_v3, 0.0  ;;  %v211_v12 = vsel %vm203_vm0, %v730_v7, 0.0  ;;  %v740_v13 = vld [vmem:[%s709_s17 + $0x30] sm:$0xff]  ;;  %v213_v15 = vsel %vm203_vm0, %v735_v10, 0.0  ;;  %v745_v16 = vld [vmem:[%s709_s17 + $0x38] sm:$0xff]  ;;  %v750_v19 = vld [vmem:[%s709_s17 + $0x40] sm:$0xff] }
  0x13   : > { %v215_v18 = vsel %vm203_vm0, %v740_v13, 0.0  ;;  %v217_v21 = vsel %vm203_vm0, %v745_v16, 0.0  ;;  %v755_v22 = vld [vmem:[%s709_s17 + $0x48] sm:$0xff]  ;;  %v219_v24 = vsel %vm203_vm0, %v750_v19, 0.0  ;;  %v760_v25 = vld [vmem:[%s709_s17 + $0x50] sm:$0xff]  ;;  %v765_v28 = vld [vmem:[%s709_s17 + $0x58] sm:$0xff] }
  0x14   : > { %v208_v11 = vadd.f32 %v207_v6, %v206_v8  ;;  %v221_v27 = vsel %vm203_vm0, %v755_v22, 0.0  ;;  %v223_v30 = vsel %vm203_vm0, %v760_v25, 0.0  ;;  %v770_v31 = vld [vmem:[%s709_s17 + $0x60] sm:$0xff]  ;;  %v225_v33 = vsel %vm203_vm0, %v765_v28, 0.0  ;;  %v775_v34 = vld [vmem:[%s709_s17 + $0x68] sm:$0xff]  ;;  %v780_v37 = vld [vmem:[%s709_s17 + $0x70] sm:$0xff] }
  0x15   : > { %v227_v36 = vsel %vm203_vm0, %v770_v31, 0.0  ;;  %v229_v39 = vsel %vm203_vm0, %v775_v34, 0.0  ;;  %v785_v40 = vld [vmem:[%s709_s17 + $0x78] sm:$0xff]  ;;  %v231_v42 = vsel %vm203_vm0, %v780_v37, 0.0  ;;  %v790_v43 = vld [vmem:[%s709_s17 + $0x80] sm:$0xff]  ;;  %v795_v46 = vld [vmem:[%s709_s17 + $0x88] sm:$0xff] }
  0x16   : > { %v210_v14 = vadd.f32 %v209_v9, %v208_v11  ;;  %v233_v45 = vsel %vm203_vm0, %v785_v40, 0.0  ;;  %v235_v48 = vsel %vm203_vm0, %v790_v43, 0.0  ;;  %v800_v49 = vld [vmem:[%s709_s17 + $0x90] sm:$0xff]  ;;  %v237_v51 = vsel %vm203_vm0, %v795_v46, 0.0  ;;  %v805_v52 = vld [vmem:[%s709_s17 + $0x98] sm:$0xff]  ;;  %v810_v55 = vld [vmem:[%s709_s17 + $0xa0] sm:$0xff] }
  0x17   : > { %v239_v54 = vsel %vm203_vm0, %v800_v49, 0.0  ;;  %v241_v57 = vsel %vm203_vm0, %v805_v52, 0.0  ;;  %v815_v58 = vld [vmem:[%s709_s17 + $0xa8] sm:$0xff]  ;;  %v243_v60 = vsel %vm203_vm0, %v810_v55, 0.0  ;;  %v820_v61 = vld [vmem:[%s709_s17 + $0xb0] sm:$0xff]  ;;  %v825_v4 = vld [vmem:[%s709_s17 + $0xb8] sm:$0xff] }
  0x18   : > { %v212_v17 = vadd.f32 %v211_v12, %v210_v14  ;;  %v245_v63 = vsel %vm203_vm0, %v815_v58, 0.0  ;;  %v247_v6 = vsel %vm203_vm0, %v820_v61, 0.0  ;;  %v830_v8 = vld [vmem:[%s709_s17 + $0xc0] sm:$0xff]  ;;  %v249_v11 = vsel %vm203_vm0, %v825_v4, 0.0  ;;  %v835_v12 = vld [vmem:[%s709_s17 + $0xc8] sm:$0xff] }
  0x1a   : > { %v214_v20 = vadd.f32 %v213_v15, %v212_v17  ;;  %v251_v15 = vsel %vm203_vm0, %v830_v8, 0.0  ;;  %v840_v17 = vld [vmem:[%s709_s17 + $0xd0] sm:$0xff] }
  0x1c   : > { %v216_v23 = vadd.f32 %v215_v18, %v214_v20  ;;  %v253_v20 = vsel %vm203_vm0, %v835_v12, 0.0 }
  0x1e   : > { %v218_v26 = vadd.f32 %v217_v21, %v216_v23  ;;  %v845_v21 = vld [vmem:[%s709_s17 + $0xd8] sm:$0xff] }
  0x20   : > { %v220_v29 = vadd.f32 %v219_v24, %v218_v26  ;;  %v255_v24 = vsel %vm203_vm0, %v840_v17, 0.0  ;;  %v850_v26 = vld [vmem:[%s709_s17 + $0xe0] sm:$0xff] }
  0x22   : > { %v222_v32 = vadd.f32 %v221_v27, %v220_v29  ;;  %v257_v29 = vsel %vm203_vm0, %v845_v21, 0.0 }
  0x24   : > { %v224_v35 = vadd.f32 %v223_v30, %v222_v32  ;;  %v855_v30 = vld [vmem:[%s709_s17 + $0xe8] sm:$0xff] }
  0x26   : > { %v226_v38 = vadd.f32 %v225_v33, %v224_v35  ;;  %v259_v33 = vsel %vm203_vm0, %v850_v26, 0.0  ;;  %v860_v35 = vld [vmem:[%s709_s17 + $0xf0] sm:$0xff] }
  0x28   : > { %v228_v41 = vadd.f32 %v227_v36, %v226_v38  ;;  %v261_v38 = vsel %vm203_vm0, %v855_v30, 0.0 }
  0x2a   : > { %v230_v44 = vadd.f32 %v229_v39, %v228_v41  ;;  %v865_v39 = vld [vmem:[%s709_s17 + $0xf8] sm:$0xff] }
  0x2c   : > { %v232_v47 = vadd.f32 %v231_v42, %v230_v44  ;;  %v263_v42 = vsel %vm203_vm0, %v860_v35, 0.0 }
  0x2e   : > { %v234_v50 = vadd.f32 %v233_v45, %v232_v47  ;;  %v265_v45 = vsel %vm203_vm0, %v865_v39, 0.0 }
  0x30   : > { %v236_v53 = vadd.f32 %v235_v48, %v234_v50 }
  0x32   : > { %v238_v56 = vadd.f32 %v237_v51, %v236_v53 }
  0x34   : > { %v240_v59 = vadd.f32 %v239_v54, %v238_v56 }
  0x36   : > { %v242_v62 = vadd.f32 %v241_v57, %v240_v59 }
  0x38   : > { %v244_v5 = vadd.f32 %v243_v60, %v242_v62 }
  0x3a   : > { %v246_v9 = vadd.f32 %v245_v63, %v244_v5 }
  0x3c   : > { %v248_v14 = vadd.f32 %v247_v6, %v246_v9 }
  0x3e   : > { %v250_v18 = vadd.f32 %v249_v11, %v248_v14 }
  0x40   : > { %v252_v23 = vadd.f32 %v251_v15, %v250_v18 }
  0x42   : > { %v254_v27 = vadd.f32 %v253_v20, %v252_v23 }
  0x44   : > { %v256_v32 = vadd.f32 %v255_v24, %v254_v27 }
  0x46   : > { %v258_v36 = vadd.f32 %v257_v29, %v256_v32 }
  0x48   : > { %v260_v41 = vadd.f32 %v259_v33, %v258_v36 }
  0x4a   : > { %v262_v44 = vadd.f32 %v261_v38, %v260_v41 }
  0x4c   : > { %v264_v47 = vadd.f32 %v263_v42, %v262_v44 }
  0x4e   : > { %v266_v48 = vadd.f32 %v265_v45, %v264_v47 }
  0x50   : > { %v267_v50 = vrot.slane %v266_v48, 4 }
  0x52   : > { %v268_v51 = vadd.f32 %v267_v50, %v266_v48 }
  0x54   : > { %v269_v53 = vrot.slane %v268_v51, 2 }
  0x56   : > { %v270_v54 = vadd.f32 %v269_v53, %v268_v51 }
  0x58   : > { %v271_v56 = vrot.slane %v270_v54, 1 }
  0x5a   : > { %v272_v57 = vadd.f32 %v271_v56, %v270_v54 }
  0x5c   : > { %v871_v59 = vmul.f32 0.00390625, %v272_v57 }
  0x5e   : > { %v875_v60 = vsub.f32 %v712_v0, %v871_v59  ;;  %v879_v62 = vsub.f32 %v715_v1, %v871_v59  ;;  %v883_v63 = vsub.f32 %v718_v2, %v871_v59  ;;  %v887_v5 = vsub.f32 %v721_v3, %v871_v59 }
  0x5f   : > { %v891_v6 = vsub.f32 %v730_v7, %v871_v59  ;;  %v901_v2 = vsub.f32 %v735_v10, %v871_v59  ;;  %v907_v7 = vsub.f32 %v740_v13, %v871_v59  ;;  %v916_v10 = vsub.f32 %v745_v16, %v871_v59 }
  0x60   : > { %v307_v0 = vmul.f32 %v875_v60, %v875_v60  ;;  %v308_v9 = vmul.f32 %v879_v62, %v879_v62  ;;  %v309_v1 = vmul.f32 %v883_v63, %v883_v63  ;;  %v310_v3 = vmul.f32 %v887_v5, %v887_v5 }
  0x61   : > { %v311_v11 = vmul.f32 %v891_v6, %v891_v6  ;;  %v312_v23 = vmul.f32 %v901_v2, %v901_v2  ;;  %v923_v27 = vsub.f32 %v750_v19, %v871_v59  ;;  %v313_v29 = vmul.f32 %v907_v7, %v907_v7 }
  0x62   : > { %v339_v14 = vsel %vm203_vm0, %v307_v0, 0.0  ;;  %v340_v15 = vsel %vm203_vm0, %v308_v9, 0.0  ;;  %v342_v18 = vsel %vm203_vm0, %v309_v1, 0.0  ;;  %v344_v13 = vsel %vm203_vm0, %v310_v3, 0.0 }
  0x63   : > { %v341_v20 = vadd.f32 %v340_v15, %v339_v14  ;;  %v346_v32 = vsel %vm203_vm0, %v311_v11, 0.0  ;;  %v930_v16 = vsub.f32 %v755_v22, %v871_v59  ;;  %v314_v36 = vmul.f32 %v916_v10, %v916_v10 }
  0x64   : > { %v348_v38 = vsel %vm203_vm0, %v312_v23, 0.0  ;;  %v937_v19 = vsub.f32 %v760_v25, %v871_v59  ;;  %v315_v42 = vmul.f32 %v923_v27, %v923_v27  ;;  %v350_v44 = vsel %vm203_vm0, %v313_v29, 0.0 }
  0x65   : > { %v343_v24 = vadd.f32 %v342_v18, %v341_v20  ;;  %v944_v22 = vsub.f32 %v765_v28, %v871_v59  ;;  %v316_v47 = vmul.f32 %v930_v16, %v930_v16  ;;  %v352_v48 = vsel %vm203_vm0, %v314_v36, 0.0 }
  0x66   : > { %v951_v25 = vsub.f32 %v770_v31, %v871_v59  ;;  %v317_v51 = vmul.f32 %v937_v19, %v937_v19  ;;  %v354_v53 = vsel %vm203_vm0, %v315_v42, 0.0  ;;  %v958_v28 = vsub.f32 %v775_v34, %v871_v59 }
  0x67   : > { %v345_v33 = vadd.f32 %v344_v13, %v343_v24  ;;  %v318_v56 = vmul.f32 %v944_v22, %v944_v22  ;;  %v356_v57 = vsel %vm203_vm0, %v316_v47, 0.0  ;;  %v965_v31 = vsub.f32 %v780_v37, %v871_v59 }
  0x68   : > { %v319_v9 = vmul.f32 %v951_v25, %v951_v25  ;;  %v358_v1 = vsel %vm203_vm0, %v317_v51, 0.0  ;;  %v972_v34 = vsub.f32 %v785_v40, %v871_v59  ;;  %v320_v11 = vmul.f32 %v958_v28, %v958_v28 }
  0x69   : > { %v347_v41 = vadd.f32 %v346_v32, %v345_v33  ;;  %v360_v14 = vsel %vm203_vm0, %v318_v56, 0.0  ;;  %v979_v37 = vsub.f32 %v790_v43, %v871_v59  ;;  %v321_v18 = vmul.f32 %v965_v31, %v965_v31 }
  0x6a   : > { %v362_v20 = vsel %vm203_vm0, %v319_v9, 0.0  ;;  %v986_v40 = vsub.f32 %v795_v46, %v871_v59  ;;  %v322_v13 = vmul.f32 %v972_v34, %v972_v34  ;;  %v364_v24 = vsel %vm203_vm0, %v320_v11, 0.0 }
  0x6b   : > { %v349_v45 = vadd.f32 %v348_v38, %v347_v41  ;;  %v993_v43 = vsub.f32 %v800_v49, %v871_v59  ;;  %v323_v32 = vmul.f32 %v979_v37, %v979_v37  ;;  %v366_v33 = vsel %vm203_vm0, %v321_v18, 0.0 }
  0x6c   : > { %v1000_v46 = vsub.f32 %v805_v52, %v871_v59  ;;  %v324_v38 = vmul.f32 %v986_v40, %v986_v40  ;;  %v368_v41 = vsel %vm203_vm0, %v322_v13, 0.0  ;;  %v1007_v49 = vsub.f32 %v810_v55, %v871_v59 }
  0x6d   : > { %v351_v50 = vadd.f32 %v350_v44, %v349_v45  ;;  %v325_v44 = vmul.f32 %v993_v43, %v993_v43  ;;  %v370_v45 = vsel %vm203_vm0, %v323_v32, 0.0  ;;  %v1014_v52 = vsub.f32 %v815_v58, %v871_v59 }
  0x6e   : > { %v1021_v55 = vsub.f32 %v820_v61, %v871_v59  ;;  %v1028_v58 = vsub.f32 %v825_v4, %v871_v59  ;;  %v1035_v61 = vsub.f32 %v830_v8, %v871_v59  ;;  %v1042_v4 = vsub.f32 %v835_v12, %v871_v59 }
  0x6f   : > { %v353_v54 = vadd.f32 %v352_v48, %v351_v50  ;;  %v326_v48 = vmul.f32 %v1000_v46, %v1000_v46  ;;  %v372_v50 = vsel %vm203_vm0, %v324_v38, 0.0  ;;  %v1049_v8 = vsub.f32 %v840_v17, %v871_v59 }
  0x70   : > { %v1056_v12 = vsub.f32 %v845_v21, %v871_v59  ;;  %v1063_v17 = vsub.f32 %v850_v26, %v871_v59  ;;  %v1070_v21 = vsub.f32 %v855_v30, %v871_v59  ;;  %v1077_v26 = vsub.f32 %v860_v35, %v871_v59 }
  0x71   : > { %v355_v0 = vadd.f32 %v354_v53, %v353_v54  ;;  %v327_v53 = vmul.f32 %v1007_v49, %v1007_v49  ;;  %v374_v54 = vsel %vm203_vm0, %v325_v44, 0.0  ;;  %v1084_v30 = vsub.f32 %v865_v39, %v871_v59 }
  0x72   : > { %v337_v35 = vmul.f32 %v1077_v26, %v1077_v26 }
  0x73   : > { %v357_v3 = vadd.f32 %v356_v57, %v355_v0  ;;  %v328_v57 = vmul.f32 %v1014_v52, %v1014_v52  ;;  %v376_v0 = vsel %vm203_vm0, %v326_v48, 0.0 }
  0x74   : > { %v398_v39 = vsel %vm203_vm0, %v337_v35, 0.0 }
  0x75   : > { %v359_v15 = vadd.f32 %v358_v1, %v357_v3  ;;  %v329_v1 = vmul.f32 %v1021_v55, %v1021_v55  ;;  %v378_v3 = vsel %vm203_vm0, %v327_v53, 0.0 }
  0x77   : > { %v361_v23 = vadd.f32 %v360_v14, %v359_v15  ;;  %v330_v14 = vmul.f32 %v1028_v58, %v1028_v58  ;;  %v380_v15 = vsel %vm203_vm0, %v328_v57, 0.0  ;;  %v338_v57 = vmul.f32 %v1084_v30, %v1084_v30 }
  0x79   : > { %v363_v29 = vadd.f32 %v362_v20, %v361_v23  ;;  %v331_v20 = vmul.f32 %v1035_v61, %v1035_v61  ;;  %v382_v23 = vsel %vm203_vm0, %v329_v1, 0.0  ;;  %v400_v1 = vsel %vm203_vm0, %v338_v57, 0.0 }
  0x7b   : > { %v365_v36 = vadd.f32 %v364_v24, %v363_v29  ;;  %v332_v24 = vmul.f32 %v1042_v4, %v1042_v4  ;;  %v384_v29 = vsel %vm203_vm0, %v330_v14, 0.0 }
  0x7d   : > { %v367_v42 = vadd.f32 %v366_v33, %v365_v36  ;;  %v333_v33 = vmul.f32 %v1049_v8, %v1049_v8  ;;  %v386_v36 = vsel %vm203_vm0, %v331_v20, 0.0 }
  0x7f   : > { %v369_v47 = vadd.f32 %v368_v41, %v367_v42  ;;  %v334_v41 = vmul.f32 %v1056_v12, %v1056_v12  ;;  %v388_v42 = vsel %vm203_vm0, %v332_v24, 0.0 }
  0x81   : > { %v371_v51 = vadd.f32 %v370_v45, %v369_v47  ;;  %v335_v45 = vmul.f32 %v1063_v17, %v1063_v17  ;;  %v390_v47 = vsel %vm203_vm0, %v333_v33, 0.0  ;;  %v1102_v33 = vld [vmem:[%s1312_s1] ss:$0 sm:$0xff] }
  0x83   : > { %v373_v56 = vadd.f32 %v372_v50, %v371_v51  ;;  %v336_v50 = vmul.f32 %v1070_v21, %v1070_v21  ;;  %v392_v51 = vsel %vm203_vm0, %v334_v41, 0.0 }
  0x85   : > { %v375_v9 = vadd.f32 %v374_v54, %v373_v56  ;;  %v394_v54 = vsel %vm203_vm0, %v335_v45, 0.0 }
  0x87   : > { %v377_v11 = vadd.f32 %v376_v0, %v375_v9  ;;  %v396_v0 = vsel %vm203_vm0, %v336_v50, 0.0 }
  0x89   : > { %v379_v18 = vadd.f32 %v378_v3, %v377_v11 }
  0x8b   : > { %v381_v13 = vadd.f32 %v380_v15, %v379_v18 }
  0x8d   : > { %v383_v32 = vadd.f32 %v382_v23, %v381_v13 }
  0x8f   : > { %v385_v38 = vadd.f32 %v384_v29, %v383_v32 }
  0x91   : > { %v387_v44 = vadd.f32 %v386_v36, %v385_v38 }
  0x93   : > { %v389_v48 = vadd.f32 %v388_v42, %v387_v44  ;;  %v1115_v44 = vld [vmem:[%s1313_s2] ss:$0 sm:$0xff] }
  0x95   : > { %v391_v53 = vadd.f32 %v390_v47, %v389_v48 }
  0x97   : > { %v393_v56 = vadd.f32 %v392_v51, %v391_v53 }
  0x99   : > { %v395_v9 = vadd.f32 %v394_v54, %v393_v56 }
  0x9b   : > { %v397_v59 = vadd.f32 %v396_v0, %v395_v9 }
  0x9d   : > { %v399_v3 = vadd.f32 %v398_v39, %v397_v59 }
  0x9f   : > { %v401_v11 = vadd.f32 %v400_v1, %v399_v3 }
  0xa1   : > { %v402_v14 = vrot.slane %v401_v11, 4 }
  0xa3   : > { %v403_v15 = vadd.f32 %v402_v14, %v401_v11 }
  0xa5   : > { %v404_v18 = vrot.slane %v403_v15, 2 }
  0xa7   : > { %v405_v20 = vadd.f32 %v404_v18, %v403_v15 }
  0xa9   : > { %v406_v23 = vrot.slane %v405_v20, 1 }
  0xab   : > { %v407_v13 = vadd.f32 %v406_v23, %v405_v20 }
  0xad   : > { %v408_v24 = vmul.f32 0.00390625, %v407_v13 }
  0xaf   : > { %v409_v29 = vadd.f32 1e-05, %v408_v24 }
  0xb1   : > { %663 = vrsqrt.f32 %v409_v29 }
  0xbb   : > { %v1097_v32 = vpop.eup %663 }
  0xbc   : > { %v411_v36 = vmul.f32 %v1097_v32, %v875_v60  ;;  %v412_v38 = vmul.f32 %v1097_v32, %v879_v62  ;;  %v413_v41 = vmul.f32 %v1097_v32, %v883_v63  ;;  %v414_v42 = vmul.f32 %v1097_v32, %v887_v5 }
  0xbd   : > { %v415_v45 = vmul.f32 %v1097_v32, %v891_v6  ;;  %v416_v60 = vmul.f32 %v1097_v32, %v901_v2  ;;  %v417_v62 = vmul.f32 %v1097_v32, %v907_v7  ;;  %v418_v63 = vmul.f32 %v1097_v32, %v916_v10 }
  0xbe   : > { %v450_v5 = vmul.f32 %v1102_v33, %v411_v36  ;;  %v451_v47 = vmul.f32 %v1102_v33, %v412_v38  ;;  %v452_v48 = vmul.f32 %v1102_v33, %v413_v41  ;;  %v453_v50 = vmul.f32 %v1102_v33, %v414_v42 }
  0xbf   : > { %v454_v6 = vmul.f32 %v1102_v33, %v415_v45  ;;  %v455_v51 = vmul.f32 %v1102_v33, %v416_v60  ;;  %v456_v2 = vmul.f32 %v1102_v33, %v417_v62  ;;  %v457_v53 = vmul.f32 %v1102_v33, %v418_v63 }
  0xc0   : > { %v489_v7 = vadd.f32 %v1115_v44, %v450_v5  ;;  %v490_v10 = vadd.f32 %v1115_v44, %v451_v47  ;;  %v491_v35 = vadd.f32 %v1115_v44, %v452_v48  ;;  %v492_v54 = vadd.f32 %v1115_v44, %v453_v50 }
  0xc1   : > { %v493_v56 = vadd.f32 %v1115_v44, %v454_v6  ;;  %v494_v57 = vadd.f32 %v1115_v44, %v455_v51  ;;  %v495_v0 = vadd.f32 %v1115_v44, %v456_v2  ;;  %v496_v9 = vadd.f32 %v1115_v44, %v457_v53 }
  0xc2   : > { %v521_v39 = vmax.f32 %v489_v7, 0.0  ;;  %v522_v59 = vmax.f32 %v490_v10, 0.0  ;;  %v523_v1 = vmax.f32 %v491_v35, 0.0  ;;  %v524_v3 = vmax.f32 %v492_v54, 0.0 }
  0xc3   : > { %v525_v11 = vmax.f32 %v493_v56, 0.0  ;;  %v526_v14 = vmax.f32 %v494_v57, 0.0  ;;  %v527_v15 = vmax.f32 %v495_v0, 0.0  ;;  %v528_v18 = vmax.f32 %v496_v9, 0.0 }
  0xc4   : > { %553 = vst.msk [vmem:[%s1142_s24] sm:$0xff] %vm203_vm0, %v521_v39  ;;  %554 = vst.msk [vmem:[%s1142_s24 + $0x8] sm:$0xff] %vm203_vm0, %v522_v59  ;;  %v419_v20 = vmul.f32 %v1097_v32, %v923_v27  ;;  %v420_v23 = vmul.f32 %v1097_v32, %v930_v16  ;;  %v421_v13 = vmul.f32 %v1097_v32, %v937_v19 }
  0xc5   : > { %555 = vst.msk [vmem:[%s1142_s24 + $0x10] sm:$0xff] %vm203_vm0, %v523_v1  ;;  %556 = vst.msk [vmem:[%s1142_s24 + $0x18] sm:$0xff] %vm203_vm0, %v524_v3  ;;  %v422_v24 = vmul.f32 %v1097_v32, %v944_v22  ;;  %v423_v27 = vmul.f32 %v1097_v32, %v951_v25  ;;  %v424_v16 = vmul.f32 %v1097_v32, %v958_v28 }
  0xc6   : > { %557 = vst.msk [vmem:[%s1142_s24 + $0x20] sm:$0xff] %vm203_vm0, %v525_v11  ;;  %558 = vst.msk [vmem:[%s1142_s24 + $0x28] sm:$0xff] %vm203_vm0, %v526_v14  ;;  %v425_v19 = vmul.f32 %v1097_v32, %v965_v31  ;;  %v426_v22 = vmul.f32 %v1097_v32, %v972_v34  ;;  %v458_v29 = vmul.f32 %v1102_v33, %v419_v20 }
  0xc7   : > { %559 = vst.msk [vmem:[%s1142_s24 + $0x30] sm:$0xff] %vm203_vm0, %v527_v15  ;;  %560 = vst.msk [vmem:[%s1142_s24 + $0x38] sm:$0xff] %vm203_vm0, %v528_v18  ;;  %v459_v36 = vmul.f32 %v1102_v33, %v420_v23  ;;  %v460_v38 = vmul.f32 %v1102_v33, %v421_v13  ;;  %v461_v41 = vmul.f32 %v1102_v33, %v422_v24 }
  0xc8   : > { %v462_v42 = vmul.f32 %v1102_v33, %v423_v27  ;;  %v463_v25 = vmul.f32 %v1102_v33, %v424_v16  ;;  %v464_v28 = vmul.f32 %v1102_v33, %v425_v19  ;;  %v465_v45 = vmul.f32 %v1102_v33, %v426_v22 }
  0xc9   : > { %v497_v31 = vadd.f32 %v1115_v44, %v458_v29  ;;  %v498_v34 = vadd.f32 %v1115_v44, %v459_v36  ;;  %v499_v60 = vadd.f32 %v1115_v44, %v460_v38  ;;  %v500_v62 = vadd.f32 %v1115_v44, %v461_v41 }
  0xca   : > { %v501_v63 = vadd.f32 %v1115_v44, %v462_v42  ;;  %v502_v5 = vadd.f32 %v1115_v44, %v463_v25  ;;  %v503_v47 = vadd.f32 %v1115_v44, %v464_v28  ;;  %v504_v48 = vadd.f32 %v1115_v44, %v465_v45 }
  0xcb   : > { %v529_v50 = vmax.f32 %v497_v31, 0.0  ;;  %v530_v6 = vmax.f32 %v498_v34, 0.0  ;;  %v531_v51 = vmax.f32 %v499_v60, 0.0  ;;  %v532_v2 = vmax.f32 %v500_v62, 0.0 }
  0xcc   : > { %v533_v53 = vmax.f32 %v501_v63, 0.0  ;;  %v534_v7 = vmax.f32 %v502_v5, 0.0  ;;  %v535_v10 = vmax.f32 %v503_v47, 0.0  ;;  %v536_v35 = vmax.f32 %v504_v48, 0.0 }
  0xcd   : > { %561 = vst.msk [vmem:[%s1142_s24 + $0x40] sm:$0xff] %vm203_vm0, %v529_v50  ;;  %562 = vst.msk [vmem:[%s1142_s24 + $0x48] sm:$0xff] %vm203_vm0, %v530_v6  ;;  %v427_v54 = vmul.f32 %v1097_v32, %v979_v37  ;;  %v428_v56 = vmul.f32 %v1097_v32, %v986_v40  ;;  %v429_v57 = vmul.f32 %v1097_v32, %v993_v43 }
  0xce   : > { %563 = vst.msk [vmem:[%s1142_s24 + $0x50] sm:$0xff] %vm203_vm0, %v531_v51  ;;  %564 = vst.msk [vmem:[%s1142_s24 + $0x58] sm:$0xff] %vm203_vm0, %v532_v2  ;;  %v430_v0 = vmul.f32 %v1097_v32, %v1000_v46  ;;  %v431_v37 = vmul.f32 %v1097_v32, %v1007_v49  ;;  %v432_v40 = vmul.f32 %v1097_v32, %v1014_v52 }
  0xcf   : > { %565 = vst.msk [vmem:[%s1142_s24 + $0x60] sm:$0xff] %vm203_vm0, %v533_v53  ;;  %566 = vst.msk [vmem:[%s1142_s24 + $0x68] sm:$0xff] %vm203_vm0, %v534_v7  ;;  %v433_v43 = vmul.f32 %v1097_v32, %v1021_v55  ;;  %v434_v46 = vmul.f32 %v1097_v32, %v1028_v58  ;;  %v466_v9 = vmul.f32 %v1102_v33, %v427_v54 }
  0xd0   : > { %567 = vst.msk [vmem:[%s1142_s24 + $0x70] sm:$0xff] %vm203_vm0, %v535_v10  ;;  %568 = vst.msk [vmem:[%s1142_s24 + $0x78] sm:$0xff] %vm203_vm0, %v536_v35  ;;  %v467_v39 = vmul.f32 %v1102_v33, %v428_v56  ;;  %v468_v59 = vmul.f32 %v1102_v33, %v429_v57  ;;  %v469_v1 = vmul.f32 %v1102_v33, %v430_v0 }
  0xd1   : > { %v470_v3 = vmul.f32 %v1102_v33, %v431_v37  ;;  %v471_v49 = vmul.f32 %v1102_v33, %v432_v40  ;;  %v472_v52 = vmul.f32 %v1102_v33, %v433_v43  ;;  %v473_v11 = vmul.f32 %v1102_v33, %v434_v46 }
  0xd2   : > { %v505_v55 = vadd.f32 %v1115_v44, %v466_v9  ;;  %v506_v58 = vadd.f32 %v1115_v44, %v467_v39  ;;  %v507_v14 = vadd.f32 %v1115_v44, %v468_v59  ;;  %v508_v15 = vadd.f32 %v1115_v44, %v469_v1 }
  0xd3   : > { %v509_v18 = vadd.f32 %v1115_v44, %v470_v3  ;;  %v510_v20 = vadd.f32 %v1115_v44, %v471_v49  ;;  %v511_v23 = vadd.f32 %v1115_v44, %v472_v52  ;;  %v512_v13 = vadd.f32 %v1115_v44, %v473_v11 }
  0xd4   : > { %v537_v24 = vmax.f32 %v505_v55, 0.0  ;;  %v538_v27 = vmax.f32 %v506_v58, 0.0  ;;  %v539_v16 = vmax.f32 %v507_v14, 0.0  ;;  %v540_v19 = vmax.f32 %v508_v15, 0.0 }
  0xd5   : > { %v541_v22 = vmax.f32 %v509_v18, 0.0  ;;  %v542_v29 = vmax.f32 %v510_v20, 0.0  ;;  %v543_v36 = vmax.f32 %v511_v23, 0.0  ;;  %v544_v38 = vmax.f32 %v512_v13, 0.0 }
  0xd6   : > { %569 = vst.msk [vmem:[%s1142_s24 + $0x80] sm:$0xff] %vm203_vm0, %v537_v24  ;;  %570 = vst.msk [vmem:[%s1142_s24 + $0x88] sm:$0xff] %vm203_vm0, %v538_v27  ;;  %v435_v41 = vmul.f32 %v1097_v32, %v1035_v61  ;;  %v436_v42 = vmul.f32 %v1097_v32, %v1042_v4  ;;  %v437_v25 = vmul.f32 %v1097_v32, %v1049_v8 }
  0xd7   : > { %571 = vst.msk [vmem:[%s1142_s24 + $0x90] sm:$0xff] %vm203_vm0, %v539_v16  ;;  %572 = vst.msk [vmem:[%s1142_s24 + $0x98] sm:$0xff] %vm203_vm0, %v540_v19  ;;  %v438_v28 = vmul.f32 %v1097_v32, %v1056_v12  ;;  %v439_v61 = vmul.f32 %v1097_v32, %v1063_v17  ;;  %v440_v4 = vmul.f32 %v1097_v32, %v1070_v21 }
  0xd8   : > { %573 = vst.msk [vmem:[%s1142_s24 + $0xa0] sm:$0xff] %vm203_vm0, %v541_v22  ;;  %574 = vst.msk [vmem:[%s1142_s24 + $0xa8] sm:$0xff] %vm203_vm0, %v542_v29  ;;  %v441_v8 = vmul.f32 %v1097_v32, %v1077_v26  ;;  %v442_v12 = vmul.f32 %v1097_v32, %v1084_v30  ;;  %v474_v45 = vmul.f32 %v1102_v33, %v435_v41 }
  0xd9   : > { %575 = vst.msk [vmem:[%s1142_s24 + $0xb0] sm:$0xff] %vm203_vm0, %v543_v36  ;;  %576 = vst.msk [vmem:[%s1142_s24 + $0xb8] sm:$0xff] %vm203_vm0, %v544_v38  ;;  %v475_v31 = vmul.f32 %v1102_v33, %v436_v42  ;;  %v476_v34 = vmul.f32 %v1102_v33, %v437_v25  ;;  %v477_v60 = vmul.f32 %v1102_v33, %v438_v28 }
  0xda   : > { %v478_v62 = vmul.f32 %v1102_v33, %v439_v61  ;;  %v479_v17 = vmul.f32 %v1102_v33, %v440_v4  ;;  %v480_v21 = vmul.f32 %v1102_v33, %v441_v8  ;;  %v481_v63 = vmul.f32 %v1102_v33, %v442_v12 }
  0xdb   : > { %v513_v26 = vadd.f32 %v1115_v44, %v474_v45  ;;  %v514_v30 = vadd.f32 %v1115_v44, %v475_v31  ;;  %v515_v32 = vadd.f32 %v1115_v44, %v476_v34  ;;  %v516_v5 = vadd.f32 %v1115_v44, %v477_v60 }
  0xdc   : > { %v517_v47 = vadd.f32 %v1115_v44, %v478_v62  ;;  %v518_v48 = vadd.f32 %v1115_v44, %v479_v17  ;;  %v519_v33 = vadd.f32 %v1115_v44, %v480_v21  ;;  %v520_v50 = vadd.f32 %v1115_v44, %v481_v63 }
  0xdd   : > { %v545_v6 = vmax.f32 %v513_v26, 0.0  ;;  %v546_v51 = vmax.f32 %v514_v30, 0.0  ;;  %v547_v2 = vmax.f32 %v515_v32, 0.0  ;;  %v548_v53 = vmax.f32 %v516_v5, 0.0 }
  0xde   : > { %v549_v7 = vmax.f32 %v517_v47, 0.0  ;;  %v550_v10 = vmax.f32 %v518_v48, 0.0  ;;  %v551_v35 = vmax.f32 %v519_v33, 0.0  ;;  %v552_v54 = vmax.f32 %v520_v50, 0.0 }
  0xdf   : > { %577 = vst.msk [vmem:[%s1142_s24 + $0xc0] sm:$0xff] %vm203_vm0, %v545_v6  ;;  %578 = vst.msk [vmem:[%s1142_s24 + $0xc8] sm:$0xff] %vm203_vm0, %v546_v51 }
  0xe0   : > { %579 = vst.msk [vmem:[%s1142_s24 + $0xd0] sm:$0xff] %vm203_vm0, %v547_v2  ;;  %580 = vst.msk [vmem:[%s1142_s24 + $0xd8] sm:$0xff] %vm203_vm0, %v548_v53 }
  0xe1   : > { %581 = vst.msk [vmem:[%s1142_s24 + $0xe0] sm:$0xff] %vm203_vm0, %v549_v7  ;;  %582 = vst.msk [vmem:[%s1142_s24 + $0xe8] sm:$0xff] %vm203_vm0, %v550_v10 }
  0xe2   : > { %583 = vst.msk [vmem:[%s1142_s24 + $0xf0] sm:$0xff] %vm203_vm0, %v551_v35  ;;  %584 = vst.msk [vmem:[%s1142_s24 + $0xf8] sm:$0xff] %vm203_vm0, %v552_v54 }
  0xe3 PF: > { %s13_s12 = sadd.s32 1, %s671_s12  }
  0xe4   : > { %p10_p4 = scmp.ge.s32.totalorder %s13_s12, 4  }
  0xe6   :  { %12 = sbr.rel (!%p10_p4) target bundleno = 1 (0x1), region = 62 }

// kernel: _lambda_.27
= control target key start
LH: loop header
LB: loop body
LE: loop exit
PB: predicated region body
PF: predicated region fallthrough
CT: control target
= control target key end

     0   :  { %s1564_s15 = smov 0   ;;  %s1566_s16 = smov 0   ;;  %s1951_s0 = inlined_call_operand.vmem [shape: bf16[1,512,128], index: 0, kind: input, shape index: {}]   ;;  %s1952_s1 = inlined_call_operand.vmem [shape: bf16[1,128,128], index: 1, kind: input, shape index: {}]   ;;  %s1953_s2 = inlined_call_operand.vmem [shape: f32[1,128], index: 2, kind: input, shape index: {}]   ;;  %s1954_s3 = inlined_call_operand.vmem [shape: f32[1,128], index: 3, kind: input, shape index: {}]   ;;  %s1955_s4 = inlined_call_operand.vmem [shape: f32[1,512,128], index: 4, kind: output, shape index: {}]  }
   0x1   :  { %s1568_s17 = smov 0  }
   0x2 LB: > { %s36_s18 = sadd.s32 1, %s1533_s16  ;;  %p1344_p0 = scmp.ge.s32.totalorder %s1537_s17, 1  ;;  %s1537_s17 = sphi %s1568_s17, %s14_s17   ;;  %s1533_s16 = sphi %s1566_s16, %s1957_s16   ;;  %s1529_s15 = sphi %s1564_s15, %s1956_s15  }
   0x3   : > { %p38_p1 = scmp.ge.s32.totalorder %s36_s18, 2  ;;  %p242_p2 = scmp.lt.s32.totalorder %s1537_s17, 3 }
   0x5   : > { %s1959_s18 = smov (%p38_p1, %s36_s18), 0  ;;  %p243_p3 = pnand %p1344_p0, %p242_p2 }
   0x6   : > { %v1489_v0 = vld [vmem:[%s1952_s1] sm:$0xff] (!%p243_p3)   ;;  %s1345_s21 = sshll.u32 (!%p243_p3), %s1529_s15, 5  ;;  %v1490_v1 = vld [vmem:[%s1952_s1 + $0x8] sm:$0xff] (!%p243_p3)   ;;  %v1491_v2 = vld [vmem:[%s1952_s1 + $0x10] sm:$0xff] (!%p243_p3)  }
   0x7   : > { %246 = sbr.rel (%p243_p3) target bundleno = 471 (0x1d7), region = 36  ;;  %p303_p4 = scmp.lt.s32.totalorder (!%p243_p3), %s1345_s21, 63  ;;  %1401 = vmatprep.subr.bf16.mxu0 (!%p243_p3), %v1489_v0  ;;  %1449 = vmatprep.subr.bf16.mxu1 (!%p243_p3), %v1489_v0  ;;  %v1492_v3 = vld [vmem:[%s1952_s1 + $0x18] sm:$0xff] (!%p243_p3)   ;;  %v1493_v5 = vld [vmem:[%s1952_s1 + $0x20] sm:$0xff] (!%p243_p3)   ;;  %v1494_v6 = vld [vmem:[%s1952_s1 + $0x28] sm:$0xff] (!%p243_p3)  }
   0x8   : > { %1402 = vmatpush3.bf16.msra.mxu0 (!%p243_p3), %v1489_v0  ;;  %1457 = vmatpush3.bf16.msra.mxu1 (!%p243_p3), %v1489_v0  ;;  %v1495_v8 = vld [vmem:[%s1952_s1 + $0x30] sm:$0xff] (!%p243_p3)   ;;  %v1496_v9 = vld [vmem:[%s1952_s1 + $0x38] sm:$0xff] (!%p243_p3)  }
   0x9   : > { %1403 = vmatprep.subr.bf16.mxu0 (!%p243_p3), %v1490_v1  ;;  %1450 = vmatprep.subr.bf16.mxu1 (!%p243_p3), %v1490_v1 }
   0xc   : > { %1404 = vmatpush3.bf16.msra.mxu0 (!%p243_p3), %v1490_v1  ;;  %1458 = vmatpush3.bf16.msra.mxu1 (!%p243_p3), %v1490_v1 }
   0xd   : > { %1405 = vmatprep.subr.bf16.mxu0 (!%p243_p3), %v1491_v2  ;;  %1451 = vmatprep.subr.bf16.mxu1 (!%p243_p3), %v1491_v2 }
   0xe   : > { %s1961_s21 = smov (!%p303_p4, %s1345_s21), 63 }
   0xf   : > { %s1346_s26 = sshll.u32 %s1961_s21, 2  ;;  %s1348_s22 = sshll.u32 %s1961_s21, 3 }
  0x10   : > { %s1597_s29 = scalar_lea.vmem %s1951_s0, %s1346_s26  ;;  %1406 = vmatpush3.bf16.msra.mxu0 %v1491_v2  ;;  %1459 = vmatpush3.bf16.msra.mxu1 %v1491_v2  ;;  %s1888_s24 = scalar_lea.vmem %s1955_s4, %s1348_s22 }
  0x11   : > { %v1497_v4 = vld [vmem:[%s1597_s29] sm:$0xff]   ;;  %1407 = vmatprep.subr.bf16.mxu0 %v1492_v3  ;;  %1452 = vmatprep.subr.bf16.mxu1 %v1492_v3  ;;  %v1498_v10 = vld [vmem:[%s1597_s29 + $0x8] sm:$0xff]   ;;  %v1499_v12 = vld [vmem:[%s1597_s29 + $0x10] sm:$0xff]  }
  0x12   : > { %1417 = vmatprep.mubr.bf16.mxu0 %v1497_v4  ;;  %v1505_v7 = vld [vmem:[%s1597_s29 + $0x40] sm:$0xff]   ;;  %v1506_v11 = vld [vmem:[%s1597_s29 + $0x48] sm:$0xff]   ;;  %v1507_v13 = vld [vmem:[%s1597_s29 + $0x50] sm:$0xff]  }
  0x13   : > { %1433 = vmatprep.mubr.bf16.mxu1 %v1505_v7  ;;  %v1500_v14 = vld [vmem:[%s1597_s29 + $0x18] sm:$0xff]   ;;  %v1501_v16 = vld [vmem:[%s1597_s29 + $0x20] sm:$0xff]   ;;  %v1502_v18 = vld [vmem:[%s1597_s29 + $0x28] sm:$0xff]  }
  0x14   : > { %1408 = vmatpush3.bf16.msra.mxu0 %v1492_v3  ;;  %1460 = vmatpush3.bf16.msra.mxu1 %v1492_v3  ;;  %v1508_v15 = vld [vmem:[%s1597_s29 + $0x58] sm:$0xff]   ;;  %v1509_v17 = vld [vmem:[%s1597_s29 + $0x60] sm:$0xff]   ;;  %v1510_v19 = vld [vmem:[%s1597_s29 + $0x68] sm:$0xff]  }
  0x15   : > { %1409 = vmatprep.subr.bf16.mxu0 %v1493_v5  ;;  %1453 = vmatprep.subr.bf16.mxu1 %v1493_v5  ;;  %v1503_v20 = vld [vmem:[%s1597_s29 + $0x30] sm:$0xff]   ;;  %v1504_v22 = vld [vmem:[%s1597_s29 + $0x38] sm:$0xff]  }
  0x16   : > { %v1511_v21 = vld [vmem:[%s1597_s29 + $0x70] sm:$0xff]   ;;  %v1512_v23 = vld [vmem:[%s1597_s29 + $0x78] sm:$0xff]  }
  0x18   : > { %1410 = vmatpush3.bf16.msra.mxu0 %v1493_v5  ;;  %1461 = vmatpush3.bf16.msra.mxu1 %v1493_v5 }
  0x19   : > { %1411 = vmatprep.subr.bf16.mxu0 %v1494_v6  ;;  %1454 = vmatprep.subr.bf16.mxu1 %v1494_v6 }
  0x1c   : > { %1412 = vmatpush3.bf16.msra.mxu0 %v1494_v6  ;;  %1462 = vmatpush3.bf16.msra.mxu1 %v1494_v6 }
  0x1d   : > { %1413 = vmatprep.subr.bf16.mxu0 %v1495_v8  ;;  %1455 = vmatprep.subr.bf16.mxu1 %v1495_v8 }
  0x20   : > { %1414 = vmatpush3.bf16.msra.mxu0 %v1495_v8  ;;  %1463 = vmatpush3.bf16.msra.mxu1 %v1495_v8 }
  0x21   : > { %1415 = vmatprep.subr.bf16.mxu0 %v1496_v9  ;;  %1456 = vmatprep.subr.bf16.mxu1 %v1496_v9 }
  0x24   : > { %1416 = vmatpush3.bf16.msra.mxu0 %v1496_v9  ;;  %1464 = vmatpush3.bf16.msra.mxu1 %v1496_v9 }
  0x27   : > { %1418 = vmatmul.mubr.bf16.vlgmr.msra.gmra.mrb[0].mxu0 %v1498_v10  ;;  %1434 = vmatmul.mubr.bf16.vlgmr.msra.gmra.mrb[0].mxu1 %v1506_v11 }
  0x28   : > { %1421 = vmatprep.mubr.bf16.mxu0 %v1499_v12  ;;  %1437 = vmatprep.mubr.bf16.mxu1 %v1507_v13 }
  0x2f   : > { %1422 = vmatmul.mubr.bf16.gmra.mrb[4].mxu0 %v1500_v14  ;;  %1438 = vmatmul.mubr.bf16.gmra.mrb[4].mxu1 %v1508_v15 }
  0x30   : > { %1425 = vmatprep.mubr.bf16.mxu0 %v1501_v16  ;;  %1441 = vmatprep.mubr.bf16.mxu1 %v1509_v17 }
  0x37   : > { %1426 = vmatmul.mubr.bf16.gmra.mrb[8].mxu0 %v1502_v18  ;;  %1442 = vmatmul.mubr.bf16.gmra.mrb[8].mxu1 %v1510_v19 }
  0x38   : > { %1429 = vmatprep.mubr.bf16.mxu0 %v1503_v20  ;;  %1445 = vmatprep.mubr.bf16.mxu1 %v1511_v21 }
  0x3f   : > { %1430 = vmatmul.mubr.bf16.gmra.mrb[12].mxu0 %v1504_v22  ;;  %1446 = vmatmul.mubr.bf16.gmra.mrb[12].mxu1 %v1512_v23 }
  0xfa   : > { %v1630_v24 = vpop.f32.mrb[0].mxu0  ;;  %v1632_v25 = vpop.f32.mrb[0].mxu1 }
  0xfb   : > { %v1634_v26 = vpop.f32.mrb[1].mxu0  ;;  %v1636_v27 = vpop.f32.mrb[1].mxu1 }
  0xfc   : > { %v1638_v28 = vpop.f32.mrb[2].mxu0  ;;  %v1640_v29 = vpop.f32.mrb[2].mxu1 }
  0xfd   : > { %v1642_v30 = vpop.f32.mrb[3].mxu0  ;;  %v1644_v31 = vpop.f32.mrb[3].mxu1 }
  0xfe   : > { %v866_v32 = vadd.f32 %v1642_v30, %v1634_v26 }
 0x100   : > { %v867_v33 = vadd.f32 %v1630_v24, %v866_v32 }
 0x102   : > { %v1649_v34 = vpop.f32.mrb[4].mxu0  ;;  %v868_v35 = vadd.f32 %v1638_v28, %v867_v33  ;;  %v1652_v36 = vpop.f32.mrb[4].mxu1 }
 0x103   : > { %v656_v37 = vpop.f32.mrb[5].mxu0  ;;  %v1654_v38 = vpop.f32.mrb[5].mxu1 }
 0x104   : > { %v869_v39 = vadd.f32 %v868_v35, %v656_v37  ;;  %v1424_v40 = vpop.f32.mrb[6].mxu0  ;;  %v1656_v41 = vpop.f32.mrb[6].mxu1 }
 0x105   : > { %v659_v42 = vpop.f32.mrb[7].mxu0  ;;  %v1658_v43 = vpop.f32.mrb[7].mxu1 }
 0x106   : > { %v870_v44 = vadd.f32 %v869_v39, %v659_v42 }
 0x108   : > { %v871_v45 = vadd.f32 %v1649_v34, %v870_v44 }
 0x10a   : > { %v1427_v46 = vpop.f32.mrb[8].mxu0  ;;  %v872_v47 = vadd.f32 %v1424_v40, %v871_v45  ;;  %v1661_v48 = vpop.f32.mrb[8].mxu1 }
 0x10b   : > { %v672_v49 = vpop.f32.mrb[9].mxu0  ;;  %v1663_v50 = vpop.f32.mrb[9].mxu1 }
 0x10c   : > { %v873_v51 = vadd.f32 %v872_v47, %v672_v49  ;;  %v1428_v52 = vpop.f32.mrb[10].mxu0  ;;  %v1665_v53 = vpop.f32.mrb[10].mxu1 }
 0x10d   : > { %v675_v54 = vpop.f32.mrb[11].mxu0  ;;  %v1667_v55 = vpop.f32.mrb[11].mxu1 }
 0x10e   : > { %v874_v56 = vadd.f32 %v873_v51, %v675_v54 }
 0x110   : > { %v875_v57 = vadd.f32 %v1427_v46, %v874_v56 }
 0x112   : > { %v1431_v58 = vpop.f32.mrb[12].mxu0  ;;  %v876_v59 = vadd.f32 %v1428_v52, %v875_v57  ;;  %v1669_v60 = vpop.f32.mrb[12].mxu1 }
 0x113   : > { %v688_v61 = vpop.f32.mrb[13].mxu0  ;;  %v752_v62 = vpop.f32.mrb[13].mxu1 }
 0x114   : > { %v877_v63 = vadd.f32 %v876_v59, %v688_v61  ;;  %v1432_v0 = vpop.f32.mrb[14].mxu0  ;;  %v1448_v1 = vpop.f32.mrb[14].mxu1 }
 0x115   : > { %v691_v2 = vpop.f32.mrb[15].mxu0  ;;  %v755_v3 = vpop.f32.mrb[15].mxu1 }
 0x116   : > { %v878_v4 = vadd.f32 %v877_v63, %v691_v2 }
 0x118   : > { %v879_v5 = vadd.f32 %v1431_v58, %v878_v4 }
 0x11a   : > { %v880_v6 = vadd.f32 %v1432_v0, %v879_v5 }
 0x11c   : > { %v881_v7 = vadd.f32 %v880_v6, %v1636_v27 }
 0x11e   : > { %v882_v8 = vadd.f32 %v881_v7, %v1644_v31 }
 0x120   : > { %v883_v9 = vadd.f32 %v1632_v25, %v882_v8 }
 0x122   : > { %v884_v10 = vadd.f32 %v1640_v29, %v883_v9 }
 0x124   : > { %v885_v11 = vadd.f32 %v884_v10, %v1654_v38 }
 0x126   : > { %v886_v12 = vadd.f32 %v885_v11, %v1658_v43 }
 0x128   : > { %v887_v13 = vadd.f32 %v1652_v36, %v886_v12 }
 0x12a   : > { %v888_v14 = vadd.f32 %v1656_v41, %v887_v13 }
 0x12c   : > { %v889_v15 = vadd.f32 %v888_v14, %v1663_v50 }
 0x12e   : > { %v890_v16 = vadd.f32 %v889_v15, %v1667_v55 }
 0x130   : > { %v891_v17 = vadd.f32 %v1661_v48, %v890_v16 }
 0x132   : > { %v892_v18 = vadd.f32 %v1665_v53, %v891_v17 }
 0x134   : > { %v893_v19 = vadd.f32 %v892_v18, %v752_v62 }
 0x136   : > { %v894_v20 = vadd.f32 %v893_v19, %v755_v3 }
 0x138   : > { %v895_v21 = vadd.f32 %v1669_v60, %v894_v20 }
 0x13a   : > { %v896_v22 = vadd.f32 %v1448_v1, %v895_v21 }
 0x13c   : > { %v897_v23 = vrot.slane %v896_v22, 4 }
 0x13e   : > { %v898_v32 = vadd.f32 %v897_v23, %v896_v22 }
 0x140   : > { %v899_v33 = vrot.slane %v898_v32, 2 }
 0x142   : > { %v900_v35 = vadd.f32 %v899_v33, %v898_v32 }
 0x144   : > { %v901_v39 = vrot.slane %v900_v35, 1 }
 0x146   : > { %v902_v44 = vadd.f32 %v901_v39, %v900_v35 }
 0x148   : > { %v904_v45 = vmul.f32 0.00390625, %v902_v44 }
 0x14a   : > { %v1685_v47 = vsub.f32 %v1634_v26, %v904_v45  ;;  %v1688_v51 = vsub.f32 %v1642_v30, %v904_v45  ;;  %v1691_v56 = vsub.f32 %v1630_v24, %v904_v45  ;;  %v1694_v57 = vsub.f32 %v1638_v28, %v904_v45 }
 0x14b   : > { %v1696_v59 = vsub.f32 %v656_v37, %v904_v45  ;;  %v1698_v63 = vsub.f32 %v659_v42, %v904_v45  ;;  %v1701_v4 = vsub.f32 %v1649_v34, %v904_v45  ;;  %v1703_v5 = vsub.f32 %v1424_v40, %v904_v45 }
 0x14c   : > { %v1705_v26 = vsub.f32 %v672_v49, %v904_v45  ;;  %v1707_v6 = vsub.f32 %v675_v54, %v904_v45  ;;  %v1709_v30 = vsub.f32 %v1427_v46, %v904_v45  ;;  %v1711_v24 = vsub.f32 %v1428_v52, %v904_v45 }
 0x14d   : > { %v1713_v7 = vsub.f32 %v688_v61, %v904_v45  ;;  %v1715_v28 = vsub.f32 %v691_v2, %v904_v45  ;;  %v1717_v37 = vsub.f32 %v1431_v58, %v904_v45  ;;  %v1719_v42 = vsub.f32 %v1432_v0, %v904_v45 }
 0x14e   : > { %v1722_v34 = vsub.f32 %v1636_v27, %v904_v45  ;;  %v1725_v40 = vsub.f32 %v1644_v31, %v904_v45  ;;  %v1728_v49 = vsub.f32 %v1632_v25, %v904_v45  ;;  %v1731_v46 = vsub.f32 %v1640_v29, %v904_v45 }
 0x14f   : > { %v1734_v52 = vsub.f32 %v1654_v38, %v904_v45  ;;  %v1737_v54 = vsub.f32 %v1658_v43, %v904_v45  ;;  %v1740_v58 = vsub.f32 %v1652_v36, %v904_v45  ;;  %v1743_v27 = vsub.f32 %v1656_v41, %v904_v45 }
 0x150   : > { %v1746_v31 = vsub.f32 %v1663_v50, %v904_v45  ;;  %v1749_v25 = vsub.f32 %v1667_v55, %v904_v45  ;;  %v1752_v29 = vsub.f32 %v1661_v48, %v904_v45  ;;  %v1755_v38 = vsub.f32 %v1665_v53, %v904_v45 }
 0x151   : > { %v1757_v43 = vsub.f32 %v752_v62, %v904_v45  ;;  %v1759_v61 = vsub.f32 %v755_v3, %v904_v45  ;;  %v1762_v36 = vsub.f32 %v1669_v60, %v904_v45  ;;  %v1764_v41 = vsub.f32 %v1448_v1, %v904_v45 }
 0x152   : > { %v937_v50 = vmul.f32 %v1685_v47, %v1685_v47  ;;  %v938_v55 = vmul.f32 %v1688_v51, %v1688_v51  ;;  %v939_v48 = vmul.f32 %v1691_v56, %v1691_v56  ;;  %v940_v62 = vmul.f32 %v1694_v57, %v1694_v57 }
 0x153   : > { %v941_v60 = vmul.f32 %v1696_v59, %v1696_v59  ;;  %v942_v1 = vmul.f32 %v1698_v63, %v1698_v63  ;;  %v943_v8 = vmul.f32 %v1701_v4, %v1701_v4  ;;  %v944_v10 = vmul.f32 %v1703_v5, %v1703_v5 }
 0x154   : > { %v969_v53 = vadd.f32 %v938_v55, %v937_v50  ;;  %v945_v12 = vmul.f32 %v1705_v26, %v1705_v26  ;;  %v946_v14 = vmul.f32 %v1707_v6, %v1707_v6  ;;  %v947_v16 = vmul.f32 %v1709_v30, %v1709_v30 }
 0x155   : > { %v948_v18 = vmul.f32 %v1711_v24, %v1711_v24  ;;  %v949_v20 = vmul.f32 %v1713_v7, %v1713_v7  ;;  %v950_v22 = vmul.f32 %v1715_v28, %v1715_v28  ;;  %v951_v32 = vmul.f32 %v1717_v37, %v1717_v37 }
 0x156   : > { %v970_v0 = vadd.f32 %v969_v53, %v939_v48  ;;  %v952_v35 = vmul.f32 %v1719_v42, %v1719_v42  ;;  %v953_v44 = vmul.f32 %v1722_v34, %v1722_v34  ;;  %v954_v50 = vmul.f32 %v1725_v40, %v1725_v40 }
 0x157   : > { %v955_v48 = vmul.f32 %v1728_v49, %v1728_v49 }
 0x158   : > { %v971_v2 = vadd.f32 %v970_v0, %v940_v62  ;;  %v956_v62 = vmul.f32 %v1731_v46, %v1731_v46 }
 0x15a   : > { %v972_v3 = vadd.f32 %v971_v2, %v941_v60  ;;  %v957_v60 = vmul.f32 %v1734_v52, %v1734_v52 }
 0x15c   : > { %v973_v9 = vadd.f32 %v972_v3, %v942_v1  ;;  %v958_v1 = vmul.f32 %v1737_v54, %v1737_v54 }
 0x15e   : > { %v974_v11 = vadd.f32 %v973_v9, %v943_v8  ;;  %v959_v8 = vmul.f32 %v1740_v58, %v1740_v58 }
 0x160   : > { %v975_v13 = vadd.f32 %v974_v11, %v944_v10  ;;  %v960_v10 = vmul.f32 %v1743_v27, %v1743_v27 }
 0x162   : > { %v976_v15 = vadd.f32 %v975_v13, %v945_v12  ;;  %v961_v12 = vmul.f32 %v1746_v31, %v1746_v31 }
 0x164   : > { %v977_v17 = vadd.f32 %v976_v15, %v946_v14  ;;  %v962_v14 = vmul.f32 %v1749_v25, %v1749_v25 }
 0x166   : > { %v978_v19 = vadd.f32 %v977_v17, %v947_v16  ;;  %v963_v16 = vmul.f32 %v1752_v29, %v1752_v29 }
 0x168   : > { %v979_v21 = vadd.f32 %v978_v19, %v948_v18  ;;  %v964_v18 = vmul.f32 %v1755_v38, %v1755_v38 }
 0x16a   : > { %v980_v23 = vadd.f32 %v979_v21, %v949_v20  ;;  %v965_v20 = vmul.f32 %v1757_v43, %v1757_v43 }
 0x16c   : > { %v981_v33 = vadd.f32 %v980_v23, %v950_v22  ;;  %v966_v22 = vmul.f32 %v1759_v61, %v1759_v61 }
 0x16e   : > { %v982_v39 = vadd.f32 %v981_v33, %v951_v32  ;;  %v967_v32 = vmul.f32 %v1762_v36, %v1762_v36 }
 0x170   : > { %v983_v45 = vadd.f32 %v982_v39, %v952_v35  ;;  %v968_v35 = vmul.f32 %v1764_v41, %v1764_v41 }
 0x172   : > { %v984_v55 = vadd.f32 %v983_v45, %v953_v44 }
 0x174   : > { %v985_v53 = vadd.f32 %v984_v55, %v954_v50 }
 0x176   : > { %v986_v0 = vadd.f32 %v985_v53, %v955_v48 }
 0x178   : > { %v987_v2 = vadd.f32 %v986_v0, %v956_v62 }
 0x17a   : > { %v988_v3 = vadd.f32 %v987_v2, %v957_v60 }
 0x17c   : > { %v989_v9 = vadd.f32 %v988_v3, %v958_v1 }
 0x17e   : > { %v990_v11 = vadd.f32 %v989_v9, %v959_v8 }
 0x180   : > { %v991_v13 = vadd.f32 %v990_v11, %v960_v10 }
 0x182   : > { %v992_v15 = vadd.f32 %v991_v13, %v961_v12 }
 0x184   : > { %v993_v17 = vadd.f32 %v992_v15, %v962_v14 }
 0x186   : > { %v994_v19 = vadd.f32 %v993_v17, %v963_v16 }
 0x188   : > { %v995_v21 = vadd.f32 %v994_v19, %v964_v18 }
 0x18a   : > { %v996_v23 = vadd.f32 %v995_v21, %v965_v20 }
 0x18c   : > { %v997_v33 = vadd.f32 %v996_v23, %v966_v22 }
 0x18e   : > { %v998_v39 = vadd.f32 %v997_v33, %v967_v32 }
 0x190   : > { %v999_v44 = vadd.f32 %v998_v39, %v968_v35 }
 0x192   : > { %v1000_v45 = vrot.slane %v999_v44, 4 }
 0x194   : > { %v1001_v50 = vadd.f32 %v1000_v45, %v999_v44 }
 0x196   : > { %v1002_v55 = vrot.slane %v1001_v50, 2 }
 0x198   : > { %v1003_v48 = vadd.f32 %v1002_v55, %v1001_v50  ;;  %v1374_v55 = vld [vmem:[%s1954_s3] ss:$0 sm:$0xff] }
 0x19a   : > { %v1004_v53 = vrot.slane %v1003_v48, 1 }
 0x19c   : > { %v1005_v62 = vadd.f32 %v1004_v53, %v1003_v48 }
 0x19e   : > { %v1006_v0 = vmul.f32 0.00390625, %v1005_v62 }
 0x1a0   : > { %v1007_v60 = vadd.f32 1e-05, %v1006_v0 }
 0x1a2   : > { %1513 = vrsqrt.f32 %v1007_v60 }
 0x1ac   : > { %v1514_v2 = vpop.eup %1513 }
 0x1ad   : > { %v1009_v1 = vmul.f32 %v1514_v2, %v1685_v47  ;;  %v1010_v3 = vmul.f32 %v1514_v2, %v1688_v51  ;;  %v1011_v8 = vmul.f32 %v1514_v2, %v1691_v56  ;;  %v1012_v9 = vmul.f32 %v1514_v2, %v1694_v57 }
 0x1ae   : > { %v1013_v10 = vmul.f32 %v1514_v2, %v1696_v59  ;;  %v1014_v11 = vmul.f32 %v1514_v2, %v1698_v63  ;;  %v1015_v12 = vmul.f32 %v1514_v2, %v1701_v4  ;;  %v1016_v13 = vmul.f32 %v1514_v2, %v1703_v5 }
 0x1af   : > { %v1017_v14 = vmul.f32 %v1514_v2, %v1705_v26  ;;  %v1018_v15 = vmul.f32 %v1514_v2, %v1707_v6  ;;  %v1019_v47 = vmul.f32 %v1514_v2, %v1709_v30  ;;  %v1020_v51 = vmul.f32 %v1514_v2, %v1711_v24 }
 0x1b0   : > { %v1021_v56 = vmul.f32 %v1514_v2, %v1713_v7  ;;  %v1022_v57 = vmul.f32 %v1514_v2, %v1715_v28  ;;  %v1023_v59 = vmul.f32 %v1514_v2, %v1717_v37  ;;  %v1024_v63 = vmul.f32 %v1514_v2, %v1719_v42  ;;  %v1373_v37 = vld [vmem:[%s1953_s2] ss:$0 sm:$0xff] }
 0x1b1   : > { %v1025_v4 = vmul.f32 %v1514_v2, %v1722_v34  ;;  %v1026_v5 = vmul.f32 %v1514_v2, %v1725_v40  ;;  %v1027_v26 = vmul.f32 %v1514_v2, %v1728_v49  ;;  %v1028_v6 = vmul.f32 %v1514_v2, %v1731_v46 }
 0x1b2   : > { %v1029_v30 = vmul.f32 %v1514_v2, %v1734_v52  ;;  %v1030_v24 = vmul.f32 %v1514_v2, %v1737_v54  ;;  %v1031_v7 = vmul.f32 %v1514_v2, %v1740_v58  ;;  %v1032_v28 = vmul.f32 %v1514_v2, %v1743_v27 }
 0x1b3   : > { %v1033_v42 = vmul.f32 %v1514_v2, %v1746_v31  ;;  %v1034_v34 = vmul.f32 %v1514_v2, %v1749_v25  ;;  %v1035_v40 = vmul.f32 %v1514_v2, %v1752_v29  ;;  %v1036_v49 = vmul.f32 %v1514_v2, %v1755_v38 }
 0x1b4   : > { %v1037_v46 = vmul.f32 %v1514_v2, %v1757_v43  ;;  %v1038_v52 = vmul.f32 %v1514_v2, %v1759_v61  ;;  %v1039_v54 = vmul.f32 %v1514_v2, %v1762_v36  ;;  %v1040_v58 = vmul.f32 %v1514_v2, %v1764_v41 }
 0x1b5   : > { %v1048_v27 = vmul.f32 %v1373_v37, %v1009_v1  ;;  %v1049_v16 = vmul.f32 %v1373_v37, %v1010_v3  ;;  %v1050_v17 = vmul.f32 %v1373_v37, %v1011_v8  ;;  %v1051_v18 = vmul.f32 %v1373_v37, %v1012_v9 }
 0x1b6   : > { %v1052_v19 = vmul.f32 %v1373_v37, %v1013_v10  ;;  %v1053_v31 = vmul.f32 %v1373_v37, %v1014_v11  ;;  %v1054_v20 = vmul.f32 %v1373_v37, %v1015_v12  ;;  %v1055_v25 = vmul.f32 %v1373_v37, %v1016_v13 }
 0x1b7   : > { %v1056_v21 = vmul.f32 %v1373_v37, %v1017_v14  ;;  %v1057_v29 = vmul.f32 %v1373_v37, %v1018_v15  ;;  %v1058_v22 = vmul.f32 %v1373_v37, %v1019_v47  ;;  %v1059_v38 = vmul.f32 %v1373_v37, %v1020_v51 }
 0x1b8   : > { %v1060_v23 = vmul.f32 %v1373_v37, %v1021_v56  ;;  %v1061_v43 = vmul.f32 %v1373_v37, %v1022_v57  ;;  %v1062_v32 = vmul.f32 %v1373_v37, %v1023_v59  ;;  %v1063_v61 = vmul.f32 %v1373_v37, %v1024_v63 }
 0x1b9   : > { %v1064_v33 = vmul.f32 %v1373_v37, %v1025_v4  ;;  %v1065_v36 = vmul.f32 %v1373_v37, %v1026_v5  ;;  %v1066_v35 = vmul.f32 %v1373_v37, %v1027_v26  ;;  %v1067_v41 = vmul.f32 %v1373_v37, %v1028_v6 }
 0x1ba   : > { %v1068_v39 = vmul.f32 %v1373_v37, %v1029_v30  ;;  %v1069_v44 = vmul.f32 %v1373_v37, %v1030_v24  ;;  %v1070_v45 = vmul.f32 %v1373_v37, %v1031_v7  ;;  %v1071_v50 = vmul.f32 %v1373_v37, %v1032_v28 }
 0x1bb   : > { %v1072_v48 = vmul.f32 %v1373_v37, %v1033_v42  ;;  %v1073_v53 = vmul.f32 %v1373_v37, %v1034_v34  ;;  %v1074_v62 = vmul.f32 %v1373_v37, %v1035_v40  ;;  %v1075_v0 = vmul.f32 %v1373_v37, %v1036_v49 }
 0x1bc   : > { %v1076_v60 = vmul.f32 %v1373_v37, %v1037_v46  ;;  %v1077_v2 = vmul.f32 %v1373_v37, %v1038_v52  ;;  %v1078_v1 = vmul.f32 %v1373_v37, %v1039_v54  ;;  %v1079_v3 = vmul.f32 %v1373_v37, %v1040_v58 }
 0x1bd   : > { %v1087_v8 = vadd.f32 %v1374_v55, %v1048_v27  ;;  %v1088_v9 = vadd.f32 %v1374_v55, %v1049_v16  ;;  %v1089_v10 = vadd.f32 %v1374_v55, %v1050_v17  ;;  %v1090_v11 = vadd.f32 %v1374_v55, %v1051_v18 }
 0x1be   : > { %v1091_v12 = vadd.f32 %v1374_v55, %v1052_v19  ;;  %v1092_v13 = vadd.f32 %v1374_v55, %v1053_v31  ;;  %v1093_v14 = vadd.f32 %v1374_v55, %v1054_v20  ;;  %v1094_v15 = vadd.f32 %v1374_v55, %v1055_v25 }
 0x1bf   : > { %v1095_v47 = vadd.f32 %v1374_v55, %v1056_v21  ;;  %v1096_v51 = vadd.f32 %v1374_v55, %v1057_v29  ;;  %v1097_v56 = vadd.f32 %v1374_v55, %v1058_v22  ;;  %v1098_v57 = vadd.f32 %v1374_v55, %v1059_v38 }
 0x1c0   : > { %v1099_v59 = vadd.f32 %v1374_v55, %v1060_v23  ;;  %v1100_v63 = vadd.f32 %v1374_v55, %v1061_v43  ;;  %v1101_v4 = vadd.f32 %v1374_v55, %v1062_v32  ;;  %v1102_v5 = vadd.f32 %v1374_v55, %v1063_v61 }
 0x1c1   : > { %v1103_v26 = vadd.f32 %v1374_v55, %v1064_v33  ;;  %v1104_v6 = vadd.f32 %v1374_v55, %v1065_v36  ;;  %v1105_v30 = vadd.f32 %v1374_v55, %v1066_v35  ;;  %v1106_v24 = vadd.f32 %v1374_v55, %v1067_v41 }
 0x1c2   : > { %v1869_v7 = vadd.f32 %v1374_v55, %v1068_v39  ;;  %v1871_v28 = vadd.f32 %v1374_v55, %v1069_v44  ;;  %v1873_v37 = vadd.f32 %v1374_v55, %v1070_v45  ;;  %v1875_v42 = vadd.f32 %v1374_v55, %v1071_v50 }
 0x1c3   : > { %v1877_v34 = vadd.f32 %v1374_v55, %v1072_v48  ;;  %v1879_v40 = vadd.f32 %v1374_v55, %v1073_v53  ;;  %v1881_v49 = vadd.f32 %v1374_v55, %v1074_v62  ;;  %v1883_v46 = vadd.f32 %v1374_v55, %v1075_v0 }
 0x1c4   : > { %v1890_v52 = vadd.f32 %v1374_v55, %v1076_v60  ;;  %v1892_v54 = vadd.f32 %v1374_v55, %v1077_v2  ;;  %v1894_v58 = vadd.f32 %v1374_v55, %v1078_v1  ;;  %v1896_v27 = vadd.f32 %v1374_v55, %v1079_v3 }
 0x1c5   : > { %v1119_v16 = vmax.f32 %v1087_v8, 0.0  ;;  %v1120_v17 = vmax.f32 %v1088_v9, 0.0  ;;  %v1121_v18 = vmax.f32 %v1089_v10, 0.0  ;;  %v1122_v19 = vmax.f32 %v1090_v11, 0.0 }
 0x1c6   : > { %v1123_v31 = vmax.f32 %v1091_v12, 0.0  ;;  %v1124_v20 = vmax.f32 %v1092_v13, 0.0  ;;  %v1125_v25 = vmax.f32 %v1093_v14, 0.0  ;;  %v1126_v21 = vmax.f32 %v1094_v15, 0.0 }
 0x1c7   : > { %v1127_v29 = vmax.f32 %v1095_v47, 0.0  ;;  %v1128_v22 = vmax.f32 %v1096_v51, 0.0  ;;  %v1129_v38 = vmax.f32 %v1097_v56, 0.0  ;;  %v1130_v23 = vmax.f32 %v1098_v57, 0.0  ;;  %1151 = vst [vmem:[%s1888_s24] sm:$0xff] %v1119_v16  ;;  %1152 = vst [vmem:[%s1888_s24 + $0x8] sm:$0xff] %v1120_v17 }
 0x1c8   : > { %1153 = vst [vmem:[%s1888_s24 + $0x10] sm:$0xff] %v1121_v18  ;;  %1154 = vst [vmem:[%s1888_s24 + $0x18] sm:$0xff] %v1122_v19  ;;  %v1131_v43 = vmax.f32 %v1099_v59, 0.0  ;;  %v1132_v32 = vmax.f32 %v1100_v63, 0.0  ;;  %v1133_v61 = vmax.f32 %v1101_v4, 0.0  ;;  %v1134_v33 = vmax.f32 %v1102_v5, 0.0 }
 0x1c9   : > { %1155 = vst [vmem:[%s1888_s24 + $0x20] sm:$0xff] %v1123_v31  ;;  %1156 = vst [vmem:[%s1888_s24 + $0x28] sm:$0xff] %v1124_v20  ;;  %v1135_v36 = vmax.f32 %v1103_v26, 0.0  ;;  %v1136_v35 = vmax.f32 %v1104_v6, 0.0  ;;  %v1137_v41 = vmax.f32 %v1105_v30, 0.0  ;;  %v1138_v39 = vmax.f32 %v1106_v24, 0.0 }
 0x1ca   : > { %1157 = vst [vmem:[%s1888_s24 + $0x30] sm:$0xff] %v1125_v25  ;;  %1158 = vst [vmem:[%s1888_s24 + $0x38] sm:$0xff] %v1126_v21  ;;  %v1139_v44 = vmax.f32 %v1869_v7, 0.0  ;;  %v1140_v45 = vmax.f32 %v1871_v28, 0.0  ;;  %v1141_v50 = vmax.f32 %v1873_v37, 0.0  ;;  %v1142_v55 = vmax.f32 %v1875_v42, 0.0 }
 0x1cb   : > { %1159 = vst [vmem:[%s1888_s24 + $0x40] sm:$0xff] %v1127_v29  ;;  %1160 = vst [vmem:[%s1888_s24 + $0x48] sm:$0xff] %v1128_v22  ;;  %v1143_v48 = vmax.f32 %v1877_v34, 0.0  ;;  %v1144_v53 = vmax.f32 %v1879_v40, 0.0  ;;  %v1145_v62 = vmax.f32 %v1881_v49, 0.0  ;;  %v1146_v0 = vmax.f32 %v1883_v46, 0.0 }
 0x1cc   : > { %1161 = vst [vmem:[%s1888_s24 + $0x50] sm:$0xff] %v1129_v38  ;;  %1162 = vst [vmem:[%s1888_s24 + $0x58] sm:$0xff] %v1130_v23  ;;  %v1147_v60 = vmax.f32 %v1890_v52, 0.0  ;;  %v1148_v2 = vmax.f32 %v1892_v54, 0.0  ;;  %v1149_v1 = vmax.f32 %v1894_v58, 0.0  ;;  %v1150_v3 = vmax.f32 %v1896_v27, 0.0 }
 0x1cd   : > { %1163 = vst [vmem:[%s1888_s24 + $0x60] sm:$0xff] %v1131_v43  ;;  %1164 = vst [vmem:[%s1888_s24 + $0x68] sm:$0xff] %v1132_v32 }
 0x1ce   : > { %1165 = vst [vmem:[%s1888_s24 + $0x70] sm:$0xff] %v1133_v61  ;;  %1166 = vst [vmem:[%s1888_s24 + $0x78] sm:$0xff] %v1134_v33 }
 0x1cf   : > { %1167 = vst [vmem:[%s1888_s24 + $0x80] sm:$0xff] %v1135_v36  ;;  %1168 = vst [vmem:[%s1888_s24 + $0x88] sm:$0xff] %v1136_v35 }
 0x1d0   : > { %1169 = vst [vmem:[%s1888_s24 + $0x90] sm:$0xff] %v1137_v41  ;;  %1170 = vst [vmem:[%s1888_s24 + $0x98] sm:$0xff] %v1138_v39 }
 0x1d1   : > { %1171 = vst [vmem:[%s1888_s24 + $0xa0] sm:$0xff] %v1139_v44  ;;  %1172 = vst [vmem:[%s1888_s24 + $0xa8] sm:$0xff] %v1140_v45 }
 0x1d2   : > { %1173 = vst [vmem:[%s1888_s24 + $0xb0] sm:$0xff] %v1141_v50  ;;  %1174 = vst [vmem:[%s1888_s24 + $0xb8] sm:$0xff] %v1142_v55 }
 0x1d3   : > { %1175 = vst [vmem:[%s1888_s24 + $0xc0] sm:$0xff] %v1143_v48  ;;  %1176 = vst [vmem:[%s1888_s24 + $0xc8] sm:$0xff] %v1144_v53 }
 0x1d4   : > { %1177 = vst [vmem:[%s1888_s24 + $0xd0] sm:$0xff] %v1145_v62  ;;  %1178 = vst [vmem:[%s1888_s24 + $0xd8] sm:$0xff] %v1146_v0 }
 0x1d5   : > { %1179 = vst [vmem:[%s1888_s24 + $0xe0] sm:$0xff] %v1147_v60  ;;  %1180 = vst [vmem:[%s1888_s24 + $0xe8] sm:$0xff] %v1148_v2 }
 0x1d6   : > { %1181 = vst [vmem:[%s1888_s24 + $0xf0] sm:$0xff] %v1149_v1  ;;  %1182 = vst [vmem:[%s1888_s24 + $0xf8] sm:$0xff] %v1150_v3 }
 0x1d7 PF: > { %s14_s17 = sadd.s32 1, %s1537_s17   ;;  %s1956_s15 = smov %s1533_s16 }
 0x1d8   : > { %p11_p5 = scmp.ge.s32.totalorder %s14_s17, 4   ;;  %s1957_s16 = smov %s1959_s18 }
 0x1da   :  { %13 = sbr.rel (!%p11_p5) target bundleno = 2 (0x2), region = 83 }

// kernel: _lambda_.29
= control target key start
LH: loop header
LB: loop body
LE: loop exit
PB: predicated region body
PF: predicated region fallthrough
CT: control target
= control target key end

     0   :  { %s2386_s9 = smov 0   ;;  %s2388_s10 = smov 0   ;;  %s2957_s0 = inlined_call_operand.vmem [shape: bf16[1,512,512], index: 0, kind: input, shape index: {}]   ;;  %s2958_s1 = inlined_call_operand.vmem [shape: bf16[1,512,128], index: 1, kind: input, shape index: {}]   ;;  %s2959_s2 = inlined_call_operand.vmem [shape: f32[1,512,128], index: 2, kind: output, shape index: {}]  }
   0x1   :  { %s2390_s11 = smov 0   ;;  %s2392_s12 = smov 0  }
   0x2   :  { %s2394_s13 = smov 0  }
   0x3 LB: > { %s27_s14 = sadd.s32 1, %s2363_s12  ;;  %p56_p1 = scmp.ne.s32.totalorder %s2355_s10, %s2351_s9  ;;  %s2367_s13 = sphi %s2394_s13, %s12_s13   ;;  %s2363_s12 = sphi %s2392_s12, %s2963_s12   ;;  %s2359_s11 = sphi %s2390_s11, %s2962_s11   ;;  %s2355_s10 = sphi %s2388_s10, %s2961_s10   ;;  %s2351_s9 = sphi %s2386_s9, %s2960_s9  }
   0x4   : > { %p28_p0 = scmp.ge.s32.totalorder %s27_s14, 2  ;;  %p57_p2 = scmp.eq.s32.totalorder %s2367_s13, 0 }
   0x5   : > { %s49_s16 = sadd.s32 1, %s2355_s10  ;;  %p1920_p5 = scmp.ge.s32.totalorder %s2367_s13, 2 }
   0x6   : > { %s2965_s14 = smov (%p28_p0, %s27_s14), 0  ;;  %p58_p3 = por %p57_p2, %p56_p1 }
   0x7   : > { %s45_s15 = ssub.s32 %s2363_s12, %s2965_s14  ;;  %142 = sbr.rel (%p1920_p5) target bundleno = 50 (0x32), region = 16 }
   0x8   : > { %p47_p4 = scmp.eq.s32.totalorder %s45_s15, 0 }
   0xa   : > { %s2421_s17 = scalar_select %p47_p4, %s2355_s10, %s49_s16  }
   0xe   : > { %145 = sbr.rel (!%p58_p3) target bundleno = 50 (0x32), region = 20  ;;  %s147_s18 = sand.u32 (%p58_p3), 1, %s2355_s10  }
   0xf   : > { %s2014_s19 = sshll.u32 (%p58_p3), %s2363_s12, 3  ;;  %s1921_s20 = sshll.u32 (%p58_p3), %s147_s18, 9 }
  0x10   : > { %s2429_s23 = scalar_lea.vmem (%p58_p3), %s2957_s0, %s2014_s19  ;;  %s2434_s24 = scalar_lea.vmem (%p58_p3), [#allocation3], %s1921_s20 }
  0x11   : > { %v311_v0 = vld [vmem:[%s2429_s23] sm:$0xff] (%p58_p3)  ;;  %v313_v1 = vld [vmem:[%s2429_s23 + $0x10] sm:$0xff] (%p58_p3) }
  0x12   : > { %v315_v2 = vld [vmem:[%s2429_s23 + $0x20] sm:$0xff] (%p58_p3)  ;;  %312 = vst [vmem:[%s2434_s24] sm:$0xff] (%p58_p3), %v311_v0  ;;  %314 = vst [vmem:[%s2434_s24 + $0x8] sm:$0xff] (%p58_p3), %v313_v1  ;;  %v317_v3 = vld [vmem:[%s2429_s23 + $0x30] sm:$0xff] (%p58_p3) }
  0x13   : > { %316 = vst [vmem:[%s2434_s24 + $0x10] sm:$0xff] (%p58_p3), %v315_v2  ;;  %v319_v4 = vld [vmem:[%s2429_s23 + $0x40] sm:$0xff] (%p58_p3)  ;;  %v321_v5 = vld [vmem:[%s2429_s23 + $0x50] sm:$0xff] (%p58_p3)  ;;  %318 = vst [vmem:[%s2434_s24 + $0x18] sm:$0xff] (%p58_p3), %v317_v3 }
  0x14   : > { %320 = vst [vmem:[%s2434_s24 + $0x20] sm:$0xff] (%p58_p3), %v319_v4  ;;  %322 = vst [vmem:[%s2434_s24 + $0x28] sm:$0xff] (%p58_p3), %v321_v5  ;;  %v323_v6 = vld [vmem:[%s2429_s23 + $0x60] sm:$0xff] (%p58_p3)  ;;  %v325_v7 = vld [vmem:[%s2429_s23 + $0x70] sm:$0xff] (%p58_p3) }
  0x15   : > { %v327_v8 = vld [vmem:[%s2429_s23 + $0x80] sm:$0xff]  ;;  %324 = vst [vmem:[%s2434_s24 + $0x30] sm:$0xff] %v323_v6  ;;  %326 = vst [vmem:[%s2434_s24 + $0x38] sm:$0xff] %v325_v7  ;;  %v329_v9 = vld [vmem:[%s2429_s23 + $0x90] sm:$0xff] }
  0x16   : > { %328 = vst [vmem:[%s2434_s24 + $0x40] sm:$0xff] %v327_v8  ;;  %v331_v10 = vld [vmem:[%s2429_s23 + $0xa0] sm:$0xff]  ;;  %v333_v11 = vld [vmem:[%s2429_s23 + $0xb0] sm:$0xff]  ;;  %330 = vst [vmem:[%s2434_s24 + $0x48] sm:$0xff] %v329_v9 }
  0x17   : > { %332 = vst [vmem:[%s2434_s24 + $0x50] sm:$0xff] %v331_v10  ;;  %334 = vst [vmem:[%s2434_s24 + $0x58] sm:$0xff] %v333_v11  ;;  %v335_v12 = vld [vmem:[%s2429_s23 + $0xc0] sm:$0xff]  ;;  %v337_v13 = vld [vmem:[%s2429_s23 + $0xd0] sm:$0xff] }
  0x18   : > { %v339_v14 = vld [vmem:[%s2429_s23 + $0xe0] sm:$0xff]  ;;  %336 = vst [vmem:[%s2434_s24 + $0x60] sm:$0xff] %v335_v12  ;;  %338 = vst [vmem:[%s2434_s24 + $0x68] sm:$0xff] %v337_v13  ;;  %v341_v15 = vld [vmem:[%s2429_s23 + $0xf0] sm:$0xff] }
  0x19   : > { %340 = vst [vmem:[%s2434_s24 + $0x70] sm:$0xff] %v339_v14  ;;  %v343_v16 = vld [vmem:[%s2429_s23 + $0x100] sm:$0xff]  ;;  %v345_v17 = vld [vmem:[%s2429_s23 + $0x110] sm:$0xff]  ;;  %342 = vst [vmem:[%s2434_s24 + $0x78] sm:$0xff] %v341_v15 }
  0x1a   : > { %344 = vst [vmem:[%s2434_s24 + $0x80] sm:$0xff] %v343_v16  ;;  %346 = vst [vmem:[%s2434_s24 + $0x88] sm:$0xff] %v345_v17  ;;  %v347_v18 = vld [vmem:[%s2429_s23 + $0x120] sm:$0xff]  ;;  %v349_v19 = vld [vmem:[%s2429_s23 + $0x130] sm:$0xff] }
  0x1b   : > { %v351_v20 = vld [vmem:[%s2429_s23 + $0x140] sm:$0xff]  ;;  %348 = vst [vmem:[%s2434_s24 + $0x90] sm:$0xff] %v347_v18  ;;  %350 = vst [vmem:[%s2434_s24 + $0x98] sm:$0xff] %v349_v19  ;;  %v353_v21 = vld [vmem:[%s2429_s23 + $0x150] sm:$0xff] }
  0x1c   : > { %352 = vst [vmem:[%s2434_s24 + $0xa0] sm:$0xff] %v351_v20  ;;  %v355_v22 = vld [vmem:[%s2429_s23 + $0x160] sm:$0xff]  ;;  %v357_v23 = vld [vmem:[%s2429_s23 + $0x170] sm:$0xff]  ;;  %354 = vst [vmem:[%s2434_s24 + $0xa8] sm:$0xff] %v353_v21 }
  0x1d   : > { %356 = vst [vmem:[%s2434_s24 + $0xb0] sm:$0xff] %v355_v22  ;;  %358 = vst [vmem:[%s2434_s24 + $0xb8] sm:$0xff] %v357_v23  ;;  %v359_v24 = vld [vmem:[%s2429_s23 + $0x180] sm:$0xff]  ;;  %v361_v25 = vld [vmem:[%s2429_s23 + $0x190] sm:$0xff] }
  0x1e   : > { %v363_v26 = vld [vmem:[%s2429_s23 + $0x1a0] sm:$0xff]  ;;  %360 = vst [vmem:[%s2434_s24 + $0xc0] sm:$0xff] %v359_v24  ;;  %362 = vst [vmem:[%s2434_s24 + $0xc8] sm:$0xff] %v361_v25  ;;  %v365_v27 = vld [vmem:[%s2429_s23 + $0x1b0] sm:$0xff] }
  0x1f   : > { %364 = vst [vmem:[%s2434_s24 + $0xd0] sm:$0xff] %v363_v26  ;;  %v367_v28 = vld [vmem:[%s2429_s23 + $0x1c0] sm:$0xff]  ;;  %v369_v29 = vld [vmem:[%s2429_s23 + $0x1d0] sm:$0xff]  ;;  %366 = vst [vmem:[%s2434_s24 + $0xd8] sm:$0xff] %v365_v27 }
  0x20   : > { %368 = vst [vmem:[%s2434_s24 + $0xe0] sm:$0xff] %v367_v28  ;;  %370 = vst [vmem:[%s2434_s24 + $0xe8] sm:$0xff] %v369_v29  ;;  %v371_v30 = vld [vmem:[%s2429_s23 + $0x1e0] sm:$0xff]  ;;  %v373_v31 = vld [vmem:[%s2429_s23 + $0x1f0] sm:$0xff] }
  0x21   : > { %v375_v32 = vld [vmem:[%s2429_s23 + $0x200] sm:$0xff]  ;;  %372 = vst [vmem:[%s2434_s24 + $0xf0] sm:$0xff] %v371_v30  ;;  %374 = vst [vmem:[%s2434_s24 + $0xf8] sm:$0xff] %v373_v31  ;;  %v377_v33 = vld [vmem:[%s2429_s23 + $0x210] sm:$0xff] }
  0x22   : > { %376 = vst [vmem:[%s2434_s24 + $0x100] sm:$0xff] %v375_v32  ;;  %v379_v34 = vld [vmem:[%s2429_s23 + $0x220] sm:$0xff]  ;;  %v381_v35 = vld [vmem:[%s2429_s23 + $0x230] sm:$0xff]  ;;  %378 = vst [vmem:[%s2434_s24 + $0x108] sm:$0xff] %v377_v33 }
  0x23   : > { %380 = vst [vmem:[%s2434_s24 + $0x110] sm:$0xff] %v379_v34  ;;  %382 = vst [vmem:[%s2434_s24 + $0x118] sm:$0xff] %v381_v35  ;;  %v383_v36 = vld [vmem:[%s2429_s23 + $0x240] sm:$0xff]  ;;  %v385_v37 = vld [vmem:[%s2429_s23 + $0x250] sm:$0xff] }
  0x24   : > { %v387_v38 = vld [vmem:[%s2429_s23 + $0x260] sm:$0xff]  ;;  %384 = vst [vmem:[%s2434_s24 + $0x120] sm:$0xff] %v383_v36  ;;  %386 = vst [vmem:[%s2434_s24 + $0x128] sm:$0xff] %v385_v37  ;;  %v389_v39 = vld [vmem:[%s2429_s23 + $0x270] sm:$0xff] }
  0x25   : > { %388 = vst [vmem:[%s2434_s24 + $0x130] sm:$0xff] %v387_v38  ;;  %v391_v40 = vld [vmem:[%s2429_s23 + $0x280] sm:$0xff]  ;;  %v393_v41 = vld [vmem:[%s2429_s23 + $0x290] sm:$0xff]  ;;  %390 = vst [vmem:[%s2434_s24 + $0x138] sm:$0xff] %v389_v39 }
  0x26   : > { %392 = vst [vmem:[%s2434_s24 + $0x140] sm:$0xff] %v391_v40  ;;  %394 = vst [vmem:[%s2434_s24 + $0x148] sm:$0xff] %v393_v41  ;;  %v395_v42 = vld [vmem:[%s2429_s23 + $0x2a0] sm:$0xff]  ;;  %v397_v43 = vld [vmem:[%s2429_s23 + $0x2b0] sm:$0xff] }
  0x27   : > { %v399_v44 = vld [vmem:[%s2429_s23 + $0x2c0] sm:$0xff]  ;;  %396 = vst [vmem:[%s2434_s24 + $0x150] sm:$0xff] %v395_v42  ;;  %398 = vst [vmem:[%s2434_s24 + $0x158] sm:$0xff] %v397_v43  ;;  %v401_v45 = vld [vmem:[%s2429_s23 + $0x2d0] sm:$0xff] }
  0x28   : > { %400 = vst [vmem:[%s2434_s24 + $0x160] sm:$0xff] %v399_v44  ;;  %v403_v46 = vld [vmem:[%s2429_s23 + $0x2e0] sm:$0xff]  ;;  %v405_v47 = vld [vmem:[%s2429_s23 + $0x2f0] sm:$0xff]  ;;  %402 = vst [vmem:[%s2434_s24 + $0x168] sm:$0xff] %v401_v45 }
  0x29   : > { %404 = vst [vmem:[%s2434_s24 + $0x170] sm:$0xff] %v403_v46  ;;  %406 = vst [vmem:[%s2434_s24 + $0x178] sm:$0xff] %v405_v47  ;;  %v407_v48 = vld [vmem:[%s2429_s23 + $0x300] sm:$0xff]  ;;  %v409_v49 = vld [vmem:[%s2429_s23 + $0x310] sm:$0xff] }
  0x2a   : > { %v411_v50 = vld [vmem:[%s2429_s23 + $0x320] sm:$0xff]  ;;  %408 = vst [vmem:[%s2434_s24 + $0x180] sm:$0xff] %v407_v48  ;;  %410 = vst [vmem:[%s2434_s24 + $0x188] sm:$0xff] %v409_v49  ;;  %v413_v51 = vld [vmem:[%s2429_s23 + $0x330] sm:$0xff] }
  0x2b   : > { %412 = vst [vmem:[%s2434_s24 + $0x190] sm:$0xff] %v411_v50  ;;  %v415_v52 = vld [vmem:[%s2429_s23 + $0x340] sm:$0xff]  ;;  %v417_v53 = vld [vmem:[%s2429_s23 + $0x350] sm:$0xff]  ;;  %414 = vst [vmem:[%s2434_s24 + $0x198] sm:$0xff] %v413_v51 }
  0x2c   : > { %416 = vst [vmem:[%s2434_s24 + $0x1a0] sm:$0xff] %v415_v52  ;;  %418 = vst [vmem:[%s2434_s24 + $0x1a8] sm:$0xff] %v417_v53  ;;  %v419_v54 = vld [vmem:[%s2429_s23 + $0x360] sm:$0xff]  ;;  %v421_v55 = vld [vmem:[%s2429_s23 + $0x370] sm:$0xff] }
  0x2d   : > { %v423_v56 = vld [vmem:[%s2429_s23 + $0x380] sm:$0xff]  ;;  %420 = vst [vmem:[%s2434_s24 + $0x1b0] sm:$0xff] %v419_v54  ;;  %422 = vst [vmem:[%s2434_s24 + $0x1b8] sm:$0xff] %v421_v55  ;;  %v425_v57 = vld [vmem:[%s2429_s23 + $0x390] sm:$0xff] }
  0x2e   : > { %424 = vst [vmem:[%s2434_s24 + $0x1c0] sm:$0xff] %v423_v56  ;;  %v427_v58 = vld [vmem:[%s2429_s23 + $0x3a0] sm:$0xff]  ;;  %v429_v59 = vld [vmem:[%s2429_s23 + $0x3b0] sm:$0xff]  ;;  %426 = vst [vmem:[%s2434_s24 + $0x1c8] sm:$0xff] %v425_v57 }
  0x2f   : > { %428 = vst [vmem:[%s2434_s24 + $0x1d0] sm:$0xff] %v427_v58  ;;  %430 = vst [vmem:[%s2434_s24 + $0x1d8] sm:$0xff] %v429_v59  ;;  %v431_v60 = vld [vmem:[%s2429_s23 + $0x3c0] sm:$0xff]  ;;  %v433_v61 = vld [vmem:[%s2429_s23 + $0x3d0] sm:$0xff] }
  0x30   : > { %v435_v62 = vld [vmem:[%s2429_s23 + $0x3e0] sm:$0xff]  ;;  %432 = vst [vmem:[%s2434_s24 + $0x1e0] sm:$0xff] %v431_v60  ;;  %434 = vst [vmem:[%s2434_s24 + $0x1e8] sm:$0xff] %v433_v61  ;;  %v437_v63 = vld [vmem:[%s2429_s23 + $0x3f0] sm:$0xff] }
  0x31   : > { %436 = vst [vmem:[%s2434_s24 + $0x1f0] sm:$0xff] %v435_v62  ;;  %438 = vst [vmem:[%s2434_s24 + $0x1f8] sm:$0xff] %v437_v63 }
  0x32 PF: > { %p1924_p6 = scmp.ge.s32.totalorder %s2367_s13, 1  ;;  %p459_p7 = scmp.lt.s32.totalorder %s2367_s13, 3 }
  0x34   : > { %p460_p8 = pnand %p1924_p6, %p459_p7 }
  0x35   : > { %s466_s25 = sand.u32 (!%p460_p8), 1, %s2351_s9   ;;  %s1926_s26 = sshll.u32 (!%p460_p8), %s2359_s11, 5 }
  0x36   : > { %463 = sbr.rel (%p460_p8) target bundleno = 552 (0x228), region = 62  ;;  %s1925_s27 = sshll.u32 (!%p460_p8), %s466_s25, 9 }
  0x37   : > { %p511_p9 = scmp.lt.s32.totalorder (!%p460_p8), %s1926_s26, 63  ;;  %s2570_s4 = scalar_lea.vmem (!%p460_p8), [#allocation3], %s1925_s27 }
  0x38   : > { %p1928_p10 = scmp.ne.s32.totalorder (!%p460_p8), %s2359_s11, 0 }
  0x3d   : > { %s2967_s26 = smov (!%p511_p9, %s1926_s26), 63  ;;  %538 = sbr.rel (%p1928_p10) target bundleno = 95 (0x5f), region = 70 }
  0x3e   : > { %s1927_s28 = sshll.u32 %s2967_s26, 2  ;;  %v2369_v0 = vmov (!%p1928_p10), 0.0  }
  0x3f   : > { %s2568_s3 = scalar_lea.vmem %s2958_s1, %s1927_s28  ;;  %539 = vst [vmem:[#allocation2] sm:$0xff] (!%p1928_p10), %v2369_v0  ;;  %540 = vst [vmem:[#allocation2 + $0x8] sm:$0xff] (!%p1928_p10), %v2369_v0 }
  0x40   : > { %541 = vst [vmem:[#allocation2 + $0x10] sm:$0xff] (!%p1928_p10), %v2369_v0  ;;  %542 = vst [vmem:[#allocation2 + $0x18] sm:$0xff] (!%p1928_p10), %v2369_v0 }
  0x41   : > { %543 = vst [vmem:[#allocation2 + $0x20] sm:$0xff] (!%p1928_p10), %v2369_v0  ;;  %544 = vst [vmem:[#allocation2 + $0x28] sm:$0xff] (!%p1928_p10), %v2369_v0 }
  0x42   : > { %545 = vst [vmem:[#allocation2 + $0x30] sm:$0xff] (!%p1928_p10), %v2369_v0  ;;  %546 = vst [vmem:[#allocation2 + $0x38] sm:$0xff] (!%p1928_p10), %v2369_v0 }
  0x43   : > { %547 = vst [vmem:[#allocation2 + $0x40] sm:$0xff] (!%p1928_p10), %v2369_v0  ;;  %548 = vst [vmem:[#allocation2 + $0x48] sm:$0xff] (!%p1928_p10), %v2369_v0 }
  0x44   : > { %549 = vst [vmem:[#allocation2 + $0x50] sm:$0xff] %v2369_v0  ;;  %550 = vst [vmem:[#allocation2 + $0x58] sm:$0xff] %v2369_v0 }
  0x45   : > { %551 = vst [vmem:[#allocation2 + $0x60] sm:$0xff] %v2369_v0  ;;  %552 = vst [vmem:[#allocation2 + $0x68] sm:$0xff] %v2369_v0 }
  0x46   : > { %553 = vst [vmem:[#allocation2 + $0x70] sm:$0xff] %v2369_v0  ;;  %554 = vst [vmem:[#allocation2 + $0x78] sm:$0xff] %v2369_v0 }
  0x47   : > { %555 = vst [vmem:[#allocation2 + $0x80] sm:$0xff] %v2369_v0  ;;  %556 = vst [vmem:[#allocation2 + $0x88] sm:$0xff] %v2369_v0 }
  0x48   : > { %557 = vst [vmem:[#allocation2 + $0x90] sm:$0xff] %v2369_v0  ;;  %558 = vst [vmem:[#allocation2 + $0x98] sm:$0xff] %v2369_v0 }
  0x49   : > { %559 = vst [vmem:[#allocation2 + $0xa0] sm:$0xff] %v2369_v0  ;;  %560 = vst [vmem:[#allocation2 + $0xa8] sm:$0xff] %v2369_v0 }
  0x4a   : > { %561 = vst [vmem:[#allocation2 + $0xb0] sm:$0xff] %v2369_v0  ;;  %562 = vst [vmem:[#allocation2 + $0xb8] sm:$0xff] %v2369_v0 }
  0x4b   : > { %563 = vst [vmem:[#allocation2 + $0xc0] sm:$0xff] %v2369_v0  ;;  %564 = vst [vmem:[#allocation2 + $0xc8] sm:$0xff] %v2369_v0 }
  0x4c   : > { %565 = vst [vmem:[#allocation2 + $0xd0] sm:$0xff] %v2369_v0  ;;  %566 = vst [vmem:[#allocation2 + $0xd8] sm:$0xff] %v2369_v0 }
  0x4d   : > { %567 = vst [vmem:[#allocation2 + $0xe0] sm:$0xff] %v2369_v0  ;;  %568 = vst [vmem:[#allocation2 + $0xe8] sm:$0xff] %v2369_v0 }
  0x4e   : > { %569 = vst [vmem:[#allocation2 + $0xf0] sm:$0xff] %v2369_v0  ;;  %570 = vst [vmem:[#allocation2 + $0xf8] sm:$0xff] %v2369_v0 }
  0x4f   : > { %571 = vst [vmem:[#allocation2 + $0x100] sm:$0xff] %v2369_v0  ;;  %572 = vst [vmem:[#allocation2 + $0x108] sm:$0xff] %v2369_v0 }
  0x50   : > { %573 = vst [vmem:[#allocation2 + $0x110] sm:$0xff] %v2369_v0  ;;  %574 = vst [vmem:[#allocation2 + $0x118] sm:$0xff] %v2369_v0 }
  0x51   : > { %575 = vst [vmem:[#allocation2 + $0x120] sm:$0xff] %v2369_v0  ;;  %576 = vst [vmem:[#allocation2 + $0x128] sm:$0xff] %v2369_v0 }
  0x52   : > { %577 = vst [vmem:[#allocation2 + $0x130] sm:$0xff] %v2369_v0  ;;  %578 = vst [vmem:[#allocation2 + $0x138] sm:$0xff] %v2369_v0 }
  0x53   : > { %579 = vst [vmem:[#allocation2 + $0x140] sm:$0xff] %v2369_v0  ;;  %580 = vst [vmem:[#allocation2 + $0x148] sm:$0xff] %v2369_v0 }
  0x54   : > { %581 = vst [vmem:[#allocation2 + $0x150] sm:$0xff] %v2369_v0  ;;  %582 = vst [vmem:[#allocation2 + $0x158] sm:$0xff] %v2369_v0 }
  0x55   : > { %583 = vst [vmem:[#allocation2 + $0x160] sm:$0xff] %v2369_v0  ;;  %584 = vst [vmem:[#allocation2 + $0x168] sm:$0xff] %v2369_v0 }
  0x56   : > { %585 = vst [vmem:[#allocation2 + $0x170] sm:$0xff] %v2369_v0  ;;  %586 = vst [vmem:[#allocation2 + $0x178] sm:$0xff] %v2369_v0 }
  0x57   : > { %587 = vst [vmem:[#allocation2 + $0x180] sm:$0xff] %v2369_v0  ;;  %588 = vst [vmem:[#allocation2 + $0x188] sm:$0xff] %v2369_v0 }
  0x58   : > { %589 = vst [vmem:[#allocation2 + $0x190] sm:$0xff] %v2369_v0  ;;  %590 = vst [vmem:[#allocation2 + $0x198] sm:$0xff] %v2369_v0 }
  0x59   : > { %591 = vst [vmem:[#allocation2 + $0x1a0] sm:$0xff] %v2369_v0  ;;  %592 = vst [vmem:[#allocation2 + $0x1a8] sm:$0xff] %v2369_v0 }
  0x5a   : > { %593 = vst [vmem:[#allocation2 + $0x1b0] sm:$0xff] %v2369_v0  ;;  %594 = vst [vmem:[#allocation2 + $0x1b8] sm:$0xff] %v2369_v0 }
  0x5b   : > { %595 = vst [vmem:[#allocation2 + $0x1c0] sm:$0xff] %v2369_v0  ;;  %596 = vst [vmem:[#allocation2 + $0x1c8] sm:$0xff] %v2369_v0 }
  0x5c   : > { %597 = vst [vmem:[#allocation2 + $0x1d0] sm:$0xff] %v2369_v0  ;;  %598 = vst [vmem:[#allocation2 + $0x1d8] sm:$0xff] %v2369_v0 }
  0x5d   : > { %599 = vst [vmem:[#allocation2 + $0x1e0] sm:$0xff] %v2369_v0  ;;  %600 = vst [vmem:[#allocation2 + $0x1e8] sm:$0xff] %v2369_v0 }
  0x5e   : > { %601 = vst [vmem:[#allocation2 + $0x1f0] sm:$0xff] %v2369_v0  ;;  %602 = vst [vmem:[#allocation2 + $0x1f8] sm:$0xff] %v2369_v0 }
  0x5f PF: > { %v2089_v1 = vld [vmem:[%s2568_s3] sm:$0xff]   ;;  %v2370_v2 = vmov 0   ;;  %v2090_v3 = vld [vmem:[%s2568_s3 + $0x8] sm:$0xff]   ;;  %v2091_v4 = vld [vmem:[%s2568_s3 + $0x10] sm:$0xff]   ;;  %p2009_p11 = scmp.ne.s32.totalorder %s2359_s11, 1 }
  0x60   : > { %1179 = vmatprep.subr.bf16.mxu0 %v2370_v2  ;;  %2015 = vmatprep.subr.bf16.mxu1 %v2370_v2  ;;  %v2092_v5 = vld [vmem:[%s2568_s3 + $0x18] sm:$0xff]   ;;  %v2093_v6 = vld [vmem:[%s2568_s3 + $0x20] sm:$0xff]   ;;  %v2094_v8 = vld [vmem:[%s2568_s3 + $0x28] sm:$0xff]  }
  0x61   : > { %1180 = vmatpush1.bf16.msra.mxu0 %v2089_v1  ;;  %2031 = vmatpush1.bf16.msra.mxu1 %v2089_v1  ;;  %v2107_v7 = vld [vmem:[%s2570_s4 + $0x4] ss:$8 sps:$4 sm:$0xff]   ;;  %v2095_v10 = vld [vmem:[%s2568_s3 + $0x30] sm:$0xff]   ;;  %v2096_v11 = vld [vmem:[%s2568_s3 + $0x38] sm:$0xff]  }
  0x62   : > { %1181 = vmatprep.subr.bf16.mxu0 %v2370_v2  ;;  %2016 = vmatprep.subr.bf16.mxu1 %v2370_v2  ;;  %v2110_v9 = vld [vmem:[%s2570_s4 + $0x104] ss:$8 sps:$4 sm:$0xff]   ;;  %v2099_v14 = vld [vmem:[%s2568_s3 + $0x50] sm:$0xff]   ;;  %v2100_v15 = vld [vmem:[%s2568_s3 + $0x58] sm:$0xff]  }
  0x63   : > { %1211 = vmatprep.mubr.bf16.mxu0 %v2107_v7  ;;  %1339 = vmatprep.mubr.bf16.mxu1 %v2110_v9  ;;  %v2097_v12 = vld [vmem:[%s2568_s3 + $0x40] sm:$0xff]   ;;  %v2098_v13 = vld [vmem:[%s2568_s3 + $0x48] sm:$0xff]   ;;  %v2103_v18 = vld [vmem:[%s2568_s3 + $0x70] sm:$0xff]  }
  0x64   : > { %v2101_v16 = vld [vmem:[%s2568_s3 + $0x60] sm:$0xff]   ;;  %v2102_v17 = vld [vmem:[%s2568_s3 + $0x68] sm:$0xff]   ;;  %v2104_v19 = vld [vmem:[%s2568_s3 + $0x78] sm:$0xff]  }
  0x65   : > { %1182 = vmatpush1.bf16.msra.mxu0 %v2090_v3  ;;  %2032 = vmatpush1.bf16.msra.mxu1 %v2090_v3  ;;  %v2105_v20 = vld [vmem:[%s2570_s4] ss:$8 sps:$4 sm:$0xff]   ;;  %v2111_v22 = vld [vmem:[%s2570_s4 + $0x14] ss:$8 sps:$4 sm:$0xff]   ;;  %v2115_v24 = vld [vmem:[%s2570_s4 + $0x10] ss:$8 sps:$4 sm:$0xff]  }
  0x66   : > { %1183 = vmatprep.subr.bf16.mxu0 %v2370_v2  ;;  %2017 = vmatprep.subr.bf16.mxu1 %v2370_v2  ;;  %v2108_v21 = vld [vmem:[%s2570_s4 + $0x100] ss:$8 sps:$4 sm:$0xff]   ;;  %v2113_v23 = vld [vmem:[%s2570_s4 + $0x114] ss:$8 sps:$4 sm:$0xff]   ;;  %v2116_v25 = vld [vmem:[%s2570_s4 + $0x110] ss:$8 sps:$4 sm:$0xff]  }
  0x67   : > { %v2117_v26 = vld [vmem:[%s2570_s4 + $0x24] ss:$8 sps:$4 sm:$0xff]   ;;  %v2121_v28 = vld [vmem:[%s2570_s4 + $0x20] ss:$8 sps:$4 sm:$0xff]   ;;  %v2123_v30 = vld [vmem:[%s2570_s4 + $0x34] ss:$8 sps:$4 sm:$0xff]  }
  0x68   : > { %v2119_v27 = vld [vmem:[%s2570_s4 + $0x124] ss:$8 sps:$4 sm:$0xff]   ;;  %v2122_v29 = vld [vmem:[%s2570_s4 + $0x120] ss:$8 sps:$4 sm:$0xff]   ;;  %v2125_v31 = vld [vmem:[%s2570_s4 + $0x134] ss:$8 sps:$4 sm:$0xff]  }
  0x69   : > { %1184 = vmatpush1.bf16.msra.mxu0 %v2091_v4  ;;  %2033 = vmatpush1.bf16.msra.mxu1 %v2091_v4  ;;  %v2127_v32 = vld [vmem:[%s2570_s4 + $0x30] ss:$8 sps:$4 sm:$0xff]   ;;  %v2129_v34 = vld [vmem:[%s2570_s4 + $0x44] ss:$8 sps:$4 sm:$0xff]   ;;  %v2133_v36 = vld [vmem:[%s2570_s4 + $0x40] ss:$8 sps:$4 sm:$0xff]  }
  0x6a   : > { %1185 = vmatprep.subr.bf16.mxu0 %v2370_v2  ;;  %2018 = vmatprep.subr.bf16.mxu1 %v2370_v2  ;;  %v2128_v33 = vld [vmem:[%s2570_s4 + $0x130] ss:$8 sps:$4 sm:$0xff]   ;;  %v2131_v35 = vld [vmem:[%s2570_s4 + $0x144] ss:$8 sps:$4 sm:$0xff]   ;;  %v2134_v37 = vld [vmem:[%s2570_s4 + $0x140] ss:$8 sps:$4 sm:$0xff]  }
  0x6b   : > { %v2135_v38 = vld [vmem:[%s2570_s4 + $0x54] ss:$8 sps:$4 sm:$0xff]   ;;  %v2139_v40 = vld [vmem:[%s2570_s4 + $0x50] ss:$8 sps:$4 sm:$0xff]   ;;  %v2141_v42 = vld [vmem:[%s2570_s4 + $0x64] ss:$8 sps:$4 sm:$0xff]  }
  0x6c   : > { %v2137_v39 = vld [vmem:[%s2570_s4 + $0x154] ss:$8 sps:$4 sm:$0xff]   ;;  %v2140_v41 = vld [vmem:[%s2570_s4 + $0x150] ss:$8 sps:$4 sm:$0xff]   ;;  %v2143_v43 = vld [vmem:[%s2570_s4 + $0x164] ss:$8 sps:$4 sm:$0xff]  }
  0x6d   : > { %1186 = vmatpush1.bf16.msra.mxu0 %v2092_v5  ;;  %2034 = vmatpush1.bf16.msra.mxu1 %v2092_v5  ;;  %v2145_v44 = vld [vmem:[%s2570_s4 + $0x60] ss:$8 sps:$4 sm:$0xff]   ;;  %v2147_v46 = vld [vmem:[%s2570_s4 + $0x74] ss:$8 sps:$4 sm:$0xff]   ;;  %v2151_v48 = vld [vmem:[%s2570_s4 + $0x70] ss:$8 sps:$4 sm:$0xff]  }
  0x6e   : > { %1187 = vmatprep.subr.bf16.mxu0 %v2370_v2  ;;  %2019 = vmatprep.subr.bf16.mxu1 %v2370_v2  ;;  %v2146_v45 = vld [vmem:[%s2570_s4 + $0x160] ss:$8 sps:$4 sm:$0xff]   ;;  %v2149_v47 = vld [vmem:[%s2570_s4 + $0x174] ss:$8 sps:$4 sm:$0xff]   ;;  %v2152_v49 = vld [vmem:[%s2570_s4 + $0x170] ss:$8 sps:$4 sm:$0xff]  }
  0x6f   : > { %v2153_v50 = vld [vmem:[%s2570_s4 + $0x84] ss:$8 sps:$4 sm:$0xff]   ;;  %v2157_v52 = vld [vmem:[%s2570_s4 + $0x80] ss:$8 sps:$4 sm:$0xff]   ;;  %v2159_v54 = vld [vmem:[%s2570_s4 + $0x94] ss:$8 sps:$4 sm:$0xff]  }
  0x70   : > { %v2155_v51 = vld [vmem:[%s2570_s4 + $0x184] ss:$8 sps:$4 sm:$0xff]   ;;  %v2158_v53 = vld [vmem:[%s2570_s4 + $0x180] ss:$8 sps:$4 sm:$0xff]   ;;  %v2161_v55 = vld [vmem:[%s2570_s4 + $0x194] ss:$8 sps:$4 sm:$0xff]  }
  0x71   : > { %1188 = vmatpush1.bf16.msra.mxu0 %v2093_v6  ;;  %2035 = vmatpush1.bf16.msra.mxu1 %v2093_v6  ;;  %v2163_v56 = vld [vmem:[%s2570_s4 + $0x90] ss:$8 sps:$4 sm:$0xff]   ;;  %v2165_v58 = vld [vmem:[%s2570_s4 + $0xa4] ss:$8 sps:$4 sm:$0xff]   ;;  %v2169_v60 = vld [vmem:[%s2570_s4 + $0xa0] ss:$8 sps:$4 sm:$0xff]  }
  0x72   : > { %1189 = vmatprep.subr.bf16.mxu0 %v2370_v2  ;;  %2020 = vmatprep.subr.bf16.mxu1 %v2370_v2  ;;  %v2164_v57 = vld [vmem:[%s2570_s4 + $0x190] ss:$8 sps:$4 sm:$0xff]   ;;  %v2167_v59 = vld [vmem:[%s2570_s4 + $0x1a4] ss:$8 sps:$4 sm:$0xff]   ;;  %v2170_v61 = vld [vmem:[%s2570_s4 + $0x1a0] ss:$8 sps:$4 sm:$0xff]  }
  0x73   : > { %v2171_v62 = vld [vmem:[%s2570_s4 + $0xb4] ss:$8 sps:$4 sm:$0xff]   ;;  %v2175_v0 = vld [vmem:[%s2570_s4 + $0xb0] ss:$8 sps:$4 sm:$0xff]   ;;  %v2179_v3 = vld [vmem:[%s2570_s4 + $0x1c4] ss:$8 sps:$4 sm:$0xff]  }
  0x74   : > { %v2173_v63 = vld [vmem:[%s2570_s4 + $0x1b4] ss:$8 sps:$4 sm:$0xff]   ;;  %v2176_v1 = vld [vmem:[%s2570_s4 + $0x1b0] ss:$8 sps:$4 sm:$0xff]   ;;  %v2181_v4 = vld [vmem:[%s2570_s4 + $0xc0] ss:$8 sps:$4 sm:$0xff]  }
  0x75   : > { %1190 = vmatpush1.bf16.msra.mxu0 %v2094_v8  ;;  %2036 = vmatpush1.bf16.msra.mxu1 %v2094_v8  ;;  %v2182_v5 = vld [vmem:[%s2570_s4 + $0x1c0] ss:$8 sps:$4 sm:$0xff]   ;;  %v2183_v6 = vld [vmem:[%s2570_s4 + $0xd4] ss:$8 sps:$4 sm:$0xff]   ;;  %v2187_v8 = vld [vmem:[%s2570_s4 + $0xd0] ss:$8 sps:$4 sm:$0xff]  }
  0x76   : > { %1191 = vmatprep.subr.bf16.mxu0 %v2370_v2  ;;  %2021 = vmatprep.subr.bf16.mxu1 %v2370_v2  ;;  %v2185_v7 = vld [vmem:[%s2570_s4 + $0x1d4] ss:$8 sps:$4 sm:$0xff]   ;;  %v2188_v9 = vld [vmem:[%s2570_s4 + $0x1d0] ss:$8 sps:$4 sm:$0xff]  }
  0x79   : > { %1192 = vmatpush1.bf16.msra.mxu0 %v2095_v10  ;;  %2037 = vmatpush1.bf16.msra.mxu1 %v2095_v10  ;;  %v2189_v10 = vld [vmem:[%s2570_s4 + $0xe4] ss:$8 sps:$4 sm:$0xff]  }
  0x7a   : > { %1193 = vmatprep.subr.bf16.mxu0 %v2370_v2  ;;  %2022 = vmatprep.subr.bf16.mxu1 %v2370_v2 }
  0x7d   : > { %1194 = vmatpush1.bf16.msra.mxu0 %v2096_v11  ;;  %2038 = vmatpush1.bf16.msra.mxu1 %v2096_v11  ;;  %v2191_v11 = vld [vmem:[%s2570_s4 + $0x1e4] ss:$8 sps:$4 sm:$0xff]  }
  0x7e   : > { %1195 = vmatprep.subr.bf16.mxu0 %v2370_v2  ;;  %2023 = vmatprep.subr.bf16.mxu1 %v2370_v2 }
  0x81   : > { %1196 = vmatpush1.bf16.msra.mxu0 %v2097_v12  ;;  %2039 = vmatpush1.bf16.msra.mxu1 %v2097_v12  ;;  %v2193_v12 = vld [vmem:[%s2570_s4 + $0xe0] ss:$8 sps:$4 sm:$0xff]  }
  0x82   : > { %1197 = vmatprep.subr.bf16.mxu0 %v2370_v2  ;;  %2024 = vmatprep.subr.bf16.mxu1 %v2370_v2 }
  0x85   : > { %1198 = vmatpush1.bf16.msra.mxu0 %v2098_v13  ;;  %2040 = vmatpush1.bf16.msra.mxu1 %v2098_v13  ;;  %v2194_v13 = vld [vmem:[%s2570_s4 + $0x1e0] ss:$8 sps:$4 sm:$0xff]  }
  0x86   : > { %1199 = vmatprep.subr.bf16.mxu0 %v2370_v2  ;;  %2025 = vmatprep.subr.bf16.mxu1 %v2370_v2 }
  0x89   : > { %1200 = vmatpush1.bf16.msra.mxu0 %v2099_v14  ;;  %2041 = vmatpush1.bf16.msra.mxu1 %v2099_v14  ;;  %v2195_v14 = vld [vmem:[%s2570_s4 + $0xf4] ss:$8 sps:$4 sm:$0xff]  }
  0x8a   : > { %1201 = vmatprep.subr.bf16.mxu0 %v2370_v2  ;;  %2026 = vmatprep.subr.bf16.mxu1 %v2370_v2 }
  0x8d   : > { %1202 = vmatpush1.bf16.msra.mxu0 %v2100_v15  ;;  %2042 = vmatpush1.bf16.msra.mxu1 %v2100_v15  ;;  %v2197_v15 = vld [vmem:[%s2570_s4 + $0x1f4] ss:$8 sps:$4 sm:$0xff]  }
  0x8e   : > { %1203 = vmatprep.subr.bf16.mxu0 %v2370_v2  ;;  %2027 = vmatprep.subr.bf16.mxu1 %v2370_v2 }
  0x91   : > { %1204 = vmatpush1.bf16.msra.mxu0 %v2101_v16  ;;  %2043 = vmatpush1.bf16.msra.mxu1 %v2101_v16  ;;  %v2199_v16 = vld [vmem:[%s2570_s4 + $0xf0] ss:$8 sps:$4 sm:$0xff]  }
  0x92   : > { %1205 = vmatprep.subr.bf16.mxu0 %v2370_v2  ;;  %2028 = vmatprep.subr.bf16.mxu1 %v2370_v2 }
  0x95   : > { %1206 = vmatpush1.bf16.msra.mxu0 %v2102_v17  ;;  %2044 = vmatpush1.bf16.msra.mxu1 %v2102_v17  ;;  %v2200_v17 = vld [vmem:[%s2570_s4 + $0x1f0] ss:$8 sps:$4 sm:$0xff]  }
  0x96   : > { %1207 = vmatprep.subr.bf16.mxu0 %v2370_v2  ;;  %2029 = vmatprep.subr.bf16.mxu1 %v2370_v2 }
  0x99   : > { %1208 = vmatpush1.bf16.msra.mxu0 %v2103_v18  ;;  %2045 = vmatpush1.bf16.msra.mxu1 %v2103_v18  ;;  %v603_v18 = vld [vmem:[#allocation2] sm:$0xff] }
  0x9a   : > { %1209 = vmatprep.subr.bf16.mxu0 %v2370_v2  ;;  %2030 = vmatprep.subr.bf16.mxu1 %v2370_v2  ;;  %v2177_v2 = vld [vmem:[%s2570_s4 + $0xc4] ss:$8 sps:$4 sm:$0xff]  }
  0x9d   : > { %1210 = vmatpush1.bf16.msra.mxu0 %v2104_v19  ;;  %2046 = vmatpush1.bf16.msra.mxu1 %v2104_v19  ;;  %v635_v19 = vld [vmem:[#allocation2 + $0x100] sm:$0xff] }
  0xa0   : > { %1212 = vmatmul.mubr.bf16.vlgmr.msra.gmra.mrb[0].mxu0 %v2105_v20  ;;  %1340 = vmatmul.mubr.bf16.vlgmr.msra.gmra.mrb[0].mxu1 %v2108_v21 }
  0xa1   : > { %1219 = vmatprep.mubr.bf16.mxu0 %v2111_v22  ;;  %1347 = vmatprep.mubr.bf16.mxu1 %v2113_v23  ;;  %v604_v22 = vld [vmem:[#allocation2 + $0x8] sm:$0xff] }
  0xa2   : > { %v636_v23 = vld [vmem:[#allocation2 + $0x108] sm:$0xff] }
  0xa8   : > { %1220 = vmatmul.mubr.bf16.gmra.mrb[4].mxu0 %v2115_v24  ;;  %1348 = vmatmul.mubr.bf16.gmra.mrb[4].mxu1 %v2116_v25 }
  0xa9   : > { %1227 = vmatprep.mubr.bf16.mxu0 %v2117_v26  ;;  %1355 = vmatprep.mubr.bf16.mxu1 %v2119_v27 }
  0xb0   : > { %1228 = vmatmul.mubr.bf16.gmra.mrb[8].mxu0 %v2121_v28  ;;  %1356 = vmatmul.mubr.bf16.gmra.mrb[8].mxu1 %v2122_v29 }
  0xb1   : > { %1235 = vmatprep.mubr.bf16.mxu0 %v2123_v30  ;;  %1363 = vmatprep.mubr.bf16.mxu1 %v2125_v31 }
  0xb8   : > { %1236 = vmatmul.mubr.bf16.gmra.mrb[12].mxu0 %v2127_v32  ;;  %1364 = vmatmul.mubr.bf16.gmra.mrb[12].mxu1 %v2128_v33 }
  0xb9   : > { %1243 = vmatprep.mubr.bf16.mxu0 %v2129_v34  ;;  %1371 = vmatprep.mubr.bf16.mxu1 %v2131_v35  ;;  %v605_v34 = vld [vmem:[#allocation2 + $0x10] sm:$0xff] }
  0xba   : > { %v637_v35 = vld [vmem:[#allocation2 + $0x110] sm:$0xff] }
  0xc0   : > { %1244 = vmatmul.mubr.bf16.gmra.mrb[16].mxu0 %v2133_v36  ;;  %1372 = vmatmul.mubr.bf16.gmra.mrb[16].mxu1 %v2134_v37 }
  0xc1   : > { %1251 = vmatprep.mubr.bf16.mxu0 %v2135_v38  ;;  %1379 = vmatprep.mubr.bf16.mxu1 %v2137_v39  ;;  %v606_v38 = vld [vmem:[#allocation2 + $0x18] sm:$0xff] }
  0xc2   : > { %v638_v39 = vld [vmem:[#allocation2 + $0x118] sm:$0xff] }
  0xc8   : > { %1252 = vmatmul.mubr.bf16.gmra.mrb[20].mxu0 %v2139_v40  ;;  %1380 = vmatmul.mubr.bf16.gmra.mrb[20].mxu1 %v2140_v41 }
  0xc9   : > { %1259 = vmatprep.mubr.bf16.mxu0 %v2141_v42  ;;  %1387 = vmatprep.mubr.bf16.mxu1 %v2143_v43 }
  0xd0   : > { %1260 = vmatmul.mubr.bf16.gmra.mrb[24].mxu0 %v2145_v44  ;;  %1388 = vmatmul.mubr.bf16.gmra.mrb[24].mxu1 %v2146_v45 }
  0xd1   : > { %1267 = vmatprep.mubr.bf16.mxu0 %v2147_v46  ;;  %1395 = vmatprep.mubr.bf16.mxu1 %v2149_v47 }
  0xd8   : > { %1268 = vmatmul.mubr.bf16.gmra.mrb[28].mxu0 %v2151_v48  ;;  %1396 = vmatmul.mubr.bf16.gmra.mrb[28].mxu1 %v2152_v49 }
  0xd9   : > { %1275 = vmatprep.mubr.bf16.mxu0 %v2153_v50  ;;  %1403 = vmatprep.mubr.bf16.mxu1 %v2155_v51  ;;  %v607_v50 = vld [vmem:[#allocation2 + $0x20] sm:$0xff] }
  0xda   : > { %v639_v51 = vld [vmem:[#allocation2 + $0x120] sm:$0xff] }
  0xe0   : > { %1276 = vmatmul.mubr.bf16.gmra.mrb[32].mxu0 %v2157_v52  ;;  %1404 = vmatmul.mubr.bf16.gmra.mrb[32].mxu1 %v2158_v53 }
  0xe1   : > { %1283 = vmatprep.mubr.bf16.mxu0 %v2159_v54  ;;  %1411 = vmatprep.mubr.bf16.mxu1 %v2161_v55  ;;  %v608_v54 = vld [vmem:[#allocation2 + $0x28] sm:$0xff] }
  0xe2   : > { %v640_v55 = vld [vmem:[#allocation2 + $0x128] sm:$0xff] }
  0xe8   : > { %1284 = vmatmul.mubr.bf16.gmra.mrb[36].mxu0 %v2163_v56  ;;  %1412 = vmatmul.mubr.bf16.gmra.mrb[36].mxu1 %v2164_v57 }
  0xe9   : > { %1291 = vmatprep.mubr.bf16.mxu0 %v2165_v58  ;;  %1419 = vmatprep.mubr.bf16.mxu1 %v2167_v59 }
  0xf0   : > { %1292 = vmatmul.mubr.bf16.gmra.mrb[40].mxu0 %v2169_v60  ;;  %1420 = vmatmul.mubr.bf16.gmra.mrb[40].mxu1 %v2170_v61 }
  0xf1   : > { %1299 = vmatprep.mubr.bf16.mxu0 %v2171_v62  ;;  %1427 = vmatprep.mubr.bf16.mxu1 %v2173_v63 }
  0xf8   : > { %1300 = vmatmul.mubr.bf16.gmra.mrb[44].mxu0 %v2175_v0  ;;  %1428 = vmatmul.mubr.bf16.gmra.mrb[44].mxu1 %v2176_v1 }
  0xf9   : > { %1307 = vmatprep.mubr.bf16.mxu0 %v2177_v2  ;;  %1435 = vmatprep.mubr.bf16.mxu1 %v2179_v3  ;;  %v609_v2 = vld [vmem:[#allocation2 + $0x30] sm:$0xff] }
  0xfa   : > { %v641_v3 = vld [vmem:[#allocation2 + $0x130] sm:$0xff] }
 0x100   : > { %1308 = vmatmul.mubr.bf16.gmra.mrb[48].mxu0 %v2181_v4  ;;  %1436 = vmatmul.mubr.bf16.gmra.mrb[48].mxu1 %v2182_v5 }
 0x101   : > { %1315 = vmatprep.mubr.bf16.mxu0 %v2183_v6  ;;  %1443 = vmatprep.mubr.bf16.mxu1 %v2185_v7  ;;  %v610_v6 = vld [vmem:[#allocation2 + $0x38] sm:$0xff] }
 0x102   : > { %v642_v7 = vld [vmem:[#allocation2 + $0x138] sm:$0xff] }
 0x108   : > { %1316 = vmatmul.mubr.bf16.gmra.mrb[52].mxu0 %v2187_v8  ;;  %1444 = vmatmul.mubr.bf16.gmra.mrb[52].mxu1 %v2188_v9 }
 0x109   : > { %1323 = vmatprep.mubr.bf16.mxu0 %v2189_v10  ;;  %1451 = vmatprep.mubr.bf16.mxu1 %v2191_v11 }
 0x110   : > { %1324 = vmatmul.mubr.bf16.gmra.mrb[56].mxu0 %v2193_v12  ;;  %1452 = vmatmul.mubr.bf16.gmra.mrb[56].mxu1 %v2194_v13 }
 0x111   : > { %1331 = vmatprep.mubr.bf16.mxu0 %v2195_v14  ;;  %1459 = vmatprep.mubr.bf16.mxu1 %v2197_v15 }
 0x118   : > { %1332 = vmatmul.mubr.bf16.gmra.mrb[60].mxu0 %v2199_v16  ;;  %1460 = vmatmul.mubr.bf16.gmra.mrb[60].mxu1 %v2200_v17 }
 0x173   : > { %v1213_v20 = vpop.f32.mrb[0].mxu0  ;;  %v1341_v21 = vpop.f32.mrb[0].mxu1 }
 0x174   : > { %v1468_v24 = vadd.f32 %v1213_v20, %v603_v18  ;;  %v1500_v25 = vadd.f32 %v1341_v21, %v635_v19  ;;  %v1215_v26 = vpop.f32.mrb[1].mxu0  ;;  %v1343_v27 = vpop.f32.mrb[1].mxu1  ;;  %v611_v18 = vld [vmem:[#allocation2 + $0x40] sm:$0xff] }
 0x175   : > { %v1216_v28 = vpop.f32.mrb[2].mxu0  ;;  %v1344_v29 = vpop.f32.mrb[2].mxu1  ;;  %v643_v19 = vld [vmem:[#allocation2 + $0x140] sm:$0xff] }
 0x176   : > { %1532 = vst [vmem:[#allocation2] sm:$0xff] %v1468_v24  ;;  %1564 = vst [vmem:[#allocation2 + $0x100] sm:$0xff] %v1500_v25  ;;  %v1469_v30 = vadd.f32 %v1216_v28, %v604_v22  ;;  %v1501_v31 = vadd.f32 %v1344_v29, %v636_v23  ;;  %v1218_v32 = vpop.f32.mrb[3].mxu0  ;;  %v1346_v33 = vpop.f32.mrb[3].mxu1  ;;  %v612_v22 = vld [vmem:[#allocation2 + $0x48] sm:$0xff] }
 0x177   : > { %v644_v23 = vld [vmem:[#allocation2 + $0x148] sm:$0xff] }
 0x178   : > { %1533 = vst [vmem:[#allocation2 + $0x8] sm:$0xff] %v1469_v30  ;;  %1565 = vst [vmem:[#allocation2 + $0x108] sm:$0xff] %v1501_v31 }
 0x17b   : > { %v1221_v36 = vpop.f32.mrb[4].mxu0  ;;  %v1349_v37 = vpop.f32.mrb[4].mxu1 }
 0x17c   : > { %v1470_v40 = vadd.f32 %v1221_v36, %v605_v34  ;;  %v1502_v41 = vadd.f32 %v1349_v37, %v637_v35  ;;  %v1223_v42 = vpop.f32.mrb[5].mxu0  ;;  %v1351_v43 = vpop.f32.mrb[5].mxu1  ;;  %v613_v34 = vld [vmem:[#allocation2 + $0x50] sm:$0xff] }
 0x17d   : > { %v1224_v44 = vpop.f32.mrb[6].mxu0  ;;  %v1352_v45 = vpop.f32.mrb[6].mxu1  ;;  %v645_v35 = vld [vmem:[#allocation2 + $0x150] sm:$0xff] }
 0x17e   : > { %1534 = vst [vmem:[#allocation2 + $0x10] sm:$0xff] %v1470_v40  ;;  %1566 = vst [vmem:[#allocation2 + $0x110] sm:$0xff] %v1502_v41  ;;  %v1471_v46 = vadd.f32 %v1224_v44, %v606_v38  ;;  %v1503_v47 = vadd.f32 %v1352_v45, %v638_v39  ;;  %v1226_v48 = vpop.f32.mrb[7].mxu0  ;;  %v1354_v49 = vpop.f32.mrb[7].mxu1  ;;  %v614_v38 = vld [vmem:[#allocation2 + $0x58] sm:$0xff] }
 0x17f   : > { %v646_v39 = vld [vmem:[#allocation2 + $0x158] sm:$0xff] }
 0x180   : > { %1535 = vst [vmem:[#allocation2 + $0x18] sm:$0xff] %v1471_v46  ;;  %1567 = vst [vmem:[#allocation2 + $0x118] sm:$0xff] %v1503_v47 }
 0x183   : > { %v1229_v52 = vpop.f32.mrb[8].mxu0  ;;  %v1357_v53 = vpop.f32.mrb[8].mxu1 }
 0x184   : > { %v1472_v56 = vadd.f32 %v1229_v52, %v607_v50  ;;  %v1504_v57 = vadd.f32 %v1357_v53, %v639_v51  ;;  %v1231_v58 = vpop.f32.mrb[9].mxu0  ;;  %v1359_v59 = vpop.f32.mrb[9].mxu1  ;;  %v615_v50 = vld [vmem:[#allocation2 + $0x60] sm:$0xff] }
 0x185   : > { %v1232_v60 = vpop.f32.mrb[10].mxu0  ;;  %v1360_v61 = vpop.f32.mrb[10].mxu1  ;;  %v647_v51 = vld [vmem:[#allocation2 + $0x160] sm:$0xff] }
 0x186   : > { %1536 = vst [vmem:[#allocation2 + $0x20] sm:$0xff] %v1472_v56  ;;  %1568 = vst [vmem:[#allocation2 + $0x120] sm:$0xff] %v1504_v57  ;;  %v1473_v62 = vadd.f32 %v1232_v60, %v608_v54  ;;  %v1505_v63 = vadd.f32 %v1360_v61, %v640_v55  ;;  %v1234_v0 = vpop.f32.mrb[11].mxu0  ;;  %v1362_v1 = vpop.f32.mrb[11].mxu1  ;;  %v616_v54 = vld [vmem:[#allocation2 + $0x68] sm:$0xff] }
 0x187   : > { %v648_v55 = vld [vmem:[#allocation2 + $0x168] sm:$0xff] }
 0x188   : > { %1537 = vst [vmem:[#allocation2 + $0x28] sm:$0xff] %v1473_v62  ;;  %1569 = vst [vmem:[#allocation2 + $0x128] sm:$0xff] %v1505_v63 }
 0x18b   : > { %v1237_v4 = vpop.f32.mrb[12].mxu0  ;;  %v1365_v5 = vpop.f32.mrb[12].mxu1 }
 0x18c   : > { %v1474_v8 = vadd.f32 %v1237_v4, %v609_v2  ;;  %v1506_v9 = vadd.f32 %v1365_v5, %v641_v3  ;;  %v1239_v10 = vpop.f32.mrb[13].mxu0  ;;  %v1367_v11 = vpop.f32.mrb[13].mxu1  ;;  %v617_v2 = vld [vmem:[#allocation2 + $0x70] sm:$0xff] }
 0x18d   : > { %v1240_v12 = vpop.f32.mrb[14].mxu0  ;;  %v1368_v13 = vpop.f32.mrb[14].mxu1  ;;  %v649_v3 = vld [vmem:[#allocation2 + $0x170] sm:$0xff] }
 0x18e   : > { %1538 = vst [vmem:[#allocation2 + $0x30] sm:$0xff] %v1474_v8  ;;  %1570 = vst [vmem:[#allocation2 + $0x130] sm:$0xff] %v1506_v9  ;;  %v1475_v14 = vadd.f32 %v1240_v12, %v610_v6  ;;  %v1507_v15 = vadd.f32 %v1368_v13, %v642_v7  ;;  %v1242_v16 = vpop.f32.mrb[15].mxu0  ;;  %v1370_v17 = vpop.f32.mrb[15].mxu1  ;;  %v618_v6 = vld [vmem:[#allocation2 + $0x78] sm:$0xff] }
 0x18f   : > { %v650_v7 = vld [vmem:[#allocation2 + $0x178] sm:$0xff] }
 0x190   : > { %1539 = vst [vmem:[#allocation2 + $0x38] sm:$0xff] %v1475_v14  ;;  %1571 = vst [vmem:[#allocation2 + $0x138] sm:$0xff] %v1507_v15 }
 0x193   : > { %v1245_v20 = vpop.f32.mrb[16].mxu0  ;;  %v1373_v21 = vpop.f32.mrb[16].mxu1 }
 0x194   : > { %v1476_v24 = vadd.f32 %v1245_v20, %v611_v18  ;;  %v1508_v25 = vadd.f32 %v1373_v21, %v643_v19  ;;  %v1247_v26 = vpop.f32.mrb[17].mxu0  ;;  %v1375_v27 = vpop.f32.mrb[17].mxu1  ;;  %v619_v18 = vld [vmem:[#allocation2 + $0x80] sm:$0xff] }
 0x195   : > { %v1248_v28 = vpop.f32.mrb[18].mxu0  ;;  %v1376_v29 = vpop.f32.mrb[18].mxu1  ;;  %v651_v19 = vld [vmem:[#allocation2 + $0x180] sm:$0xff] }
 0x196   : > { %1540 = vst [vmem:[#allocation2 + $0x40] sm:$0xff] %v1476_v24  ;;  %1572 = vst [vmem:[#allocation2 + $0x140] sm:$0xff] %v1508_v25  ;;  %v1477_v30 = vadd.f32 %v1248_v28, %v612_v22  ;;  %v1509_v31 = vadd.f32 %v1376_v29, %v644_v23  ;;  %v1250_v32 = vpop.f32.mrb[19].mxu0  ;;  %v1378_v33 = vpop.f32.mrb[19].mxu1  ;;  %v620_v22 = vld [vmem:[#allocation2 + $0x88] sm:$0xff] }
 0x197   : > { %v652_v23 = vld [vmem:[#allocation2 + $0x188] sm:$0xff] }
 0x198   : > { %1541 = vst [vmem:[#allocation2 + $0x48] sm:$0xff] %v1477_v30  ;;  %1573 = vst [vmem:[#allocation2 + $0x148] sm:$0xff] %v1509_v31 }
 0x19b   : > { %v1253_v36 = vpop.f32.mrb[20].mxu0  ;;  %v1381_v37 = vpop.f32.mrb[20].mxu1 }
 0x19c   : > { %v1478_v40 = vadd.f32 %v1253_v36, %v613_v34  ;;  %v1510_v41 = vadd.f32 %v1381_v37, %v645_v35  ;;  %v1255_v42 = vpop.f32.mrb[21].mxu0  ;;  %v1383_v43 = vpop.f32.mrb[21].mxu1  ;;  %v621_v34 = vld [vmem:[#allocation2 + $0x90] sm:$0xff] }
 0x19d   : > { %v1256_v44 = vpop.f32.mrb[22].mxu0  ;;  %v1384_v45 = vpop.f32.mrb[22].mxu1  ;;  %v653_v35 = vld [vmem:[#allocation2 + $0x190] sm:$0xff] }
 0x19e   : > { %1542 = vst [vmem:[#allocation2 + $0x50] sm:$0xff] %v1478_v40  ;;  %1574 = vst [vmem:[#allocation2 + $0x150] sm:$0xff] %v1510_v41  ;;  %v1479_v46 = vadd.f32 %v1256_v44, %v614_v38  ;;  %v1511_v47 = vadd.f32 %v1384_v45, %v646_v39  ;;  %v1258_v48 = vpop.f32.mrb[23].mxu0  ;;  %v1386_v49 = vpop.f32.mrb[23].mxu1  ;;  %v622_v38 = vld [vmem:[#allocation2 + $0x98] sm:$0xff] }
 0x19f   : > { %v654_v39 = vld [vmem:[#allocation2 + $0x198] sm:$0xff] }
 0x1a0   : > { %1543 = vst [vmem:[#allocation2 + $0x58] sm:$0xff] %v1479_v46  ;;  %1575 = vst [vmem:[#allocation2 + $0x158] sm:$0xff] %v1511_v47 }
 0x1a3   : > { %v1261_v52 = vpop.f32.mrb[24].mxu0  ;;  %v1389_v53 = vpop.f32.mrb[24].mxu1 }
 0x1a4   : > { %v1480_v56 = vadd.f32 %v1261_v52, %v615_v50  ;;  %v1512_v57 = vadd.f32 %v1389_v53, %v647_v51  ;;  %v1263_v58 = vpop.f32.mrb[25].mxu0  ;;  %v1391_v59 = vpop.f32.mrb[25].mxu1  ;;  %v623_v50 = vld [vmem:[#allocation2 + $0xa0] sm:$0xff] }
 0x1a5   : > { %v1264_v60 = vpop.f32.mrb[26].mxu0  ;;  %v1392_v61 = vpop.f32.mrb[26].mxu1  ;;  %v655_v51 = vld [vmem:[#allocation2 + $0x1a0] sm:$0xff] }
 0x1a6   : > { %1544 = vst [vmem:[#allocation2 + $0x60] sm:$0xff] %v1480_v56  ;;  %1576 = vst [vmem:[#allocation2 + $0x160] sm:$0xff] %v1512_v57  ;;  %v1481_v62 = vadd.f32 %v1264_v60, %v616_v54  ;;  %v1513_v63 = vadd.f32 %v1392_v61, %v648_v55  ;;  %v1266_v0 = vpop.f32.mrb[27].mxu0  ;;  %v1394_v1 = vpop.f32.mrb[27].mxu1  ;;  %v624_v54 = vld [vmem:[#allocation2 + $0xa8] sm:$0xff] }
 0x1a7   : > { %v656_v55 = vld [vmem:[#allocation2 + $0x1a8] sm:$0xff] }
 0x1a8   : > { %1545 = vst [vmem:[#allocation2 + $0x68] sm:$0xff] %v1481_v62  ;;  %1577 = vst [vmem:[#allocation2 + $0x168] sm:$0xff] %v1513_v63 }
 0x1ab   : > { %v1269_v4 = vpop.f32.mrb[28].mxu0  ;;  %v1397_v5 = vpop.f32.mrb[28].mxu1 }
 0x1ac   : > { %v1482_v8 = vadd.f32 %v1269_v4, %v617_v2  ;;  %v1514_v9 = vadd.f32 %v1397_v5, %v649_v3  ;;  %v1271_v10 = vpop.f32.mrb[29].mxu0  ;;  %v1399_v11 = vpop.f32.mrb[29].mxu1  ;;  %v625_v2 = vld [vmem:[#allocation2 + $0xb0] sm:$0xff] }
 0x1ad   : > { %v1272_v12 = vpop.f32.mrb[30].mxu0  ;;  %v1400_v13 = vpop.f32.mrb[30].mxu1  ;;  %v657_v3 = vld [vmem:[#allocation2 + $0x1b0] sm:$0xff] }
 0x1ae   : > { %1546 = vst [vmem:[#allocation2 + $0x70] sm:$0xff] %v1482_v8  ;;  %1578 = vst [vmem:[#allocation2 + $0x170] sm:$0xff] %v1514_v9  ;;  %v1483_v14 = vadd.f32 %v1272_v12, %v618_v6  ;;  %v1515_v15 = vadd.f32 %v1400_v13, %v650_v7  ;;  %v1274_v16 = vpop.f32.mrb[31].mxu0  ;;  %v1402_v17 = vpop.f32.mrb[31].mxu1  ;;  %v626_v6 = vld [vmem:[#allocation2 + $0xb8] sm:$0xff] }
 0x1af   : > { %v658_v7 = vld [vmem:[#allocation2 + $0x1b8] sm:$0xff] }
 0x1b0   : > { %1547 = vst [vmem:[#allocation2 + $0x78] sm:$0xff] %v1483_v14  ;;  %1579 = vst [vmem:[#allocation2 + $0x178] sm:$0xff] %v1515_v15 }
 0x1b3   : > { %v1277_v20 = vpop.f32.mrb[32].mxu0  ;;  %v1405_v21 = vpop.f32.mrb[32].mxu1 }
 0x1b4   : > { %v1484_v24 = vadd.f32 %v1277_v20, %v619_v18  ;;  %v1516_v25 = vadd.f32 %v1405_v21, %v651_v19  ;;  %v1279_v26 = vpop.f32.mrb[33].mxu0  ;;  %v1407_v27 = vpop.f32.mrb[33].mxu1  ;;  %v627_v18 = vld [vmem:[#allocation2 + $0xc0] sm:$0xff] }
 0x1b5   : > { %v1280_v28 = vpop.f32.mrb[34].mxu0  ;;  %v1408_v29 = vpop.f32.mrb[34].mxu1  ;;  %v659_v19 = vld [vmem:[#allocation2 + $0x1c0] sm:$0xff] }
 0x1b6   : > { %1548 = vst [vmem:[#allocation2 + $0x80] sm:$0xff] %v1484_v24  ;;  %1580 = vst [vmem:[#allocation2 + $0x180] sm:$0xff] %v1516_v25  ;;  %v1485_v30 = vadd.f32 %v1280_v28, %v620_v22  ;;  %v1517_v31 = vadd.f32 %v1408_v29, %v652_v23  ;;  %v1282_v32 = vpop.f32.mrb[35].mxu0  ;;  %v1410_v33 = vpop.f32.mrb[35].mxu1  ;;  %v628_v22 = vld [vmem:[#allocation2 + $0xc8] sm:$0xff] }
 0x1b7   : > { %v660_v23 = vld [vmem:[#allocation2 + $0x1c8] sm:$0xff] }
 0x1b8   : > { %1549 = vst [vmem:[#allocation2 + $0x88] sm:$0xff] %v1485_v30  ;;  %1581 = vst [vmem:[#allocation2 + $0x188] sm:$0xff] %v1517_v31 }
 0x1bb   : > { %v1285_v36 = vpop.f32.mrb[36].mxu0  ;;  %v1413_v37 = vpop.f32.mrb[36].mxu1 }
 0x1bc   : > { %v1486_v40 = vadd.f32 %v1285_v36, %v621_v34  ;;  %v1518_v41 = vadd.f32 %v1413_v37, %v653_v35  ;;  %v1287_v42 = vpop.f32.mrb[37].mxu0  ;;  %v1415_v43 = vpop.f32.mrb[37].mxu1  ;;  %v629_v34 = vld [vmem:[#allocation2 + $0xd0] sm:$0xff] }
 0x1bd   : > { %v1288_v44 = vpop.f32.mrb[38].mxu0  ;;  %v1416_v45 = vpop.f32.mrb[38].mxu1  ;;  %v661_v35 = vld [vmem:[#allocation2 + $0x1d0] sm:$0xff] }
 0x1be   : > { %1550 = vst [vmem:[#allocation2 + $0x90] sm:$0xff] %v1486_v40  ;;  %1582 = vst [vmem:[#allocation2 + $0x190] sm:$0xff] %v1518_v41  ;;  %v1487_v46 = vadd.f32 %v1288_v44, %v622_v38  ;;  %v1519_v47 = vadd.f32 %v1416_v45, %v654_v39  ;;  %v1290_v48 = vpop.f32.mrb[39].mxu0  ;;  %v1418_v49 = vpop.f32.mrb[39].mxu1  ;;  %v630_v38 = vld [vmem:[#allocation2 + $0xd8] sm:$0xff] }
 0x1bf   : > { %v662_v39 = vld [vmem:[#allocation2 + $0x1d8] sm:$0xff] }
 0x1c0   : > { %1551 = vst [vmem:[#allocation2 + $0x98] sm:$0xff] %v1487_v46  ;;  %1583 = vst [vmem:[#allocation2 + $0x198] sm:$0xff] %v1519_v47 }
 0x1c3   : > { %v1293_v52 = vpop.f32.mrb[40].mxu0  ;;  %v1421_v53 = vpop.f32.mrb[40].mxu1 }
 0x1c4   : > { %v1488_v56 = vadd.f32 %v1293_v52, %v623_v50  ;;  %v1520_v57 = vadd.f32 %v1421_v53, %v655_v51  ;;  %v1295_v58 = vpop.f32.mrb[41].mxu0  ;;  %v1423_v59 = vpop.f32.mrb[41].mxu1  ;;  %v631_v50 = vld [vmem:[#allocation2 + $0xe0] sm:$0xff] }
 0x1c5   : > { %v1296_v60 = vpop.f32.mrb[42].mxu0  ;;  %v1424_v61 = vpop.f32.mrb[42].mxu1  ;;  %v663_v51 = vld [vmem:[#allocation2 + $0x1e0] sm:$0xff] }
 0x1c6   : > { %1552 = vst [vmem:[#allocation2 + $0xa0] sm:$0xff] %v1488_v56  ;;  %1584 = vst [vmem:[#allocation2 + $0x1a0] sm:$0xff] %v1520_v57  ;;  %v1489_v62 = vadd.f32 %v1296_v60, %v624_v54  ;;  %v1521_v63 = vadd.f32 %v1424_v61, %v656_v55  ;;  %v1298_v0 = vpop.f32.mrb[43].mxu0  ;;  %v1426_v1 = vpop.f32.mrb[43].mxu1  ;;  %v632_v54 = vld [vmem:[#allocation2 + $0xe8] sm:$0xff] }
 0x1c7   : > { %v664_v55 = vld [vmem:[#allocation2 + $0x1e8] sm:$0xff] }
 0x1c8   : > { %1553 = vst [vmem:[#allocation2 + $0xa8] sm:$0xff] %v1489_v62  ;;  %1585 = vst [vmem:[#allocation2 + $0x1a8] sm:$0xff] %v1521_v63 }
 0x1cb   : > { %v1301_v4 = vpop.f32.mrb[44].mxu0  ;;  %v1429_v5 = vpop.f32.mrb[44].mxu1 }
 0x1cc   : > { %v1490_v8 = vadd.f32 %v1301_v4, %v625_v2  ;;  %v1522_v9 = vadd.f32 %v1429_v5, %v657_v3  ;;  %v1303_v10 = vpop.f32.mrb[45].mxu0  ;;  %v1431_v11 = vpop.f32.mrb[45].mxu1  ;;  %v633_v2 = vld [vmem:[#allocation2 + $0xf0] sm:$0xff] }
 0x1cd   : > { %v1304_v12 = vpop.f32.mrb[46].mxu0  ;;  %v1432_v13 = vpop.f32.mrb[46].mxu1  ;;  %v665_v3 = vld [vmem:[#allocation2 + $0x1f0] sm:$0xff] }
 0x1ce   : > { %1554 = vst [vmem:[#allocation2 + $0xb0] sm:$0xff] %v1490_v8  ;;  %1586 = vst [vmem:[#allocation2 + $0x1b0] sm:$0xff] %v1522_v9  ;;  %v1491_v14 = vadd.f32 %v1304_v12, %v626_v6  ;;  %v1523_v15 = vadd.f32 %v1432_v13, %v658_v7  ;;  %v1306_v16 = vpop.f32.mrb[47].mxu0  ;;  %v1434_v17 = vpop.f32.mrb[47].mxu1  ;;  %v634_v6 = vld [vmem:[#allocation2 + $0xf8] sm:$0xff] }
 0x1cf   : > { %v666_v7 = vld [vmem:[#allocation2 + $0x1f8] sm:$0xff] }
 0x1d0   : > { %1555 = vst [vmem:[#allocation2 + $0xb8] sm:$0xff] %v1491_v14  ;;  %1587 = vst [vmem:[#allocation2 + $0x1b8] sm:$0xff] %v1523_v15 }
 0x1d3   : > { %v1309_v20 = vpop.f32.mrb[48].mxu0  ;;  %v1437_v21 = vpop.f32.mrb[48].mxu1 }
 0x1d4   : > { %v1492_v24 = vadd.f32 %v1309_v20, %v627_v18  ;;  %v1524_v25 = vadd.f32 %v1437_v21, %v659_v19  ;;  %v1311_v26 = vpop.f32.mrb[49].mxu0  ;;  %v1439_v27 = vpop.f32.mrb[49].mxu1  ;;  %v1600_v18 = vld [vmem:[#allocation2] sm:$0xff] (!%p2009_p11)  ;;  %v1601_v19 = vld [vmem:[#allocation2 + $0x8] sm:$0xff] (!%p2009_p11)  ;;  %v1602_v20 = vld [vmem:[#allocation2 + $0x10] sm:$0xff] (!%p2009_p11) }
 0x1d5   : > { %v1312_v28 = vpop.f32.mrb[50].mxu0  ;;  %v1440_v29 = vpop.f32.mrb[50].mxu1  ;;  %2201 = vtanh.f32 (!%p2009_p11), %v1600_v18  ;;  %v1603_v21 = vld [vmem:[#allocation2 + $0x18] sm:$0xff] (!%p2009_p11)  ;;  %v1608_v26 = vld [vmem:[#allocation2 + $0x40] sm:$0xff] (!%p2009_p11)  ;;  %v1609_v27 = vld [vmem:[#allocation2 + $0x48] sm:$0xff] (!%p2009_p11) }
 0x1d6   : > { %1556 = vst [vmem:[#allocation2 + $0xc0] sm:$0xff] %v1492_v24  ;;  %1588 = vst [vmem:[#allocation2 + $0x1c0] sm:$0xff] %v1524_v25  ;;  %v1493_v30 = vadd.f32 %v1312_v28, %v628_v22  ;;  %v1525_v31 = vadd.f32 %v1440_v29, %v660_v23  ;;  %v1314_v32 = vpop.f32.mrb[51].mxu0  ;;  %v1442_v33 = vpop.f32.mrb[51].mxu1  ;;  %2203 = vtanh.f32 (!%p2009_p11), %v1601_v19  ;;  %v1604_v22 = vld [vmem:[#allocation2 + $0x20] sm:$0xff] (!%p2009_p11)  ;;  %v1605_v23 = vld [vmem:[#allocation2 + $0x28] sm:$0xff] (!%p2009_p11) }
 0x1d7   : > { %2205 = vtanh.f32 (!%p2009_p11), %v1602_v20  ;;  %v1606_v24 = vld [vmem:[#allocation2 + $0x30] sm:$0xff] (!%p2009_p11)  ;;  %v1607_v25 = vld [vmem:[#allocation2 + $0x38] sm:$0xff] (!%p2009_p11)  ;;  %v1613_v32 = vld [vmem:[#allocation2 + $0x68] sm:$0xff] (!%p2009_p11) }
 0x1d8   : > { %1557 = vst [vmem:[#allocation2 + $0xc8] sm:$0xff] %v1493_v30  ;;  %1589 = vst [vmem:[#allocation2 + $0x1c8] sm:$0xff] %v1525_v31  ;;  %2207 = vtanh.f32 (!%p2009_p11), %v1603_v21  ;;  %v1610_v28 = vld [vmem:[#allocation2 + $0x50] sm:$0xff] (!%p2009_p11)  ;;  %v1611_v29 = vld [vmem:[#allocation2 + $0x58] sm:$0xff] (!%p2009_p11) }
 0x1d9   : > { %2209 = vtanh.f32 (!%p2009_p11), %v1604_v22  ;;  %v1612_v30 = vld [vmem:[#allocation2 + $0x60] sm:$0xff] (!%p2009_p11)  ;;  %v1638_v18 = vld [vmem:[#allocation2 + $0x130] sm:$0xff] (!%p2009_p11)  ;;  %v1639_v20 = vld [vmem:[#allocation2 + $0x138] sm:$0xff] (!%p2009_p11) }
 0x1da   : > { %2211 = vtanh.f32 (!%p2009_p11), %v1605_v23  ;;  %v1640_v22 = vld [vmem:[#allocation2 + $0x140] sm:$0xff] (!%p2009_p11) }
 0x1db   : > { %v1317_v36 = vpop.f32.mrb[52].mxu0  ;;  %v1445_v37 = vpop.f32.mrb[52].mxu1  ;;  %2213 = vtanh.f32 (!%p2009_p11), %v1606_v24  ;;  %v1641_v24 = vld [vmem:[#allocation2 + $0x148] sm:$0xff] (!%p2009_p11) }
 0x1dc   : > { %v1494_v40 = vadd.f32 %v1317_v36, %v629_v34  ;;  %v1526_v41 = vadd.f32 %v1445_v37, %v661_v35  ;;  %v1319_v42 = vpop.f32.mrb[53].mxu0  ;;  %v1447_v43 = vpop.f32.mrb[53].mxu1  ;;  %2215 = vtanh.f32 (!%p2009_p11), %v1607_v25  ;;  %v1614_v34 = vld [vmem:[#allocation2 + $0x70] sm:$0xff] (!%p2009_p11)  ;;  %v1615_v36 = vld [vmem:[#allocation2 + $0x78] sm:$0xff] (!%p2009_p11) }
 0x1dd   : > { %v1320_v44 = vpop.f32.mrb[54].mxu0  ;;  %v1448_v45 = vpop.f32.mrb[54].mxu1  ;;  %2217 = vtanh.f32 (!%p2009_p11), %v1608_v26  ;;  %v1618_v42 = vld [vmem:[#allocation2 + $0x90] sm:$0xff] (!%p2009_p11) }
 0x1de   : > { %1558 = vst [vmem:[#allocation2 + $0xd0] sm:$0xff] %v1494_v40  ;;  %1590 = vst [vmem:[#allocation2 + $0x1d0] sm:$0xff] %v1526_v41  ;;  %v1495_v46 = vadd.f32 %v1320_v44, %v630_v38  ;;  %v1527_v47 = vadd.f32 %v1448_v45, %v662_v39  ;;  %v1322_v48 = vpop.f32.mrb[55].mxu0  ;;  %v1450_v49 = vpop.f32.mrb[55].mxu1  ;;  %2219 = vtanh.f32 (!%p2009_p11), %v1609_v27  ;;  %v1616_v38 = vld [vmem:[#allocation2 + $0x80] sm:$0xff] (!%p2009_p11)  ;;  %v1617_v40 = vld [vmem:[#allocation2 + $0x88] sm:$0xff] (!%p2009_p11) }
 0x1df   : > { %v2202_v31 = vpop.eup (!%p2009_p11), %2201  ;;  %2221 = vtanh.f32 (!%p2009_p11), %v1610_v28  ;;  %v1619_v44 = vld [vmem:[#allocation2 + $0x98] sm:$0xff] (!%p2009_p11)  ;;  %v1621_v48 = vld [vmem:[#allocation2 + $0xa8] sm:$0xff] (!%p2009_p11)  ;;  %v1642_v26 = vld [vmem:[#allocation2 + $0x150] sm:$0xff] (!%p2009_p11) }
 0x1e0   : > { %1559 = vst [vmem:[#allocation2 + $0xd8] sm:$0xff] %v1495_v46  ;;  %1591 = vst [vmem:[#allocation2 + $0x1d8] sm:$0xff] %v1527_v47  ;;  %v2204_v33 = vpop.eup (!%p2009_p11), %2203  ;;  %2223 = vtanh.f32 (!%p2009_p11), %v1611_v29  ;;  %v1620_v46 = vld [vmem:[#allocation2 + $0xa0] sm:$0xff] (!%p2009_p11)  ;;  %v1643_v28 = vld [vmem:[#allocation2 + $0x158] sm:$0xff] (!%p2009_p11) }
 0x1e1   : > { %1728 = vst [vmem:[%s2959_s2] sm:$0xff] (!%p2009_p11), %v2202_v31  ;;  %v2206_v35 = vpop.eup (!%p2009_p11), %2205  ;;  %1729 = vst [vmem:[%s2959_s2 + $0x8] sm:$0xff] (!%p2009_p11), %v2204_v33  ;;  %2225 = vtanh.f32 (!%p2009_p11), %v1612_v30  ;;  %v1644_v30 = vld [vmem:[#allocation2 + $0x160] sm:$0xff] (!%p2009_p11) }
 0x1e2   : > { %v2208_v37 = vpop.eup (!%p2009_p11), %2207  ;;  %1730 = vst [vmem:[%s2959_s2 + $0x10] sm:$0xff] (!%p2009_p11), %v2206_v35  ;;  %2227 = vtanh.f32 (!%p2009_p11), %v1613_v32  ;;  %v1645_v32 = vld [vmem:[#allocation2 + $0x168] sm:$0xff] (!%p2009_p11) }
 0x1e3   : > { %v1325_v52 = vpop.f32.mrb[56].mxu0  ;;  %v1453_v53 = vpop.f32.mrb[56].mxu1  ;;  %1731 = vst [vmem:[%s2959_s2 + $0x18] sm:$0xff] (!%p2009_p11), %v2208_v37  ;;  %2229 = vtanh.f32 (!%p2009_p11), %v1614_v34  ;;  %v1646_v34 = vld [vmem:[#allocation2 + $0x170] sm:$0xff] (!%p2009_p11) }
 0x1e4   : > { %v1496_v56 = vadd.f32 %v1325_v52, %v631_v50  ;;  %v1528_v57 = vadd.f32 %v1453_v53, %v663_v51  ;;  %v1327_v58 = vpop.f32.mrb[57].mxu0  ;;  %v1455_v59 = vpop.f32.mrb[57].mxu1  ;;  %2231 = vtanh.f32 (!%p2009_p11), %v1615_v36  ;;  %v1622_v50 = vld [vmem:[#allocation2 + $0xb0] sm:$0xff] (!%p2009_p11)  ;;  %v1623_v52 = vld [vmem:[#allocation2 + $0xb8] sm:$0xff] (!%p2009_p11) }
 0x1e5   : > { %v1328_v60 = vpop.f32.mrb[58].mxu0  ;;  %v1456_v61 = vpop.f32.mrb[58].mxu1  ;;  %2233 = vtanh.f32 (!%p2009_p11), %v1616_v38  ;;  %v1626_v58 = vld [vmem:[#allocation2 + $0xd0] sm:$0xff] (!%p2009_p11)  ;;  %v1647_v36 = vld [vmem:[#allocation2 + $0x178] sm:$0xff] (!%p2009_p11)  ;;  %v1648_v38 = vld [vmem:[#allocation2 + $0x180] sm:$0xff] (!%p2009_p11) }
 0x1e6   : > { %1560 = vst [vmem:[#allocation2 + $0xe0] sm:$0xff] %v1496_v56  ;;  %1592 = vst [vmem:[#allocation2 + $0x1e0] sm:$0xff] %v1528_v57  ;;  %v1497_v62 = vadd.f32 %v1328_v60, %v632_v54  ;;  %v1529_v63 = vadd.f32 %v1456_v61, %v664_v55  ;;  %v1330_v0 = vpop.f32.mrb[59].mxu0  ;;  %v1458_v1 = vpop.f32.mrb[59].mxu1  ;;  %2235 = vtanh.f32 (!%p2009_p11), %v1617_v40  ;;  %v1624_v54 = vld [vmem:[#allocation2 + $0xc0] sm:$0xff] (!%p2009_p11)  ;;  %v1625_v56 = vld [vmem:[#allocation2 + $0xc8] sm:$0xff] (!%p2009_p11) }
 0x1e7   : > { %v2210_v39 = vpop.eup (!%p2009_p11), %2209  ;;  %2237 = vtanh.f32 (!%p2009_p11), %v1618_v42  ;;  %v1627_v60 = vld [vmem:[#allocation2 + $0xd8] sm:$0xff] (!%p2009_p11)  ;;  %v1649_v40 = vld [vmem:[#allocation2 + $0x188] sm:$0xff] (!%p2009_p11)  ;;  %v1650_v42 = vld [vmem:[#allocation2 + $0x190] sm:$0xff] (!%p2009_p11) }
 0x1e8   : > { %1561 = vst [vmem:[#allocation2 + $0xe8] sm:$0xff] %v1497_v62  ;;  %1593 = vst [vmem:[#allocation2 + $0x1e8] sm:$0xff] %v1529_v63  ;;  %v2212_v41 = vpop.eup (!%p2009_p11), %2211  ;;  %2239 = vtanh.f32 (!%p2009_p11), %v1619_v44  ;;  %v1651_v44 = vld [vmem:[#allocation2 + $0x198] sm:$0xff] (!%p2009_p11) }
 0x1e9   : > { %1732 = vst [vmem:[%s2959_s2 + $0x20] sm:$0xff] (!%p2009_p11), %v2210_v39  ;;  %v2214_v43 = vpop.eup (!%p2009_p11), %2213  ;;  %1733 = vst [vmem:[%s2959_s2 + $0x28] sm:$0xff] (!%p2009_p11), %v2212_v41  ;;  %2241 = vtanh.f32 (!%p2009_p11), %v1620_v46  ;;  %v1652_v46 = vld [vmem:[#allocation2 + $0x1a0] sm:$0xff] (!%p2009_p11) }
 0x1ea   : > { %1599 = sbr.rel (%p2009_p11) target bundleno = 552 (0x228), region = 74  ;;  %v2216_v45 = vpop.eup (!%p2009_p11), %2215  ;;  %1734 = vst [vmem:[%s2959_s2 + $0x30] sm:$0xff] (!%p2009_p11), %v2214_v43  ;;  %2243 = vtanh.f32 (!%p2009_p11), %v1621_v48  ;;  %v1653_v48 = vld [vmem:[#allocation2 + $0x1a8] sm:$0xff] (!%p2009_p11) }
 0x1eb   : > { %v1333_v4 = vpop.f32.mrb[60].mxu0  ;;  %v1461_v5 = vpop.f32.mrb[60].mxu1  ;;  %1735 = vst [vmem:[%s2959_s2 + $0x38] sm:$0xff] (!%p2009_p11), %v2216_v45  ;;  %2245 = vtanh.f32 (!%p2009_p11), %v1622_v50  ;;  %v1654_v50 = vld [vmem:[#allocation2 + $0x1b0] sm:$0xff] (!%p2009_p11) }
 0x1ec   : > { %v1498_v8 = vadd.f32 %v1333_v4, %v633_v2  ;;  %v1530_v9 = vadd.f32 %v1461_v5, %v665_v3  ;;  %v1335_v10 = vpop.f32.mrb[61].mxu0  ;;  %v1463_v11 = vpop.f32.mrb[61].mxu1  ;;  %2247 = vtanh.f32 (!%p2009_p11), %v1623_v52  ;;  %v1655_v52 = vld [vmem:[#allocation2 + $0x1b8] sm:$0xff] (!%p2009_p11) }
 0x1ed   : > { %v1336_v12 = vpop.f32.mrb[62].mxu0  ;;  %v1464_v13 = vpop.f32.mrb[62].mxu1  ;;  %v1628_v62 = vld [vmem:[#allocation2 + $0xe0] sm:$0xff] (!%p2009_p11)  ;;  %v1634_v10 = vld [vmem:[#allocation2 + $0x110] sm:$0xff] (!%p2009_p11) }
 0x1ee   : > { %1562 = vst [vmem:[#allocation2 + $0xf0] sm:$0xff] %v1498_v8  ;;  %1594 = vst [vmem:[#allocation2 + $0x1f0] sm:$0xff] %v1530_v9  ;;  %v1499_v14 = vadd.f32 %v1336_v12, %v634_v6  ;;  %v1531_v15 = vadd.f32 %v1464_v13, %v666_v7  ;;  %v1338_v16 = vpop.f32.mrb[63].mxu0  ;;  %v1466_v17 = vpop.f32.mrb[63].mxu1  ;;  %v1632_v6 = vld [vmem:[#allocation2 + $0x100] sm:$0xff] (!%p2009_p11)  ;;  %v1633_v8 = vld [vmem:[#allocation2 + $0x108] sm:$0xff] (!%p2009_p11) }
 0x1ef   : > { %v2218_v47 = vpop.eup (!%p2009_p11), %2217  ;;  %2249 = vtanh.f32 (!%p2009_p11), %v1624_v54  ;;  %v1629_v0 = vld [vmem:[#allocation2 + $0xe8] sm:$0xff] (!%p2009_p11)  ;;  %v1635_v12 = vld [vmem:[#allocation2 + $0x118] sm:$0xff] (!%p2009_p11)  ;;  %v1656_v54 = vld [vmem:[#allocation2 + $0x1c0] sm:$0xff] (!%p2009_p11) }
 0x1f0   : > { %1563 = vst [vmem:[#allocation2 + $0xf8] sm:$0xff] %v1499_v14  ;;  %1595 = vst [vmem:[#allocation2 + $0x1f8] sm:$0xff] %v1531_v15  ;;  %v2220_v49 = vpop.eup (!%p2009_p11), %2219  ;;  %2251 = vtanh.f32 (!%p2009_p11), %v1625_v56  ;;  %v1636_v14 = vld [vmem:[#allocation2 + $0x120] sm:$0xff] (!%p2009_p11)  ;;  %v1637_v16 = vld [vmem:[#allocation2 + $0x128] sm:$0xff] (!%p2009_p11) }
 0x1f1   : > { %1736 = vst [vmem:[%s2959_s2 + $0x40] sm:$0xff] %v2218_v47  ;;  %v2222_v51 = vpop.eup %2221  ;;  %1737 = vst [vmem:[%s2959_s2 + $0x48] sm:$0xff] %v2220_v49  ;;  %2253 = vtanh.f32 %v1626_v58  ;;  %v1657_v56 = vld [vmem:[#allocation2 + $0x1c8] sm:$0xff]  ;;  %v1658_v58 = vld [vmem:[#allocation2 + $0x1d0] sm:$0xff] }
 0x1f2   : > { %v2224_v53 = vpop.eup %2223  ;;  %1738 = vst [vmem:[%s2959_s2 + $0x50] sm:$0xff] %v2222_v51  ;;  %2255 = vtanh.f32 %v1627_v60  ;;  %v1659_v60 = vld [vmem:[#allocation2 + $0x1d8] sm:$0xff] }
 0x1f3   : > { %v2226_v55 = vpop.eup %2225  ;;  %1739 = vst [vmem:[%s2959_s2 + $0x58] sm:$0xff] %v2224_v53  ;;  %2257 = vtanh.f32 %v1628_v62  ;;  %v1660_v62 = vld [vmem:[#allocation2 + $0x1e0] sm:$0xff] }
 0x1f4   : > { %v2228_v57 = vpop.eup %2227  ;;  %1740 = vst [vmem:[%s2959_s2 + $0x60] sm:$0xff] %v2226_v55  ;;  %2259 = vtanh.f32 %v1629_v0  ;;  %v1661_v0 = vld [vmem:[#allocation2 + $0x1e8] sm:$0xff] }
 0x1f5   : > { %v2230_v59 = vpop.eup %2229  ;;  %1741 = vst [vmem:[%s2959_s2 + $0x68] sm:$0xff] %v2228_v57  ;;  %v1630_v2 = vld [vmem:[#allocation2 + $0xf0] sm:$0xff] }
 0x1f6   : > { %v2232_v61 = vpop.eup %2231  ;;  %1742 = vst [vmem:[%s2959_s2 + $0x70] sm:$0xff] %v2230_v59  ;;  %2261 = vtanh.f32 %v1630_v2  ;;  %v1662_v2 = vld [vmem:[#allocation2 + $0x1f0] sm:$0xff] }
 0x1f7   : > { %v2234_v63 = vpop.eup %2233  ;;  %1743 = vst [vmem:[%s2959_s2 + $0x78] sm:$0xff] %v2232_v61  ;;  %v1631_v4 = vld [vmem:[#allocation2 + $0xf8] sm:$0xff] }
 0x1f8   : > { %v2236_v1 = vpop.eup %2235  ;;  %1744 = vst [vmem:[%s2959_s2 + $0x80] sm:$0xff] %v2234_v63  ;;  %2263 = vtanh.f32 %v1631_v4  ;;  %v1663_v4 = vld [vmem:[#allocation2 + $0x1f8] sm:$0xff] }
 0x1f9   : > { %v2238_v3 = vpop.eup %2237  ;;  %1745 = vst [vmem:[%s2959_s2 + $0x88] sm:$0xff] %v2236_v1  ;;  %2265 = vtanh.f32 %v1632_v6 }
 0x1fa   : > { %v2240_v5 = vpop.eup %2239  ;;  %1746 = vst [vmem:[%s2959_s2 + $0x90] sm:$0xff] %v2238_v3  ;;  %2267 = vtanh.f32 %v1633_v8 }
 0x1fb   : > { %v2242_v7 = vpop.eup %2241  ;;  %1747 = vst [vmem:[%s2959_s2 + $0x98] sm:$0xff] %v2240_v5  ;;  %2269 = vtanh.f32 %v1634_v10 }
 0x1fc   : > { %v2244_v9 = vpop.eup %2243  ;;  %1748 = vst [vmem:[%s2959_s2 + $0xa0] sm:$0xff] %v2242_v7  ;;  %2271 = vtanh.f32 %v1635_v12 }
 0x1fd   : > { %v2246_v11 = vpop.eup %2245  ;;  %1749 = vst [vmem:[%s2959_s2 + $0xa8] sm:$0xff] %v2244_v9  ;;  %2273 = vtanh.f32 %v1636_v14 }
 0x1fe   : > { %v2248_v13 = vpop.eup %2247  ;;  %1750 = vst [vmem:[%s2959_s2 + $0xb0] sm:$0xff] %v2246_v11  ;;  %2275 = vtanh.f32 %v1637_v16 }
 0x1ff   : > { %v2250_v15 = vpop.eup %2249  ;;  %1751 = vst [vmem:[%s2959_s2 + $0xb8] sm:$0xff] %v2248_v13  ;;  %2277 = vtanh.f32 %v1638_v18 }
 0x200   : > { %v2252_v17 = vpop.eup %2251  ;;  %1752 = vst [vmem:[%s2959_s2 + $0xc0] sm:$0xff] %v2250_v15  ;;  %2279 = vtanh.f32 %v1639_v20 }
 0x201   : > { %v2254_v19 = vpop.eup %2253  ;;  %1753 = vst [vmem:[%s2959_s2 + $0xc8] sm:$0xff] %v2252_v17  ;;  %2281 = vtanh.f32 %v1640_v22 }
 0x202   : > { %v2256_v21 = vpop.eup %2255  ;;  %1754 = vst [vmem:[%s2959_s2 + $0xd0] sm:$0xff] %v2254_v19  ;;  %2283 = vtanh.f32 %v1641_v24 }
 0x203   : > { %v2258_v23 = vpop.eup %2257  ;;  %1755 = vst [vmem:[%s2959_s2 + $0xd8] sm:$0xff] %v2256_v21  ;;  %2285 = vtanh.f32 %v1642_v26 }
 0x204   : > { %v2260_v25 = vpop.eup %2259  ;;  %1756 = vst [vmem:[%s2959_s2 + $0xe0] sm:$0xff] %v2258_v23  ;;  %2287 = vtanh.f32 %v1643_v28 }
 0x205   : > { %v2262_v27 = vpop.eup %2261  ;;  %1757 = vst [vmem:[%s2959_s2 + $0xe8] sm:$0xff] %v2260_v25  ;;  %2289 = vtanh.f32 %v1644_v30 }
 0x206   : > { %v2264_v29 = vpop.eup %2263  ;;  %1758 = vst [vmem:[%s2959_s2 + $0xf0] sm:$0xff] %v2262_v27  ;;  %2291 = vtanh.f32 %v1645_v32 }
 0x207   : > { %v2266_v31 = vpop.eup %2265  ;;  %1759 = vst [vmem:[%s2959_s2 + $0xf8] sm:$0xff] %v2264_v29  ;;  %2293 = vtanh.f32 %v1646_v34 }
 0x208   : > { %v2268_v33 = vpop.eup %2267  ;;  %1760 = vst [vmem:[%s2959_s2 + $0x100] sm:$0xff] %v2266_v31  ;;  %2295 = vtanh.f32 %v1647_v36 }
 0x209   : > { %v2270_v35 = vpop.eup %2269  ;;  %1761 = vst [vmem:[%s2959_s2 + $0x108] sm:$0xff] %v2268_v33  ;;  %2297 = vtanh.f32 %v1648_v38 }
 0x20a   : > { %v2272_v37 = vpop.eup %2271  ;;  %1762 = vst [vmem:[%s2959_s2 + $0x110] sm:$0xff] %v2270_v35  ;;  %2299 = vtanh.f32 %v1649_v40 }
 0x20b   : > { %v2274_v39 = vpop.eup %2273  ;;  %1763 = vst [vmem:[%s2959_s2 + $0x118] sm:$0xff] %v2272_v37  ;;  %2301 = vtanh.f32 %v1650_v42 }
 0x20c   : > { %v2276_v41 = vpop.eup %2275  ;;  %1764 = vst [vmem:[%s2959_s2 + $0x120] sm:$0xff] %v2274_v39  ;;  %2303 = vtanh.f32 %v1651_v44 }
 0x20d   : > { %v2278_v43 = vpop.eup %2277  ;;  %1765 = vst [vmem:[%s2959_s2 + $0x128] sm:$0xff] %v2276_v41  ;;  %2305 = vtanh.f32 %v1652_v46 }
 0x20e   : > { %v2280_v45 = vpop.eup %2279  ;;  %1766 = vst [vmem:[%s2959_s2 + $0x130] sm:$0xff] %v2278_v43  ;;  %2307 = vtanh.f32 %v1653_v48 }
 0x20f   : > { %v2282_v47 = vpop.eup %2281  ;;  %1767 = vst [vmem:[%s2959_s2 + $0x138] sm:$0xff] %v2280_v45  ;;  %2309 = vtanh.f32 %v1654_v50 }
 0x210   : > { %v2284_v49 = vpop.eup %2283  ;;  %1768 = vst [vmem:[%s2959_s2 + $0x140] sm:$0xff] %v2282_v47  ;;  %2311 = vtanh.f32 %v1655_v52 }
 0x211   : > { %v2286_v51 = vpop.eup %2285  ;;  %1769 = vst [vmem:[%s2959_s2 + $0x148] sm:$0xff] %v2284_v49  ;;  %2313 = vtanh.f32 %v1656_v54 }
 0x212   : > { %v2288_v53 = vpop.eup %2287  ;;  %1770 = vst [vmem:[%s2959_s2 + $0x150] sm:$0xff] %v2286_v51  ;;  %2315 = vtanh.f32 %v1657_v56 }
 0x213   : > { %v2290_v55 = vpop.eup %2289  ;;  %1771 = vst [vmem:[%s2959_s2 + $0x158] sm:$0xff] %v2288_v53  ;;  %2317 = vtanh.f32 %v1658_v58 }
 0x214   : > { %v2292_v57 = vpop.eup %2291  ;;  %1772 = vst [vmem:[%s2959_s2 + $0x160] sm:$0xff] %v2290_v55  ;;  %2319 = vtanh.f32 %v1659_v60 }
 0x215   : > { %v2294_v59 = vpop.eup %2293  ;;  %1773 = vst [vmem:[%s2959_s2 + $0x168] sm:$0xff] %v2292_v57  ;;  %2321 = vtanh.f32 %v1660_v62 }
 0x216   : > { %v2296_v61 = vpop.eup %2295  ;;  %1774 = vst [vmem:[%s2959_s2 + $0x170] sm:$0xff] %v2294_v59  ;;  %2323 = vtanh.f32 %v1661_v0 }
 0x217   : > { %v2298_v63 = vpop.eup %2297  ;;  %1775 = vst [vmem:[%s2959_s2 + $0x178] sm:$0xff] %v2296_v61  ;;  %2325 = vtanh.f32 %v1662_v2 }
 0x218   : > { %v2300_v1 = vpop.eup %2299  ;;  %1776 = vst [vmem:[%s2959_s2 + $0x180] sm:$0xff] %v2298_v63  ;;  %2327 = vtanh.f32 %v1663_v4 }
 0x219   : > { %v2302_v3 = vpop.eup %2301  ;;  %1777 = vst [vmem:[%s2959_s2 + $0x188] sm:$0xff] %v2300_v1 }
 0x21a   : > { %v2304_v5 = vpop.eup %2303  ;;  %1778 = vst [vmem:[%s2959_s2 + $0x190] sm:$0xff] %v2302_v3 }
 0x21b   : > { %v2306_v6 = vpop.eup %2305  ;;  %1779 = vst [vmem:[%s2959_s2 + $0x198] sm:$0xff] %v2304_v5 }
 0x21c   : > { %v2308_v7 = vpop.eup %2307  ;;  %1780 = vst [vmem:[%s2959_s2 + $0x1a0] sm:$0xff] %v2306_v6 }
 0x21d   : > { %v2310_v8 = vpop.eup %2309  ;;  %1781 = vst [vmem:[%s2959_s2 + $0x1a8] sm:$0xff] %v2308_v7 }
 0x21e   : > { %v2312_v9 = vpop.eup %2311  ;;  %1782 = vst [vmem:[%s2959_s2 + $0x1b0] sm:$0xff] %v2310_v8 }
 0x21f   : > { %v2314_v10 = vpop.eup %2313  ;;  %1783 = vst [vmem:[%s2959_s2 + $0x1b8] sm:$0xff] %v2312_v9 }
 0x220   : > { %v2316_v11 = vpop.eup %2315  ;;  %1784 = vst [vmem:[%s2959_s2 + $0x1c0] sm:$0xff] %v2314_v10 }
 0x221   : > { %v2318_v12 = vpop.eup %2317  ;;  %1785 = vst [vmem:[%s2959_s2 + $0x1c8] sm:$0xff] %v2316_v11 }
 0x222   : > { %v2320_v13 = vpop.eup %2319  ;;  %1786 = vst [vmem:[%s2959_s2 + $0x1d0] sm:$0xff] %v2318_v12 }
 0x223   : > { %v2322_v14 = vpop.eup %2321  ;;  %1787 = vst [vmem:[%s2959_s2 + $0x1d8] sm:$0xff] %v2320_v13 }
 0x224   : > { %v2324_v15 = vpop.eup %2323  ;;  %1788 = vst [vmem:[%s2959_s2 + $0x1e0] sm:$0xff] %v2322_v14 }
 0x225   : > { %v2326_v16 = vpop.eup %2325  ;;  %1789 = vst [vmem:[%s2959_s2 + $0x1e8] sm:$0xff] %v2324_v15 }
 0x226   : > { %v2328_v17 = vpop.eup %2327  ;;  %1790 = vst [vmem:[%s2959_s2 + $0x1f0] sm:$0xff] %v2326_v16 }
 0x227   : > { %1791 = vst [vmem:[%s2959_s2 + $0x1f8] sm:$0xff] %v2328_v17 }
 0x228 PF: > { %s12_s13 = sadd.s32 1, %s2367_s13   ;;  %s2960_s9 = smov %s2355_s10 }
 0x229   : > { %p9_p12 = scmp.ge.s32.totalorder %s12_s13, 4   ;;  %s2961_s10 = smov %s2421_s17 }
 0x22a   : > { %s2962_s11 = smov %s2363_s12  ;;  %s2963_s12 = smov %s2965_s14 }
 0x22b   :  { %11 = sbr.rel (!%p9_p12) target bundleno = 3 (0x3), region = 112 }

</bundles_post_ra>
